<compile_context>
chip_gen: v7x
topology: tpu7x:2x2x1
jax: 0.10.0
libtpu: 0.0.40
codegen_flags: <defaults>
</compile_context>

<pallas_src>
import functools
import math

import jax
import jax.numpy as jnp
from jax.experimental import pallas as pl
from jax.experimental.pallas import tpu as pltpu


LEAKY_SLOPE = 0.2
# Native MXU operand dtype (f32 accumulation via preferred_element_type).
MXU_DTYPE = jnp.bfloat16


def _round_up(n, m):
    return (n + m - 1) // m * m


def _leaky(v, slope):
    return jnp.where(v >= 0, v, slope * v)


def _vmem_limit_bytes():
    """Generation-aware VMEM limit (~3/4 of physical; 64 MiB v7x fallback)."""
    cap = 64 * 1024 * 1024
    try:
        info = pltpu.get_tpu_info()
        cap = int(getattr(info, "vmem_capacity_bytes", cap))
    except Exception:
        pass
    return min(cap * 3 // 4, 100 * 1024 * 1024)


# ----------------------------------------------------------------------------
# Fully fused kernel (one batch element per grid step).
#
# xq_ref holds the 16 stride-4 "phase" views of the zero-padded NHWC input:
#     xq[0, 4*r + s, i, j, c] = x_padded[4*i + r, 4*j + s, c]
# so conv1 restricted to output-parity class (a, b) -- pixels (2i+a, 2j+b) --
# reads tap (kh, kw) as the CONTIGUOUS slice of phase (2a+kh)%4, (2b+kw)%4.
# The 4 class results are scattered (static slices) into y1p_ref, which holds
# the stride-2 parity views of the zero-padded y1; conv2's 16 taps are then
# contiguous slices of y1p_ref and conv2 is a single K=16*c1 MXU dot.
# ----------------------------------------------------------------------------
def _disc_kernel(xq_ref, w1_ref, b1_ref, w2_ref, b2_ref, wfc_ref, bfc_ref,
                 o_ref, y1p_ref, *, P, cin_p, c1_p, c2_p, slope):
    m = P * P

    # Zero the padded-parity y1 scratch; its 1-wide ring is conv2's zero pad.
    y1p_ref[...] = jnp.zeros_like(y1p_ref)

    # ---- conv1 + bias + LeakyReLU: one K=16*cin_p dot per parity class ----
    for a in range(2):
        for b in range(2):
            taps = []
            for kh in range(4):
                for kw in range(4):
                    rr, cc = 2 * a + kh, 2 * b + kw
                    taps.append(
                        xq_ref[0, (rr % 4) * 4 + (cc % 4),
                               rr // 4:rr // 4 + P,
                               cc // 4:cc // 4 + P, :])
            im = jnp.concatenate(taps, axis=-1).reshape(m, 16 * cin_p)
            acc = jnp.dot(im, w1_ref[...],
                          preferred_element_type=jnp.float32)
            y = _leaky(acc + b1_ref[...], slope).reshape(P, P, c1_p)
            p, q = (a + 1) % 2, (b + 1) % 2
            dr, dc = (a + 1) // 2, (b + 1) // 2
            y1p_ref[p * 2 + q, dr:dr + P, dc:dc + P, :] = (
                y.astype(y1p_ref.dtype))

    # ---- conv2 + bias + LeakyReLU: single K=16*c1_p MXU dot ---------------
    taps = []
    for kh in range(4):
        for kw in range(4):
            taps.append(
                y1p_ref[(kh % 2) * 2 + (kw % 2),
                        kh // 2:kh // 2 + P,
                        kw // 2:kw // 2 + P, :])
    im2 = jnp.concatenate(taps, axis=-1).reshape(m, 16 * c1_p)
    acc2 = jnp.dot(im2, w2_ref[...], preferred_element_type=jnp.float32)
    y2 = _leaky(acc2 + b2_ref[...], slope)                    # (m, c2_p) f32

    # ---- fused fc head: VPU multiply + cross-lane / cross-sublane reduce --
    prod = y2 * wfc_ref[...]                                  # (m, c2_p)
    red = jnp.sum(prod, axis=1, keepdims=True)                # (m, 1)
    out_val = jnp.sum(red, axis=0, keepdims=True) + bfc_ref[...]   # (1, 1)
    o_ref[...] = jnp.broadcast_to(out_val.reshape(1, 1, 1),
                                  o_ref.shape).astype(o_ref.dtype)


# ----------------------------------------------------------------------------
# One-time parameter preparation (layout / dtype transforms, batch-agnostic).
# ----------------------------------------------------------------------------
def prepare_params(params):
    w1, b1 = params["w1"], params["b1"]          # (C1, Cin, 4, 4), (C1,)
    w2, b2 = params["w2"], params["b2"]          # (C2, C1, 4, 4), (C2,)
    wfc, bfc = params["w_fc"], params["b_fc"]    # (1, C2*P*P), (1,)

    c1, cin = int(w1.shape[0]), int(w1.shape[1])
    c2 = int(w2.shape[0])
    cin_p = _round_up(cin, 8)
    c1_p = _round_up(c1, 8)
    c2_p = _round_up(c2, 8)
    p_side = int(round((int(wfc.shape[1]) // c2) ** 0.5))     # = 8

    # conv weights -> (kh, kw, cin, cout), zero-padded, flattened so each
    # conv is ONE dot with K = 16 * Cin (tap-major, channel-minor columns).
    w1k = jnp.transpose(w1, (2, 3, 1, 0))
    w1k = jnp.pad(w1k, ((0, 0), (0, 0), (0, cin_p - cin), (0, c1_p - c1)))
    w1k = w1k.reshape(16 * cin_p, c1_p).astype(MXU_DTYPE)

    w2k = jnp.transpose(w2, (2, 3, 1, 0))
    w2k = jnp.pad(w2k, ((0, 0), (0, 0), (0, c1_p - c1), (0, c2_p - c2)))
    w2k = w2k.reshape(16 * c1_p, c2_p).astype(MXU_DTYPE)

    # fc weight reordered to (row = oh*P+ow, col = channel); PyTorch flattens
    # NCHW so feature index f = c*P*P + oh*P + ow.
    wfc_r = jnp.transpose(wfc.reshape(c2, p_side, p_side), (1, 2, 0))
    wfc_r = wfc_r.reshape(p_side * p_side, c2)
    wfc_r = jnp.pad(wfc_r, ((0, 0), (0, c2_p - c2))).astype(jnp.float32)

    return {
        "w1k": w1k,
        "b1": jnp.pad(b1, (0, c1_p - c1)).reshape(1, c1_p).astype(jnp.float32),
        "w2k": w2k,
        "b2": jnp.pad(b2, (0, c2_p - c2)).reshape(1, c2_p).astype(jnp.float32),
        "wfc": wfc_r,
        "bfc": bfc.reshape(1, 1).astype(jnp.float32),
    }


# ----------------------------------------------------------------------------
# Full Discriminator forward: ONE pallas_call, grid over batch.
# ----------------------------------------------------------------------------
def discriminator_forward(x_nchw, prep):
    B, cin, H, W = x_nchw.shape
    cin_p = prep["w1k"].shape[0] // 16
    c1_p = prep["w1k"].shape[1]
    c2_p = prep["w2k"].shape[1]
    P = int(round(prep["wfc"].shape[0] ** 0.5))               # conv2 out side
    assert H == W == 4 * P, "fc head requires input spatial = 4*P (= 32)"
    assert prep["w2k"].shape[0] == 16 * c1_p

    # NCHW -> NHWC, channel pad, bf16 cast, spatial pad (1 top/left,
    # 3 bottom/right so side 4P+4 splits into 4 equal stride-4 phases), then
    # one reshape+transpose exposing the 16 phase views:
    #   xq[b, 4r+s, i, j, c] = x_padded[b, 4i+r, 4j+s, c]
    # TODO(synk): extract the phases in-kernel from the single padded tensor
    # (strided pl.ds) to drop this ~1x-input-bytes relayout on v5e.
    xp = jnp.transpose(x_nchw, (0, 2, 3, 1)).astype(MXU_DTYPE)
    xp = jnp.pad(xp, ((0, 0), (1, 3), (1, 3), (0, cin_p - cin)))
    xq = xp.reshape(B, P + 1, 4, P + 1, 4, cin_p)
    xq = jnp.transpose(xq, (0, 2, 4, 1, 3, 5)).reshape(
        B, 16, P + 1, P + 1, cin_p)

    # Generation-aware VMEM budget check for the per-step resident blocks.
    bf = jnp.dtype(MXU_DTYPE).itemsize
    per_block_in = (16 * (P + 1) * (P + 1) * cin_p * bf
                    + int(prep["w1k"].size) * bf + int(prep["w2k"].size) * bf
                    + int(prep["b1"].size) * 4 + int(prep["b2"].size) * 4
                    + int(prep["wfc"].size) * 4 + int(prep["bfc"].size) * 4)
    vmem_need = (2 * per_block_in                              # double-buffer
                 + 4 * (P + 1) * (P + 1) * c1_p * bf           # y1 scratch
                 + 2 * 1 * 128 * 4)                            # out block
    vmem_limit = _vmem_limit_bytes()
    assert vmem_need < vmem_limit, (
        f"per-step VMEM {vmem_need}B exceeds budget {vmem_limit}B; "
        "tile the spatial dims over an extra grid axis.")

    kern = functools.partial(_disc_kernel, P=P, cin_p=cin_p, c1_p=c1_p,
                             c2_p=c2_p, slope=LEAKY_SLOPE)

    in_specs = [
        pl.BlockSpec((1, 16, P + 1, P + 1, cin_p),
                     lambda i: (i, 0, 0, 0, 0)),
        pl.BlockSpec(prep["w1k"].shape, lambda i: (0, 0)),
        pl.BlockSpec(prep["b1"].shape, lambda i: (0, 0)),
        pl.BlockSpec(prep["w2k"].shape, lambda i: (0, 0)),
        pl.BlockSpec(prep["b2"].shape, lambda i: (0, 0)),
        pl.BlockSpec(prep["wfc"].shape, lambda i: (0, 0)),
        pl.BlockSpec(prep["bfc"].shape, lambda i: (0, 0)),
    ]
    out_specs = pl.BlockSpec((1, 1, 128), lambda i: (i, 0, 0))

    out = pl.pallas_call(
        kern,
        out_shape=jax.ShapeDtypeStruct((B, 1, 128), jnp.float32),
        grid_spec=pltpu.PrefetchScalarGridSpec(
            num_scalar_prefetch=0,
            grid=(B,),
            in_specs=in_specs,
            out_specs=out_specs,
            scratch_shapes=[pltpu.VMEM((4, P + 1, P + 1, c1_p), MXU_DTYPE)]),
        compiler_params=pltpu.CompilerParams(
            dimension_semantics=("parallel",),
            vmem_limit_bytes=vmem_limit),
    )(xq, prep["w1k"], prep["b1"], prep["w2k"], prep["b2"],
      prep["wfc"], prep["bfc"])

    return out[:, 0, :1]                                       # (B, 1)


# ----------------------------------------------------------------------------
# PyTorch-layout parameter init + pure-JAX reference (for self-check).
# ----------------------------------------------------------------------------
def init_params(key, input_channels, hidden_dim):
    k1, k2, k3, k4, k5, k6 = jax.random.split(key, 6)
    scale = 0.02
    return {
        "w1": scale * jax.random.normal(
            k1, (hidden_dim, input_channels, 4, 4), jnp.float32),
        "b1": scale * jax.random.normal(k2, (hidden_dim,), jnp.float32),
        "w2": scale * jax.random.normal(
            k3, (hidden_dim * 2, hidden_dim, 4, 4), jnp.float32),
        "b2": scale * jax.random.normal(k4, (hidden_dim * 2,), jnp.float32),
        "w_fc": scale * jax.random.normal(
            k5, (1, hidden_dim * 2 * 8 * 8), jnp.float32),
        "b_fc": scale * jax.random.normal(k6, (1,), jnp.float32),
    }


def discriminator_reference(x, params):
    def conv(v, w, b):
        out = jax.lax.conv_general_dilated(
            v, w, window_strides=(2, 2), padding=((1, 1), (1, 1)),
            dimension_numbers=("NCHW", "OIHW", "NCHW"),
            precision=jax.lax.Precision.HIGHEST)
        return out + b.reshape(1, -1, 1, 1)

    h = _leaky(conv(x, params["w1"], params["b1"]), LEAKY_SLOPE)
    h = _leaky(conv(h, params["w2"], params["b2"]), LEAKY_SLOPE)
    h = h.reshape(h.shape[0], -1)
    return jnp.dot(h, params["w_fc"].T,
                   precision=jax.lax.Precision.HIGHEST) + params["b_fc"]


if __name__ == "__main__":
    # fc expects hidden_dim*2*8*8 features -> input spatial must be 32x32.
    batch, input_channels, hidden_dim, spatial = 2, 4, 8, 32

    key = jax.random.PRNGKey(0)
    kx, kp = jax.random.split(key)
    x = jax.random.normal(kx, (batch, input_channels, spatial, spatial),
                          jnp.float32)
    params = init_params(kp, input_channels, hidden_dim)
    prep = prepare_params(params)

    fwd = jax.jit(discriminator_forward)
    out = fwd(x, prep)
    jax.block_until_ready(out)
    assert out.shape == (batch, 1), out.shape

    ref = discriminator_reference(x, params)
    assert jnp.allclose(out, ref, rtol=3e-2, atol=3e-3), (out, ref)

    print("KERNEL_OK")
</pallas_src>

<mosaic_0001>
module attributes {stable_mosaic.version = 11 : i64} {
  func.func @_disc_kernel(%arg0: i32, %arg1: memref<1x16x9x9x8xbf16, #tpu.memory_space<vmem>>, %arg2: memref<128x8xbf16, #tpu.memory_space<vmem>>, %arg3: memref<1x8xf32, #tpu.memory_space<vmem>>, %arg4: memref<128x16xbf16, #tpu.memory_space<vmem>>, %arg5: memref<1x16xf32, #tpu.memory_space<vmem>>, %arg6: memref<64x16xf32, #tpu.memory_space<vmem>>, %arg7: memref<1x1xf32, #tpu.memory_space<vmem>>, %arg8: memref<1x1x128xf32, #tpu.memory_space<vmem>>, %arg9: memref<4x9x9x8xbf16, #tpu.memory_space<vmem>>) attributes {dimension_semantics = [#tpu.dimension_semantics<parallel>], iteration_bounds = array<i64: 2>, scalar_prefetch = 0 : i64, scratch_operands = 1 : i64, tpu.core_type = #tpu.core_type<tc>, window_params = [{transform_indices = @transform_0, window_bounds = array<i64: 1, 16, 9, 9, 8>}, {pipeline_mode = #tpu.pipeline_mode<synchronous>, transform_indices = @transform_1, window_bounds = array<i64: 128, 8>}, {pipeline_mode = #tpu.pipeline_mode<synchronous>, transform_indices = @transform_2, window_bounds = array<i64: 1, 8>}, {pipeline_mode = #tpu.pipeline_mode<synchronous>, transform_indices = @transform_3, window_bounds = array<i64: 128, 16>}, {pipeline_mode = #tpu.pipeline_mode<synchronous>, transform_indices = @transform_4, window_bounds = array<i64: 1, 16>}, {pipeline_mode = #tpu.pipeline_mode<synchronous>, transform_indices = @transform_5, window_bounds = array<i64: 64, 16>}, {pipeline_mode = #tpu.pipeline_mode<synchronous>, transform_indices = @transform_6, window_bounds = array<i64: 1, 1>}, {transform_indices = @transform_7, window_bounds = array<i64: 1, 1, 128>}]} {
    %cst = arith.constant 0.000000e+00 : bf16
    %0 = vector.broadcast %cst : bf16 to vector<4x9x9x8xbf16>
    %c0 = arith.constant 0 : index
    %c0_0 = arith.constant 0 : index
    %c0_1 = arith.constant 0 : index
    %c0_2 = arith.constant 0 : index
    %1 = vector.load %arg9[%c0, %c0_0, %c0_1, %c0_2] : memref<4x9x9x8xbf16, #tpu.memory_space<vmem>>, vector<4x9x9x8xbf16>
    tpu.vector_store %arg9[%c0, %c0_0, %c0_1, %c0_2], %0 {strides = array<i32>} : memref<4x9x9x8xbf16, #tpu.memory_space<vmem>>, vector<4x9x9x8xbf16>,
    %c0_3 = arith.constant 0 : index
    %c0_4 = arith.constant 0 : index
    %c0_5 = arith.constant 0 : index
    %c0_6 = arith.constant 0 : index
    %c0_7 = arith.constant 0 : index
    %2 = vector.load %arg1[%c0_3, %c0_4, %c0_5, %c0_6, %c0_7] : memref<1x16x9x9x8xbf16, #tpu.memory_space<vmem>>, vector<1x1x8x8x8xbf16>
    %3 = vector.shape_cast %2 : vector<1x1x8x8x8xbf16> to vector<8x8x8xbf16>
    %c0_8 = arith.constant 0 : index
    %c1 = arith.constant 1 : index
    %c0_9 = arith.constant 0 : index
    %c0_10 = arith.constant 0 : index
    %c0_11 = arith.constant 0 : index
    %4 = vector.load %arg1[%c0_8, %c1, %c0_9, %c0_10, %c0_11] : memref<1x16x9x9x8xbf16, #tpu.memory_space<vmem>>, vector<1x1x8x8x8xbf16>
    %5 = vector.shape_cast %4 : vector<1x1x8x8x8xbf16> to vector<8x8x8xbf16>
    %c0_12 = arith.constant 0 : index
    %c2 = arith.constant 2 : index
    %c0_13 = arith.constant 0 : index
    %c0_14 = arith.constant 0 : index
    %c0_15 = arith.constant 0 : index
    %6 = vector.load %arg1[%c0_12, %c2, %c0_13, %c0_14, %c0_15] : memref<1x16x9x9x8xbf16, #tpu.memory_space<vmem>>, vector<1x1x8x8x8xbf16>
    %7 = vector.shape_cast %6 : vector<1x1x8x8x8xbf16> to vector<8x8x8xbf16>
    %c0_16 = arith.constant 0 : index
    %c3 = arith.constant 3 : index
    %c0_17 = arith.constant 0 : index
    %c0_18 = arith.constant 0 : index
    %c0_19 = arith.constant 0 : index
    %8 = vector.load %arg1[%c0_16, %c3, %c0_17, %c0_18, %c0_19] : memref<1x16x9x9x8xbf16, #tpu.memory_space<vmem>>, vector<1x1x8x8x8xbf16>
    %9 = vector.shape_cast %8 : vector<1x1x8x8x8xbf16> to vector<8x8x8xbf16>
    %c0_20 = arith.constant 0 : index
    %c4 = arith.constant 4 : index
    %c0_21 = arith.constant 0 : index
    %c0_22 = arith.constant 0 : index
    %c0_23 = arith.constant 0 : index
    %10 = vector.load %arg1[%c0_20, %c4, %c0_21, %c0_22, %c0_23] : memref<1x16x9x9x8xbf16, #tpu.memory_space<vmem>>, vector<1x1x8x8x8xbf16>
    %11 = vector.shape_cast %10 : vector<1x1x8x8x8xbf16> to vector<8x8x8xbf16>
    %c0_24 = arith.constant 0 : index
    %c5 = arith.constant 5 : index
    %c0_25 = arith.constant 0 : index
    %c0_26 = arith.constant 0 : index
    %c0_27 = arith.constant 0 : index
    %12 = vector.load %arg1[%c0_24, %c5, %c0_25, %c0_26, %c0_27] : memref<1x16x9x9x8xbf16, #tpu.memory_space<vmem>>, vector<1x1x8x8x8xbf16>
    %13 = vector.shape_cast %12 : vector<1x1x8x8x8xbf16> to vector<8x8x8xbf16>
    %c0_28 = arith.constant 0 : index
    %c6 = arith.constant 6 : index
    %c0_29 = arith.constant 0 : index
    %c0_30 = arith.constant 0 : index
    %c0_31 = arith.constant 0 : index
    %14 = vector.load %arg1[%c0_28, %c6, %c0_29, %c0_30, %c0_31] : memref<1x16x9x9x8xbf16, #tpu.memory_space<vmem>>, vector<1x1x8x8x8xbf16>
    %15 = vector.shape_cast %14 : vector<1x1x8x8x8xbf16> to vector<8x8x8xbf16>
    %c0_32 = arith.constant 0 : index
    %c7 = arith.constant 7 : index
    %c0_33 = arith.constant 0 : index
    %c0_34 = arith.constant 0 : index
    %c0_35 = arith.constant 0 : index
    %16 = vector.load %arg1[%c0_32, %c7, %c0_33, %c0_34, %c0_35] : memref<1x16x9x9x8xbf16, #tpu.memory_space<vmem>>, vector<1x1x8x8x8xbf16>
    %17 = vector.shape_cast %16 : vector<1x1x8x8x8xbf16> to vector<8x8x8xbf16>
    %c0_36 = arith.constant 0 : index
    %c8 = arith.constant 8 : index
    %c0_37 = arith.constant 0 : index
    %c0_38 = arith.constant 0 : index
    %c0_39 = arith.constant 0 : index
    %18 = vector.load %arg1[%c0_36, %c8, %c0_37, %c0_38, %c0_39] : memref<1x16x9x9x8xbf16, #tpu.memory_space<vmem>>, vector<1x1x8x8x8xbf16>
    %19 = vector.shape_cast %18 : vector<1x1x8x8x8xbf16> to vector<8x8x8xbf16>
    %c0_40 = arith.constant 0 : index
    %c9 = arith.constant 9 : index
    %c0_41 = arith.constant 0 : index
    %c0_42 = arith.constant 0 : index
    %c0_43 = arith.constant 0 : index
    %20 = vector.load %arg1[%c0_40, %c9, %c0_41, %c0_42, %c0_43] : memref<1x16x9x9x8xbf16, #tpu.memory_space<vmem>>, vector<1x1x8x8x8xbf16>
    %21 = vector.shape_cast %20 : vector<1x1x8x8x8xbf16> to vector<8x8x8xbf16>
    %c0_44 = arith.constant 0 : index
    %c10 = arith.constant 10 : index
    %c0_45 = arith.constant 0 : index
    %c0_46 = arith.constant 0 : index
    %c0_47 = arith.constant 0 : index
    %22 = vector.load %arg1[%c0_44, %c10, %c0_45, %c0_46, %c0_47] : memref<1x16x9x9x8xbf16, #tpu.memory_space<vmem>>, vector<1x1x8x8x8xbf16>
    %23 = vector.shape_cast %22 : vector<1x1x8x8x8xbf16> to vector<8x8x8xbf16>
    %c0_48 = arith.constant 0 : index
    %c11 = arith.constant 11 : index
    %c0_49 = arith.constant 0 : index
    %c0_50 = arith.constant 0 : index
    %c0_51 = arith.constant 0 : index
    %24 = vector.load %arg1[%c0_48, %c11, %c0_49, %c0_50, %c0_51] : memref<1x16x9x9x8xbf16, #tpu.memory_space<vmem>>, vector<1x1x8x8x8xbf16>
    %25 = vector.shape_cast %24 : vector<1x1x8x8x8xbf16> to vector<8x8x8xbf16>
    %c0_52 = arith.constant 0 : index
    %c12 = arith.constant 12 : index
    %c0_53 = arith.constant 0 : index
    %c0_54 = arith.constant 0 : index
    %c0_55 = arith.constant 0 : index
    %26 = vector.load %arg1[%c0_52, %c12, %c0_53, %c0_54, %c0_55] : memref<1x16x9x9x8xbf16, #tpu.memory_space<vmem>>, vector<1x1x8x8x8xbf16>
    %27 = vector.shape_cast %26 : vector<1x1x8x8x8xbf16> to vector<8x8x8xbf16>
    %c0_56 = arith.constant 0 : index
    %c13 = arith.constant 13 : index
    %c0_57 = arith.constant 0 : index
    %c0_58 = arith.constant 0 : index
    %c0_59 = arith.constant 0 : index
    %28 = vector.load %arg1[%c0_56, %c13, %c0_57, %c0_58, %c0_59] : memref<1x16x9x9x8xbf16, #tpu.memory_space<vmem>>, vector<1x1x8x8x8xbf16>
    %29 = vector.shape_cast %28 : vector<1x1x8x8x8xbf16> to vector<8x8x8xbf16>
    %c0_60 = arith.constant 0 : index
    %c14 = arith.constant 14 : index
    %c0_61 = arith.constant 0 : index
    %c0_62 = arith.constant 0 : index
    %c0_63 = arith.constant 0 : index
    %30 = vector.load %arg1[%c0_60, %c14, %c0_61, %c0_62, %c0_63] : memref<1x16x9x9x8xbf16, #tpu.memory_space<vmem>>, vector<1x1x8x8x8xbf16>
    %31 = vector.shape_cast %30 : vector<1x1x8x8x8xbf16> to vector<8x8x8xbf16>
    %c0_64 = arith.constant 0 : index
    %c15 = arith.constant 15 : index
    %c0_65 = arith.constant 0 : index
    %c0_66 = arith.constant 0 : index
    %c0_67 = arith.constant 0 : index
    %32 = vector.load %arg1[%c0_64, %c15, %c0_65, %c0_66, %c0_67] : memref<1x16x9x9x8xbf16, #tpu.memory_space<vmem>>, vector<1x1x8x8x8xbf16>
    %33 = vector.shape_cast %32 : vector<1x1x8x8x8xbf16> to vector<8x8x8xbf16>
    %34 = tpu.concatenate %3, %5, %7, %9, %11, %13, %15, %17, %19, %21, %23, %25, %27, %29, %31, %33 in 2 : vector<8x8x8xbf16>, vector<8x8x8xbf16>, vector<8x8x8xbf16>, vector<8x8x8xbf16>, vector<8x8x8xbf16>, vector<8x8x8xbf16>, vector<8x8x8xbf16>, vector<8x8x8xbf16>, vector<8x8x8xbf16>, vector<8x8x8xbf16>, vector<8x8x8xbf16>, vector<8x8x8xbf16>, vector<8x8x8xbf16>, vector<8x8x8xbf16>, vector<8x8x8xbf16>, vector<8x8x8xbf16> -> vector<8x8x128xbf16>
    %35 = vector.shape_cast %34 : vector<8x8x128xbf16> to vector<64x128xbf16>
    %c0_68 = arith.constant 0 : index
    %c0_69 = arith.constant 0 : index
    %36 = vector.load %arg2[%c0_68, %c0_69] : memref<128x8xbf16, #tpu.memory_space<vmem>>, vector<128x8xbf16>
    %cst_70 = arith.constant dense<0.000000e+00> : vector<64x8xf32>
    %37 = tpu.matmul %35, %36, %cst_70 {dimension_numbers = #tpu.dot_dimension_numbers<[1], [0], [0], [1], [0, 0, 1, 1], [], []>} : vector<64x128xbf16>, vector<128x8xbf16>, vector<64x8xf32> -> vector<64x8xf32>
    %c0_71 = arith.constant 0 : index
    %c0_72 = arith.constant 0 : index
    %38 = vector.load %arg3[%c0_71, %c0_72] : memref<1x8xf32, #tpu.memory_space<vmem>>, vector<1x8xf32>
    %39 = vector.broadcast %38 : vector<1x8xf32> to vector<64x8xf32>
    %40 = arith.addf %37, %39 : vector<64x8xf32>
    %cst_73 = arith.constant 0.000000e+00 : f32
    %41 = vector.broadcast %cst_73 : f32 to vector<64x8xf32>
    %42 = arith.cmpf oge, %40, %41 : vector<64x8xf32>
    %cst_74 = arith.constant 2.000000e-01 : f32
    %43 = vector.broadcast %cst_74 : f32 to vector<64x8xf32>
    %44 = arith.mulf %43, %40 : vector<64x8xf32>
    %45 = arith.select %42, %40, %44 : vector<64x8xi1>, vector<64x8xf32>
    %46 = vector.shape_cast %45 : vector<64x8xf32> to vector<8x8x8xf32>
    %47 = arith.truncf %46 : vector<8x8x8xf32> to vector<8x8x8xbf16>
    %c3_75 = arith.constant 3 : index
    %c0_76 = arith.constant 0 : index
    %c0_77 = arith.constant 0 : index
    %c0_78 = arith.constant 0 : index
    %48 = vector.load %arg9[%c3_75, %c0_76, %c0_77, %c0_78] : memref<4x9x9x8xbf16, #tpu.memory_space<vmem>>, vector<1x8x8x8xbf16>
    %49 = vector.shape_cast %48 : vector<1x8x8x8xbf16> to vector<8x8x8xbf16>
    %50 = vector.shape_cast %47 : vector<8x8x8xbf16> to vector<1x8x8x8xbf16>
    tpu.vector_store %arg9[%c3_75, %c0_76, %c0_77, %c0_78], %50 {strides = array<i32>} : memref<4x9x9x8xbf16, #tpu.memory_space<vmem>>, vector<1x8x8x8xbf16>,
    %c0_79 = arith.constant 0 : index
    %c2_80 = arith.constant 2 : index
    %c0_81 = arith.constant 0 : index
    %c0_82 = arith.constant 0 : index
    %c0_83 = arith.constant 0 : index
    %51 = vector.load %arg1[%c0_79, %c2_80, %c0_81, %c0_82, %c0_83] : memref<1x16x9x9x8xbf16, #tpu.memory_space<vmem>>, vector<1x1x8x8x8xbf16>
    %52 = vector.shape_cast %51 : vector<1x1x8x8x8xbf16> to vector<8x8x8xbf16>
    %c0_84 = arith.constant 0 : index
    %c3_85 = arith.constant 3 : index
    %c0_86 = arith.constant 0 : index
    %c0_87 = arith.constant 0 : index
    %c0_88 = arith.constant 0 : index
    %53 = vector.load %arg1[%c0_84, %c3_85, %c0_86, %c0_87, %c0_88] : memref<1x16x9x9x8xbf16, #tpu.memory_space<vmem>>, vector<1x1x8x8x8xbf16>
    %54 = vector.shape_cast %53 : vector<1x1x8x8x8xbf16> to vector<8x8x8xbf16>
    %c0_89 = arith.constant 0 : index
    %c0_90 = arith.constant 0 : index
    %c0_91 = arith.constant 0 : index
    %c1_92 = arith.constant 1 : index
    %c0_93 = arith.constant 0 : index
    %55 = vector.load %arg1[%c0_89, %c0_90, %c0_91, %c1_92, %c0_93] : memref<1x16x9x9x8xbf16, #tpu.memory_space<vmem>>, vector<1x1x8x8x8xbf16>
    %56 = vector.shape_cast %55 : vector<1x1x8x8x8xbf16> to vector<8x8x8xbf16>
    %c0_94 = arith.constant 0 : index
    %c1_95 = arith.constant 1 : index
    %c0_96 = arith.constant 0 : index
    %c1_97 = arith.constant 1 : index
    %c0_98 = arith.constant 0 : index
    %57 = vector.load %arg1[%c0_94, %c1_95, %c0_96, %c1_97, %c0_98] : memref<1x16x9x9x8xbf16, #tpu.memory_space<vmem>>, vector<1x1x8x8x8xbf16>
    %58 = vector.shape_cast %57 : vector<1x1x8x8x8xbf16> to vector<8x8x8xbf16>
    %c0_99 = arith.constant 0 : index
    %c6_100 = arith.constant 6 : index
    %c0_101 = arith.constant 0 : index
    %c0_102 = arith.constant 0 : index
    %c0_103 = arith.constant 0 : index
    %59 = vector.load %arg1[%c0_99, %c6_100, %c0_101, %c0_102, %c0_103] : memref<1x16x9x9x8xbf16, #tpu.memory_space<vmem>>, vector<1x1x8x8x8xbf16>
    %60 = vector.shape_cast %59 : vector<1x1x8x8x8xbf16> to vector<8x8x8xbf16>
    %c0_104 = arith.constant 0 : index
    %c7_105 = arith.constant 7 : index
    %c0_106 = arith.constant 0 : index
    %c0_107 = arith.constant 0 : index
    %c0_108 = arith.constant 0 : index
    %61 = vector.load %arg1[%c0_104, %c7_105, %c0_106, %c0_107, %c0_108] : memref<1x16x9x9x8xbf16, #tpu.memory_space<vmem>>, vector<1x1x8x8x8xbf16>
    %62 = vector.shape_cast %61 : vector<1x1x8x8x8xbf16> to vector<8x8x8xbf16>
    %c0_109 = arith.constant 0 : index
    %c4_110 = arith.constant 4 : index
    %c0_111 = arith.constant 0 : index
    %c1_112 = arith.constant 1 : index
    %c0_113 = arith.constant 0 : index
    %63 = vector.load %arg1[%c0_109, %c4_110, %c0_111, %c1_112, %c0_113] : memref<1x16x9x9x8xbf16, #tpu.memory_space<vmem>>, vector<1x1x8x8x8xbf16>
    %64 = vector.shape_cast %63 : vector<1x1x8x8x8xbf16> to vector<8x8x8xbf16>
    %c0_114 = arith.constant 0 : index
    %c5_115 = arith.constant 5 : index
    %c0_116 = arith.constant 0 : index
    %c1_117 = arith.constant 1 : index
    %c0_118 = arith.constant 0 : index
    %65 = vector.load %arg1[%c0_114, %c5_115, %c0_116, %c1_117, %c0_118] : memref<1x16x9x9x8xbf16, #tpu.memory_space<vmem>>, vector<1x1x8x8x8xbf16>
    %66 = vector.shape_cast %65 : vector<1x1x8x8x8xbf16> to vector<8x8x8xbf16>
    %c0_119 = arith.constant 0 : index
    %c10_120 = arith.constant 10 : index
    %c0_121 = arith.constant 0 : index
    %c0_122 = arith.constant 0 : index
    %c0_123 = arith.constant 0 : index
    %67 = vector.load %arg1[%c0_119, %c10_120, %c0_121, %c0_122, %c0_123] : memref<1x16x9x9x8xbf16, #tpu.memory_space<vmem>>, vector<1x1x8x8x8xbf16>
    %68 = vector.shape_cast %67 : vector<1x1x8x8x8xbf16> to vector<8x8x8xbf16>
    %c0_124 = arith.constant 0 : index
    %c11_125 = arith.constant 11 : index
    %c0_126 = arith.constant 0 : index
    %c0_127 = arith.constant 0 : index
    %c0_128 = arith.constant 0 : index
    %69 = vector.load %arg1[%c0_124, %c11_125, %c0_126, %c0_127, %c0_128] : memref<1x16x9x9x8xbf16, #tpu.memory_space<vmem>>, vector<1x1x8x8x8xbf16>
    %70 = vector.shape_cast %69 : vector<1x1x8x8x8xbf16> to vector<8x8x8xbf16>
    %c0_129 = arith.constant 0 : index
    %c8_130 = arith.constant 8 : index
    %c0_131 = arith.constant 0 : index
    %c1_132 = arith.constant 1 : index
    %c0_133 = arith.constant 0 : index
    %71 = vector.load %arg1[%c0_129, %c8_130, %c0_131, %c1_132, %c0_133] : memref<1x16x9x9x8xbf16, #tpu.memory_space<vmem>>, vector<1x1x8x8x8xbf16>
    %72 = vector.shape_cast %71 : vector<1x1x8x8x8xbf16> to vector<8x8x8xbf16>
    %c0_134 = arith.constant 0 : index
    %c9_135 = arith.constant 9 : index
    %c0_136 = arith.constant 0 : index
    %c1_137 = arith.constant 1 : index
    %c0_138 = arith.constant 0 : index
    %73 = vector.load %arg1[%c0_134, %c9_135, %c0_136, %c1_137, %c0_138] : memref<1x16x9x9x8xbf16, #tpu.memory_space<vmem>>, vector<1x1x8x8x8xbf16>
    %74 = vector.shape_cast %73 : vector<1x1x8x8x8xbf16> to vector<8x8x8xbf16>
    %c0_139 = arith.constant 0 : index
    %c14_140 = arith.constant 14 : index
    %c0_141 = arith.constant 0 : index
    %c0_142 = arith.constant 0 : index
    %c0_143 = arith.constant 0 : index
    %75 = vector.load %arg1[%c0_139, %c14_140, %c0_141, %c0_142, %c0_143] : memref<1x16x9x9x8xbf16, #tpu.memory_space<vmem>>, vector<1x1x8x8x8xbf16>
    %76 = vector.shape_cast %75 : vector<1x1x8x8x8xbf16> to vector<8x8x8xbf16>
    %c0_144 = arith.constant 0 : index
    %c15_145 = arith.constant 15 : index
    %c0_146 = arith.constant 0 : index
    %c0_147 = arith.constant 0 : index
    %c0_148 = arith.constant 0 : index
    %77 = vector.load %arg1[%c0_144, %c15_145, %c0_146, %c0_147, %c0_148] : memref<1x16x9x9x8xbf16, #tpu.memory_space<vmem>>, vector<1x1x8x8x8xbf16>
    %78 = vector.shape_cast %77 : vector<1x1x8x8x8xbf16> to vector<8x8x8xbf16>
    %c0_149 = arith.constant 0 : index
    %c12_150 = arith.constant 12 : index
    %c0_151 = arith.constant 0 : index
    %c1_152 = arith.constant 1 : index
    %c0_153 = arith.constant 0 : index
    %79 = vector.load %arg1[%c0_149, %c12_150, %c0_151, %c1_152, %c0_153] : memref<1x16x9x9x8xbf16, #tpu.memory_space<vmem>>, vector<1x1x8x8x8xbf16>
    %80 = vector.shape_cast %79 : vector<1x1x8x8x8xbf16> to vector<8x8x8xbf16>
    %c0_154 = arith.constant 0 : index
    %c13_155 = arith.constant 13 : index
    %c0_156 = arith.constant 0 : index
    %c1_157 = arith.constant 1 : index
    %c0_158 = arith.constant 0 : index
    %81 = vector.load %arg1[%c0_154, %c13_155, %c0_156, %c1_157, %c0_158] : memref<1x16x9x9x8xbf16, #tpu.memory_space<vmem>>, vector<1x1x8x8x8xbf16>
    %82 = vector.shape_cast %81 : vector<1x1x8x8x8xbf16> to vector<8x8x8xbf16>
    %83 = tpu.concatenate %52, %54, %56, %58, %60, %62, %64, %66, %68, %70, %72, %74, %76, %78, %80, %82 in 2 : vector<8x8x8xbf16>, vector<8x8x8xbf16>, vector<8x8x8xbf16>, vector<8x8x8xbf16>, vector<8x8x8xbf16>, vector<8x8x8xbf16>, vector<8x8x8xbf16>, vector<8x8x8xbf16>, vector<8x8x8xbf16>, vector<8x8x8xbf16>, vector<8x8x8xbf16>, vector<8x8x8xbf16>, vector<8x8x8xbf16>, vector<8x8x8xbf16>, vector<8x8x8xbf16>, vector<8x8x8xbf16> -> vector<8x8x128xbf16>
    %84 = vector.shape_cast %83 : vector<8x8x128xbf16> to vector<64x128xbf16>
    %c0_159 = arith.constant 0 : index
    %c0_160 = arith.constant 0 : index
    %85 = vector.load %arg2[%c0_159, %c0_160] : memref<128x8xbf16, #tpu.memory_space<vmem>>, vector<128x8xbf16>
    %cst_161 = arith.constant dense<0.000000e+00> : vector<64x8xf32>
    %86 = tpu.matmul %84, %85, %cst_161 {dimension_numbers = #tpu.dot_dimension_numbers<[1], [0], [0], [1], [0, 0, 1, 1], [], []>} : vector<64x128xbf16>, vector<128x8xbf16>, vector<64x8xf32> -> vector<64x8xf32>
    %c0_162 = arith.constant 0 : index
    %c0_163 = arith.constant 0 : index
    %87 = vector.load %arg3[%c0_162, %c0_163] : memref<1x8xf32, #tpu.memory_space<vmem>>, vector<1x8xf32>
    %88 = vector.broadcast %87 : vector<1x8xf32> to vector<64x8xf32>
    %89 = arith.addf %86, %88 : vector<64x8xf32>
    %cst_164 = arith.constant 0.000000e+00 : f32
    %90 = vector.broadcast %cst_164 : f32 to vector<64x8xf32>
    %91 = arith.cmpf oge, %89, %90 : vector<64x8xf32>
    %cst_165 = arith.constant 2.000000e-01 : f32
    %92 = vector.broadcast %cst_165 : f32 to vector<64x8xf32>
    %93 = arith.mulf %92, %89 : vector<64x8xf32>
    %94 = arith.select %91, %89, %93 : vector<64x8xi1>, vector<64x8xf32>
    %95 = vector.shape_cast %94 : vector<64x8xf32> to vector<8x8x8xf32>
    %96 = arith.truncf %95 : vector<8x8x8xf32> to vector<8x8x8xbf16>
    %c2_166 = arith.constant 2 : index
    %c0_167 = arith.constant 0 : index
    %c1_168 = arith.constant 1 : index
    %c0_169 = arith.constant 0 : index
    %97 = vector.load %arg9[%c2_166, %c0_167, %c1_168, %c0_169] : memref<4x9x9x8xbf16, #tpu.memory_space<vmem>>, vector<1x8x8x8xbf16>
    %98 = vector.shape_cast %97 : vector<1x8x8x8xbf16> to vector<8x8x8xbf16>
    %99 = vector.shape_cast %96 : vector<8x8x8xbf16> to vector<1x8x8x8xbf16>
    tpu.vector_store %arg9[%c2_166, %c0_167, %c1_168, %c0_169], %99 {strides = array<i32>} : memref<4x9x9x8xbf16, #tpu.memory_space<vmem>>, vector<1x8x8x8xbf16>,
    %c0_170 = arith.constant 0 : index
    %c8_171 = arith.constant 8 : index
    %c0_172 = arith.constant 0 : index
    %c0_173 = arith.constant 0 : index
    %c0_174 = arith.constant 0 : index
    %100 = vector.load %arg1[%c0_170, %c8_171, %c0_172, %c0_173, %c0_174] : memref<1x16x9x9x8xbf16, #tpu.memory_space<vmem>>, vector<1x1x8x8x8xbf16>
    %101 = vector.shape_cast %100 : vector<1x1x8x8x8xbf16> to vector<8x8x8xbf16>
    %c0_175 = arith.constant 0 : index
    %c9_176 = arith.constant 9 : index
    %c0_177 = arith.constant 0 : index
    %c0_178 = arith.constant 0 : index
    %c0_179 = arith.constant 0 : index
    %102 = vector.load %arg1[%c0_175, %c9_176, %c0_177, %c0_178, %c0_179] : memref<1x16x9x9x8xbf16, #tpu.memory_space<vmem>>, vector<1x1x8x8x8xbf16>
    %103 = vector.shape_cast %102 : vector<1x1x8x8x8xbf16> to vector<8x8x8xbf16>
    %c0_180 = arith.constant 0 : index
    %c10_181 = arith.constant 10 : index
    %c0_182 = arith.constant 0 : index
    %c0_183 = arith.constant 0 : index
    %c0_184 = arith.constant 0 : index
    %104 = vector.load %arg1[%c0_180, %c10_181, %c0_182, %c0_183, %c0_184] : memref<1x16x9x9x8xbf16, #tpu.memory_space<vmem>>, vector<1x1x8x8x8xbf16>
    %105 = vector.shape_cast %104 : vector<1x1x8x8x8xbf16> to vector<8x8x8xbf16>
    %c0_185 = arith.constant 0 : index
    %c11_186 = arith.constant 11 : index
    %c0_187 = arith.constant 0 : index
    %c0_188 = arith.constant 0 : index
    %c0_189 = arith.constant 0 : index
    %106 = vector.load %arg1[%c0_185, %c11_186, %c0_187, %c0_188, %c0_189] : memref<1x16x9x9x8xbf16, #tpu.memory_space<vmem>>, vector<1x1x8x8x8xbf16>
    %107 = vector.shape_cast %106 : vector<1x1x8x8x8xbf16> to vector<8x8x8xbf16>
    %c0_190 = arith.constant 0 : index
    %c12_191 = arith.constant 12 : index
    %c0_192 = arith.constant 0 : index
    %c0_193 = arith.constant 0 : index
    %c0_194 = arith.constant 0 : index
    %108 = vector.load %arg1[%c0_190, %c12_191, %c0_192, %c0_193, %c0_194] : memref<1x16x9x9x8xbf16, #tpu.memory_space<vmem>>, vector<1x1x8x8x8xbf16>
    %109 = vector.shape_cast %108 : vector<1x1x8x8x8xbf16> to vector<8x8x8xbf16>
    %c0_195 = arith.constant 0 : index
    %c13_196 = arith.constant 13 : index
    %c0_197 = arith.constant 0 : index
    %c0_198 = arith.constant 0 : index
    %c0_199 = arith.constant 0 : index
    %110 = vector.load %arg1[%c0_195, %c13_196, %c0_197, %c0_198, %c0_199] : memref<1x16x9x9x8xbf16, #tpu.memory_space<vmem>>, vector<1x1x8x8x8xbf16>
    %111 = vector.shape_cast %110 : vector<1x1x8x8x8xbf16> to vector<8x8x8xbf16>
    %c0_200 = arith.constant 0 : index
    %c14_201 = arith.constant 14 : index
    %c0_202 = arith.constant 0 : index
    %c0_203 = arith.constant 0 : index
    %c0_204 = arith.constant 0 : index
    %112 = vector.load %arg1[%c0_200, %c14_201, %c0_202, %c0_203, %c0_204] : memref<1x16x9x9x8xbf16, #tpu.memory_space<vmem>>, vector<1x1x8x8x8xbf16>
    %113 = vector.shape_cast %112 : vector<1x1x8x8x8xbf16> to vector<8x8x8xbf16>
    %c0_205 = arith.constant 0 : index
    %c15_206 = arith.constant 15 : index
    %c0_207 = arith.constant 0 : index
    %c0_208 = arith.constant 0 : index
    %c0_209 = arith.constant 0 : index
    %114 = vector.load %arg1[%c0_205, %c15_206, %c0_207, %c0_208, %c0_209] : memref<1x16x9x9x8xbf16, #tpu.memory_space<vmem>>, vector<1x1x8x8x8xbf16>
    %115 = vector.shape_cast %114 : vector<1x1x8x8x8xbf16> to vector<8x8x8xbf16>
    %c0_210 = arith.constant 0 : index
    %c0_211 = arith.constant 0 : index
    %c1_212 = arith.constant 1 : index
    %c0_213 = arith.constant 0 : index
    %c0_214 = arith.constant 0 : index
    %116 = vector.load %arg1[%c0_210, %c0_211, %c1_212, %c0_213, %c0_214] : memref<1x16x9x9x8xbf16, #tpu.memory_space<vmem>>, vector<1x1x8x8x8xbf16>
    %117 = vector.shape_cast %116 : vector<1x1x8x8x8xbf16> to vector<8x8x8xbf16>
    %c0_215 = arith.constant 0 : index
    %c1_216 = arith.constant 1 : index
    %c1_217 = arith.constant 1 : index
    %c0_218 = arith.constant 0 : index
    %c0_219 = arith.constant 0 : index
    %118 = vector.load %arg1[%c0_215, %c1_216, %c1_217, %c0_218, %c0_219] : memref<1x16x9x9x8xbf16, #tpu.memory_space<vmem>>, vector<1x1x8x8x8xbf16>
    %119 = vector.shape_cast %118 : vector<1x1x8x8x8xbf16> to vector<8x8x8xbf16>
    %c0_220 = arith.constant 0 : index
    %c2_221 = arith.constant 2 : index
    %c1_222 = arith.constant 1 : index
    %c0_223 = arith.constant 0 : index
    %c0_224 = arith.constant 0 : index
    %120 = vector.load %arg1[%c0_220, %c2_221, %c1_222, %c0_223, %c0_224] : memref<1x16x9x9x8xbf16, #tpu.memory_space<vmem>>, vector<1x1x8x8x8xbf16>
    %121 = vector.shape_cast %120 : vector<1x1x8x8x8xbf16> to vector<8x8x8xbf16>
    %c0_225 = arith.constant 0 : index
    %c3_226 = arith.constant 3 : index
    %c1_227 = arith.constant 1 : index
    %c0_228 = arith.constant 0 : index
    %c0_229 = arith.constant 0 : index
    %122 = vector.load %arg1[%c0_225, %c3_226, %c1_227, %c0_228, %c0_229] : memref<1x16x9x9x8xbf16, #tpu.memory_space<vmem>>, vector<1x1x8x8x8xbf16>
    %123 = vector.shape_cast %122 : vector<1x1x8x8x8xbf16> to vector<8x8x8xbf16>
    %c0_230 = arith.constant 0 : index
    %c4_231 = arith.constant 4 : index
    %c1_232 = arith.constant 1 : index
    %c0_233 = arith.constant 0 : index
    %c0_234 = arith.constant 0 : index
    %124 = vector.load %arg1[%c0_230, %c4_231, %c1_232, %c0_233, %c0_234] : memref<1x16x9x9x8xbf16, #tpu.memory_space<vmem>>, vector<1x1x8x8x8xbf16>
    %125 = vector.shape_cast %124 : vector<1x1x8x8x8xbf16> to vector<8x8x8xbf16>
    %c0_235 = arith.constant 0 : index
    %c5_236 = arith.constant 5 : index
    %c1_237 = arith.constant 1 : index
    %c0_238 = arith.constant 0 : index
    %c0_239 = arith.constant 0 : index
    %126 = vector.load %arg1[%c0_235, %c5_236, %c1_237, %c0_238, %c0_239] : memref<1x16x9x9x8xbf16, #tpu.memory_space<vmem>>, vector<1x1x8x8x8xbf16>
    %127 = vector.shape_cast %126 : vector<1x1x8x8x8xbf16> to vector<8x8x8xbf16>
    %c0_240 = arith.constant 0 : index
    %c6_241 = arith.constant 6 : index
    %c1_242 = arith.constant 1 : index
    %c0_243 = arith.constant 0 : index
    %c0_244 = arith.constant 0 : index
    %128 = vector.load %arg1[%c0_240, %c6_241, %c1_242, %c0_243, %c0_244] : memref<1x16x9x9x8xbf16, #tpu.memory_space<vmem>>, vector<1x1x8x8x8xbf16>
    %129 = vector.shape_cast %128 : vector<1x1x8x8x8xbf16> to vector<8x8x8xbf16>
    %c0_245 = arith.constant 0 : index
    %c7_246 = arith.constant 7 : index
    %c1_247 = arith.constant 1 : index
    %c0_248 = arith.constant 0 : index
    %c0_249 = arith.constant 0 : index
    %130 = vector.load %arg1[%c0_245, %c7_246, %c1_247, %c0_248, %c0_249] : memref<1x16x9x9x8xbf16, #tpu.memory_space<vmem>>, vector<1x1x8x8x8xbf16>
    %131 = vector.shape_cast %130 : vector<1x1x8x8x8xbf16> to vector<8x8x8xbf16>
    %132 = tpu.concatenate %101, %103, %105, %107, %109, %111, %113, %115, %117, %119, %121, %123, %125, %127, %129, %131 in 2 : vector<8x8x8xbf16>, vector<8x8x8xbf16>, vector<8x8x8xbf16>, vector<8x8x8xbf16>, vector<8x8x8xbf16>, vector<8x8x8xbf16>, vector<8x8x8xbf16>, vector<8x8x8xbf16>, vector<8x8x8xbf16>, vector<8x8x8xbf16>, vector<8x8x8xbf16>, vector<8x8x8xbf16>, vector<8x8x8xbf16>, vector<8x8x8xbf16>, vector<8x8x8xbf16>, vector<8x8x8xbf16> -> vector<8x8x128xbf16>
    %133 = vector.shape_cast %132 : vector<8x8x128xbf16> to vector<64x128xbf16>
    %c0_250 = arith.constant 0 : index
    %c0_251 = arith.constant 0 : index
    %134 = vector.load %arg2[%c0_250, %c0_251] : memref<128x8xbf16, #tpu.memory_space<vmem>>, vector<128x8xbf16>
    %cst_252 = arith.constant dense<0.000000e+00> : vector<64x8xf32>
    %135 = tpu.matmul %133, %134, %cst_252 {dimension_numbers = #tpu.dot_dimension_numbers<[1], [0], [0], [1], [0, 0, 1, 1], [], []>} : vector<64x128xbf16>, vector<128x8xbf16>, vector<64x8xf32> -> vector<64x8xf32>
    %c0_253 = arith.constant 0 : index
    %c0_254 = arith.constant 0 : index
    %136 = vector.load %arg3[%c0_253, %c0_254] : memref<1x8xf32, #tpu.memory_space<vmem>>, vector<1x8xf32>
    %137 = vector.broadcast %136 : vector<1x8xf32> to vector<64x8xf32>
    %138 = arith.addf %135, %137 : vector<64x8xf32>
    %cst_255 = arith.constant 0.000000e+00 : f32
    %139 = vector.broadcast %cst_255 : f32 to vector<64x8xf32>
    %140 = arith.cmpf oge, %138, %139 : vector<64x8xf32>
    %cst_256 = arith.constant 2.000000e-01 : f32
    %141 = vector.broadcast %cst_256 : f32 to vector<64x8xf32>
    %142 = arith.mulf %141, %138 : vector<64x8xf32>
    %143 = arith.select %140, %138, %142 : vector<64x8xi1>, vector<64x8xf32>
    %144 = vector.shape_cast %143 : vector<64x8xf32> to vector<8x8x8xf32>
    %145 = arith.truncf %144 : vector<8x8x8xf32> to vector<8x8x8xbf16>
    %c1_257 = arith.constant 1 : index
    %c1_258 = arith.constant 1 : index
    %c0_259 = arith.constant 0 : index
    %c0_260 = arith.constant 0 : index
    %146 = vector.load %arg9[%c1_257, %c1_258, %c0_259, %c0_260] : memref<4x9x9x8xbf16, #tpu.memory_space<vmem>>, vector<1x8x8x8xbf16>
    %147 = vector.shape_cast %146 : vector<1x8x8x8xbf16> to vector<8x8x8xbf16>
    %148 = vector.shape_cast %145 : vector<8x8x8xbf16> to vector<1x8x8x8xbf16>
    tpu.vector_store %arg9[%c1_257, %c1_258, %c0_259, %c0_260], %148 {strides = array<i32>} : memref<4x9x9x8xbf16, #tpu.memory_space<vmem>>, vector<1x8x8x8xbf16>,
    %c0_261 = arith.constant 0 : index
    %c10_262 = arith.constant 10 : index
    %c0_263 = arith.constant 0 : index
    %c0_264 = arith.constant 0 : index
    %c0_265 = arith.constant 0 : index
    %149 = vector.load %arg1[%c0_261, %c10_262, %c0_263, %c0_264, %c0_265] : memref<1x16x9x9x8xbf16, #tpu.memory_space<vmem>>, vector<1x1x8x8x8xbf16>
    %150 = vector.shape_cast %149 : vector<1x1x8x8x8xbf16> to vector<8x8x8xbf16>
    %c0_266 = arith.constant 0 : index
    %c11_267 = arith.constant 11 : index
    %c0_268 = arith.constant 0 : index
    %c0_269 = arith.constant 0 : index
    %c0_270 = arith.constant 0 : index
    %151 = vector.load %arg1[%c0_266, %c11_267, %c0_268, %c0_269, %c0_270] : memref<1x16x9x9x8xbf16, #tpu.memory_space<vmem>>, vector<1x1x8x8x8xbf16>
    %152 = vector.shape_cast %151 : vector<1x1x8x8x8xbf16> to vector<8x8x8xbf16>
    %c0_271 = arith.constant 0 : index
    %c8_272 = arith.constant 8 : index
    %c0_273 = arith.constant 0 : index
    %c1_274 = arith.constant 1 : index
    %c0_275 = arith.constant 0 : index
    %153 = vector.load %arg1[%c0_271, %c8_272, %c0_273, %c1_274, %c0_275] : memref<1x16x9x9x8xbf16, #tpu.memory_space<vmem>>, vector<1x1x8x8x8xbf16>
    %154 = vector.shape_cast %153 : vector<1x1x8x8x8xbf16> to vector<8x8x8xbf16>
    %c0_276 = arith.constant 0 : index
    %c9_277 = arith.constant 9 : index
    %c0_278 = arith.constant 0 : index
    %c1_279 = arith.constant 1 : index
    %c0_280 = arith.constant 0 : index
    %155 = vector.load %arg1[%c0_276, %c9_277, %c0_278, %c1_279, %c0_280] : memref<1x16x9x9x8xbf16, #tpu.memory_space<vmem>>, vector<1x1x8x8x8xbf16>
    %156 = vector.shape_cast %155 : vector<1x1x8x8x8xbf16> to vector<8x8x8xbf16>
    %c0_281 = arith.constant 0 : index
    %c14_282 = arith.constant 14 : index
    %c0_283 = arith.constant 0 : index
    %c0_284 = arith.constant 0 : index
    %c0_285 = arith.constant 0 : index
    %157 = vector.load %arg1[%c0_281, %c14_282, %c0_283, %c0_284, %c0_285] : memref<1x16x9x9x8xbf16, #tpu.memory_space<vmem>>, vector<1x1x8x8x8xbf16>
    %158 = vector.shape_cast %157 : vector<1x1x8x8x8xbf16> to vector<8x8x8xbf16>
    %c0_286 = arith.constant 0 : index
    %c15_287 = arith.constant 15 : index
    %c0_288 = arith.constant 0 : index
    %c0_289 = arith.constant 0 : index
    %c0_290 = arith.constant 0 : index
    %159 = vector.load %arg1[%c0_286, %c15_287, %c0_288, %c0_289, %c0_290] : memref<1x16x9x9x8xbf16, #tpu.memory_space<vmem>>, vector<1x1x8x8x8xbf16>
    %160 = vector.shape_cast %159 : vector<1x1x8x8x8xbf16> to vector<8x8x8xbf16>
    %c0_291 = arith.constant 0 : index
    %c12_292 = arith.constant 12 : index
    %c0_293 = arith.constant 0 : index
    %c1_294 = arith.constant 1 : index
    %c0_295 = arith.constant 0 : index
    %161 = vector.load %arg1[%c0_291, %c12_292, %c0_293, %c1_294, %c0_295] : memref<1x16x9x9x8xbf16, #tpu.memory_space<vmem>>, vector<1x1x8x8x8xbf16>
    %162 = vector.shape_cast %161 : vector<1x1x8x8x8xbf16> to vector<8x8x8xbf16>
    %c0_296 = arith.constant 0 : index
    %c13_297 = arith.constant 13 : index
    %c0_298 = arith.constant 0 : index
    %c1_299 = arith.constant 1 : index
    %c0_300 = arith.constant 0 : index
    %163 = vector.load %arg1[%c0_296, %c13_297, %c0_298, %c1_299, %c0_300] : memref<1x16x9x9x8xbf16, #tpu.memory_space<vmem>>, vector<1x1x8x8x8xbf16>
    %164 = vector.shape_cast %163 : vector<1x1x8x8x8xbf16> to vector<8x8x8xbf16>
    %c0_301 = arith.constant 0 : index
    %c2_302 = arith.constant 2 : index
    %c1_303 = arith.constant 1 : index
    %c0_304 = arith.constant 0 : index
    %c0_305 = arith.constant 0 : index
    %165 = vector.load %arg1[%c0_301, %c2_302, %c1_303, %c0_304, %c0_305] : memref<1x16x9x9x8xbf16, #tpu.memory_space<vmem>>, vector<1x1x8x8x8xbf16>
    %166 = vector.shape_cast %165 : vector<1x1x8x8x8xbf16> to vector<8x8x8xbf16>
    %c0_306 = arith.constant 0 : index
    %c3_307 = arith.constant 3 : index
    %c1_308 = arith.constant 1 : index
    %c0_309 = arith.constant 0 : index
    %c0_310 = arith.constant 0 : index
    %167 = vector.load %arg1[%c0_306, %c3_307, %c1_308, %c0_309, %c0_310] : memref<1x16x9x9x8xbf16, #tpu.memory_space<vmem>>, vector<1x1x8x8x8xbf16>
    %168 = vector.shape_cast %167 : vector<1x1x8x8x8xbf16> to vector<8x8x8xbf16>
    %c0_311 = arith.constant 0 : index
    %c0_312 = arith.constant 0 : index
    %c1_313 = arith.constant 1 : index
    %c1_314 = arith.constant 1 : index
    %c0_315 = arith.constant 0 : index
    %169 = vector.load %arg1[%c0_311, %c0_312, %c1_313, %c1_314, %c0_315] : memref<1x16x9x9x8xbf16, #tpu.memory_space<vmem>>, vector<1x1x8x8x8xbf16>
    %170 = vector.shape_cast %169 : vector<1x1x8x8x8xbf16> to vector<8x8x8xbf16>
    %c0_316 = arith.constant 0 : index
    %c1_317 = arith.constant 1 : index
    %c1_318 = arith.constant 1 : index
    %c1_319 = arith.constant 1 : index
    %c0_320 = arith.constant 0 : index
    %171 = vector.load %arg1[%c0_316, %c1_317, %c1_318, %c1_319, %c0_320] : memref<1x16x9x9x8xbf16, #tpu.memory_space<vmem>>, vector<1x1x8x8x8xbf16>
    %172 = vector.shape_cast %171 : vector<1x1x8x8x8xbf16> to vector<8x8x8xbf16>
    %c0_321 = arith.constant 0 : index
    %c6_322 = arith.constant 6 : index
    %c1_323 = arith.constant 1 : index
    %c0_324 = arith.constant 0 : index
    %c0_325 = arith.constant 0 : index
    %173 = vector.load %arg1[%c0_321, %c6_322, %c1_323, %c0_324, %c0_325] : memref<1x16x9x9x8xbf16, #tpu.memory_space<vmem>>, vector<1x1x8x8x8xbf16>
    %174 = vector.shape_cast %173 : vector<1x1x8x8x8xbf16> to vector<8x8x8xbf16>
    %c0_326 = arith.constant 0 : index
    %c7_327 = arith.constant 7 : index
    %c1_328 = arith.constant 1 : index
    %c0_329 = arith.constant 0 : index
    %c0_330 = arith.constant 0 : index
    %175 = vector.load %arg1[%c0_326, %c7_327, %c1_328, %c0_329, %c0_330] : memref<1x16x9x9x8xbf16, #tpu.memory_space<vmem>>, vector<1x1x8x8x8xbf16>
    %176 = vector.shape_cast %175 : vector<1x1x8x8x8xbf16> to vector<8x8x8xbf16>
    %c0_331 = arith.constant 0 : index
    %c4_332 = arith.constant 4 : index
    %c1_333 = arith.constant 1 : index
    %c1_334 = arith.constant 1 : index
    %c0_335 = arith.constant 0 : index
    %177 = vector.load %arg1[%c0_331, %c4_332, %c1_333, %c1_334, %c0_335] : memref<1x16x9x9x8xbf16, #tpu.memory_space<vmem>>, vector<1x1x8x8x8xbf16>
    %178 = vector.shape_cast %177 : vector<1x1x8x8x8xbf16> to vector<8x8x8xbf16>
    %c0_336 = arith.constant 0 : index
    %c5_337 = arith.constant 5 : index
    %c1_338 = arith.constant 1 : index
    %c1_339 = arith.constant 1 : index
    %c0_340 = arith.constant 0 : index
    %179 = vector.load %arg1[%c0_336, %c5_337, %c1_338, %c1_339, %c0_340] : memref<1x16x9x9x8xbf16, #tpu.memory_space<vmem>>, vector<1x1x8x8x8xbf16>
    %180 = vector.shape_cast %179 : vector<1x1x8x8x8xbf16> to vector<8x8x8xbf16>
    %181 = tpu.concatenate %150, %152, %154, %156, %158, %160, %162, %164, %166, %168, %170, %172, %174, %176, %178, %180 in 2 : vector<8x8x8xbf16>, vector<8x8x8xbf16>, vector<8x8x8xbf16>, vector<8x8x8xbf16>, vector<8x8x8xbf16>, vector<8x8x8xbf16>, vector<8x8x8xbf16>, vector<8x8x8xbf16>, vector<8x8x8xbf16>, vector<8x8x8xbf16>, vector<8x8x8xbf16>, vector<8x8x8xbf16>, vector<8x8x8xbf16>, vector<8x8x8xbf16>, vector<8x8x8xbf16>, vector<8x8x8xbf16> -> vector<8x8x128xbf16>
    %182 = vector.shape_cast %181 : vector<8x8x128xbf16> to vector<64x128xbf16>
    %c0_341 = arith.constant 0 : index
    %c0_342 = arith.constant 0 : index
    %183 = vector.load %arg2[%c0_341, %c0_342] : memref<128x8xbf16, #tpu.memory_space<vmem>>, vector<128x8xbf16>
    %cst_343 = arith.constant dense<0.000000e+00> : vector<64x8xf32>
    %184 = tpu.matmul %182, %183, %cst_343 {dimension_numbers = #tpu.dot_dimension_numbers<[1], [0], [0], [1], [0, 0, 1, 1], [], []>} : vector<64x128xbf16>, vector<128x8xbf16>, vector<64x8xf32> -> vector<64x8xf32>
    %c0_344 = arith.constant 0 : index
    %c0_345 = arith.constant 0 : index
    %185 = vector.load %arg3[%c0_344, %c0_345] : memref<1x8xf32, #tpu.memory_space<vmem>>, vector<1x8xf32>
    %186 = vector.broadcast %185 : vector<1x8xf32> to vector<64x8xf32>
    %187 = arith.addf %184, %186 : vector<64x8xf32>
    %cst_346 = arith.constant 0.000000e+00 : f32
    %188 = vector.broadcast %cst_346 : f32 to vector<64x8xf32>
    %189 = arith.cmpf oge, %187, %188 : vector<64x8xf32>
    %cst_347 = arith.constant 2.000000e-01 : f32
    %190 = vector.broadcast %cst_347 : f32 to vector<64x8xf32>
    %191 = arith.mulf %190, %187 : vector<64x8xf32>
    %192 = arith.select %189, %187, %191 : vector<64x8xi1>, vector<64x8xf32>
    %193 = vector.shape_cast %192 : vector<64x8xf32> to vector<8x8x8xf32>
    %194 = arith.truncf %193 : vector<8x8x8xf32> to vector<8x8x8xbf16>
    %c0_348 = arith.constant 0 : index
    %c1_349 = arith.constant 1 : index
    %c1_350 = arith.constant 1 : index
    %c0_351 = arith.constant 0 : index
    %195 = vector.load %arg9[%c0_348, %c1_349, %c1_350, %c0_351] : memref<4x9x9x8xbf16, #tpu.memory_space<vmem>>, vector<1x8x8x8xbf16>
    %196 = vector.shape_cast %195 : vector<1x8x8x8xbf16> to vector<8x8x8xbf16>
    %197 = vector.shape_cast %194 : vector<8x8x8xbf16> to vector<1x8x8x8xbf16>
    tpu.vector_store %arg9[%c0_348, %c1_349, %c1_350, %c0_351], %197 {strides = array<i32>} : memref<4x9x9x8xbf16, #tpu.memory_space<vmem>>, vector<1x8x8x8xbf16>,
    %c0_352 = arith.constant 0 : index
    %c0_353 = arith.constant 0 : index
    %c0_354 = arith.constant 0 : index
    %c0_355 = arith.constant 0 : index
    %198 = vector.load %arg9[%c0_352, %c0_353, %c0_354, %c0_355] : memref<4x9x9x8xbf16, #tpu.memory_space<vmem>>, vector<1x8x8x8xbf16>
    %199 = vector.shape_cast %198 : vector<1x8x8x8xbf16> to vector<8x8x8xbf16>
    %c1_356 = arith.constant 1 : index
    %c0_357 = arith.constant 0 : index
    %c0_358 = arith.constant 0 : index
    %c0_359 = arith.constant 0 : index
    %200 = vector.load %arg9[%c1_356, %c0_357, %c0_358, %c0_359] : memref<4x9x9x8xbf16, #tpu.memory_space<vmem>>, vector<1x8x8x8xbf16>
    %201 = vector.shape_cast %200 : vector<1x8x8x8xbf16> to vector<8x8x8xbf16>
    %c0_360 = arith.constant 0 : index
    %c0_361 = arith.constant 0 : index
    %c1_362 = arith.constant 1 : index
    %c0_363 = arith.constant 0 : index
    %202 = vector.load %arg9[%c0_360, %c0_361, %c1_362, %c0_363] : memref<4x9x9x8xbf16, #tpu.memory_space<vmem>>, vector<1x8x8x8xbf16>
    %203 = vector.shape_cast %202 : vector<1x8x8x8xbf16> to vector<8x8x8xbf16>
    %c1_364 = arith.constant 1 : index
    %c0_365 = arith.constant 0 : index
    %c1_366 = arith.constant 1 : index
    %c0_367 = arith.constant 0 : index
    %204 = vector.load %arg9[%c1_364, %c0_365, %c1_366, %c0_367] : memref<4x9x9x8xbf16, #tpu.memory_space<vmem>>, vector<1x8x8x8xbf16>
    %205 = vector.shape_cast %204 : vector<1x8x8x8xbf16> to vector<8x8x8xbf16>
    %c2_368 = arith.constant 2 : index
    %c0_369 = arith.constant 0 : index
    %c0_370 = arith.constant 0 : index
    %c0_371 = arith.constant 0 : index
    %206 = vector.load %arg9[%c2_368, %c0_369, %c0_370, %c0_371] : memref<4x9x9x8xbf16, #tpu.memory_space<vmem>>, vector<1x8x8x8xbf16>
    %207 = vector.shape_cast %206 : vector<1x8x8x8xbf16> to vector<8x8x8xbf16>
    %c3_372 = arith.constant 3 : index
    %c0_373 = arith.constant 0 : index
    %c0_374 = arith.constant 0 : index
    %c0_375 = arith.constant 0 : index
    %208 = vector.load %arg9[%c3_372, %c0_373, %c0_374, %c0_375] : memref<4x9x9x8xbf16, #tpu.memory_space<vmem>>, vector<1x8x8x8xbf16>
    %209 = vector.shape_cast %208 : vector<1x8x8x8xbf16> to vector<8x8x8xbf16>
    %c2_376 = arith.constant 2 : index
    %c0_377 = arith.constant 0 : index
    %c1_378 = arith.constant 1 : index
    %c0_379 = arith.constant 0 : index
    %210 = vector.load %arg9[%c2_376, %c0_377, %c1_378, %c0_379] : memref<4x9x9x8xbf16, #tpu.memory_space<vmem>>, vector<1x8x8x8xbf16>
    %211 = vector.shape_cast %210 : vector<1x8x8x8xbf16> to vector<8x8x8xbf16>
    %c3_380 = arith.constant 3 : index
    %c0_381 = arith.constant 0 : index
    %c1_382 = arith.constant 1 : index
    %c0_383 = arith.constant 0 : index
    %212 = vector.load %arg9[%c3_380, %c0_381, %c1_382, %c0_383] : memref<4x9x9x8xbf16, #tpu.memory_space<vmem>>, vector<1x8x8x8xbf16>
    %213 = vector.shape_cast %212 : vector<1x8x8x8xbf16> to vector<8x8x8xbf16>
    %c0_384 = arith.constant 0 : index
    %c1_385 = arith.constant 1 : index
    %c0_386 = arith.constant 0 : index
    %c0_387 = arith.constant 0 : index
    %214 = vector.load %arg9[%c0_384, %c1_385, %c0_386, %c0_387] : memref<4x9x9x8xbf16, #tpu.memory_space<vmem>>, vector<1x8x8x8xbf16>
    %215 = vector.shape_cast %214 : vector<1x8x8x8xbf16> to vector<8x8x8xbf16>
    %c1_388 = arith.constant 1 : index
    %c1_389 = arith.constant 1 : index
    %c0_390 = arith.constant 0 : index
    %c0_391 = arith.constant 0 : index
    %216 = vector.load %arg9[%c1_388, %c1_389, %c0_390, %c0_391] : memref<4x9x9x8xbf16, #tpu.memory_space<vmem>>, vector<1x8x8x8xbf16>
    %217 = vector.shape_cast %216 : vector<1x8x8x8xbf16> to vector<8x8x8xbf16>
    %c0_392 = arith.constant 0 : index
    %c1_393 = arith.constant 1 : index
    %c1_394 = arith.constant 1 : index
    %c0_395 = arith.constant 0 : index
    %218 = vector.load %arg9[%c0_392, %c1_393, %c1_394, %c0_395] : memref<4x9x9x8xbf16, #tpu.memory_space<vmem>>, vector<1x8x8x8xbf16>
    %219 = vector.shape_cast %218 : vector<1x8x8x8xbf16> to vector<8x8x8xbf16>
    %c1_396 = arith.constant 1 : index
    %c1_397 = arith.constant 1 : index
    %c1_398 = arith.constant 1 : index
    %c0_399 = arith.constant 0 : index
    %220 = vector.load %arg9[%c1_396, %c1_397, %c1_398, %c0_399] : memref<4x9x9x8xbf16, #tpu.memory_space<vmem>>, vector<1x8x8x8xbf16>
    %221 = vector.shape_cast %220 : vector<1x8x8x8xbf16> to vector<8x8x8xbf16>
    %c2_400 = arith.constant 2 : index
    %c1_401 = arith.constant 1 : index
    %c0_402 = arith.constant 0 : index
    %c0_403 = arith.constant 0 : index
    %222 = vector.load %arg9[%c2_400, %c1_401, %c0_402, %c0_403] : memref<4x9x9x8xbf16, #tpu.memory_space<vmem>>, vector<1x8x8x8xbf16>
    %223 = vector.shape_cast %222 : vector<1x8x8x8xbf16> to vector<8x8x8xbf16>
    %c3_404 = arith.constant 3 : index
    %c1_405 = arith.constant 1 : index
    %c0_406 = arith.constant 0 : index
    %c0_407 = arith.constant 0 : index
    %224 = vector.load %arg9[%c3_404, %c1_405, %c0_406, %c0_407] : memref<4x9x9x8xbf16, #tpu.memory_space<vmem>>, vector<1x8x8x8xbf16>
    %225 = vector.shape_cast %224 : vector<1x8x8x8xbf16> to vector<8x8x8xbf16>
    %c2_408 = arith.constant 2 : index
    %c1_409 = arith.constant 1 : index
    %c1_410 = arith.constant 1 : index
    %c0_411 = arith.constant 0 : index
    %226 = vector.load %arg9[%c2_408, %c1_409, %c1_410, %c0_411] : memref<4x9x9x8xbf16, #tpu.memory_space<vmem>>, vector<1x8x8x8xbf16>
    %227 = vector.shape_cast %226 : vector<1x8x8x8xbf16> to vector<8x8x8xbf16>
    %c3_412 = arith.constant 3 : index
    %c1_413 = arith.constant 1 : index
    %c1_414 = arith.constant 1 : index
    %c0_415 = arith.constant 0 : index
    %228 = vector.load %arg9[%c3_412, %c1_413, %c1_414, %c0_415] : memref<4x9x9x8xbf16, #tpu.memory_space<vmem>>, vector<1x8x8x8xbf16>
    %229 = vector.shape_cast %228 : vector<1x8x8x8xbf16> to vector<8x8x8xbf16>
    %230 = tpu.concatenate %199, %201, %203, %205, %207, %209, %211, %213, %215, %217, %219, %221, %223, %225, %227, %229 in 2 : vector<8x8x8xbf16>, vector<8x8x8xbf16>, vector<8x8x8xbf16>, vector<8x8x8xbf16>, vector<8x8x8xbf16>, vector<8x8x8xbf16>, vector<8x8x8xbf16>, vector<8x8x8xbf16>, vector<8x8x8xbf16>, vector<8x8x8xbf16>, vector<8x8x8xbf16>, vector<8x8x8xbf16>, vector<8x8x8xbf16>, vector<8x8x8xbf16>, vector<8x8x8xbf16>, vector<8x8x8xbf16> -> vector<8x8x128xbf16>
    %231 = vector.shape_cast %230 : vector<8x8x128xbf16> to vector<64x128xbf16>
    %c0_416 = arith.constant 0 : index
    %c0_417 = arith.constant 0 : index
    %232 = vector.load %arg4[%c0_416, %c0_417] : memref<128x16xbf16, #tpu.memory_space<vmem>>, vector<128x16xbf16>
    %cst_418 = arith.constant dense<0.000000e+00> : vector<64x16xf32>
    %233 = tpu.matmul %231, %232, %cst_418 {dimension_numbers = #tpu.dot_dimension_numbers<[1], [0], [0], [1], [0, 0, 1, 1], [], []>} : vector<64x128xbf16>, vector<128x16xbf16>, vector<64x16xf32> -> vector<64x16xf32>
    %c0_419 = arith.constant 0 : index
    %c0_420 = arith.constant 0 : index
    %234 = vector.load %arg5[%c0_419, %c0_420] : memref<1x16xf32, #tpu.memory_space<vmem>>, vector<1x16xf32>
    %235 = vector.broadcast %234 : vector<1x16xf32> to vector<64x16xf32>
    %236 = arith.addf %233, %235 : vector<64x16xf32>
    %cst_421 = arith.constant 0.000000e+00 : f32
    %237 = vector.broadcast %cst_421 : f32 to vector<64x16xf32>
    %238 = arith.cmpf oge, %236, %237 : vector<64x16xf32>
    %cst_422 = arith.constant 2.000000e-01 : f32
    %239 = vector.broadcast %cst_422 : f32 to vector<64x16xf32>
    %240 = arith.mulf %239, %236 : vector<64x16xf32>
    %241 = arith.select %238, %236, %240 : vector<64x16xi1>, vector<64x16xf32>
    %c0_423 = arith.constant 0 : index
    %c0_424 = arith.constant 0 : index
    %242 = vector.load %arg6[%c0_423, %c0_424] : memref<64x16xf32, #tpu.memory_space<vmem>>, vector<64x16xf32>
    %243 = arith.mulf %241, %242 : vector<64x16xf32>
    %cst_425 = arith.constant dense<0.000000e+00> : vector<64xf32>
    %244 = vector.multi_reduction <add>, %243, %cst_425 [1] : vector<64x16xf32> to vector<64xf32>
    %245 = vector.shape_cast %244 : vector<64xf32> to vector<64x1xf32>
    %cst_426 = arith.constant dense<0.000000e+00> : vector<1xf32>
    %246 = vector.multi_reduction <add>, %245, %cst_426 [0] : vector<64x1xf32> to vector<1xf32>
    %247 = vector.shape_cast %246 : vector<1xf32> to vector<1x1xf32>
    %c0_427 = arith.constant 0 : index
    %c0_428 = arith.constant 0 : index
    %248 = vector.load %arg7[%c0_427, %c0_428] : memref<1x1xf32, #tpu.memory_space<vmem>>, vector<1x1xf32>
    %249 = arith.addf %247, %248 : vector<1x1xf32>
    %250 = vector.shape_cast %249 : vector<1x1xf32> to vector<1x1x1xf32>
    %251 = vector.shape_cast %250 : vector<1x1x1xf32> to vector<1x1x1xf32>
    %252 = vector.broadcast %251 : vector<1x1x1xf32> to vector<1x1x128xf32>
    %c0_429 = arith.constant 0 : index
    %c0_430 = arith.constant 0 : index
    %c0_431 = arith.constant 0 : index
    %253 = vector.load %arg8[%c0_429, %c0_430, %c0_431] : memref<1x1x128xf32, #tpu.memory_space<vmem>>, vector<1x1x128xf32>
    tpu.vector_store %arg8[%c0_429, %c0_430, %c0_431], %252 {strides = array<i32>} : memref<1x1x128xf32, #tpu.memory_space<vmem>>, vector<1x1x128xf32>,
    return
  }
  func.func @transform_0(%arg0: i32) -> (i32, i32, i32, i32, i32) {
    %c0_i32 = arith.constant 0 : i32
    %c0_i32_0 = arith.constant 0 : i32
    %c0_i32_1 = arith.constant 0 : i32
    %c0_i32_2 = arith.constant 0 : i32
    %c0_i32_3 = arith.constant 0 : i32
    return %arg0, %c0_i32, %c0_i32_0, %c0_i32_1, %c0_i32_2 : i32, i32, i32, i32, i32
  }
  func.func @transform_1(%arg0: i32) -> (i32, i32) {
    %c0_i32 = arith.constant 0 : i32
    %c0_i32_0 = arith.constant 0 : i32
    %c0_i32_1 = arith.constant 0 : i32
    return %c0_i32, %c0_i32_0 : i32, i32
  }
  func.func @transform_2(%arg0: i32) -> (i32, i32) {
    %c0_i32 = arith.constant 0 : i32
    %c0_i32_0 = arith.constant 0 : i32
    %c0_i32_1 = arith.constant 0 : i32
    return %c0_i32, %c0_i32_0 : i32, i32
  }
  func.func @transform_3(%arg0: i32) -> (i32, i32) {
    %c0_i32 = arith.constant 0 : i32
    %c0_i32_0 = arith.constant 0 : i32
    %c0_i32_1 = arith.constant 0 : i32
    return %c0_i32, %c0_i32_0 : i32, i32
  }
  func.func @transform_4(%arg0: i32) -> (i32, i32) {
    %c0_i32 = arith.constant 0 : i32
    %c0_i32_0 = arith.constant 0 : i32
    %c0_i32_1 = arith.constant 0 : i32
    return %c0_i32, %c0_i32_0 : i32, i32
  }
  func.func @transform_5(%arg0: i32) -> (i32, i32) {
    %c0_i32 = arith.constant 0 : i32
    %c0_i32_0 = arith.constant 0 : i32
    %c0_i32_1 = arith.constant 0 : i32
    return %c0_i32, %c0_i32_0 : i32, i32
  }
  func.func @transform_6(%arg0: i32) -> (i32, i32) {
    %c0_i32 = arith.constant 0 : i32
    %c0_i32_0 = arith.constant 0 : i32
    %c0_i32_1 = arith.constant 0 : i32
    return %c0_i32, %c0_i32_0 : i32, i32
  }
  func.func @transform_7(%arg0: i32) -> (i32, i32, i32) {
    %c0_i32 = arith.constant 0 : i32
    %c0_i32_0 = arith.constant 0 : i32
    %c0_i32_1 = arith.constant 0 : i32
    return %arg0, %c0_i32, %c0_i32_0 : i32, i32, i32
  }
}

</mosaic_0001>

<bundles_post_ra>
// kernel: discriminator_forward.1
= control target key start
LH: loop header
LB: loop body
LE: loop exit
PB: predicated region body
PF: predicated region fallthrough
CT: control target
= control target key end

     0   :  { %s10738_s26 = smov 0   ;;  %s14669_s0 = inlined_call_operand.vmem [shape: bf16[2,16,9,9,8], index: 0, kind: input, shape index: {}]   ;;  %s14670_s1 = inlined_call_operand.vmem [shape: bf16[128,8], index: 1, kind: input, shape index: {}]   ;;  %s14671_s2 = inlined_call_operand.vmem [shape: f32[1,8], index: 2, kind: input, shape index: {}]   ;;  %s14672_s3 = inlined_call_operand.vmem [shape: bf16[128,16], index: 3, kind: input, shape index: {}]   ;;  %s14673_s4 = inlined_call_operand.vmem [shape: f32[1,16], index: 4, kind: input, shape index: {}]   ;;  %s14674_s5 = inlined_call_operand.vmem [shape: f32[64,16], index: 5, kind: input, shape index: {}]   ;;  %s14675_s6 = inlined_call_operand.<no memory space> [shape: f32[1,1], index: 6, kind: input, shape index: {}]   ;;  %s14676_s7 = inlined_call_operand.vmem [shape: f32[2,1,128], index: 7, kind: output, shape index: {}]  }
   0x1   :  { %v12_v0 = vstv %s14675_s6 }
   0x2   :  { %13 = vst [vmem:[#allocation3] sm:$0x1] %v12_v0 }
   0x3 LB: > { %s8482_s27 = sadd.s32 4294967295, %s10677_s26   ;;  %p8486_p0 = scmp.ge.s32.totalorder %s10677_s26, 1  ;;  %s10677_s26 = sphi %s10738_s26, %s19_s26  }
   0x4   : > { %p239_p1 = scmp.lt.s32.totalorder %s10677_s26, 3 }
   0x6   : > { %p240_p2 = pnand %p8486_p0, %p239_p1 }
   0x8   : > { %243 = sbr.rel (%p240_p2) target bundleno = 2142 (0x85e), region = 48 }
   0xf   : > { %p269_p3 = scmp.lt.s32.totalorder %s8482_s27, 1  ;;  %s10679_s8 = smov 8   ;;  %vm1169_vm0 = vcmask 64512   ;;  %vm1194_vm1 = vcmask 130048   ;;  %vm1211_vm2 = vcmask 195584   ;;  %vm1228_vm3 = vcmask 261120  }
  0x10   : > { %s10680_s9 = smov 16   ;;  %s10681_s10 = smov 24   ;;  %vm1245_vm4 = vcmask 326656   ;;  %vm1262_vm5 = vcmask 392192   ;;  %vm14694_vm6 = vcmask 457728   ;;  %vm14693_vm7 = vcmask 523264  }
  0x11   : > { %s15360_s27 = smov (!%p269_p3, %s8482_s27), 1  ;;  %s10682_s11 = smov 32   ;;  %vm14684_vm8 = vcmask 588800   ;;  %vm14683_vm9 = vcmask 654336   ;;  %vm14686_vm10 = vcmask 719872   ;;  %vm14685_vm11 = vcmask 785408  }
  0x12   : > { %s9999_s6 = smul.u32 1152, %s15360_s27  ;;  %s10683_s12 = smov 40   ;;  %vm14680_vm12 = vcmask 850944   ;;  %vm14679_vm13 = vcmask 916480   ;;  %vm14678_vm14 = vcmask 982016   ;;  %vm14689_vm15 = vcmask 60416  }
  0x13   : > { %s10684_s13 = smov 48   ;;  %s10685_s14 = smov 56  }
  0x14   : > { %s10752_s30 = scalar_lea.vmem %s14669_s0, %s9999_s6  ;;  %s10686_s15 = smov 64  }
  0x15   : > { %v10026_v1 = vld [vmem:[%s10752_s30 + $0x58] ss:$0 sps:$4 sm:$0xff]   ;;  %v10027_v2 = vld [vmem:[%s10752_s30 + $0x48] ss:$0 sps:$4 sm:$0xff]   ;;  %v10028_v3 = vld [vmem:[%s10752_s30 + $0x60] ss:$0 sps:$4 sm:$0xff]  }
  0x16   : > { %597 = vrot.lane.b32.xlu1 %v10026_v1, %s10679_s8  ;;  %593 = vrot.lane.b32.xlu0 %v10027_v2, %s10679_s8  ;;  %v10029_v4 = vld [vmem:[%s10752_s30 + $0x50] ss:$0 sps:$4 sm:$0xff]   ;;  %v10031_v6 = vld [vmem:[%s10752_s30 + $0x68] ss:$0 sps:$4 sm:$0xff]   ;;  %s10687_s16 = smov 72   ;;  %s10688_s17 = smov 80  }
  0x17   : > { %v10030_v5 = vld [vmem:[%s10752_s30 + $0x70] ss:$0 sps:$4 sm:$0xff]   ;;  %v10032_v7 = vld [vmem:[%s10752_s30 + $0x80] ss:$0 sps:$4 sm:$0xff]   ;;  %v10033_v8 = vld [vmem:[%s10752_s30 + $0x78] ss:$0 sps:$4 sm:$0xff]  }
  0x18   : > { %v10034_v9 = vld [vmem:[%s10752_s30 + $0x98] ss:$0 sps:$4 sm:$0xff]   ;;  %v10035_v10 = vld [vmem:[%s10752_s30 + $0x90] ss:$0 sps:$4 sm:$0xff]   ;;  %v10036_v11 = vld [vmem:[%s10752_s30 + $0xa8] ss:$0 sps:$4 sm:$0xff]  }
  0x19   : > { %v10037_v12 = vld [vmem:[%s10752_s30 + $0xa0] ss:$0 sps:$4 sm:$0xff]   ;;  %v10038_v13 = vld [vmem:[%s10752_s30 + $0xb8] ss:$0 sps:$4 sm:$0xff]   ;;  %v10039_v14 = vld [vmem:[%s10752_s30 + $0xb0] ss:$0 sps:$4 sm:$0xff]  }
  0x1a   : > { %599 = vrot.lane.b32.xlu1 %v10028_v3, %s10679_s8  ;;  %595 = vrot.lane.b32.xlu0 %v10029_v4, %s10679_s8  ;;  %v10040_v15 = vld [vmem:[%s10752_s30 + $0xc8] ss:$0 sps:$4 sm:$0xff]   ;;  %v10041_v16 = vld [vmem:[%s10752_s30 + $0xc0] ss:$0 sps:$4 sm:$0xff]   ;;  %s10689_s18 = smov 88   ;;  %s10690_s19 = smov 96  }
  0x1b   : > { %v10042_v17 = vld [vmem:[%s10752_s30 + $0xe0] ss:$0 sps:$4 sm:$0xff]   ;;  %v10043_v18 = vld [vmem:[%s10752_s30 + $0xd8] ss:$0 sps:$4 sm:$0xff]   ;;  %v10044_v19 = vld [vmem:[%s10752_s30 + $0xf0] ss:$0 sps:$4 sm:$0xff]  }
  0x1c   : > { %v10045_v20 = vld [vmem:[%s10752_s30 + $0xe8] ss:$0 sps:$4 sm:$0xff]   ;;  %v10046_v21 = vld [vmem:[%s10752_s30 + $0x100] ss:$0 sps:$4 sm:$0xff]   ;;  %v10047_v22 = vld [vmem:[%s10752_s30 + $0xf8] ss:$0 sps:$4 sm:$0xff]  }
  0x1d   : > { %v10048_v23 = vld [vmem:[%s10752_s30 + $0x110] ss:$0 sps:$4 sm:$0xff]   ;;  %v10049_v24 = vld [vmem:[%s10752_s30 + $0x108] ss:$0 sps:$4 sm:$0xff]   ;;  %v10051_v26 = vld [vmem:[%s10752_s30 + $0x120] ss:$0 sps:$4 sm:$0xff]  }
  0x1e   : > { %603 = vrot.lane.b32.xlu1 %v10030_v5, %s10679_s8  ;;  %601 = vrot.lane.b32.xlu0 %v10031_v6, %s10679_s8  ;;  %v10050_v25 = vld [vmem:[%s10752_s30 + $0x128] ss:$0 sps:$4 sm:$0xff]   ;;  %v10052_v27 = vld [vmem:[%s10752_s30 + $0x138] ss:$0 sps:$4 sm:$0xff]   ;;  %s10691_s24 = smov 104   ;;  %s10692_s25 = smov 112  }
  0x1f   : > { %v10053_v28 = vld [vmem:[%s10752_s30 + $0x130] ss:$0 sps:$4 sm:$0xff]   ;;  %v10054_v29 = vld [vmem:[%s10752_s30 + $0x148] ss:$0 sps:$4 sm:$0xff]   ;;  %v10055_v30 = vld [vmem:[%s10752_s30 + $0x140] ss:$0 sps:$4 sm:$0xff]  }
  0x20   : > { %v10056_v31 = vld [vmem:[%s10752_s30 + $0x158] ss:$0 sps:$4 sm:$0xff]   ;;  %v10057_v32 = vld [vmem:[%s10752_s30 + $0x150] ss:$0 sps:$4 sm:$0xff]   ;;  %v10059_v34 = vld [vmem:[%s10752_s30 + $0x168] ss:$0 sps:$4 sm:$0xff]  }
  0x21   : > { %v10058_v33 = vld [vmem:[%s10752_s30 + $0x170] ss:$0 sps:$4 sm:$0xff]   ;;  %v10060_v35 = vld [vmem:[%s10752_s30 + $0x180] ss:$0 sps:$4 sm:$0xff]   ;;  %v10061_v36 = vld [vmem:[%s10752_s30 + $0x178] ss:$0 sps:$4 sm:$0xff]  }
  0x22   : > { %607 = vrot.lane.b32.xlu1 %v10032_v7, %s10679_s8  ;;  %605 = vrot.lane.b32.xlu0 %v10033_v8, %s10679_s8  ;;  %v10062_v37 = vld [vmem:[%s10752_s30 + $0x190] ss:$0 sps:$4 sm:$0xff]   ;;  %v10063_v38 = vld [vmem:[%s10752_s30 + $0x188] ss:$0 sps:$4 sm:$0xff]   ;;  %s10693_s21 = smov 120  }
  0x23   : > { %v10064_v39 = vld [vmem:[%s10752_s30 + $0x1a0] ss:$0 sps:$4 sm:$0xff]   ;;  %v10065_v40 = vld [vmem:[%s10752_s30 + $0x198] ss:$0 sps:$4 sm:$0xff]   ;;  %v10067_v42 = vld [vmem:[%s10752_s30 + $0x1b0] ss:$0 sps:$4 sm:$0xff]  }
  0x24   : > { %v10066_v41 = vld [vmem:[%s10752_s30 + $0x1b8] ss:$0 sps:$4 sm:$0xff]   ;;  %v10068_v43 = vld [vmem:[%s10752_s30 + $0x1c8] ss:$0 sps:$4 sm:$0xff]   ;;  %v10069_v44 = vld [vmem:[%s10752_s30 + $0x1c0] ss:$0 sps:$4 sm:$0xff]  }
  0x25   : > { %v10070_v45 = vld [vmem:[%s10752_s30 + $0x1d8] ss:$0 sps:$4 sm:$0xff]   ;;  %v10071_v46 = vld [vmem:[%s10752_s30 + $0x1d0] ss:$0 sps:$4 sm:$0xff]   ;;  %v10072_v47 = vld [vmem:[%s10752_s30 + $0x1e8] ss:$0 sps:$4 sm:$0xff]  }
  0x26   : > { %635 = vrot.lane.b32.xlu1 %v10034_v9, %s10680_s9  ;;  %633 = vrot.lane.b32.xlu0 %v10035_v10, %s10680_s9  ;;  %v10073_v48 = vld [vmem:[%s10752_s30 + $0x1e0] ss:$0 sps:$4 sm:$0xff]   ;;  %v10075_v50 = vld [vmem:[%s10752_s30 + $0x1f8] ss:$0 sps:$4 sm:$0xff]  }
  0x27   : > { %v10074_v49 = vld [vmem:[%s10752_s30 + $0x200] ss:$0 sps:$4 sm:$0xff]   ;;  %v10076_v51 = vld [vmem:[%s10752_s30 + $0x210] ss:$0 sps:$4 sm:$0xff]   ;;  %v10077_v52 = vld [vmem:[%s10752_s30 + $0x208] ss:$0 sps:$4 sm:$0xff]  }
  0x28   : > { %v10078_v53 = vld [vmem:[%s10752_s30 + $0x220] ss:$0 sps:$4 sm:$0xff]   ;;  %v10079_v54 = vld [vmem:[%s10752_s30 + $0x218] ss:$0 sps:$4 sm:$0xff]   ;;  %v10080_v55 = vld [vmem:[%s10752_s30 + $0x230] ss:$0 sps:$4 sm:$0xff]  }
  0x29   : > { %v10081_v56 = vld [vmem:[%s10752_s30 + $0x228] ss:$0 sps:$4 sm:$0xff]   ;;  %v10083_v58 = vld [vmem:[%s10752_s30 + $0x240] ss:$0 sps:$4 sm:$0xff]   ;;  %v10084_v59 = vld [vmem:[%s10752_s30 + $0x258] ss:$0 sps:$4 sm:$0xff]  }
  0x2a   : > { %639 = vrot.lane.b32.xlu1 %v10036_v11, %s10680_s9  ;;  %637 = vrot.lane.b32.xlu0 %v10037_v12, %s10680_s9  ;;  %v10082_v57 = vld [vmem:[%s10752_s30 + $0x248] ss:$0 sps:$4 sm:$0xff]   ;;  %v10085_v60 = vld [vmem:[%s10752_s30 + $0x250] ss:$0 sps:$4 sm:$0xff]  }
  0x2b   : > { %v10086_v63 = vld [vmem:[%s10752_s30 + $0x268] ss:$0 sps:$4 sm:$0xff]   ;;  %v10087_v0 = vld [vmem:[%s10752_s30 + $0x260] ss:$0 sps:$4 sm:$0xff]   ;;  %v10088_v3 = vld [vmem:[%s10752_s30 + $0x278] ss:$0 sps:$4 sm:$0xff]  }
  0x2c   : > { %v10089_v4 = vld [vmem:[%s10752_s30 + $0x270] ss:$0 sps:$4 sm:$0xff]   ;;  %v10091_v8 = vld [vmem:[%s10752_s30 + $0x288] ss:$0 sps:$4 sm:$0xff]   ;;  %v10092_v11 = vld [vmem:[%s10752_s30 + $0x2a0] ss:$0 sps:$4 sm:$0xff]  }
  0x2d   : > { %v10090_v7 = vld [vmem:[%s10752_s30 + $0x290] ss:$0 sps:$4 sm:$0xff]   ;;  %v10093_v12 = vld [vmem:[%s10752_s30 + $0x298] ss:$0 sps:$4 sm:$0xff]  }
  0x2e   : > { %643 = vrot.lane.b32.xlu1 %v10038_v13, %s10680_s9  ;;  %641 = vrot.lane.b32.xlu0 %v10039_v14, %s10680_s9 }
  0x32   : > { %647 = vrot.lane.b32.xlu1 %v10040_v15, %s10680_s9  ;;  %645 = vrot.lane.b32.xlu0 %v10041_v16, %s10680_s9  ;;  %v10094_v15 = vld [vmem:[%s10752_s30 + $0x2b0] ss:$0 sps:$4 sm:$0xff]   ;;  %v10095_v16 = vld [vmem:[%s10752_s30 + $0x2a8] ss:$0 sps:$4 sm:$0xff]  }
  0x36   : > { %675 = vrot.lane.b32.xlu1 %v10042_v17, %s10681_s10  ;;  %673 = vrot.lane.b32.xlu0 %v10043_v18, %s10681_s10 }
  0x3a   : > { %679 = vrot.lane.b32.xlu1 %v10044_v19, %s10681_s10  ;;  %677 = vrot.lane.b32.xlu0 %v10045_v20, %s10681_s10  ;;  %v10096_v19 = vld [vmem:[%s10752_s30 + $0x2c0] ss:$0 sps:$4 sm:$0xff]   ;;  %v10097_v20 = vld [vmem:[%s10752_s30 + $0x2b8] ss:$0 sps:$4 sm:$0xff]  }
  0x3e   : > { %683 = vrot.lane.b32.xlu1 %v10046_v21, %s10681_s10  ;;  %681 = vrot.lane.b32.xlu0 %v10047_v22, %s10681_s10 }
  0x42   : > { %687 = vrot.lane.b32.xlu1 %v10048_v23, %s10681_s10  ;;  %685 = vrot.lane.b32.xlu0 %v10049_v24, %s10681_s10  ;;  %v10098_v23 = vld [vmem:[%s10752_s30 + $0x2d8] ss:$0 sps:$4 sm:$0xff]   ;;  %v10099_v24 = vld [vmem:[%s10752_s30 + $0x2d0] ss:$0 sps:$4 sm:$0xff]  }
  0x46   : > { %715 = vrot.lane.b32.xlu1 %v10050_v25, %s10682_s11  ;;  %713 = vrot.lane.b32.xlu0 %v10051_v26, %s10682_s11 }
  0x4a   : > { %719 = vrot.lane.b32.xlu1 %v10052_v27, %s10682_s11  ;;  %717 = vrot.lane.b32.xlu0 %v10053_v28, %s10682_s11  ;;  %v10100_v27 = vld [vmem:[%s10752_s30 + $0x2e8] ss:$0 sps:$4 sm:$0xff]   ;;  %v10101_v28 = vld [vmem:[%s10752_s30 + $0x2e0] ss:$0 sps:$4 sm:$0xff]  }
  0x4e   : > { %723 = vrot.lane.b32.xlu1 %v10054_v29, %s10682_s11  ;;  %721 = vrot.lane.b32.xlu0 %v10055_v30, %s10682_s11 }
  0x52   : > { %727 = vrot.lane.b32.xlu1 %v10056_v31, %s10682_s11  ;;  %725 = vrot.lane.b32.xlu0 %v10057_v32, %s10682_s11  ;;  %v10102_v31 = vld [vmem:[%s10752_s30 + $0x2f8] ss:$0 sps:$4 sm:$0xff]   ;;  %v10103_v32 = vld [vmem:[%s10752_s30 + $0x2f0] ss:$0 sps:$4 sm:$0xff]  }
  0x56   : > { %755 = vrot.lane.b32.xlu1 %v10058_v33, %s10683_s12  ;;  %753 = vrot.lane.b32.xlu0 %v10059_v34, %s10683_s12 }
  0x5a   : > { %759 = vrot.lane.b32.xlu1 %v10060_v35, %s10683_s12  ;;  %757 = vrot.lane.b32.xlu0 %v10061_v36, %s10683_s12  ;;  %v10104_v35 = vld [vmem:[%s10752_s30 + $0x308] ss:$0 sps:$4 sm:$0xff]   ;;  %v10105_v36 = vld [vmem:[%s10752_s30 + $0x300] ss:$0 sps:$4 sm:$0xff]  }
  0x5e   : > { %763 = vrot.lane.b32.xlu1 %v10062_v37, %s10683_s12  ;;  %761 = vrot.lane.b32.xlu0 %v10063_v38, %s10683_s12  ;;  %v10106_v38 = vld [vmem:[%s10752_s30 + $0x320] ss:$0 sps:$4 sm:$0xff]  }
  0x62   : > { %767 = vrot.lane.b32.xlu1 %v10064_v39, %s10683_s12  ;;  %765 = vrot.lane.b32.xlu0 %v10065_v40, %s10683_s12  ;;  %v10107_v40 = vld [vmem:[%s10752_s30 + $0x318] ss:$0 sps:$4 sm:$0xff]  }
  0x66   : > { %795 = vrot.lane.b32.xlu1 %v10066_v41, %s10684_s13  ;;  %793 = vrot.lane.b32.xlu0 %v10067_v42, %s10684_s13 }
  0x6a   : > { %799 = vrot.lane.b32.xlu1 %v10068_v43, %s10684_s13  ;;  %797 = vrot.lane.b32.xlu0 %v10069_v44, %s10684_s13  ;;  %v10108_v43 = vld [vmem:[%s10752_s30 + $0x330] ss:$0 sps:$4 sm:$0xff]   ;;  %v10109_v44 = vld [vmem:[%s10752_s30 + $0x328] ss:$0 sps:$4 sm:$0xff]  }
  0x6e   : > { %803 = vrot.lane.b32.xlu1 %v10070_v45, %s10684_s13  ;;  %801 = vrot.lane.b32.xlu0 %v10071_v46, %s10684_s13 }
  0x72   : > { %807 = vrot.lane.b32.xlu1 %v10072_v47, %s10684_s13  ;;  %805 = vrot.lane.b32.xlu0 %v10073_v48, %s10684_s13  ;;  %v10110_v47 = vld [vmem:[%s10752_s30 + $0x340] ss:$0 sps:$4 sm:$0xff]   ;;  %v10111_v48 = vld [vmem:[%s10752_s30 + $0x338] ss:$0 sps:$4 sm:$0xff]  }
  0x76   : > { %835 = vrot.lane.b32.xlu1 %v10074_v49, %s10685_s14  ;;  %833 = vrot.lane.b32.xlu0 %v10075_v50, %s10685_s14 }
  0x7a   : > { %839 = vrot.lane.b32.xlu1 %v10076_v51, %s10685_s14  ;;  %837 = vrot.lane.b32.xlu0 %v10077_v52, %s10685_s14  ;;  %v10112_v51 = vld [vmem:[%s10752_s30 + $0x350] ss:$0 sps:$4 sm:$0xff]   ;;  %v10113_v52 = vld [vmem:[%s10752_s30 + $0x348] ss:$0 sps:$4 sm:$0xff]  }
  0x7e   : > { %843 = vrot.lane.b32.xlu1 %v10078_v53, %s10685_s14  ;;  %841 = vrot.lane.b32.xlu0 %v10079_v54, %s10685_s14  ;;  %v10114_v54 = vld [vmem:[%s10752_s30 + $0x368] ss:$0 sps:$4 sm:$0xff]  }
  0x82   : > { %847 = vrot.lane.b32.xlu1 %v10080_v55, %s10685_s14  ;;  %845 = vrot.lane.b32.xlu0 %v10081_v56, %s10685_s14  ;;  %v10115_v56 = vld [vmem:[%s10752_s30 + $0x360] ss:$0 sps:$4 sm:$0xff]  }
  0x86   : > { %875 = vrot.lane.b32.xlu1 %v10082_v57, %s10686_s15  ;;  %873 = vrot.lane.b32.xlu0 %v10083_v58, %s10686_s15 }
  0x88   : > { %v10872_v61 = vpop.permute.xlu1 %597  ;;  %v10874_v62 = vpop.permute.xlu0 %593 }
  0x8a   : > { %879 = vrot.lane.b32.xlu1 %v10084_v59, %s10686_s15  ;;  %877 = vrot.lane.b32.xlu0 %v10085_v60, %s10686_s15  ;;  %v10116_v59 = vld [vmem:[%s10752_s30 + $0x378] ss:$0 sps:$4 sm:$0xff]   ;;  %v10117_v60 = vld [vmem:[%s10752_s30 + $0x370] ss:$0 sps:$4 sm:$0xff]  }
  0x8c   : > { %v10880_v1 = vpop.permute.xlu1 %599  ;;  %v10882_v2 = vpop.permute.xlu0 %595 }
  0x8e   : > { %883 = vrot.lane.b32.xlu1 %v10086_v63, %s10686_s15  ;;  %881 = vrot.lane.b32.xlu0 %v10087_v0, %s10686_s15 }
  0x90   : > { %v10888_v5 = vpop.permute.xlu1 %603  ;;  %v10890_v6 = vpop.permute.xlu0 %601 }
  0x92   : > { %887 = vrot.lane.b32.xlu1 %v10088_v3, %s10686_s15  ;;  %885 = vrot.lane.b32.xlu0 %v10089_v4, %s10686_s15  ;;  %v10118_v3 = vld [vmem:[%s10752_s30 + $0x388] ss:$0 sps:$4 sm:$0xff]   ;;  %v10119_v4 = vld [vmem:[%s10752_s30 + $0x380] ss:$0 sps:$4 sm:$0xff]  }
  0x94   : > { %v10896_v9 = vpop.permute.xlu1 %607  ;;  %v10898_v10 = vpop.permute.xlu0 %605 }
  0x96   : > { %915 = vrot.lane.b32.xlu1 %v10090_v7, %s10687_s16  ;;  %913 = vrot.lane.b32.xlu0 %v10091_v8, %s10687_s16 }
  0x98   : > { %v10904_v13 = vpop.permute.xlu1 %635  ;;  %v10906_v14 = vpop.permute.xlu0 %633 }
  0x9a   : > { %919 = vrot.lane.b32.xlu1 %v10092_v11, %s10687_s16  ;;  %917 = vrot.lane.b32.xlu0 %v10093_v12, %s10687_s16  ;;  %v10120_v11 = vld [vmem:[%s10752_s30 + $0x398] ss:$0 sps:$4 sm:$0xff]   ;;  %v10121_v12 = vld [vmem:[%s10752_s30 + $0x390] ss:$0 sps:$4 sm:$0xff]  }
  0x9c   : > { %v10912_v17 = vpop.permute.xlu1 %639  ;;  %v10914_v18 = vpop.permute.xlu0 %637 }
  0x9e   : > { %923 = vrot.lane.b32.xlu1 %v10094_v15, %s10687_s16  ;;  %921 = vrot.lane.b32.xlu0 %v10095_v16, %s10687_s16  ;;  %v10184_v15 = vld [vmem:[%s14670_s1] sm:$0xff]  }
  0x9f   : > { %9863 = vmatprep.subr.bf16.mxu0 %v10184_v15 }
  0xa0   : > { %v10920_v21 = vpop.permute.xlu1 %643  ;;  %v10922_v22 = vpop.permute.xlu0 %641  ;;  %9864 = vmatpush3.bf16.msra.mxu0 %v10184_v15  ;;  %v10132_v15 = vld [vmem:[%s10752_s30 + $0x408] ss:$0 sps:$4 sm:$0xff]  }
  0xa2   : > { %927 = vrot.lane.b32.xlu1 %v10096_v19, %s10687_s16  ;;  %925 = vrot.lane.b32.xlu0 %v10097_v20, %s10687_s16  ;;  %v10122_v20 = vld [vmem:[%s10752_s30 + $0x3b0] ss:$0 sps:$4 sm:$0xff]  }
  0xa4   : > { %v10928_v25 = vpop.permute.xlu1 %647  ;;  %v10930_v26 = vpop.permute.xlu0 %645 }
  0xa6   : > { %955 = vrot.lane.b32.xlu1 %v10098_v23, %s10688_s17  ;;  %953 = vrot.lane.b32.xlu0 %v10099_v24, %s10688_s17  ;;  %v10123_v23 = vld [vmem:[%s10752_s30 + $0x3a8] ss:$0 sps:$4 sm:$0xff]  }
  0xa7   : > { %v10187_v24 = vld [vmem:[%s14670_s1 + $0x8] sm:$0xff]  }
  0xa8   : > { %v10936_v29 = vpop.permute.xlu1 %675  ;;  %v10938_v30 = vpop.permute.xlu0 %673  ;;  %9865 = vmatprep.subr.bf16.mxu0 %v10187_v24 }
  0xa9   : > { %9866 = vmatpush3.bf16.msra.mxu0 %v10187_v24 }
  0xaa   : > { %959 = vrot.lane.b32.xlu1 %v10100_v27, %s10688_s17  ;;  %957 = vrot.lane.b32.xlu0 %v10101_v28, %s10688_s17 }
  0xac   : > { %v10944_v33 = vpop.permute.xlu1 %679  ;;  %v10946_v34 = vpop.permute.xlu0 %677 }
  0xae   : > { %963 = vrot.lane.b32.xlu1 %v10102_v31, %s10688_s17  ;;  %961 = vrot.lane.b32.xlu0 %v10103_v32, %s10688_s17  ;;  %v10124_v31 = vld [vmem:[%s10752_s30 + $0x3c0] ss:$0 sps:$4 sm:$0xff]   ;;  %v10125_v32 = vld [vmem:[%s10752_s30 + $0x3b8] ss:$0 sps:$4 sm:$0xff]  }
  0xb0   : > { %v10952_v37 = vpop.permute.xlu1 %683  ;;  %v10955_v39 = vpop.permute.xlu0 %681 }
  0xb2   : > { %967 = vrot.lane.b32.xlu1 %v10104_v35, %s10688_s17  ;;  %965 = vrot.lane.b32.xlu0 %v10105_v36, %s10688_s17  ;;  %v10190_v35 = vld [vmem:[%s14670_s1 + $0x10] sm:$0xff]  }
  0xb3   : > { %9867 = vmatprep.subr.bf16.mxu0 %v10190_v35 }
  0xb4   : > { %v10960_v41 = vpop.permute.xlu1 %687  ;;  %v10962_v42 = vpop.permute.xlu0 %685  ;;  %9868 = vmatpush3.bf16.msra.mxu0 %v10190_v35  ;;  %v10135_v35 = vld [vmem:[%s10752_s30 + $0x410] ss:$0 sps:$4 sm:$0xff]  }
  0xb6   : > { %995 = vrot.lane.b32.xlu1 %v10106_v38, %s10689_s18  ;;  %993 = vrot.lane.b32.xlu0 %v10107_v40, %s10689_s18  ;;  %v10126_v40 = vld [vmem:[%s10752_s30 + $0x3d0] ss:$0 sps:$4 sm:$0xff]  }
  0xb8   : > { %v10968_v45 = vpop.permute.xlu1 %715  ;;  %v10970_v46 = vpop.permute.xlu0 %713 }
  0xba   : > { %999 = vrot.lane.b32.xlu1 %v10108_v43, %s10689_s18  ;;  %997 = vrot.lane.b32.xlu0 %v10109_v44, %s10689_s18  ;;  %v10127_v43 = vld [vmem:[%s10752_s30 + $0x3c8] ss:$0 sps:$4 sm:$0xff]   ;;  %v10193_v44 = vld [vmem:[%s14670_s1 + $0x18] sm:$0xff]  }
  0xbb   : > { %9869 = vmatprep.subr.bf16.mxu0 %v10193_v44 }
  0xbc   : > { %v10976_v49 = vpop.permute.xlu1 %719  ;;  %v10978_v50 = vpop.permute.xlu0 %717  ;;  %9870 = vmatpush3.bf16.msra.mxu0 %v10193_v44 }
  0xbe   : > { %1003 = vrot.lane.b32.xlu1 %v10110_v47, %s10689_s18  ;;  %1001 = vrot.lane.b32.xlu0 %v10111_v48, %s10689_s18 }
  0xc0   : > { %v10984_v53 = vpop.permute.xlu1 %723  ;;  %v10987_v55 = vpop.permute.xlu0 %721 }
  0xc2   : > { %1007 = vrot.lane.b32.xlu1 %v10112_v51, %s10689_s18  ;;  %1005 = vrot.lane.b32.xlu0 %v10113_v52, %s10689_s18  ;;  %v10128_v51 = vld [vmem:[%s10752_s30 + $0x3e0] ss:$0 sps:$4 sm:$0xff]   ;;  %v10129_v52 = vld [vmem:[%s10752_s30 + $0x3d8] ss:$0 sps:$4 sm:$0xff]  }
  0xc4   : > { %v10992_v57 = vpop.permute.xlu1 %727  ;;  %v10994_v58 = vpop.permute.xlu0 %725 }
  0xc6   : > { %1035 = vrot.lane.b32.xlu1 %v10114_v54, %s10690_s19  ;;  %1033 = vrot.lane.b32.xlu0 %v10115_v56, %s10690_s19  ;;  %v10196_v54 = vld [vmem:[%s14670_s1 + $0x20] sm:$0xff]  }
  0xc7   : > { %9871 = vmatprep.subr.bf16.mxu0 %v10196_v54 }
  0xc8   : > { %v11000_v63 = vpop.permute.xlu1 %755  ;;  %v11002_v0 = vpop.permute.xlu0 %753  ;;  %9872 = vmatpush3.bf16.msra.mxu0 %v10196_v54 }
  0xca   : > { %1039 = vrot.lane.b32.xlu1 %v10116_v59, %s10690_s19  ;;  %1037 = vrot.lane.b32.xlu0 %v10117_v60, %s10690_s19  ;;  %v10130_v60 = vld [vmem:[%s10752_s30 + $0x3f8] ss:$0 sps:$4 sm:$0xff]  }
  0xcc   : > { %v11008_v7 = vpop.permute.xlu1 %759  ;;  %v11010_v8 = vpop.permute.xlu0 %757 }
  0xce   : > { %1043 = vrot.lane.b32.xlu1 %v10118_v3, %s10690_s19  ;;  %1041 = vrot.lane.b32.xlu0 %v10119_v4, %s10690_s19  ;;  %v10131_v3 = vld [vmem:[%s10752_s30 + $0x3f0] ss:$0 sps:$4 sm:$0xff]   ;;  %v10199_v4 = vld [vmem:[%s14670_s1 + $0x28] sm:$0xff]  }
  0xcf   : > { %9873 = vmatprep.subr.bf16.mxu0 %v10199_v4 }
  0xd0   : > { %v11019_v16 = vpop.permute.xlu1 %763  ;;  %v11021_v19 = vpop.permute.xlu0 %761  ;;  %9874 = vmatpush3.bf16.msra.mxu0 %v10199_v4  ;;  %v10139_v4 = vld [vmem:[%s10752_s30 + $0x438] ss:$0 sps:$4 sm:$0xff]  }
  0xd1   : > { %14696 = vst [vmem:[#allocation4_spill] sm:$0xff] %v11021_v19 }
  0xd2   : > { %1047 = vrot.lane.b32.xlu1 %v10120_v11, %s10690_s19  ;;  %1045 = vrot.lane.b32.xlu0 %v10121_v12, %s10690_s19 }
  0xd4   : > { %v11030_v27 = vpop.permute.xlu1 %767  ;;  %v11032_v28 = vpop.permute.xlu0 %765 }
  0xd5   : > { %14697 = vst [vmem:[#allocation5_spill] sm:$0xff] %v11030_v27  ;;  %14698 = vst [vmem:[#allocation6_spill] sm:$0xff] %v11032_v28 }
  0xd6   : > { %1075 = vrot.lane.b32.xlu1 %v10122_v20, %s10691_s24  ;;  %1073 = vrot.lane.b32.xlu0 %v10123_v23, %s10691_s24  ;;  %v10133_v20 = vld [vmem:[%s10752_s30 + $0x400] ss:$0 sps:$4 sm:$0xff]   ;;  %v10202_v23 = vld [vmem:[%s14670_s1 + $0x30] sm:$0xff]  }
  0xd7   : > { %9875 = vmatprep.subr.bf16.mxu0 %v10202_v23 }
  0xd8   : > { %v11041_v36 = vpop.permute.xlu1 %795  ;;  %v11043_v38 = vpop.permute.xlu0 %793  ;;  %9876 = vmatpush3.bf16.msra.mxu0 %v10202_v23  ;;  %v10140_v23 = vld [vmem:[%s10752_s30 + $0x450] ss:$0 sps:$4 sm:$0xff]  }
  0xd9   : > { %14699 = vst [vmem:[#allocation7_spill] sm:$0xff] %v11041_v36  ;;  %14700 = vst [vmem:[#allocation8_spill] sm:$0xff] %v11043_v38  ;;  %v10161_v36 = vld [vmem:[%s10752_s30 + $0x30] sm:$0x1f]  }
  0xda   : > { %1079 = vrot.lane.b32.xlu1 %v10124_v31, %s10691_s24  ;;  %1077 = vrot.lane.b32.xlu0 %v10125_v32, %s10691_s24  ;;  %v10134_v32 = vld [vmem:[%s10752_s30 + $0x418] ss:$0 sps:$4 sm:$0xff]  }
  0xdc   : > { %v11052_v47 = vpop.permute.xlu1 %799  ;;  %v11054_v48 = vpop.permute.xlu0 %797 }
  0xdd   : > { %14701 = vst [vmem:[#allocation9_spill] sm:$0xff] %v11052_v47  ;;  %14702 = vst [vmem:[#allocation10_spill] sm:$0xff] %v11054_v48 }
  0xde   : > { %1083 = vrot.lane.b32.xlu1 %v10126_v40, %s10691_s24  ;;  %1081 = vrot.lane.b32.xlu0 %v10127_v43, %s10691_s24  ;;  %v10205_v40 = vld [vmem:[%s14670_s1 + $0x38] sm:$0xff]  }
  0xdf   : > { %9877 = vmatprep.subr.bf16.mxu0 %v10205_v40 }
  0xe0   : > { %v11063_v56 = vpop.permute.xlu1 %803  ;;  %v11065_v59 = vpop.permute.xlu0 %801  ;;  %9878 = vmatpush3.bf16.msra.mxu0 %v10205_v40 }
  0xe1   : > { %14703 = vst [vmem:[#allocation11_spill] sm:$0xff] %v11063_v56  ;;  %14704 = vst [vmem:[#allocation12_spill] sm:$0xff] %v11065_v59 }
  0xe2   : > { %1087 = vrot.lane.b32.xlu1 %v10128_v51, %s10691_s24  ;;  %1085 = vrot.lane.b32.xlu0 %v10129_v52, %s10691_s24  ;;  %v10136_v51 = vld [vmem:[%s10752_s30 + $0x428] ss:$0 sps:$4 sm:$0xff]   ;;  %v10137_v52 = vld [vmem:[%s10752_s30 + $0x420] ss:$0 sps:$4 sm:$0xff]  }
  0xe4   : > { %v11074_v11 = vpop.permute.xlu1 %807  ;;  %v11076_v12 = vpop.permute.xlu0 %805 }
  0xe5   : > { %14705 = vst [vmem:[#allocation13_spill] sm:$0xff] %v11074_v11  ;;  %14706 = vst [vmem:[#allocation14_spill] sm:$0xff] %v11076_v12  ;;  %v10158_v11 = vld [vmem:[%s10752_s30 + $0x28] sm:$0x1f]  }
  0xe6   : > { %1115 = vrot.lane.b32.xlu1 %v10130_v60, %s10692_s25  ;;  %1113 = vrot.lane.b32.xlu0 %v10131_v3, %s10692_s25  ;;  %v10138_v60 = vld [vmem:[%s10752_s30 + $0x440] ss:$0 sps:$4 sm:$0xff]   ;;  %v1943_v47 = vshll.u32 %v10158_v11, 16 }
  0xe8   : > { %v11085_v24 = vpop.permute.xlu1 %835  ;;  %v11087_v31 = vpop.permute.xlu0 %833 }
  0xe9   : > { %14707 = vst [vmem:[#allocation15_spill] sm:$0xff] %v11085_v24  ;;  %14708 = vst [vmem:[#allocation16_spill] sm:$0xff] %v11087_v31  ;;  %v10156_v24 = vld [vmem:[%s10752_s30 + $0x18] sm:$0x1f]  }
  0xea   : > { %1119 = vrot.lane.b32.xlu1 %v10132_v15, %s10692_s25  ;;  %1117 = vrot.lane.b32.xlu0 %v10133_v20, %s10692_s25 }
  0xec   : > { %v11096_v43 = vpop.permute.xlu1 %839  ;;  %v11098_v44 = vpop.permute.xlu0 %837 }
  0xed   : > { %14709 = vst [vmem:[#allocation17_spill] sm:$0xff] %v11096_v43  ;;  %14710 = vst [vmem:[#allocation18_spill] sm:$0xff] %v11098_v44 }
  0xee   : > { %1123 = vrot.lane.b32.xlu1 %v10134_v32, %s10692_s25  ;;  %1121 = vrot.lane.b32.xlu0 %v10135_v35, %s10692_s25  ;;  %v10141_v32 = vld [vmem:[%s10752_s30 + $0x448] ss:$0 sps:$4 sm:$0xff]  }
  0xf0   : > { %v11104_v54 = vpop.permute.xlu1 %843  ;;  %v11107_v3 = vpop.permute.xlu0 %841 }
  0xf1   : > { %14711 = vst [vmem:[#allocation19_spill] sm:$0xff] %v11104_v54  ;;  %14712 = vst [vmem:[#allocation20_spill] sm:$0xff] %v11107_v3  ;;  %v10155_v54 = vld [vmem:[%s10752_s30] sm:$0x1f]  }
  0xf2   : > { %1127 = vrot.lane.b32.xlu1 %v10136_v51, %s10692_s25  ;;  %1125 = vrot.lane.b32.xlu0 %v10137_v52, %s10692_s25  ;;  %v10142_v51 = vld [vmem:[%s10752_s30 + $0x460] ss:$0 sps:$4 sm:$0xff]   ;;  %v10143_v52 = vld [vmem:[%s10752_s30 + $0x458] ss:$0 sps:$4 sm:$0xff]   ;;  %v1908_v43 = vshll.u32 %v10155_v54, 16  ;;  %v1906_v12 = vshrl.u32 %v10155_v54, 16 }
  0xf4   : > { %v11112_v15 = vpop.permute.xlu1 %847  ;;  %v11114_v20 = vpop.permute.xlu0 %845 }
  0xf5   : > { %14713 = vst [vmem:[#allocation21_spill] sm:$0xff] %v11112_v15  ;;  %14714 = vst [vmem:[#allocation22_spill] sm:$0xff] %v11114_v20  ;;  %v10154_v15 = vld [vmem:[%s10752_s30 + $0x8] sm:$0x1f]  }
  0xf6   : > { %1155 = vrot.lane.b32.xlu1 %v10138_v60, %s10693_s21  ;;  %1153 = vrot.lane.b32.xlu0 %v10139_v4, %s10693_s21  ;;  %v10144_v4 = vld [vmem:[%s10752_s30 + $0x470] ss:$0 sps:$4 sm:$0xff]  }
  0xf8   : > { %v11120_v35 = vpop.permute.xlu1 %875  ;;  %v11122_v40 = vpop.permute.xlu0 %873 }
  0xf9   : > { %14715 = vst [vmem:[#allocation23_spill] sm:$0xff] %v11120_v35  ;;  %14716 = vst [vmem:[#allocation24_spill] sm:$0xff] %v11122_v40  ;;  %v10145_v40 = vld [vmem:[%s10752_s30 + $0x468] ss:$0 sps:$4 sm:$0xff]   ;;  %v1915_v35 = vshll.u32 %v10154_v15, 16 }
  0xfa   : > { %1159 = vrot.lane.b32.xlu1 %v10140_v23, %s10693_s21  ;;  %1157 = vrot.lane.b32.xlu0 %v10141_v32, %s10693_s21  ;;  %v10146_v32 = vld [vmem:[%s10752_s30 + $0xe0] ss:$0 sps:$4 sm:$0xff]  }
  0xfb   : > { %v1917_v44 = vrot.slane %v1915_v35, 1  ;;  %v10152_v35 = vld [vmem:[%s10752_s30 + $0x110] ss:$0 sps:$4 sm:$0xff]  }
  0xfc   : > { %v11128_v20 = vpop.permute.xlu1 %879  ;;  %v11130_v60 = vpop.permute.xlu0 %877 }
  0xfd   : > { %14717 = vst [vmem:[#allocation25_spill] sm:$0xff] %v11128_v20  ;;  %14718 = vst [vmem:[#allocation26_spill] sm:$0xff] %v11130_v60  ;;  %v10147_v60 = vld [vmem:[%s10752_s30 + $0xd8] ss:$0 sps:$4 sm:$0xff]  }
  0xfe   : > { %1163 = vrot.lane.b32.xlu1 %v10142_v51, %s10693_s21  ;;  %1161 = vrot.lane.b32.xlu0 %v10143_v52, %s10693_s21  ;;  %v10148_v52 = vld [vmem:[%s10752_s30 + $0xf0] ss:$0 sps:$4 sm:$0xff]  }
 0x100   : > { %v11137_v3 = vpop.permute.xlu1 %883  ;;  %v11139_v23 = vpop.permute.xlu0 %881 }
 0x101   : > { %14719 = vst [vmem:[#allocation27_spill] sm:$0xff] %v11137_v3  ;;  %14720 = vst [vmem:[#allocation28_spill] sm:$0xff] %v11139_v23  ;;  %v10149_v3 = vld [vmem:[%s10752_s30 + $0xe8] ss:$0 sps:$4 sm:$0xff]   ;;  %v1913_v23 = vshrl.u32 %v10154_v15, 16 }
 0x102   : > { %1167 = vrot.lane.b32.xlu1 %v10144_v4, %s10693_s21  ;;  %1165 = vrot.lane.b32.xlu0 %v10145_v40, %s10693_s21  ;;  %v10150_v40 = vld [vmem:[%s10752_s30 + $0x100] ss:$0 sps:$4 sm:$0xff]  }
 0x103   : > { %v1918_v54 = vor.u32 %v1917_v44, %v1913_v23  ;;  %v10162_v44 = vld [vmem:[%s10752_s30 + $0x50] sm:$0x1f]   ;;  %v10163_v23 = vld [vmem:[%s10752_s30 + $0x48] sm:$0x1f]  }
 0x104   : > { %v11146_v51 = vpop.permute.xlu1 %887  ;;  %v11149_v20 = vpop.permute.xlu0 %885 }
 0x105   : > { %14721 = vst [vmem:[#allocation29_spill] sm:$0xff] %v11146_v51  ;;  %14722 = vst [vmem:[#allocation30_spill] sm:$0xff] %v11149_v20  ;;  %v10151_v51 = vld [vmem:[%s10752_s30 + $0xf8] ss:$0 sps:$4 sm:$0xff]   ;;  %v10157_v20 = vld [vmem:[%s10752_s30 + $0x10] sm:$0x1f]  }
 0x106   : > { %1851 = vrot.lane.b32.xlu1 %v10146_v32, %s10679_s8  ;;  %1849 = vrot.lane.b32.xlu0 %v10147_v60, %s10679_s8  ;;  %v10153_v60 = vld [vmem:[%s10752_s30 + $0x108] ss:$0 sps:$4 sm:$0xff]   ;;  %v1922_v59 = vshll.u32 %v10157_v20, 16 }
 0x108   : > { %v11154_v4 = vpop.permute.xlu1 %915  ;;  %v11157_v31 = vpop.permute.xlu0 %913 }
 0x109   : > { %14723 = vst [vmem:[#allocation31_spill] sm:$0xff] %v11154_v4  ;;  %14724 = vst [vmem:[#allocation32_spill] sm:$0xff] %v11157_v31  ;;  %v1929_v4 = vshll.u32 %v10156_v24, 16  ;;  %v1910_v31 = vrot.slane %v1908_v43, 1  ;;  %v1924_v43 = vrot.slane %v1922_v59, 1 }
 0x10a   : > { %1855 = vrot.lane.b32.xlu1 %v10148_v52, %s10679_s8  ;;  %1853 = vrot.lane.b32.xlu0 %v10149_v3, %s10679_s8  ;;  %v10159_v52 = vld [vmem:[%s10752_s30 + $0x20] sm:$0x1f]  }
 0x10b   : > { %v1931_v48 = vrot.slane %v1929_v4, 1  ;;  %v1936_v38 = vshll.u32 %v10159_v52, 16  ;;  %v1945_v4 = vrot.slane %v1943_v47, 1 }
 0x10c   : > { %v11164_v15 = vpop.permute.xlu1 %919  ;;  %v11167_v32 = vpop.permute.xlu0 %917 }
 0x10d   : > { %14725 = vst [vmem:[#allocation33_spill] sm:$0xff] %v11164_v15  ;;  %14726 = vst [vmem:[#allocation34_spill] sm:$0xff] %v11167_v32  ;;  %v1927_v15 = vshrl.u32 %v10156_v24, 16  ;;  %v10160_v32 = vld [vmem:[%s10752_s30 + $0x38] sm:$0x1f]   ;;  %v1938_v59 = vrot.slane %v1936_v38, 1 }
 0x10e   : > { %1859 = vrot.lane.b32.xlu1 %v10150_v40, %s10679_s8  ;;  %1857 = vrot.lane.b32.xlu0 %v10151_v51, %s10679_s8  ;;  %v1911_v40 = vor.u32 %v1910_v31, %v1906_v12  ;;  %v1920_v51 = vshrl.u32 %v10157_v20, 16  ;;  %v1957_v28 = vshll.u32 %v10160_v32, 16  ;;  %v1934_v31 = vshrl.u32 %v10159_v52, 16 }
 0x10f   : > { %v1950_v20 = vshll.u32 %v10161_v36, 16  ;;  %v1955_v47 = vshrl.u32 %v10160_v32, 16  ;;  %v1948_v52 = vshrl.u32 %v10161_v36, 16  ;;  %v2018_v36 = vshrl.u32 %v10163_v23, 16 }
 0x110   : > { %v11174_v56 = vpop.permute.xlu1 %923  ;;  %v11176_v3 = vpop.permute.xlu0 %921  ;;  %v1925_v12 = vor.u32 %v1924_v43, %v1920_v51  ;;  %v2020_v51 = vshll.u32 %v10163_v23, 16  ;;  %v10165_v43 = vld [vmem:[%s10752_s30 + $0x58] sm:$0x1f]  }
 0x111   : > { %14727 = vst [vmem:[#allocation35_spill] sm:$0xff] %v11174_v56  ;;  %14728 = vst [vmem:[#allocation36_spill] sm:$0xff] %v11176_v3  ;;  %v1941_v3 = vshrl.u32 %v10158_v11, 16  ;;  %v1952_v38 = vrot.slane %v1950_v20, 1 }
 0x112   : > { %1863 = vrot.lane.b32.xlu1 %v10152_v35, %s10679_s8  ;;  %1861 = vrot.lane.b32.xlu0 %v10153_v60, %s10679_s8  ;;  %v1932_v35 = vor.u32 %v1931_v48, %v1927_v15  ;;  %v1959_v48 = vrot.slane %v1957_v28, 1  ;;  %v2027_v15 = vshll.u32 %v10162_v44, 16  ;;  %v2025_v28 = vshrl.u32 %v10162_v44, 16  ;;  %v10168_v44 = vld [vmem:[%s10752_s30 + $0x80] sm:$0x1f]  }
 0x114   : > { %v11182_v56 = vpop.permute.xlu1 %927  ;;  %v11184_v24 = vpop.permute.xlu0 %925  ;;  %v1960_v32 = vor.u32 %v1959_v48, %v1955_v47  ;;  %v2032_v48 = vshrl.u32 %v10165_v43, 16 }
 0x115   : > { %14729 = vst [vmem:[#allocation37_spill] sm:$0xff] %v11182_v56  ;;  %14730 = vst [vmem:[#allocation38_spill] sm:$0xff] %v11184_v24  ;;  %v10164_v56 = vld [vmem:[%s10752_s30 + $0x60] sm:$0x1f]  }
 0x116   : > { %1963 = vrot.lane.b32.xlu1 %v1918_v54, %s10680_s9  ;;  %1961 = vrot.lane.b32.xlu0 %v1911_v40, %s10680_s9  ;;  %v1946_v54 = vor.u32 %v1945_v4, %v1941_v3  ;;  %v1939_v40 = vor.u32 %v1938_v59, %v1934_v31  ;;  %v2029_v3 = vrot.slane %v2027_v15, 1  ;;  %v1953_v4 = vor.u32 %v1952_v38, %v1948_v52  ;;  %v10167_v31 = vld [vmem:[%s10752_s30 + $0x68] sm:$0x1f]  }
 0x117   : > { %v2039_v20 = vshrl.u32 %v10164_v56, 16  ;;  %v2048_v15 = vshll.u32 %v10167_v31, 16 }
 0x118   : > { %v11190_v60 = vpop.permute.xlu1 %955  ;;  %v11193_v11 = vpop.permute.xlu0 %953  ;;  %v2030_v47 = vor.u32 %v2029_v3, %v2025_v28  ;;  %v2046_v28 = vshrl.u32 %v10167_v31, 16 }
 0x119   : > { %14731 = vst [vmem:[#allocation39_spill] sm:$0xff] %v11190_v60  ;;  %14732 = vst [vmem:[#allocation40_spill] sm:$0xff] %v11193_v11  ;;  %v2041_v60 = vshll.u32 %v10164_v56, 16  ;;  %v10166_v11 = vld [vmem:[%s10752_s30 + $0x70] sm:$0x1f]   ;;  %v2050_v3 = vrot.slane %v2048_v15, 1 }
 0x11a   : > { %1967 = vrot.lane.b32.xlu1 %v1932_v35, %s10680_s9  ;;  %1965 = vrot.lane.b32.xlu0 %v1925_v12, %s10680_s9  ;;  %v2022_v35 = vrot.slane %v2020_v51, 1  ;;  %v2034_v12 = vshll.u32 %v10165_v43, 16  ;;  %v2055_v19 = vshll.u32 %v10166_v11, 16  ;;  %v2053_v56 = vshrl.u32 %v10166_v11, 16 }
 0x11c   : > { %v11198_v24 = vpop.permute.xlu1 %959  ;;  %v11200_v27 = vpop.permute.xlu0 %957  ;;  %v2036_v23 = vrot.slane %v2034_v12, 1  ;;  %v2057_v51 = vrot.slane %v2055_v19, 1  ;;  %v2051_v19 = vor.u32 %v2050_v3, %v2046_v28  ;;  %v11251_v3 = vld [vmem:[%s10752_s30 + $0x120] sm:$0x1f]  }
 0x11d   : > { %14733 = vst [vmem:[#allocation41_spill] sm:$0xff] %v11198_v24  ;;  %14734 = vst [vmem:[#allocation42_spill] sm:$0xff] %v11200_v27  ;;  %v2043_v27 = vrot.slane %v2041_v60, 1 }
 0x11e   : > { %1971 = vrot.lane.b32.xlu1 %v1946_v54, %s10680_s9  ;;  %1969 = vrot.lane.b32.xlu0 %v1939_v40, %s10680_s9  ;;  %v2023_v54 = vor.u32 %v2022_v35, %v2018_v36  ;;  %v10169_v40 = vld [vmem:[%s10752_s30 + $0x78] sm:$0x1f]   ;;  %v2058_v11 = vor.u32 %v2057_v51, %v2053_v56  ;;  %v2067_v35 = vshrl.u32 %v10168_v44, 16 }
 0x11f   : > { %v2044_v60 = vor.u32 %v2043_v27, %v2039_v20  ;;  %v2060_v12 = vshrl.u32 %v10169_v40, 16 }
 0x120   : > { %v11206_v59 = vpop.permute.xlu1 %963  ;;  %v11208_v24 = vpop.permute.xlu0 %961 }
 0x121   : > { %14735 = vst [vmem:[#allocation43_spill] sm:$0xff] %v11206_v59  ;;  %14736 = vst [vmem:[#allocation44_spill] sm:$0xff] %v11208_v24  ;;  %v2069_v24 = vshll.u32 %v10168_v44, 16  ;;  %v10180_v59 = vld [vmem:[%s10752_s30 + $0x210] ss:$0 sps:$4 sm:$0xff]  }
 0x122   : > { %1975 = vrot.lane.b32.xlu1 %v1960_v32, %s10680_s9  ;;  %1973 = vrot.lane.b32.xlu0 %v1953_v4, %s10680_s9  ;;  %v2037_v32 = vor.u32 %v2036_v23, %v2032_v48  ;;  %v2062_v4 = vshll.u32 %v10169_v40, 16  ;;  %v11236_v23 = vld [vmem:[%s10752_s30 + $0x128] sm:$0x1f]   ;;  %v10171_v40 = vld [vmem:[%s10752_s30 + $0x1b0] ss:$0 sps:$4 sm:$0xff]  }
 0x123   : > { %v2071_v27 = vrot.slane %v2069_v24, 1  ;;  %v10170_v24 = vld [vmem:[%s10752_s30 + $0x1b8] ss:$0 sps:$4 sm:$0xff]   ;;  %v2219_v28 = vshll.u32 %v11236_v23, 16 }
 0x124   : > { %v11214_v52 = vpop.permute.xlu1 %967  ;;  %v11216_v38 = vpop.permute.xlu0 %965  ;;  %v2064_v31 = vrot.slane %v2062_v4, 1 }
 0x125   : > { %14737 = vst [vmem:[#allocation45_spill] sm:$0xff] %v11214_v52  ;;  %14738 = vst [vmem:[#allocation46_spill] sm:$0xff] %v11216_v38 }
 0x126   : > { %2075 = vrot.lane.b32.xlu1 %v2030_v47, %s10681_s10  ;;  %2073 = vrot.lane.b32.xlu0 %v2023_v54, %s10681_s10  ;;  %v2072_v54 = vor.u32 %v2071_v27, %v2067_v35  ;;  %v2065_v44 = vor.u32 %v2064_v31, %v2060_v12  ;;  %v10175_v27 = vld [vmem:[%s10752_s30 + $0x1d0] ss:$0 sps:$4 sm:$0xff]   ;;  %v11262_v12 = vrot.slane %v2219_v28, 1  ;;  %v11275_v28 = vld [vmem:[%s10752_s30 + $0x138] sm:$0x1f]  }
 0x127   : > { %v2233_v52 = vshll.u32 %v11275_v28, 16 }
 0x128   : > { %v11220_v43 = vpop.permute.xlu1 %995  ;;  %v11222_v36 = vpop.permute.xlu0 %993 }
 0x129   : > { %14739 = vst [vmem:[#allocation47_spill] sm:$0xff] %v11220_v43  ;;  %14740 = vst [vmem:[#allocation48_spill] sm:$0xff] %v11222_v36 }
 0x12a   : > { %2079 = vrot.lane.b32.xlu1 %v2044_v60, %s10681_s10  ;;  %2077 = vrot.lane.b32.xlu0 %v2037_v32, %s10681_s10  ;;  %v10172_v60 = vld [vmem:[%s10752_s30 + $0x1c8] ss:$0 sps:$4 sm:$0xff]   ;;  %v10173_v32 = vld [vmem:[%s10752_s30 + $0x1c0] ss:$0 sps:$4 sm:$0xff]  }
 0x12c   : > { %v11226_v20 = vpop.permute.xlu1 %999  ;;  %v11228_v47 = vpop.permute.xlu0 %997 }
 0x12d   : > { %14741 = vst [vmem:[#allocation49_spill] sm:$0xff] %v11226_v20  ;;  %14742 = vst [vmem:[#allocation50_spill] sm:$0xff] %v11228_v47  ;;  %v432_v47 = vld [vmem:[%s10752_s30 + $0x30] sm:$0xf] }
 0x12e   : > { %2083 = vrot.lane.b32.xlu1 %v2058_v11, %s10681_s10  ;;  %2081 = vrot.lane.b32.xlu0 %v2051_v19, %s10681_s10  ;;  %v10174_v11 = vld [vmem:[%s10752_s30 + $0x1d8] ss:$0 sps:$4 sm:$0xff]   ;;  %v11278_v19 = vld [vmem:[%s10752_s30 + $0x130] sm:$0x1f]  }
 0x12f   : > { %14751 = vst [vmem:[#allocation59_spill] sm:$0xff] %v11278_v19 }
 0x130   : > { %v11232_v48 = vpop.permute.xlu1 %1003  ;;  %v11238_v15 = vpop.permute.xlu0 %1001 }
 0x131   : > { %14743 = vst [vmem:[#allocation51_spill] sm:$0xff] %v11232_v48  ;;  %14744 = vst [vmem:[#allocation52_spill] sm:$0xff] %v11238_v15  ;;  %v426_v15 = vld [vmem:[%s10752_s30] sm:$0xf] }
 0x132   : > { %2087 = vrot.lane.b32.xlu1 %v2072_v54, %s10681_s10  ;;  %2085 = vrot.lane.b32.xlu0 %v2065_v44, %s10681_s10  ;;  %v2212_v54 = vshll.u32 %v11251_v3, 16 }
 0x134   : > { %v11243_v56 = vpop.permute.xlu1 %1007  ;;  %v11246_v51 = vpop.permute.xlu0 %1005  ;;  %v11288_v38 = vrot.slane %v2212_v54, 1  ;;  %v427_v54 = vld [vmem:[%s10752_s30 + $0x8] sm:$0xf] }
 0x135   : > { %14745 = vst [vmem:[#allocation53_spill] sm:$0xff] %v11243_v56  ;;  %14746 = vst [vmem:[#allocation54_spill] sm:$0xff] %v11246_v51  ;;  %v10177_v51 = vld [vmem:[%s10752_s30 + $0x1e0] ss:$0 sps:$4 sm:$0xff]   ;;  %v10179_v56 = vld [vmem:[%s10752_s30 + $0x1f8] ss:$0 sps:$4 sm:$0xff]  }
 0x136   : > { %2115 = vrot.lane.b32.xlu1 %v10170_v24, %s10682_s11  ;;  %2113 = vrot.lane.b32.xlu0 %v10171_v40, %s10682_s11  ;;  %v10176_v24 = vld [vmem:[%s10752_s30 + $0x1e8] ss:$0 sps:$4 sm:$0xff]  }
 0x138   : > { %v11255_v4 = vpop.permute.xlu1 %1035  ;;  %v11258_v35 = vpop.permute.xlu0 %1033 }
 0x139   : > { %14747 = vst [vmem:[#allocation55_spill] sm:$0xff] %v11255_v4  ;;  %14748 = vst [vmem:[#allocation56_spill] sm:$0xff] %v11258_v35  ;;  %v11309_v35 = vrot.slane %v2233_v52, 1  ;;  %v11313_v4 = vld [vmem:[%s10752_s30 + $0x148] sm:$0x1f]  }
 0x13a   : > { %2119 = vrot.lane.b32.xlu1 %v10172_v60, %s10682_s11  ;;  %2117 = vrot.lane.b32.xlu0 %v10173_v32, %s10682_s11  ;;  %v10178_v32 = vld [vmem:[%s10752_s30 + $0x200] ss:$0 sps:$4 sm:$0xff]  }
 0x13b   : > { %14756 = vst [vmem:[#allocation64_spill] sm:$0xff] %v11309_v35  ;;  %v10182_v52 = vld [vmem:[%s10752_s30 + $0x220] ss:$0 sps:$4 sm:$0xff]  }
 0x13c   : > { %v11268_v44 = vpop.permute.xlu1 %1039  ;;  %v11271_v40 = vpop.permute.xlu0 %1037 }
 0x13d   : > { %14749 = vst [vmem:[#allocation57_spill] sm:$0xff] %v11268_v44  ;;  %14750 = vst [vmem:[#allocation58_spill] sm:$0xff] %v11271_v40  ;;  %v430_v40 = vld [vmem:[%s10752_s30 + $0x20] sm:$0xf]  ;;  %v433_v44 = vld [vmem:[%s10752_s30 + $0x38] sm:$0xf] }
 0x13e   : > { %2123 = vrot.lane.b32.xlu1 %v10174_v11, %s10682_s11  ;;  %2121 = vrot.lane.b32.xlu0 %v10175_v27, %s10682_s11  ;;  %v2226_v27 = vshll.u32 %v11278_v19, 16  ;;  %v431_v11 = vld [vmem:[%s10752_s30 + $0x28] sm:$0xf]  ;;  %v1175_v19 = vsel %vm1169_vm0, %v427_v54, %v10882_v2  ;;  %v1193_v2 = vsel %vm1169_vm0, %v433_v44, %v10896_v9 }
 0x140   : > { %v11282_v60 = vpop.permute.xlu1 %1043  ;;  %v11285_v31 = vpop.permute.xlu0 %1041  ;;  %v11334_v35 = vrot.slane %v2226_v27, 1 }
 0x141   : > { %14752 = vst [vmem:[#allocation60_spill] sm:$0xff] %v11282_v60  ;;  %14753 = vst [vmem:[#allocation61_spill] sm:$0xff] %v11285_v31  ;;  %v428_v60 = vld [vmem:[%s10752_s30 + $0x10] sm:$0xf]  ;;  %v429_v31 = vld [vmem:[%s10752_s30 + $0x18] sm:$0xf] }
 0x142   : > { %2127 = vrot.lane.b32.xlu1 %v10176_v24, %s10682_s11  ;;  %2125 = vrot.lane.b32.xlu0 %v10177_v51, %s10682_s11  ;;  %v10181_v24 = vld [vmem:[%s10752_s30 + $0x208] ss:$0 sps:$4 sm:$0xff]   ;;  %v1178_v36 = vsel %vm1169_vm0, %v428_v60, %v10872_v61  ;;  %v1181_v51 = vsel %vm1169_vm0, %v429_v31, %v10880_v1  ;;  %v2247_v61 = vshll.u32 %v11313_v4, 16  ;;  %v11338_v60 = vld [vmem:[%s10752_s30 + $0x158] sm:$0x1f]   ;;  %v1184_v1 = vsel %vm1169_vm0, %v430_v40, %v10890_v6 }
 0x143   : > { %v1198_v31 = vsel %vm1194_vm1, %v1175_v19, %v10904_v13  ;;  %v1200_v6 = vsel %vm1194_vm1, %v1178_v36, %v10914_v18  ;;  %v1210_v13 = vsel %vm1194_vm1, %v1193_v2, %v10928_v25  ;;  %v11435_v2 = vld [vmem:[%s10752_s30 + $0x180] sm:$0x1f]  }
 0x144   : > { %v11299_v48 = vpop.permute.xlu1 %1047  ;;  %v11306_v20 = vpop.permute.xlu0 %1045  ;;  %v1215_v18 = vsel %vm1211_vm2, %v1198_v31, %v10936_v29  ;;  %v1217_v19 = vsel %vm1211_vm2, %v1200_v6, %v10946_v34  ;;  %v1227_v44 = vsel %vm1211_vm2, %v1210_v13, %v10960_v41  ;;  %v11397_v34 = vld [vmem:[%s10752_s30 + $0x170] sm:$0x1f]  }
 0x145   : > { %14754 = vst [vmem:[#allocation62_spill] sm:$0xff] %v11299_v48  ;;  %14755 = vst [vmem:[#allocation63_spill] sm:$0xff] %v11306_v20  ;;  %v11318_v48 = vld [vmem:[%s10752_s30 + $0x140] sm:$0x1f]   ;;  %v1172_v20 = vsel %vm1169_vm0, %v426_v15, %v10874_v62  ;;  %v1187_v62 = vsel %vm1169_vm0, %v431_v11, %v10888_v5  ;;  %v1190_v15 = vsel %vm1169_vm0, %v432_v47, %v10898_v10  ;;  %v11379_v47 = vld [vmem:[%s10752_s30 + $0x150] sm:$0x1f]  }
 0x146   : > { %2155 = vrot.lane.b32.xlu1 %v10178_v32, %s10683_s12  ;;  %2153 = vrot.lane.b32.xlu0 %v10179_v56, %s10683_s12  ;;  %v10183_v56 = vld [vmem:[%s10752_s30 + $0x218] ss:$0 sps:$4 sm:$0xff]   ;;  %v1196_v27 = vsel %vm1194_vm1, %v1172_v20, %v10906_v14  ;;  %v1202_v5 = vsel %vm1194_vm1, %v1181_v51, %v10912_v17  ;;  %v1206_v9 = vsel %vm1194_vm1, %v1187_v62, %v10920_v21  ;;  %v10186_v20 = vld [vmem:[%s10752_s30 + $0x228] ss:$0 sps:$4 sm:$0xff]   ;;  %v2240_v25 = vshll.u32 %v11318_v48, 16 }
 0x147   : > { %v1204_v10 = vsel %vm1194_vm1, %v1184_v1, %v10922_v22  ;;  %v1208_v14 = vsel %vm1194_vm1, %v1190_v15, %v10930_v26  ;;  %v1213_v36 = vsel %vm1211_vm2, %v1196_v27, %v10938_v30  ;;  %v2245_v22 = vshrl.u32 %v11313_v4, 16  ;;  %v11432_v1 = vld [vmem:[%s10752_s30 + $0x168] sm:$0x1f]   ;;  %v11448_v15 = vld [vmem:[%s10752_s30 + $0x178] sm:$0x1f]  }
 0x148   : > { %v11324_v43 = vpop.permute.xlu1 %1075  ;;  %v11331_v32 = vpop.permute.xlu0 %1073  ;;  %v1219_v26 = vsel %vm1211_vm2, %v1202_v5, %v10944_v33  ;;  %v1223_v29 = vsel %vm1211_vm2, %v1206_v9, %v10952_v37  ;;  %v1221_v30 = vsel %vm1211_vm2, %v1204_v10, %v10955_v39  ;;  %v1225_v40 = vsel %vm1211_vm2, %v1208_v14, %v10962_v42  ;;  %v14759_v27 = vld [vmem:[#allocation4_spill] sm:$0xff]  ;;  %v14760_v5 = vld [vmem:[#allocation5_spill] sm:$0xff]  ;;  %v14761_v6 = vld [vmem:[#allocation6_spill] sm:$0xff] }
 0x149   : > { %v2249_v33 = vrot.slane %v2247_v61, 1  ;;  %v2261_v11 = vshll.u32 %v11338_v60, 16  ;;  %v1232_v37 = vsel %vm1228_vm3, %v1215_v18, %v10968_v45  ;;  %v1230_v39 = vsel %vm1228_vm3, %v1213_v36, %v10970_v46  ;;  %v14762_v10 = vld [vmem:[#allocation7_spill] sm:$0xff]  ;;  %v14763_v14 = vld [vmem:[#allocation8_spill] sm:$0xff] }
 0x14a   : > { %2159 = vrot.lane.b32.xlu1 %v10180_v59, %s10683_s12  ;;  %2157 = vrot.lane.b32.xlu0 %v10181_v24, %s10683_s12  ;;  %v10185_v59 = vld [vmem:[%s10752_s30 + $0x230] ss:$0 sps:$4 sm:$0xff]   ;;  %v1236_v54 = vsel %vm1228_vm3, %v1219_v26, %v10976_v49  ;;  %v1234_v41 = vsel %vm1228_vm3, %v1217_v19, %v10978_v50  ;;  %v2238_v51 = vshrl.u32 %v11318_v48, 16  ;;  %v2259_v45 = vshrl.u32 %v11338_v60, 16  ;;  %v14765_v18 = vld [vmem:[#allocation64_spill] sm:$0xff] }
 0x14b   : > { %v1240_v46 = vsel %vm1228_vm3, %v1223_v29, %v10984_v53  ;;  %v1238_v49 = vsel %vm1228_vm3, %v1221_v30, %v10987_v55  ;;  %v1244_v50 = vsel %vm1228_vm3, %v1227_v44, %v10992_v57  ;;  %v14757_v61 = vshrl.u32 %v11236_v23, 16  ;;  %v11477_v19 = vld [vmem:[%s10752_s30 + $0x188] sm:$0x1f]  }
 0x14c   : > { %v11366_v17 = vpop.permute.xlu1 %1079  ;;  %v11373_v21 = vpop.permute.xlu0 %1077  ;;  %v1242_v60 = vsel %vm1228_vm3, %v1225_v40, %v10994_v58  ;;  %v14758_v53 = vshrl.u32 %v11251_v3, 16  ;;  %v2263_v55 = vrot.slane %v2261_v11, 1  ;;  %v2331_v57 = vshll.u32 %v11397_v34, 16  ;;  %v14768_v29 = vld [vmem:[#allocation9_spill] sm:$0xff]  ;;  %v11485_v11 = vld [vmem:[%s10752_s30 + $0x1a0] sm:$0x1f]  }
 0x14d   : > { %v2222_v48 = vor.u32 %v11262_v12, %v14757_v61  ;;  %v1249_v23 = vsel %vm1245_vm4, %v1232_v37, %v11000_v63  ;;  %v1247_v58 = vsel %vm1245_vm4, %v1230_v39, %v11002_v0  ;;  %v1253_v12 = vsel %vm1245_vm4, %v1236_v54, %v11008_v7  ;;  %v14769_v37 = vld [vmem:[#allocation10_spill] sm:$0xff] }
 0x14e   : > { %2163 = vrot.lane.b32.xlu1 %v10182_v52, %s10683_s12  ;;  %2161 = vrot.lane.b32.xlu0 %v10183_v56, %s10683_s12  ;;  %v2242_v52 = vrot.slane %v2240_v25, 1  ;;  %v2254_v56 = vshll.u32 %v11379_v47, 16  ;;  %v2215_v62 = vor.u32 %v11288_v38, %v14758_v53  ;;  %v1251_v38 = vsel %vm1245_vm4, %v1234_v41, %v11010_v8  ;;  %v11461_v8 = vld [vmem:[%s10752_s30 + $0x190] sm:$0x1f]   ;;  %v14771_v53 = vld [vmem:[#allocation12_spill] sm:$0xff] }
 0x14f   : > { %v1257_v31 = vsel %vm1245_vm4, %v1240_v46, %v11019_v16  ;;  %v1255_v63 = vsel %vm1245_vm4, %v1238_v49, %v14759_v27  ;;  %v1261_v0 = vsel %vm1245_vm4, %v1244_v50, %v14760_v5  ;;  %v1259_v7 = vsel %vm1245_vm4, %v1242_v60, %v14761_v6  ;;  %v11496_v49 = vld [vmem:[%s10752_s30 + $0x198] sm:$0x1f]  }
 0x150   : > { %v11407_v42 = vpop.permute.xlu1 %1083  ;;  %v11409_v24 = vpop.permute.xlu0 %1081  ;;  %v1266_v13 = vsel %vm1262_vm5, %v1249_v23, %v14762_v10  ;;  %v11467_v16 = vsel %vm1262_vm5, %v1247_v58, %v14763_v14  ;;  %v1270_v30 = vsel %vm1262_vm5, %v1253_v12, %v14768_v29  ;;  %v2252_v44 = vshrl.u32 %v11379_v47, 16  ;;  %v14770_v47 = vld [vmem:[#allocation11_spill] sm:$0xff]  ;;  %v14773_v5 = vld [vmem:[#allocation14_spill] sm:$0xff]  ;;  %v14775_v29 = vld [vmem:[#allocation16_spill] sm:$0xff] }
 0x151   : > { %v2256_v40 = vrot.slane %v2254_v56, 1  ;;  %v1268_v39 = vsel %vm1262_vm5, %v1251_v38, %v14769_v37  ;;  %v2250_v54 = vor.u32 %v2249_v33, %v2245_v22  ;;  %v2345_v41 = vshll.u32 %v11435_v2, 16 }
 0x152   : > { %2167 = vrot.lane.b32.xlu1 %v10185_v59, %s10683_s12  ;;  %2165 = vrot.lane.b32.xlu0 %v10186_v20, %s10683_s12  ;;  %v14764_v59 = vshrl.u32 %v11275_v28, 16  ;;  %v14766_v20 = vld [vmem:[#allocation59_spill] sm:$0xff]  ;;  %v2324_v28 = vshll.u32 %v11432_v1, 16  ;;  %v2338_v46 = vshll.u32 %v11448_v15, 16  ;;  %v1274_v56 = vsel %vm1262_vm5, %v1257_v31, %v14770_v47 }
 0x153   : > { %v14767_v25 = vshrl.u32 %v14766_v20, 16  ;;  %v2243_v61 = vor.u32 %v2242_v52, %v2238_v51  ;;  %v2359_v60 = vshll.u32 %v11461_v8, 16  ;;  %v1272_v4 = vsel %vm1262_vm5, %v1255_v63, %v14771_v53  ;;  %v14782_v53 = vld [vmem:[#allocation31_spill] sm:$0xff] }
 0x154   : > { %v11445_v3 = vpop.permute.xlu1 %1087  ;;  %v11458_v9 = vpop.permute.xlu0 %1085  ;;  %v2236_v36 = vor.u32 %v14765_v18, %v14764_v59  ;;  %v2264_v22 = vor.u32 %v2263_v55, %v2259_v45  ;;  %v2333_v33 = vrot.slane %v2331_v57, 1  ;;  %v2322_v23 = vshrl.u32 %v11432_v1, 16  ;;  %v14772_v57 = vld [vmem:[#allocation13_spill] sm:$0xff]  ;;  %v14774_v59 = vld [vmem:[#allocation15_spill] sm:$0xff] }
 0x155   : > { %v2229_v26 = vor.u32 %v11334_v35, %v14767_v25  ;;  %v2326_v51 = vrot.slane %v2324_v28, 1  ;;  %v2373_v52 = vshll.u32 %v11485_v11, 16  ;;  %v2347_v12 = vrot.slane %v2345_v41, 1  ;;  %v14778_v41 = vld [vmem:[#allocation19_spill] sm:$0xff] }
 0x156   : > { %2267 = vrot.lane.b32.xlu1 %v2222_v48, %s10684_s13  ;;  %2265 = vrot.lane.b32.xlu0 %v2215_v62, %s10684_s13  ;;  %v2329_v48 = vshrl.u32 %v11397_v34, 16  ;;  %v2352_v62 = vshll.u32 %v11477_v19, 16  ;;  %v2343_v34 = vshrl.u32 %v11435_v2, 16  ;;  %v2336_v38 = vshrl.u32 %v11448_v15, 16 }
 0x157   : > { %v2340_v45 = vrot.slane %v2338_v46, 1  ;;  %v2366_v55 = vshll.u32 %v11496_v49, 16  ;;  %v1278_v31 = vsel %vm1262_vm5, %v1261_v0, %v14772_v57  ;;  %v2257_v1 = vor.u32 %v2256_v40, %v2252_v44  ;;  %v14776_v44 = vld [vmem:[#allocation17_spill] sm:$0xff]  ;;  %v14788_v57 = vld [vmem:[#allocation40_spill] sm:$0xff] }
 0x158   : > { %v11489_v35 = vpop.permute.xlu1 %1115  ;;  %v11500_v50 = vpop.permute.xlu0 %1113  ;;  %v2357_v2 = vshrl.u32 %v11461_v8, 16  ;;  %v2361_v63 = vrot.slane %v2359_v60, 1  ;;  %v1276_v6 = vsel %vm1262_vm5, %v1259_v7, %v14773_v5  ;;  %v2334_v10 = vor.u32 %v2333_v33, %v2329_v48  ;;  %v14781_v48 = vld [vmem:[#allocation24_spill] sm:$0xff]  ;;  %v14790_v5 = vld [vmem:[#allocation26_spill] sm:$0xff] }
 0x159   : > { %v2350_v15 = vshrl.u32 %v11477_v19, 16  ;;  %v2354_v14 = vrot.slane %v2352_v62, 1  ;;  %v1283_v18 = vsel %vm14694_vm6, %v1266_v13, %v14774_v59  ;;  %v2327_v0 = vor.u32 %v2326_v51, %v2322_v23  ;;  %v14784_v23 = vld [vmem:[#allocation32_spill] sm:$0xff]  ;;  %v14785_v51 = vld [vmem:[#allocation39_spill] sm:$0xff] }
 0x15a   : > { %2271 = vrot.lane.b32.xlu1 %v2236_v36, %s10684_s13  ;;  %2269 = vrot.lane.b32.xlu0 %v2229_v26, %s10684_s13  ;;  %v2371_v36 = vshrl.u32 %v11485_v11, 16  ;;  %v2375_v20 = vrot.slane %v2373_v52, 1  ;;  %v2348_v25 = vor.u32 %v2347_v12, %v2343_v34  ;;  %v2364_v7 = vshrl.u32 %v11496_v49, 16  ;;  %v14777_v11 = vld [vmem:[#allocation18_spill] sm:$0xff]  ;;  %v14779_v49 = vld [vmem:[#allocation23_spill] sm:$0xff] }
 0x15b   : > { %v2368_v26 = vrot.slane %v2366_v55, 1  ;;  %v1281_v19 = vsel %vm14694_vm6, %v11467_v16, %v14775_v29  ;;  %v1287_v13 = vsel %vm14694_vm6, %v1270_v30, %v14776_v44  ;;  %v2341_v28 = vor.u32 %v2340_v45, %v2336_v38  ;;  %v14786_v12 = vld [vmem:[#allocation22_spill] sm:$0xff]  ;;  %v14787_v45 = vld [vmem:[#allocation25_spill] sm:$0xff]  ;;  %v14796_v44 = vld [vmem:[#allocation56_spill] sm:$0xff] }
 0x15c   : > { %v11512_v58 = vpop.permute.xlu1 %1119  ;;  %v11518_v27 = vpop.permute.xlu0 %1117  ;;  %v11539_v37 = vor.u32 %v2361_v63, %v2357_v2  ;;  %v1291_v46 = vsel %vm14694_vm6, %v1274_v56, %v14778_v41  ;;  %v1300_v47 = vsel %vm14693_vm7, %v1283_v18, %v14779_v49  ;;  %v11548_v16 = vor.u32 %v2354_v14, %v2350_v15  ;;  %v14783_v56 = vld [vmem:[#allocation21_spill] sm:$0xff]  ;;  %v14791_v14 = vld [vmem:[#allocation27_spill] sm:$0xff]  ;;  %v14792_v18 = vld [vmem:[#allocation48_spill] sm:$0xff] }
 0x15d   : > { %v1298_v60 = vsel %vm14693_vm7, %v1281_v19, %v14781_v48  ;;  %v1317_v33 = vsel %vm14684_vm8, %v1300_v47, %v14782_v53  ;;  %v1295_v62 = vsel %vm14694_vm6, %v1278_v31, %v14783_v56  ;;  %v11567_v52 = vor.u32 %v2368_v26, %v2364_v7  ;;  %v14789_v31 = vld [vmem:[#allocation47_spill] sm:$0xff]  ;;  %v14794_v7 = vld [vmem:[#allocation28_spill] sm:$0xff]  ;;  %v14795_v29 = vld [vmem:[#allocation33_spill] sm:$0xff] }
 0x15e   : > { %2275 = vrot.lane.b32.xlu1 %v2250_v54, %s10684_s13  ;;  %2273 = vrot.lane.b32.xlu0 %v2243_v61, %s10684_s13  ;;  %v1285_v54 = vsel %vm14694_vm6, %v1268_v39, %v14777_v11  ;;  %v14780_v61 = vld [vmem:[#allocation20_spill] sm:$0xff]  ;;  %v11557_v39 = vor.u32 %v2375_v20, %v2371_v36  ;;  %v1334_v34 = vsel %vm14683_vm9, %v1317_v33, %v14785_v51  ;;  %v14793_v36 = vld [vmem:[#allocation55_spill] sm:$0xff]  ;;  %v14801_v56 = vld [vmem:[#allocation29_spill] sm:$0xff] }
 0x15f   : > { %v1289_v30 = vsel %vm14694_vm6, %v1272_v4, %v14780_v61  ;;  %v1293_v38 = vsel %vm14694_vm6, %v1276_v6, %v14786_v12  ;;  %v1304_v55 = vsel %vm14693_vm7, %v1287_v13, %v14787_v45  ;;  %v1351_v2 = vsel %vm14686_vm10, %v1334_v34, %v14789_v31  ;;  %v14804_v12 = vld [vmem:[#allocation35_spill] sm:$0xff] }
 0x160   : > { %v11529_v8 = vpop.permute.xlu1 %1123  ;;  %v11537_v40 = vpop.permute.xlu0 %1121  ;;  %v1302_v15 = vsel %vm14693_vm7, %v1285_v54, %v14790_v5  ;;  %v1308_v59 = vsel %vm14693_vm7, %v1291_v46, %v14791_v14  ;;  %v1368_v20 = vsel %vm14685_vm11, %v1351_v2, %v14793_v36  ;;  %v1306_v26 = vsel %vm14693_vm7, %v1289_v30, %v14794_v7  ;;  %v14797_v54 = vld [vmem:[#allocation34_spill] sm:$0xff]  ;;  %v14798_v46 = vld [vmem:[#allocation41_spill] sm:$0xff]  ;;  %v14807_v2 = vld [vmem:[#allocation43_spill] sm:$0xff] }
 0x161   : > { %v1321_v19 = vsel %vm14684_vm8, %v1304_v55, %v14795_v29  ;;  %v1385_v11 = vsel %vm14680_vm12, %v1368_v20, %v11324_v43  ;;  %v1319_v41 = vsel %vm14684_vm8, %v1302_v15, %v14797_v54  ;;  %v14799_v30 = vld [vmem:[#allocation42_spill] sm:$0xff]  ;;  %v1325_v45 = vsel %vm14684_vm8, %v1308_v59, %v14804_v12  ;;  %v14808_v59 = vld [vmem:[#allocation44_spill] sm:$0xff] }
 0x162   : > { %2279 = vrot.lane.b32.xlu1 %v2264_v22, %s10684_s13  ;;  %2277 = vrot.lane.b32.xlu0 %v2257_v1, %s10684_s13  ;;  %v1315_v22 = vsel %vm14684_vm8, %v1298_v60, %v14784_v23  ;;  %v1402_v47 = vsel %vm14679_vm13, %v1385_v11, %v11489_v35  ;;  %v1336_v48 = vsel %vm14683_vm9, %v1319_v41, %v14799_v30  ;;  %v14800_v60 = vld [vmem:[#allocation49_spill] sm:$0xff]  ;;  %v14810_v7 = vld [vmem:[#allocation30_spill] sm:$0xff]  ;;  %v14812_v29 = vld [vmem:[#allocation60_spill] sm:$0xff] }
 0x163   : > { %v1332_v1 = vsel %vm14683_vm9, %v1315_v22, %v14788_v57  ;;  %v1312_v23 = vsel %vm14693_vm7, %v1295_v62, %v14801_v56  ;;  %v14803_v35 = vld [vmem:[#allocation57_spill] sm:$0xff]  ;;  %v14820_v56 = vld [vmem:[#allocation62_spill] sm:$0xff] }
 0x164   : > { %v11565_v4 = vpop.permute.xlu1 %1127  ;;  %v11577_v63 = vpop.permute.xlu0 %1125  ;;  %v1349_v6 = vsel %vm14686_vm10, %v1332_v1, %v14792_v18  ;;  %v14806_v1 = vld [vmem:[#allocation36_spill] sm:$0xff]  ;;  %v14814_v11 = vld [vmem:[#allocation61_spill] sm:$0xff] }
 0x165   : > { %v1366_v13 = vsel %vm14685_vm11, %v1349_v6, %v14796_v44  ;;  %v1323_v31 = vsel %vm14684_vm8, %v1306_v26, %v14806_v1  ;;  %v14811_v26 = vld [vmem:[#allocation52_spill] sm:$0xff]  ;;  %v10214_v1 = vld [vmem:[%s10752_s30 + $0x2f8] ss:$0 sps:$4 sm:$0xff]  }
 0x166   : > { %2379 = vrot.lane.b32.xlu1 %v2334_v10, %s10685_s14  ;;  %2377 = vrot.lane.b32.xlu0 %v2327_v0, %s10685_s14  ;;  %v1338_v10 = vsel %vm14683_vm9, %v1321_v19, %v14798_v46  ;;  %v1383_v49 = vsel %vm14680_vm12, %v1366_v13, %v11331_v32  ;;  %v14802_v32 = vld [vmem:[#allocation50_spill] sm:$0xff]  ;;  %v1340_v18 = vsel %vm14683_vm9, %v1323_v31, %v14808_v59  ;;  %v14813_v13 = vld [vmem:[#allocation37_spill] sm:$0xff] }
 0x167   : > { %v1355_v43 = vsel %vm14686_vm10, %v1338_v10, %v14800_v60  ;;  %v1400_v0 = vsel %vm14679_vm13, %v1383_v49, %v11500_v50  ;;  %v1353_v22 = vsel %vm14686_vm10, %v1336_v48, %v14802_v32  ;;  %v14805_v50 = vld [vmem:[#allocation58_spill] sm:$0xff]  ;;  %v14816_v49 = vld [vmem:[#allocation45_spill] sm:$0xff] }
 0x168   : > { %v1156_v61 = vpop.permute.xlu1 %1155  ;;  %v1154_v53 = vpop.permute.xlu0 %1153  ;;  %v1372_v51 = vsel %vm14685_vm11, %v1355_v43, %v14803_v35  ;;  %v1370_v55 = vsel %vm14685_vm11, %v1353_v22, %v14805_v50  ;;  %v14815_v46 = vld [vmem:[#allocation38_spill] sm:$0xff]  ;;  %v14818_v60 = vld [vmem:[#allocation53_spill] sm:$0xff]  ;;  %v14821_v22 = vld [vmem:[#allocation63_spill] sm:$0xff] }
 0x169   : > { %v1419_v33 = vsel %vm14678_vm14, %v1402_v47, %v1156_v61  ;;  %v1417_v34 = vsel %vm14678_vm14, %v1400_v0, %v1154_v53  ;;  %v1389_v57 = vsel %vm14680_vm12, %v1372_v51, %v11366_v17  ;;  %v1387_v5 = vsel %vm14680_vm12, %v1370_v55, %v11373_v21  ;;  %v14809_v17 = vld [vmem:[#allocation51_spill] sm:$0xff]  ;;  %v14817_v48 = vld [vmem:[#allocation46_spill] sm:$0xff]  ;;  %v10215_v31 = vld [vmem:[%s10752_s30 + $0x2f0] ss:$0 sps:$4 sm:$0xff]  }
 0x16a   : > { %2383 = vrot.lane.b32.xlu1 %v2348_v25, %s10685_s14  ;;  %2381 = vrot.lane.b32.xlu0 %v2341_v28, %s10685_s14  ;;  %v8729_v62 = vcombine.low %v1417_v34, %v1419_v33  ;;  %v1342_v25 = vsel %vm14683_vm9, %v1325_v45, %v14807_v2  ;;  %v1406_v15 = vsel %vm14679_vm13, %v1389_v57, %v11512_v58  ;;  %v14819_v33 = vld [vmem:[#allocation54_spill] sm:$0xff]  ;;  %v10211_v34 = vld [vmem:[%s10752_s30 + $0x2d0] ss:$0 sps:$4 sm:$0xff]  }
 0x16b   : > { %v1359_v28 = vsel %vm14686_vm10, %v1342_v25, %v14809_v17  ;;  %v1404_v6 = vsel %vm14679_vm13, %v1387_v5, %v11518_v27  ;;  %v1310_v21 = vsel %vm14693_vm7, %v1293_v38, %v14810_v7  ;;  %v1357_v58 = vsel %vm14686_vm10, %v1340_v18, %v14811_v26  ;;  %v10210_v32 = vld [vmem:[%s10752_s30 + $0x2d8] ss:$0 sps:$4 sm:$0xff]   ;;  %v10216_v25 = vld [vmem:[%s10752_s30 + $0x308] ss:$0 sps:$4 sm:$0xff]   ;;  %v10218_v18 = vld [vmem:[%s10752_s30 + $0x320] ss:$0 sps:$4 sm:$0xff]  }
 0x16c   : > { %v1160_v14 = vpop.permute.xlu1 %1159  ;;  %v1158_v20 = vpop.permute.xlu0 %1157  ;;  %9879 = vmatprep.mubr.bf16.mxu0 %v8729_v62  ;;  %v1376_v19 = vsel %vm14685_vm11, %v1359_v28, %v14812_v29  ;;  %v1329_v27 = vsel %vm14684_vm8, %v1312_v23, %v14813_v13  ;;  %v1374_v54 = vsel %vm14685_vm11, %v1357_v58, %v14814_v11  ;;  %v1327_v10 = vsel %vm14684_vm8, %v1310_v21, %v14815_v46  ;;  %v10219_v17 = vld [vmem:[%s10752_s30 + $0x318] ss:$0 sps:$4 sm:$0xff]   ;;  %v10221_v7 = vld [vmem:[%s10752_s30 + $0x328] ss:$0 sps:$4 sm:$0xff]   ;;  %v10227_v21 = vld [vmem:[%s10752_s30 + $0x240] sm:$0x1f]  }
 0x16d   : > { %v1423_v36 = vsel %vm14678_vm14, %v1406_v15, %v1160_v14  ;;  %v1421_v44 = vsel %vm14678_vm14, %v1404_v6, %v1158_v20  ;;  %v1393_v38 = vsel %vm14680_vm12, %v1376_v19, %v11407_v42  ;;  %v1391_v47 = vsel %vm14680_vm12, %v1374_v54, %v11409_v24  ;;  %v10217_v15 = vld [vmem:[%s10752_s30 + $0x300] ss:$0 sps:$4 sm:$0xff]   ;;  %v10226_v20 = vld [vmem:[%s10752_s30 + $0x248] sm:$0x1f]   ;;  %v10223_v13 = vld [vmem:[%s10752_s30 + $0x338] ss:$0 sps:$4 sm:$0xff]  }
 0x16e   : > { %2387 = vrot.lane.b32.xlu1 %v11539_v37, %s10685_s14  ;;  %v8730_v41 = vcombine.low %v1421_v44, %v1423_v36  ;;  %2385 = vrot.lane.b32.xlu0 %v11548_v16, %s10685_s14  ;;  %v1346_v37 = vsel %vm14683_vm9, %v1329_v27, %v14816_v49  ;;  %v1410_v61 = vsel %vm14679_vm13, %v1393_v38, %v11529_v8  ;;  %v10220_v36 = vld [vmem:[%s10752_s30 + $0x330] ss:$0 sps:$4 sm:$0xff]   ;;  %v10222_v29 = vld [vmem:[%s10752_s30 + $0x340] ss:$0 sps:$4 sm:$0xff]   ;;  %v2523_v19 = vshll.u32 %v10226_v20, 16 }
 0x16f   : > { %v1344_v42 = vsel %vm14683_vm9, %v1327_v10, %v14817_v48  ;;  %v1363_v16 = vsel %vm14686_vm10, %v1346_v37, %v14818_v60  ;;  %v1408_v43 = vsel %vm14679_vm13, %v1391_v47, %v11537_v40  ;;  %v10228_v44 = vld [vmem:[%s10752_s30 + $0x258] sm:$0x1f]   ;;  %v2516_v27 = vshll.u32 %v10227_v21, 16  ;;  %v10229_v11 = vld [vmem:[%s10752_s30 + $0x250] sm:$0x1f]  }
 0x170   : > { %v1164_v30 = vpop.permute.xlu1 %1163  ;;  %v1162_v53 = vpop.permute.xlu0 %1161  ;;  %9880 = vmatmul.mubr.bf16.vlgmr.msra.gmra.mrb[0].mxu0 %v8730_v41  ;;  %v1361_v24 = vsel %vm14686_vm10, %v1344_v42, %v14819_v33  ;;  %v1380_v8 = vsel %vm14685_vm11, %v1363_v16, %v14820_v56  ;;  %v10224_v41 = vld [vmem:[%s10752_s30 + $0x350] ss:$0 sps:$4 sm:$0xff]   ;;  %v10225_v46 = vld [vmem:[%s10752_s30 + $0x348] ss:$0 sps:$4 sm:$0xff]   ;;  %v2521_v10 = vshrl.u32 %v10226_v20, 16  ;;  %v2525_v49 = vrot.slane %v2523_v19, 1 }
 0x171   : > { %v1427_v0 = vsel %vm14678_vm14, %v1410_v61, %v1164_v30  ;;  %v1425_v23 = vsel %vm14678_vm14, %v1408_v43, %v1162_v53  ;;  %v1378_v40 = vsel %vm14685_vm11, %v1361_v24, %v14821_v22  ;;  %v1397_v35 = vsel %vm14680_vm12, %v1380_v8, %v11445_v3  ;;  %v10230_v47 = vld [vmem:[%s10752_s30 + $0x268] sm:$0x1f]   ;;  %v10231_v42 = vld [vmem:[%s10752_s30 + $0x260] sm:$0x1f]   ;;  %v10232_v24 = vld [vmem:[%s10752_s30 + $0x278] sm:$0x1f]  }
 0x172   : > { %2391 = vrot.lane.b32.xlu1 %v11557_v39, %s10685_s14  ;;  %v8731_v51 = vcombine.low %v1425_v23, %v1427_v0  ;;  %2389 = vrot.lane.b32.xlu0 %v11567_v52, %s10685_s14  ;;  %v1395_v12 = vsel %vm14680_vm12, %v1378_v40, %v11458_v9  ;;  %v1414_v39 = vsel %vm14679_vm13, %v1397_v35, %v11565_v4  ;;  %v10212_v9 = vld [vmem:[%s10752_s30 + $0x2e8] ss:$0 sps:$4 sm:$0xff]   ;;  %v10213_v4 = vld [vmem:[%s10752_s30 + $0x2e0] ss:$0 sps:$4 sm:$0xff]   ;;  %v2537_v37 = vshll.u32 %v10228_v44, 16 }
 0x173   : > { %v1412_v50 = vsel %vm14679_vm13, %v1395_v12, %v11577_v63  ;;  %v2514_v61 = vshrl.u32 %v10227_v21, 16  ;;  %v2518_v30 = vrot.slane %v2516_v27, 1  ;;  %v2530_v48 = vshll.u32 %v10229_v11, 16  ;;  %v10233_v22 = vld [vmem:[%s10752_s30 + $0x270] sm:$0x1f]  }
 0x174   : > { %v1168_v45 = vpop.permute.xlu1 %1167  ;;  %v1166_v55 = vpop.permute.xlu0 %1165  ;;  %9883 = vmatprep.mubr.bf16.mxu0 %v8731_v51  ;;  %v2526_v43 = vor.u32 %v2525_v49, %v2521_v10  ;;  %v2535_v0 = vshrl.u32 %v10228_v44, 16  ;;  %v2539_v53 = vrot.slane %v2537_v37, 1  ;;  %v2551_v33 = vshll.u32 %v10230_v47, 16  ;;  %v10237_v21 = vld [vmem:[%s10752_s30 + $0x298] sm:$0x1f]  }
 0x175   : > { %v1431_v3 = vsel %vm14678_vm14, %v1414_v39, %v1168_v45  ;;  %v1429_v52 = vsel %vm14678_vm14, %v1412_v50, %v1166_v55  ;;  %v2519_v56 = vor.u32 %v2518_v30, %v2514_v61  ;;  %v2528_v8 = vshrl.u32 %v10229_v11, 16  ;;  %v10234_v45 = vld [vmem:[%s10752_s30 + $0x290] sm:$0x1f]  }
 0x176   : > { %2419 = vrot.lane.b32.xlu1 %v10210_v32, %s10686_s15  ;;  %v8732_v57 = vcombine.low %v1429_v52, %v1431_v3  ;;  %2417 = vrot.lane.b32.xlu0 %v10211_v34, %s10686_s15  ;;  %v2532_v23 = vrot.slane %v2530_v48, 1  ;;  %v2544_v32 = vshll.u32 %v10231_v42, 16  ;;  %v2540_v51 = vor.u32 %v2539_v53, %v2535_v0  ;;  %v10240_v53 = vld [vmem:[%s10752_s30 + $0x2c0] sm:$0x1f]  }
 0x177   : > { %v2549_v34 = vshrl.u32 %v10230_v47, 16  ;;  %v2553_v12 = vrot.slane %v2551_v33, 1  ;;  %v2565_v39 = vshll.u32 %v10232_v24, 16  ;;  %v2542_v3 = vshrl.u32 %v10231_v42, 16  ;;  %v10239_v47 = vld [vmem:[%s10752_s30 + $0x2a8] sm:$0x1f]  }
 0x178   : > { %v11701_v62 = vpop.permute.xlu1 %1851  ;;  %v11703_v63 = vpop.permute.xlu0 %1849  ;;  %9884 = vmatmul.mubr.bf16.gmra.mrb[4].mxu0 %v8732_v57  ;;  %v2533_v50 = vor.u32 %v2532_v23, %v2528_v8  ;;  %v2546_v55 = vrot.slane %v2544_v32, 1  ;;  %v2558_v52 = vshll.u32 %v10233_v22, 16  ;;  %v2642_v37 = vshll.u32 %v10237_v21, 16  ;;  %v10241_v23 = vld [vmem:[%s10752_s30 + $0x2b8] sm:$0x1f]  }
 0x179   : > { %v2656_v8 = vshll.u32 %v10239_v47, 16  ;;  %vm280_vm14 = vcmask 57344   ;;  %vm281_vm13 = vsmask.f32 256 }
 0x17a   : > { %2423 = vrot.lane.b32.xlu1 %v10212_v9, %s10686_s15  ;;  %2421 = vrot.lane.b32.xlu0 %v10213_v4, %s10686_s15  ;;  %v10235_v9 = vld [vmem:[%s10752_s30 + $0x288] sm:$0x1f]   ;;  %v2560_v20 = vrot.slane %v2558_v52, 1  ;;  %vm11953_vm12 = vmand %vm280_vm14, %vm281_vm13 }
 0x17b   : > { %v2626_v10 = vshrl.u32 %v10235_v9, 16 }
 0x17c   : > { %v11709_v2 = vpop.permute.xlu1 %1855  ;;  %v11712_v5 = vpop.permute.xlu0 %1853 }
 0x17e   : > { %2427 = vrot.lane.b32.xlu1 %v10214_v1, %s10686_s15  ;;  %2425 = vrot.lane.b32.xlu0 %v10215_v31, %s10686_s15  ;;  %v2554_v1 = vor.u32 %v2553_v12, %v2549_v34  ;;  %v2563_v31 = vshrl.u32 %v10232_v24, 16  ;;  %v2640_v24 = vshrl.u32 %v10237_v21, 16 }
 0x180   : > { %v11717_v14 = vpop.permute.xlu1 %1859  ;;  %v11719_v59 = vpop.permute.xlu0 %1857 }
 0x181   : > { %14822 = vst [vmem:[#allocation4_spill] sm:$0xff] %v11717_v14  ;;  %14823 = vst [vmem:[#allocation5_spill] sm:$0xff] %v11719_v59 }
 0x182   : > { %2431 = vrot.lane.b32.xlu1 %v10216_v25, %s10686_s15  ;;  %2429 = vrot.lane.b32.xlu0 %v10217_v15, %s10686_s15  ;;  %v2567_v25 = vrot.slane %v2565_v39, 1  ;;  %v2635_v15 = vshll.u32 %v10234_v45, 16  ;;  %v2677_v39 = vshll.u32 %v10240_v53, 16 }
 0x184   : > { %v11725_v28 = vpop.permute.xlu1 %1863  ;;  %v11727_v6 = vpop.permute.xlu0 %1861  ;;  %v2568_v44 = vor.u32 %v2567_v25, %v2563_v31  ;;  %v2637_v27 = vrot.slane %v2635_v15, 1  ;;  %v2675_v31 = vshrl.u32 %v10240_v53, 16  ;;  %v2679_v25 = vrot.slane %v2677_v39, 1  ;;  %v10317_v39 = vld [vmem:[%s14670_s1 + $0x18] sm:$0xff]  }
 0x185   : > { %14824 = vst [vmem:[#allocation6_spill] sm:$0xff] %v11725_v28  ;;  %14825 = vst [vmem:[#allocation7_spill] sm:$0xff] %v11727_v6  ;;  %v10267_v6 = vld [vmem:[%s10752_s30 + $0x380] sm:$0x1f]  }
 0x186   : > { %2459 = vrot.lane.b32.xlu1 %v10218_v18, %s10687_s16  ;;  %2457 = vrot.lane.b32.xlu0 %v10219_v17, %s10687_s16  ;;  %v10236_v18 = vld [vmem:[%s10752_s30 + $0x2a0] sm:$0x1f]   ;;  %v2547_v17 = vor.u32 %v2546_v55, %v2542_v3  ;;  %v2658_v3 = vrot.slane %v2656_v8, 1  ;;  %v2670_v55 = vshll.u32 %v10241_v23, 16  ;;  %v10314_v8 = vld [vmem:[%s14670_s1 + $0x10] sm:$0xff]  }
 0x187   : > { %v2649_v11 = vshll.u32 %v10236_v18, 16  ;;  %v2647_v42 = vshrl.u32 %v10236_v18, 16  ;;  %v2668_v18 = vshrl.u32 %v10241_v23, 16 }
 0x188   : > { %v11735_v26 = vpop.permute.xlu1 %1963  ;;  %v11737_v58 = vpop.permute.xlu0 %1961 }
 0x18a   : > { %2463 = vrot.lane.b32.xlu1 %v10220_v36, %s10687_s16  ;;  %2461 = vrot.lane.b32.xlu0 %v10221_v7, %s10687_s16  ;;  %v2556_v36 = vshrl.u32 %v10233_v22, 16  ;;  %v2628_v7 = vshll.u32 %v10235_v9, 16 }
 0x18c   : > { %v11745_v54 = vpop.permute.xlu1 %1967  ;;  %v11747_v38 = vpop.permute.xlu0 %1965  ;;  %v2630_v49 = vrot.slane %v2628_v7, 1  ;;  %v2680_v7 = vor.u32 %v2679_v25, %v2675_v31  ;;  %v10253_v31 = vld [vmem:[%s10752_s30 + $0x448] ss:$0 sps:$4 sm:$0xff]   ;;  %v10259_v25 = vld [vmem:[%s10752_s30 + $0x360] sm:$0x1f]  }
 0x18e   : > { %2467 = vrot.lane.b32.xlu1 %v10222_v29, %s10687_s16  ;;  %2465 = vrot.lane.b32.xlu0 %v10223_v13, %s10687_s16  ;;  %v2633_v13 = vshrl.u32 %v10234_v45, 16  ;;  %v2631_v33 = vor.u32 %v2630_v49, %v2626_v10  ;;  %v10244_v10 = vld [vmem:[%s10752_s30 + $0x408] ss:$0 sps:$4 sm:$0xff]   ;;  %v10245_v49 = vld [vmem:[%s10752_s30 + $0x400] ss:$0 sps:$4 sm:$0xff]  }
 0x190   : > { %v11755_v60 = vpop.permute.xlu1 %1971  ;;  %v11757_v16 = vpop.permute.xlu0 %1969  ;;  %v2638_v48 = vor.u32 %v2637_v27, %v2633_v13  ;;  %v10242_v27 = vld [vmem:[%s10752_s30 + $0x3f8] ss:$0 sps:$4 sm:$0xff]  }
 0x191   : > { %14826 = vst [vmem:[#allocation8_spill] sm:$0xff] %v11755_v60  ;;  %14827 = vst [vmem:[#allocation64_spill] sm:$0xff] %v11757_v16  ;;  %v10295_v60 = vld [vmem:[%s10752_s30 + $0x370] sm:$0x1f]  }
 0x192   : > { %2471 = vrot.lane.b32.xlu1 %v10224_v41, %s10687_s16  ;;  %2469 = vrot.lane.b32.xlu0 %v10225_v46, %s10687_s16  ;;  %v10238_v41 = vld [vmem:[%s10752_s30 + $0x2b0] sm:$0x1f]   ;;  %v2561_v46 = vor.u32 %v2560_v20, %v2556_v36 }
 0x193   : > { %v2663_v0 = vshll.u32 %v10238_v41, 16  ;;  %v2661_v34 = vshrl.u32 %v10238_v41, 16 }
 0x194   : > { %v11763_v40 = vpop.permute.xlu1 %1975  ;;  %v11765_v35 = vpop.permute.xlu0 %1973 }
 0x195   : > { %14828 = vst [vmem:[#allocation59_spill] sm:$0xff] %v11763_v40  ;;  %14829 = vst [vmem:[#allocation9_spill] sm:$0xff] %v11765_v35  ;;  %v2665_v12 = vrot.slane %v2663_v0, 1  ;;  %v10311_v0 = vld [vmem:[%s14670_s1 + $0x8] sm:$0xff]  }
 0x196   : > { %2571 = vrot.lane.b32.xlu1 %v2526_v43, %s10688_s17  ;;  %2569 = vrot.lane.b32.xlu0 %v2519_v56, %s10688_s17  ;;  %v2651_v43 = vrot.slane %v2649_v11, 1  ;;  %v2644_v56 = vrot.slane %v2642_v37, 1  ;;  %v10243_v11 = vld [vmem:[%s10752_s30 + $0x3f0] ss:$0 sps:$4 sm:$0xff]   ;;  %v10308_v37 = vld [vmem:[%s14670_s1] sm:$0xff]  }
 0x197   : > { %9887 = vmatprep.subr.bf16.mxu1 %v10308_v37  ;;  %v10266_v40 = vld [vmem:[%s10752_s30 + $0x388] sm:$0x1f]  }
 0x198   : > { %v11771_v57 = vpop.permute.xlu1 %2075  ;;  %v11773_v4 = vpop.permute.xlu0 %2073  ;;  %v2645_v45 = vor.u32 %v2644_v56, %v2640_v24  ;;  %9888 = vmatpush3.bf16.msra.mxu1 %v10308_v37  ;;  %v10248_v24 = vld [vmem:[%s10752_s30 + $0x428] ss:$0 sps:$4 sm:$0xff]   ;;  %v10249_v56 = vld [vmem:[%s10752_s30 + $0x420] ss:$0 sps:$4 sm:$0xff]  }
 0x199   : > { %9889 = vmatprep.subr.bf16.mxu1 %v10311_v0 }
 0x19a   : > { %2575 = vrot.lane.b32.xlu1 %v2540_v51, %s10688_s17  ;;  %2573 = vrot.lane.b32.xlu0 %v2533_v50, %s10688_s17  ;;  %v2652_v51 = vor.u32 %v2651_v43, %v2647_v42  ;;  %v2654_v50 = vshrl.u32 %v10239_v47, 16  ;;  %v10246_v42 = vld [vmem:[%s10752_s30 + $0x418] ss:$0 sps:$4 sm:$0xff]   ;;  %v10247_v43 = vld [vmem:[%s10752_s30 + $0x410] ss:$0 sps:$4 sm:$0xff]  }
 0x19c   : > { %v11779_v29 = vpop.permute.xlu1 %2079  ;;  %v11781_v19 = vpop.permute.xlu0 %2077  ;;  %v2659_v15 = vor.u32 %v2658_v3, %v2654_v50  ;;  %9890 = vmatpush3.bf16.msra.mxu1 %v10311_v0  ;;  %v10694_v50 = vmov 0  }
 0x19d   : > { %9891 = vmatprep.subr.bf16.mxu1 %v10314_v8  ;;  %398 = vst.msk [vmem:[#allocation2 + $0xe8] sm:$0xf] %vm14689_vm15, %v10694_v50  ;;  %279 = vst.msk [vmem:[#allocation2] sm:$0xf] %vm14689_vm15, %v10694_v50  ;;  %10024 = vset.pattern.permute.xlu1 %v10694_v50 }
 0x19e   : > { %2579 = vrot.lane.b32.xlu1 %v2554_v1, %s10688_s17  ;;  %2577 = vrot.lane.b32.xlu0 %v2547_v17, %s10688_s17  ;;  %v2666_v1 = vor.u32 %v2665_v12, %v2661_v34  ;;  %v2672_v17 = vrot.slane %v2670_v55, 1  ;;  %v10250_v34 = vld [vmem:[%s10752_s30 + $0x440] ss:$0 sps:$4 sm:$0xff]   ;;  %v10251_v12 = vld [vmem:[%s10752_s30 + $0x438] ss:$0 sps:$4 sm:$0xff]  }
 0x19f   : > { %286 = vst.msk [vmem:[#allocation2 + $0x8] sm:$0xf] %vm14689_vm15, %v10694_v50  ;;  %290 = vst.msk [vmem:[#allocation2 + $0x10] sm:$0xf] %vm14689_vm15, %v10694_v50  ;;  %10025 = vset.pattern.permute.xlu0 %v10694_v50  ;;  %v10252_v55 = vld [vmem:[%s10752_s30 + $0x450] ss:$0 sps:$4 sm:$0xff]  }
 0x1a0   : > { %v11787_v61 = vpop.permute.xlu1 %2083  ;;  %v11789_v30 = vpop.permute.xlu0 %2081  ;;  %v2673_v21 = vor.u32 %v2672_v17, %v2668_v18  ;;  %9892 = vmatpush3.bf16.msra.mxu1 %v10314_v8  ;;  %294 = vst.msk [vmem:[#allocation2 + $0x18] sm:$0xf] %vm14689_vm15, %v10694_v50  ;;  %298 = vst.msk [vmem:[#allocation2 + $0x20] sm:$0xf] %vm14689_vm15, %v10694_v50  ;;  %v11917_v17 = vld [vmem:[%s10752_s30 + $0x378] sm:$0x1f]  }
 0x1a1   : > { %14830 = vst [vmem:[#allocation10_spill] sm:$0xff] %v11787_v61  ;;  %14831 = vst [vmem:[#allocation11_spill] sm:$0xff] %v11789_v30  ;;  %9893 = vmatprep.subr.bf16.mxu1 %v10317_v39  ;;  %v10294_v61 = vld [vmem:[%s10752_s30 + $0x378] sm:$0x1f]  }
 0x1a2   : > { %2583 = vrot.lane.b32.xlu1 %v2568_v44, %s10688_s17  ;;  %2581 = vrot.lane.b32.xlu0 %v2561_v46, %s10688_s17  ;;  %302 = vst.msk [vmem:[#allocation2 + $0x28] sm:$0xf] %vm14689_vm15, %v10694_v50  ;;  %306 = vst.msk [vmem:[#allocation2 + $0x30] sm:$0xf] %vm14689_vm15, %v10694_v50 }
 0x1a3   : > { %310 = vst.msk [vmem:[#allocation2 + $0x38] sm:$0xf] %vm14689_vm15, %v10694_v50  ;;  %314 = vst.msk [vmem:[#allocation2 + $0x40] sm:$0xf] %vm14689_vm15, %v10694_v50 }
 0x1a4   : > { %v11795_v32 = vpop.permute.xlu1 %2087  ;;  %v11797_v22 = vpop.permute.xlu0 %2085  ;;  %318 = vst.msk [vmem:[#allocation2 + $0x48] sm:$0xf] %vm14689_vm15, %v10694_v50  ;;  %322 = vst.msk [vmem:[#allocation2 + $0x50] sm:$0xf] %vm14689_vm15, %v10694_v50  ;;  %9894 = vmatpush3.bf16.msra.mxu1 %v10317_v39  ;;  %v11941_v39 = vld [vmem:[%s10752_s30 + $0x3a8] sm:$0x1f]  }
 0x1a5   : > { %14832 = vst [vmem:[#allocation12_spill] sm:$0xff] %v11795_v32  ;;  %14833 = vst [vmem:[#allocation13_spill] sm:$0xff] %v11797_v22  ;;  %v10265_v22 = vld [vmem:[%s10752_s30 + $0x3b8] sm:$0x1f]  }
 0x1a6   : > { %2683 = vrot.lane.b32.xlu1 %v2638_v48, %s10689_s18  ;;  %2681 = vrot.lane.b32.xlu0 %v2631_v33, %s10689_s18  ;;  %326 = vst.msk [vmem:[#allocation2 + $0x58] sm:$0xf] %vm14689_vm15, %v10694_v50  ;;  %330 = vst.msk [vmem:[#allocation2 + $0x60] sm:$0xf] %vm14689_vm15, %v10694_v50 }
 0x1a7   : > { %334 = vst.msk [vmem:[#allocation2 + $0x68] sm:$0xf] %vm14689_vm15, %v10694_v50  ;;  %338 = vst.msk [vmem:[#allocation2 + $0x70] sm:$0xf] %vm14689_vm15, %v10694_v50 }
 0x1a8   : > { %v11801_v52 = vpop.permute.xlu1 %2115  ;;  %v11803_v9 = vpop.permute.xlu0 %2113  ;;  %342 = vst.msk [vmem:[#allocation2 + $0x78] sm:$0xf] %vm14689_vm15, %v10694_v50  ;;  %346 = vst.msk [vmem:[#allocation2 + $0x80] sm:$0xf] %vm14689_vm15, %v10694_v50 }
 0x1a9   : > { %350 = vst.msk [vmem:[#allocation2 + $0x88] sm:$0xf] %vm14689_vm15, %v10694_v50  ;;  %354 = vst.msk [vmem:[#allocation2 + $0x90] sm:$0xf] %vm14689_vm15, %v10694_v50 }
 0x1aa   : > { %2687 = vrot.lane.b32.xlu1 %v2652_v51, %s10689_s18  ;;  %2685 = vrot.lane.b32.xlu0 %v2645_v45, %s10689_s18  ;;  %358 = vst.msk [vmem:[#allocation2 + $0x98] sm:$0xf] %vm14689_vm15, %v10694_v50  ;;  %362 = vst.msk [vmem:[#allocation2 + $0xa0] sm:$0xf] %vm14689_vm15, %v10694_v50 }
 0x1ab   : > { %366 = vst.msk [vmem:[#allocation2 + $0xa8] sm:$0xf] %vm14689_vm15, %v10694_v50  ;;  %370 = vst.msk [vmem:[#allocation2 + $0xb0] sm:$0xf] %vm14689_vm15, %v10694_v50 }
 0x1ac   : > { %v11807_v36 = vpop.permute.xlu1 %2119  ;;  %v11809_v20 = vpop.permute.xlu0 %2117  ;;  %374 = vst.msk [vmem:[#allocation2 + $0xb8] sm:$0xf] %vm14689_vm15, %v10694_v50  ;;  %378 = vst.msk [vmem:[#allocation2 + $0xc0] sm:$0xf] %vm14689_vm15, %v10694_v50 }
 0x1ad   : > { %382 = vst.msk [vmem:[#allocation2 + $0xc8] sm:$0xf] %vm14689_vm15, %v10694_v50  ;;  %386 = vst.msk [vmem:[#allocation2 + $0xd0] sm:$0xf] %vm14689_vm15, %v10694_v50 }
 0x1ae   : > { %2691 = vrot.lane.b32.xlu1 %v2666_v1, %s10689_s18  ;;  %2689 = vrot.lane.b32.xlu0 %v2659_v15, %s10689_s18  ;;  %390 = vst.msk [vmem:[#allocation2 + $0xd8] sm:$0xf] %vm14689_vm15, %v10694_v50  ;;  %394 = vst.msk [vmem:[#allocation2 + $0xe0] sm:$0xf] %vm14689_vm15, %v10694_v50  ;;  %v10258_v1 = vld [vmem:[%s10752_s30 + $0x368] sm:$0x1f]  }
 0x1af   : > { %402 = vst.msk [vmem:[#allocation2 + $0xf0] sm:$0xf] %vm14689_vm15, %v10694_v50  ;;  %406 = vst.msk [vmem:[#allocation2 + $0xf8] sm:$0xf] %vm14689_vm15, %v10694_v50  ;;  %v10320_v15 = vld [vmem:[%s14670_s1 + $0x20] sm:$0xff]   ;;  %v2825_v8 = vshrl.u32 %v10258_v1, 16 }
 0x1b0   : > { %v11813_v44 = vpop.permute.xlu1 %2123  ;;  %v11815_v13 = vpop.permute.xlu0 %2121  ;;  %410 = vst.msk [vmem:[#allocation2 + $0x100] sm:$0xf] %vm14689_vm15, %v10694_v50  ;;  %414 = vst.msk [vmem:[#allocation2 + $0x108] sm:$0xf] %vm14689_vm15, %v10694_v50  ;;  %9895 = vmatprep.subr.bf16.mxu1 %v10320_v15 }
 0x1b1   : > { %14834 = vst [vmem:[#allocation14_spill] sm:$0xff] %v11813_v44  ;;  %14835 = vst [vmem:[#allocation15_spill] sm:$0xff] %v11815_v13  ;;  %9896 = vmatpush3.bf16.msra.mxu1 %v10320_v15 }
 0x1b2   : > { %2695 = vrot.lane.b32.xlu1 %v2680_v7, %s10689_s18  ;;  %2693 = vrot.lane.b32.xlu0 %v2673_v21, %s10689_s18  ;;  %418 = vst.msk [vmem:[#allocation2 + $0x110] sm:$0xf] %vm14689_vm15, %v10694_v50  ;;  %422 = vst.msk [vmem:[#allocation2 + $0x118] sm:$0xf] %vm14689_vm15, %v10694_v50  ;;  %v11922_v21 = vld [vmem:[%s10752_s30 + $0x370] sm:$0x1f]  }
 0x1b3   : > { %v10257_v50 = vld [vmem:[%s10752_s30 + $0x468] ss:$0 sps:$4 sm:$0xff]  }
 0x1b4   : > { %v11821_v41 = vpop.permute.xlu1 %2127  ;;  %v11823_v46 = vpop.permute.xlu0 %2125 }
 0x1b5   : > { %14836 = vst [vmem:[#allocation16_spill] sm:$0xff] %v11821_v41  ;;  %14837 = vst [vmem:[#allocation17_spill] sm:$0xff] %v11823_v46  ;;  %v2932_v46 = vshll.u32 %v11941_v39, 16  ;;  %v10264_v41 = vld [vmem:[%s10752_s30 + $0x3c0] sm:$0x1f]  }
 0x1b6   : > { %2723 = vrot.lane.b32.xlu1 %v10242_v27, %s10690_s19  ;;  %2721 = vrot.lane.b32.xlu0 %v10243_v11, %s10690_s19  ;;  %v10254_v27 = vld [vmem:[%s10752_s30 + $0x460] ss:$0 sps:$4 sm:$0xff]   ;;  %v2827_v11 = vshll.u32 %v10258_v1, 16  ;;  %v10326_v1 = vld [vmem:[%s14670_s1 + $0x30] sm:$0xff]  }
 0x1b8   : > { %v11832_v47 = vpop.permute.xlu1 %2155  ;;  %v11834_v48 = vpop.permute.xlu0 %2153 }
 0x1ba   : > { %2727 = vrot.lane.b32.xlu1 %v10244_v10, %s10690_s19  ;;  %2725 = vrot.lane.b32.xlu0 %v10245_v49, %s10690_s19  ;;  %v10255_v10 = vld [vmem:[%s10752_s30 + $0x458] ss:$0 sps:$4 sm:$0xff]   ;;  %v2820_v49 = vshll.u32 %v10259_v25, 16 }
 0x1bc   : > { %v11843_v53 = vpop.permute.xlu1 %2159  ;;  %v11845_v33 = vpop.permute.xlu0 %2157 }
 0x1be   : > { %2731 = vrot.lane.b32.xlu1 %v10246_v42, %s10690_s19  ;;  %2729 = vrot.lane.b32.xlu0 %v10247_v43, %s10690_s19  ;;  %v2841_v42 = vshll.u32 %v11917_v17, 16  ;;  %v10323_v43 = vld [vmem:[%s14670_s1 + $0x28] sm:$0xff]  }
 0x1bf   : > { %9897 = vmatprep.subr.bf16.mxu1 %v10323_v43 }
 0x1c0   : > { %v11854_v23 = vpop.permute.xlu1 %2163  ;;  %v11856_v51 = vpop.permute.xlu0 %2161  ;;  %9898 = vmatpush3.bf16.msra.mxu1 %v10323_v43  ;;  %v399_v43 = vld [vmem:[#allocation2 + $0xec] sm:$0x1] }
 0x1c1   : > { %14838 = vst [vmem:[#allocation18_spill] sm:$0xff] %v11854_v23  ;;  %14839 = vst [vmem:[#allocation19_spill] sm:$0xff] %v11856_v51  ;;  %9899 = vmatprep.subr.bf16.mxu1 %v10326_v1 }
 0x1c2   : > { %2735 = vrot.lane.b32.xlu1 %v10248_v24, %s10690_s19  ;;  %2733 = vrot.lane.b32.xlu0 %v10249_v56, %s10690_s19  ;;  %v10256_v24 = vld [vmem:[%s10752_s30 + $0x470] ss:$0 sps:$4 sm:$0xff]   ;;  %v2834_v56 = vshll.u32 %v11922_v21, 16 }
 0x1c4   : > { %v11865_v45 = vpop.permute.xlu1 %2167  ;;  %v11903_v3 = vpop.permute.xlu0 %2165  ;;  %9900 = vmatpush3.bf16.msra.mxu1 %v10326_v1 }
 0x1c5   : > { %14840 = vst [vmem:[#allocation23_spill] sm:$0xff] %v11865_v45  ;;  %14841 = vst [vmem:[#allocation20_spill] sm:$0xff] %v11903_v3  ;;  %v2839_v3 = vshrl.u32 %v11917_v17, 16  ;;  %v2843_v45 = vrot.slane %v2841_v42, 1 }
 0x1c6   : > { %2763 = vrot.lane.b32.xlu1 %v10250_v34, %s10691_s24  ;;  %2761 = vrot.lane.b32.xlu0 %v10251_v12, %s10691_s24  ;;  %v2829_v34 = vrot.slane %v2827_v11, 1  ;;  %v10262_v12 = vld [vmem:[%s10752_s30 + $0x3b0] sm:$0x1f]   ;;  %v2832_v11 = vshrl.u32 %v11922_v21, 16  ;;  %v395_v21 = vld [vmem:[#allocation2 + $0xe4] sm:$0x1] }
 0x1c7   : > { %v2939_v42 = vshll.u32 %v10262_v12, 16  ;;  %v2844_v1 = vor.u32 %v2843_v45, %v2839_v3  ;;  %v2951_v3 = vshrl.u32 %v10264_v41, 16 }
 0x1c8   : > { %v11914_v18 = vpop.permute.xlu1 %2267  ;;  %v11919_v7 = vpop.permute.xlu0 %2265  ;;  %v2830_v17 = vor.u32 %v2829_v34, %v2825_v8  ;;  %v10329_v34 = vld [vmem:[%s14670_s1 + $0x38] sm:$0xff]  }
 0x1c9   : > { %9901 = vmatprep.subr.bf16.mxu1 %v10329_v34 }
 0x1ca   : > { %2767 = vrot.lane.b32.xlu1 %v10252_v55, %s10691_s24  ;;  %2765 = vrot.lane.b32.xlu0 %v10253_v31, %s10691_s24  ;;  %v2818_v55 = vshrl.u32 %v10259_v25, 16  ;;  %v2822_v31 = vrot.slane %v2820_v49, 1  ;;  %v391_v49 = vld [vmem:[#allocation2 + $0xdc] sm:$0x1] }
 0x1cb   : > { %v392_v35 = vsel %vm11953_vm12, 0, %v391_v49  ;;  %v2937_v49 = vshrl.u32 %v10262_v12, 16  ;;  %9902 = vmatpush3.bf16.msra.mxu1 %v10329_v34 }
 0x1cc   : > { %v11928_v37 = vpop.permute.xlu1 %2271  ;;  %v11934_v0 = vpop.permute.xlu0 %2269  ;;  %v2823_v32 = vor.u32 %v2822_v31, %v2818_v55  ;;  %393 = vst [vmem:[#allocation2 + $0xdc] sm:$0x1] %v392_v35  ;;  %v396_v55 = vsel %vm11953_vm12, 0, %v395_v21  ;;  %v2934_v21 = vrot.slane %v2932_v46, 1  ;;  %v2848_v46 = vshll.u32 %v10267_v6, 16 }
 0x1cd   : > { %397 = vst [vmem:[#allocation2 + $0xe4] sm:$0x1] %v396_v55 }
 0x1ce   : > { %2771 = vrot.lane.b32.xlu1 %v10254_v27, %s10691_s24  ;;  %2769 = vrot.lane.b32.xlu0 %v10255_v10, %s10691_s24  ;;  %v14843_v27 = vmov 0  ;;  %v2836_v10 = vrot.slane %v2834_v56, 1  ;;  %v400_v56 = vsel %vm11953_vm12, 0, %v399_v43  ;;  %v2941_v43 = vrot.slane %v2939_v42, 1 }
 0x1cf   : > { %v14844_v27 = vsel %vm11953_vm12, 4294967295, %v14843_v27  ;;  %401 = vst [vmem:[#allocation2 + $0xec] sm:$0x1] %v400_v56  ;;  %v2930_v56 = vshrl.u32 %v11941_v39, 16  ;;  %v2855_v42 = vshll.u32 %v10266_v40, 16 }
 0x1d0   : > { %v11945_v15 = vpop.permute.xlu1 %2275  ;;  %14845 = vst [vmem:[#allocation31_spill] sm:$0xff] %v14844_v27  ;;  %v11957_v25 = vpop.permute.xlu0 %2273  ;;  %v2837_v35 = vor.u32 %v2836_v10, %v2832_v11  ;;  %v2942_v45 = vor.u32 %v2941_v43, %v2937_v49  ;;  %v2944_v11 = vshrl.u32 %v10265_v22, 16  ;;  %v10277_v27 = vld [vmem:[%s10752_s30 + $0x288] sm:$0x1f]  }
 0x1d1   : > { %14842 = vst [vmem:[#allocation24_spill] sm:$0xff] %v11945_v15  ;;  %14846 = vst [vmem:[#allocation21_spill] sm:$0xff] %v11957_v25  ;;  %v10279_v15 = vld [vmem:[%s10752_s30 + $0x298] sm:$0x1f]  }
 0x1d2   : > { %2775 = vrot.lane.b32.xlu1 %v10256_v24, %s10691_s24  ;;  %2773 = vrot.lane.b32.xlu0 %v10257_v50, %s10691_s24  ;;  %v403_v24 = vld [vmem:[#allocation2 + $0xf4] sm:$0x1] }
 0x1d3   : > { %v404_v31 = vsel %vm11953_vm12, 0, %v403_v24 }
 0x1d4   : > { %v11969_v8 = vpop.permute.xlu1 %2279  ;;  %v11974_v50 = vpop.permute.xlu0 %2277  ;;  %405 = vst [vmem:[#allocation2 + $0xf4] sm:$0x1] %v404_v31  ;;  %v2853_v31 = vshrl.u32 %v10266_v40, 16 }
 0x1d5   : > { %14847 = vst [vmem:[#allocation32_spill] sm:$0xff] %v11969_v8  ;;  %14848 = vst [vmem:[#allocation39_spill] sm:$0xff] %v11974_v50  ;;  %v2953_v8 = vshll.u32 %v10264_v41, 16  ;;  %v2946_v50 = vshll.u32 %v10265_v22, 16  ;;  %v2850_v22 = vrot.slane %v2848_v46, 1 }
 0x1d6   : > { %2875 = vrot.lane.b32.xlu1 %v2830_v17, %s10692_s25  ;;  %2873 = vrot.lane.b32.xlu0 %v2823_v32, %s10692_s25  ;;  %v2935_v32 = vor.u32 %v2934_v21, %v2930_v56  ;;  %v10273_v56 = vld [vmem:[%s10752_s30 + $0x240] sm:$0x1f]   ;;  %v415_v21 = vld [vmem:[#allocation2 + $0x10c] sm:$0x1] }
 0x1d7   : > { %v2955_v12 = vrot.slane %v2953_v8, 1  ;;  %v2948_v10 = vrot.slane %v2946_v50, 1  ;;  %v2846_v8 = vshrl.u32 %v10267_v6, 16  ;;  %v416_v6 = vsel %vm11953_vm12, 0, %v415_v21 }
 0x1d8   : > { %v11985_v24 = vpop.permute.xlu1 %2379  ;;  %v11987_v17 = vpop.permute.xlu0 %2377  ;;  %417 = vst [vmem:[#allocation2 + $0x10c] sm:$0x1] %v416_v6  ;;  %v10270_v6 = vld [vmem:[%s10752_s30 + $0x330] ss:$0 sps:$4 sm:$0xff]  }
 0x1d9   : > { %v2956_v55 = vor.u32 %v2955_v12, %v2951_v3  ;;  %v2949_v41 = vor.u32 %v2948_v10, %v2944_v11  ;;  %v2851_v40 = vor.u32 %v2850_v22, %v2846_v8  ;;  %v10268_v12 = vld [vmem:[%s10752_s30 + $0x320] ss:$0 sps:$4 sm:$0xff]   ;;  %v10274_v10 = vld [vmem:[%s10752_s30 + $0x258] sm:$0x1f]   ;;  %v419_v8 = vld [vmem:[#allocation2 + $0x114] sm:$0x1] }
 0x1da   : > { %2879 = vrot.lane.b32.xlu1 %v2844_v1, %s10692_s25  ;;  %2877 = vrot.lane.b32.xlu0 %v2837_v35, %s10692_s25  ;;  %v2857_v1 = vrot.slane %v2855_v42, 1  ;;  %v10272_v35 = vld [vmem:[%s10752_s30 + $0x248] sm:$0x1f]   ;;  %v10269_v42 = vld [vmem:[%s10752_s30 + $0x318] ss:$0 sps:$4 sm:$0xff]  }
 0x1db   : > { %v5064_v11 = vshll.u32 %v10272_v35, 16 }
 0x1dc   : > { %v11991_v39 = vpop.permute.xlu1 %2383  ;;  %v11993_v34 = vpop.permute.xlu0 %2381  ;;  %v2858_v43 = vor.u32 %v2857_v1, %v2853_v31  ;;  %v5057_v31 = vshll.u32 %v10273_v56, 16  ;;  %v10275_v1 = vld [vmem:[%s10752_s30 + $0x250] sm:$0x1f]  }
 0x1de   : > { %2987 = vrot.lane.b32.xlu1 %v2942_v45, %s10693_s21  ;;  %2985 = vrot.lane.b32.xlu0 %v2935_v32, %s10693_s21  ;;  %v407_v32 = vld [vmem:[#allocation2 + $0xfc] sm:$0x1]  ;;  %v5059_v28 = vrot.slane %v5057_v31, 1  ;;  %v5169_v31 = vshll.u32 %v10277_v27, 16 }
 0x1df   : > { %v408_v46 = vsel %vm11953_vm12, 0, %v407_v32  ;;  %v10271_v32 = vld [vmem:[%s10752_s30 + $0x328] ss:$0 sps:$4 sm:$0xff]  }
 0x1e0   : > { %v11997_v50 = vpop.permute.xlu1 %2387  ;;  %v11999_v49 = vpop.permute.xlu0 %2385  ;;  %409 = vst [vmem:[#allocation2 + $0xfc] sm:$0x1] %v408_v46  ;;  %v5066_v46 = vrot.slane %v5064_v11, 1  ;;  %v10278_v11 = vld [vmem:[%s10752_s30 + $0x2a0] sm:$0x1f]  }
 0x1e1   : > { %14849 = vst [vmem:[#allocation22_spill] sm:$0xff] %v11997_v50  ;;  %14850 = vst [vmem:[#allocation25_spill] sm:$0xff] %v11999_v49 }
 0x1e2   : > { %2991 = vrot.lane.b32.xlu1 %v2956_v55, %s10693_s21  ;;  %2989 = vrot.lane.b32.xlu0 %v2949_v41, %s10693_s21  ;;  %v411_v55 = vld [vmem:[#allocation2 + $0x104] sm:$0x1] }
 0x1e3   : > { %v412_v41 = vsel %vm11953_vm12, 0, %v411_v55  ;;  %v10276_v55 = vld [vmem:[%s10752_s30 + $0x290] sm:$0x1f]  }
 0x1e4   : > { %v12005_v45 = vpop.permute.xlu1 %2391  ;;  %v12009_v3 = vpop.permute.xlu0 %2389  ;;  %413 = vst [vmem:[#allocation2 + $0x104] sm:$0x1] %v412_v41  ;;  %v5071_v41 = vshll.u32 %v10275_v1, 16  ;;  %v5176_v50 = vshll.u32 %v10276_v55, 16 }
 0x1e5   : > { %14851 = vst [vmem:[#allocation40_spill] sm:$0xff] %v12005_v45  ;;  %14852 = vst [vmem:[#allocation47_spill] sm:$0xff] %v12009_v3  ;;  %v5078_v3 = vshll.u32 %v10274_v10, 16  ;;  %v5055_v45 = vshrl.u32 %v10273_v56, 16 }
 0x1e6   : > { %2883 = vrot.lane.b32.xlu1 %v2858_v43, %s10692_s25  ;;  %2881 = vrot.lane.b32.xlu0 %v2851_v40, %s10692_s25  ;;  %v420_v43 = vsel %vm11953_vm12, 0, %v419_v8  ;;  %v5062_v40 = vshrl.u32 %v10272_v35, 16  ;;  %v5073_v56 = vrot.slane %v5071_v41, 1 }
 0x1e7   : > { %421 = vst [vmem:[#allocation2 + $0x114] sm:$0x1] %v420_v43  ;;  %v5080_v35 = vrot.slane %v5078_v3, 1  ;;  %v5060_v25 = vor.u32 %v5059_v28, %v5055_v45  ;;  %v5183_v28 = vshll.u32 %v10279_v15, 16 }
 0x1e8   : > { %v12021_v22 = vpop.permute.xlu1 %2419  ;;  %v12025_v21 = vpop.permute.xlu0 %2417  ;;  %v5067_v43 = vor.u32 %v5066_v46, %v5062_v40  ;;  %v5178_v40 = vrot.slane %v5176_v50, 1  ;;  %v5167_v46 = vshrl.u32 %v10277_v27, 16 }
 0x1ea   : > { %5000 = vrot.lane.b32.xlu1 %v10268_v12, %s10679_s8  ;;  %4998 = vrot.lane.b32.xlu0 %v10269_v42, %s10679_s8  ;;  %v5076_v12 = vshrl.u32 %v10274_v10, 16  ;;  %v5069_v42 = vshrl.u32 %v10275_v1, 16  ;;  %v5190_v10 = vshll.u32 %v10278_v11, 16 }
 0x1ec   : > { %v12033_v8 = vpop.permute.xlu1 %2423  ;;  %v12035_v49 = vpop.permute.xlu0 %2421  ;;  %v5081_v13 = vor.u32 %v5080_v35, %v5076_v12  ;;  %v5074_v3 = vor.u32 %v5073_v56, %v5069_v42  ;;  %v10281_v56 = vld [vmem:[%s10752_s30 + $0x3f0] ss:$0 sps:$4 sm:$0xff]  }
 0x1ee   : > { %5004 = vrot.lane.b32.xlu1 %v10270_v6, %s10679_s8  ;;  %5002 = vrot.lane.b32.xlu0 %v10271_v32, %s10679_s8  ;;  %v5174_v6 = vshrl.u32 %v10276_v55, 16  ;;  %v5171_v32 = vrot.slane %v5169_v31, 1  ;;  %v5181_v55 = vshrl.u32 %v10279_v15, 16  ;;  %v10280_v15 = vld [vmem:[%s10752_s30 + $0x3f8] ss:$0 sps:$4 sm:$0xff]  }
 0x1f0   : > { %v12041_v51 = vpop.permute.xlu1 %2427  ;;  %v12043_v23 = vpop.permute.xlu0 %2425  ;;  %v5179_v41 = vor.u32 %v5178_v40, %v5174_v6  ;;  %v5172_v50 = vor.u32 %v5171_v32, %v5167_v46  ;;  %v10282_v6 = vld [vmem:[%s10752_s30 + $0x408] ss:$0 sps:$4 sm:$0xff]  }
 0x1f1   : > { %14853 = vst [vmem:[#allocation26_spill] sm:$0xff] %v12041_v51  ;;  %14854 = vst [vmem:[#allocation27_spill] sm:$0xff] %v12043_v23  ;;  %v5188_v23 = vshrl.u32 %v10278_v11, 16  ;;  %v10288_v40 = vld [vmem:[%s10752_s30 + $0x368] sm:$0x1f]  }
 0x1f2   : > { %5112 = vrot.lane.b32.xlu1 %v5067_v43, %s10680_s9  ;;  %5110 = vrot.lane.b32.xlu0 %v5060_v25, %s10680_s9  ;;  %v5192_v43 = vrot.slane %v5190_v10, 1  ;;  %v5185_v25 = vrot.slane %v5183_v28, 1  ;;  %v10283_v10 = vld [vmem:[%s10752_s30 + $0x400] ss:$0 sps:$4 sm:$0xff]  }
 0x1f3   : > { %v10284_v28 = vld [vmem:[%s10752_s30 + $0x440] ss:$0 sps:$4 sm:$0xff]  }
 0x1f4   : > { %v12047_v45 = vpop.permute.xlu1 %2431  ;;  %v12049_v1 = vpop.permute.xlu0 %2429  ;;  %v5186_v35 = vor.u32 %v5185_v25, %v5181_v55  ;;  %v10291_v25 = vld [vmem:[%s10752_s30 + $0x390] sm:$0x1f]  }
 0x1f5   : > { %14855 = vst [vmem:[#allocation48_spill] sm:$0xff] %v12047_v45  ;;  %14856 = vst [vmem:[#allocation55_spill] sm:$0xff] %v12049_v1  ;;  %v10292_v1 = vld [vmem:[%s10752_s30 + $0x3d0] sm:$0x1f]  }
 0x1f6   : > { %5116 = vrot.lane.b32.xlu1 %v5081_v13, %s10680_s9  ;;  %5114 = vrot.lane.b32.xlu0 %v5074_v3, %s10680_s9  ;;  %v5193_v13 = vor.u32 %v5192_v43, %v5188_v23  ;;  %v10289_v3 = vld [vmem:[%s10752_s30 + $0x360] sm:$0x1f]   ;;  %v10290_v43 = vld [vmem:[%s10752_s30 + $0x398] sm:$0x1f]  }
 0x1f7   : > { %v5361_v55 = vshll.u32 %v10289_v3, 16 }
 0x1f8   : > { %v12053_v27 = vpop.permute.xlu1 %2459  ;;  %v12055_v12 = vpop.permute.xlu0 %2457 }
 0x1f9   : > { %v5363_v45 = vrot.slane %v5361_v55, 1 }
 0x1fa   : > { %5224 = vrot.lane.b32.xlu1 %v5179_v41, %s10681_s10  ;;  %5222 = vrot.lane.b32.xlu0 %v5172_v50, %s10681_s10  ;;  %v5368_v41 = vshll.u32 %v10288_v40, 16  ;;  %v10285_v50 = vld [vmem:[%s10752_s30 + $0x438] ss:$0 sps:$4 sm:$0xff]  }
 0x1fc   : > { %v12059_v11 = vpop.permute.xlu1 %2463  ;;  %v12061_v42 = vpop.permute.xlu0 %2461 }
 0x1fe   : > { %5228 = vrot.lane.b32.xlu1 %v5193_v13, %s10681_s10  ;;  %5226 = vrot.lane.b32.xlu0 %v5186_v35, %s10681_s10 }
 0x200   : > { %v12067_v31 = vpop.permute.xlu1 %2467  ;;  %v12069_v23 = vpop.permute.xlu0 %2465 }
 0x201   : > { %14857 = vst [vmem:[#allocation28_spill] sm:$0xff] %v12067_v31  ;;  %14858 = vst [vmem:[#allocation33_spill] sm:$0xff] %v12069_v23  ;;  %v2862_v23 = vshll.u32 %v10291_v25, 16  ;;  %v10293_v31 = vld [vmem:[%s10752_s30 + $0x3c8] sm:$0x1f]  }
 0x202   : > { %5264 = vrot.lane.b32.xlu1 %v10280_v15, %s10682_s11  ;;  %5262 = vrot.lane.b32.xlu0 %v10281_v56, %s10682_s11  ;;  %v10286_v15 = vld [vmem:[%s10752_s30 + $0x450] ss:$0 sps:$4 sm:$0xff]   ;;  %v10287_v56 = vld [vmem:[%s10752_s30 + $0x448] ss:$0 sps:$4 sm:$0xff]   ;;  %v2960_v16 = vshll.u32 %v10293_v31, 16 }
 0x203   : > { %v2864_v55 = vrot.slane %v2862_v23, 1 }
 0x204   : > { %v12077_v46 = vpop.permute.xlu1 %2471  ;;  %v12079_v32 = vpop.permute.xlu0 %2469  ;;  %v2962_v23 = vrot.slane %v2960_v16, 1 }
 0x205   : > { %14859 = vst [vmem:[#allocation56_spill] sm:$0xff] %v12077_v46  ;;  %14860 = vst [vmem:[#allocation34_spill] sm:$0xff] %v12079_v32  ;;  %v5366_v32 = vshrl.u32 %v10288_v40, 16  ;;  %v2869_v46 = vshll.u32 %v10290_v43, 16 }
 0x206   : > { %5268 = vrot.lane.b32.xlu1 %v10282_v6, %s10682_s11  ;;  %5266 = vrot.lane.b32.xlu0 %v10283_v10, %s10682_s11  ;;  %v5370_v6 = vrot.slane %v5368_v41, 1  ;;  %v5359_v10 = vshrl.u32 %v10289_v3, 16  ;;  %v2967_v41 = vshll.u32 %v10292_v1, 16  ;;  %v2860_v3 = vshrl.u32 %v10291_v25, 16 }
 0x207   : > { %v2871_v40 = vrot.slane %v2869_v46, 1  ;;  %v2958_v25 = vshrl.u32 %v10293_v31, 16  ;;  %v5373_v31 = vshrl.u32 %v10295_v60, 16 }
 0x208   : > { %v12087_v13 = vpop.permute.xlu1 %2571  ;;  %v12089_v35 = vpop.permute.xlu0 %2569  ;;  %v5371_v30 = vor.u32 %v5370_v6, %v5366_v32  ;;  %v2969_v46 = vrot.slane %v2967_v41, 1  ;;  %v10296_v6 = vld [vmem:[%s10752_s30 + $0x3b0] sm:$0x1f]   ;;  %v10298_v41 = vld [vmem:[%s10752_s30 + $0x3e0] sm:$0x1f]  }
 0x20a   : > { %5304 = vrot.lane.b32.xlu1 %v10284_v28, %s10683_s12  ;;  %5302 = vrot.lane.b32.xlu0 %v10285_v50, %s10683_s12  ;;  %v2867_v28 = vshrl.u32 %v10290_v43, 16  ;;  %v5364_v50 = vor.u32 %v5363_v45, %v5359_v10  ;;  %v2965_v43 = vshrl.u32 %v10292_v1, 16  ;;  %v2865_v45 = vor.u32 %v2864_v55, %v2860_v3  ;;  %v10297_v10 = vld [vmem:[%s10752_s30 + $0x3a8] sm:$0x1f]   ;;  %v10299_v55 = vld [vmem:[%s10752_s30 + $0x3d8] sm:$0x1f]  }
 0x20b   : > { %v5380_v1 = vshrl.u32 %v10294_v61, 16  ;;  %v5473_v3 = vshll.u32 %v10297_v10, 16 }
 0x20c   : > { %v12097_v51 = vpop.permute.xlu1 %2575  ;;  %v12099_v44 = vpop.permute.xlu0 %2573  ;;  %v2872_v32 = vor.u32 %v2871_v40, %v2867_v28  ;;  %v5480_v40 = vshll.u32 %v10296_v6, 16 }
 0x20d   : > { %14861 = vst [vmem:[#allocation41_spill] sm:$0xff] %v12097_v51  ;;  %14862 = vst [vmem:[#allocation42_spill] sm:$0xff] %v12099_v44 }
 0x20e   : > { %5308 = vrot.lane.b32.xlu1 %v10286_v15, %s10683_s12  ;;  %5306 = vrot.lane.b32.xlu0 %v10287_v56, %s10683_s12  ;;  %v5382_v15 = vshll.u32 %v10294_v61, 16  ;;  %v5375_v56 = vshll.u32 %v10295_v60, 16  ;;  %v5478_v61 = vshrl.u32 %v10296_v6, 16  ;;  %v5475_v60 = vrot.slane %v5473_v3, 1 }
 0x210   : > { %v12105_v59 = vpop.permute.xlu1 %2579  ;;  %v12107_v14 = vpop.permute.xlu0 %2577  ;;  %v5384_v28 = vrot.slane %v5382_v15, 1  ;;  %v5377_v16 = vrot.slane %v5375_v56, 1  ;;  %v10300_v15 = vld [vmem:[%s10752_s30 + $0x3c0] sm:$0x1f]   ;;  %v10301_v56 = vld [vmem:[%s10752_s30 + $0x3b8] sm:$0x1f]  }
 0x211   : > { %14863 = vst [vmem:[#allocation49_spill] sm:$0xff] %v12105_v59  ;;  %14864 = vst [vmem:[#allocation29_spill] sm:$0xff] %v12107_v14  ;;  %v5494_v6 = vshll.u32 %v10300_v15, 16 }
 0x212   : > { %5416 = vrot.lane.b32.xlu1 %v5371_v30, %s10684_s13  ;;  %5414 = vrot.lane.b32.xlu0 %v5364_v50, %s10684_s13  ;;  %v2970_v30 = vor.u32 %v2969_v46, %v2965_v43  ;;  %v2963_v50 = vor.u32 %v2962_v23, %v2958_v25  ;;  %v5482_v43 = vrot.slane %v5480_v40, 1  ;;  %v2981_v46 = vshll.u32 %v10298_v41, 16 }
 0x213   : > { %v5471_v25 = vshrl.u32 %v10297_v10, 16  ;;  %v2974_v23 = vshll.u32 %v10299_v55, 16  ;;  %v2972_v40 = vshrl.u32 %v10299_v55, 16 }
 0x214   : > { %v12113_v44 = vpop.permute.xlu1 %2583  ;;  %v12115_v59 = vpop.permute.xlu0 %2581 }
 0x215   : > { %14865 = vst [vmem:[#allocation50_spill] sm:$0xff] %v12113_v44  ;;  %14866 = vst [vmem:[#allocation57_spill] sm:$0xff] %v12115_v59 }
 0x216   : > { %2887 = vrot.lane.b32.xlu1 %v2872_v32, %s10692_s25  ;;  %2885 = vrot.lane.b32.xlu0 %v2865_v45, %s10692_s25  ;;  %v5385_v32 = vor.u32 %v5384_v28, %v5380_v1  ;;  %v5378_v45 = vor.u32 %v5377_v16, %v5373_v31  ;;  %v2983_v1 = vrot.slane %v2981_v46, 1  ;;  %v5476_v28 = vor.u32 %v5475_v60, %v5471_v25  ;;  %v10302_v60 = vld [vmem:[%s10752_s30 + $0xa0] ss:$0 sps:$4 sm:$0xff]  }
 0x217   : > { %v5487_v31 = vshll.u32 %v10301_v56, 16 }
 0x218   : > { %v12121_v14 = vpop.permute.xlu1 %2683  ;;  %v12123_v44 = vpop.permute.xlu0 %2681 }
 0x219   : > { %14867 = vst [vmem:[#allocation35_spill] sm:$0xff] %v12123_v44  ;;  %v5483_v44 = vor.u32 %v5482_v43, %v5478_v61  ;;  %v5485_v61 = vshrl.u32 %v10301_v56, 16  ;;  %v5489_v43 = vrot.slane %v5487_v31, 1  ;;  %v8742_v31 = vld [vmem:[%s10752_s30 + $0x98] sm:$0xf] }
 0x21a   : > { %2995 = vrot.lane.b32.xlu1 %v2970_v30, %s10693_s21  ;;  %2993 = vrot.lane.b32.xlu0 %v2963_v50, %s10693_s21  ;;  %v2979_v30 = vshrl.u32 %v10298_v41, 16  ;;  %v2976_v50 = vrot.slane %v2974_v23, 1  ;;  %v10303_v23 = vld [vmem:[%s10752_s30 + $0x98] ss:$0 sps:$4 sm:$0xff]  }
 0x21c   : > { %v12129_v59 = vpop.permute.xlu1 %2687  ;;  %v12131_v51 = vpop.permute.xlu0 %2685  ;;  %v2984_v3 = vor.u32 %v2983_v1, %v2979_v30  ;;  %v2977_v41 = vor.u32 %v2976_v50, %v2972_v40  ;;  %v10304_v30 = vld [vmem:[%s10752_s30 + $0x290] ss:$0 sps:$4 sm:$0xff]   ;;  %v10305_v1 = vld [vmem:[%s10752_s30 + $0x288] ss:$0 sps:$4 sm:$0xff]   ;;  %v10306_v40 = vld [vmem:[%s10752_s30 + $0x340] ss:$0 sps:$4 sm:$0xff]  }
 0x21d   : > { %14868 = vst [vmem:[#allocation58_spill] sm:$0xff] %v12131_v51  ;;  %v5492_v51 = vshrl.u32 %v10300_v15, 16  ;;  %v10307_v50 = vld [vmem:[%s10752_s30 + $0x338] ss:$0 sps:$4 sm:$0xff]  }
 0x21e   : > { %5420 = vrot.lane.b32.xlu1 %v5385_v32, %s10684_s13  ;;  %5418 = vrot.lane.b32.xlu0 %v5378_v45, %s10684_s13  ;;  %v5496_v32 = vrot.slane %v5494_v6, 1 }
 0x220   : > { %v12135_v10 = vpop.permute.xlu1 %2691  ;;  %v12137_v16 = vpop.permute.xlu0 %2689  ;;  %v5497_v45 = vor.u32 %v5496_v32, %v5492_v51 }
 0x221   : > { %14869 = vst [vmem:[#allocation36_spill] sm:$0xff] %v12137_v16 }
 0x222   : > { %5528 = vrot.lane.b32.xlu1 %v5483_v44, %s10685_s14  ;;  %5526 = vrot.lane.b32.xlu0 %v5476_v28, %s10685_s14  ;;  %v5490_v44 = vor.u32 %v5489_v43, %v5485_v61  ;;  %v10324_v43 = vld [vmem:[%s10752_s30 + $0x268] sm:$0x1f]  }
 0x224   : > { %v12141_v55 = vpop.permute.xlu1 %2695  ;;  %v12143_v46 = vpop.permute.xlu0 %2693 }
 0x225   : > { %14870 = vst [vmem:[#allocation43_spill] sm:$0xff] %v12141_v55  ;;  %14871 = vst [vmem:[#allocation44_spill] sm:$0xff] %v12143_v46  ;;  %v3006_v46 = vsel %vm1169_vm0, %v8742_v31, %v11701_v62  ;;  %v10312_v31 = vld [vmem:[%s10752_s30 + $0xe8] ss:$0 sps:$4 sm:$0xff]  }
 0x226   : > { %2999 = vrot.lane.b32.xlu1 %v2984_v3, %s10693_s21  ;;  %2997 = vrot.lane.b32.xlu0 %v2977_v41, %s10693_s21  ;;  %v8741_v3 = vld [vmem:[%s10752_s30 + $0x90] sm:$0xf]  ;;  %v8744_v41 = vld [vmem:[%s10752_s30 + $0xa8] sm:$0xf]  ;;  %v3028_v62 = vsel %vm1194_vm1, %v3006_v46, %v11735_v26 }
 0x227   : > { %v10313_v26 = vld [vmem:[%s10752_s30 + $0xe0] ss:$0 sps:$4 sm:$0xff]  }
 0x228   : > { %v12147_v15 = vpop.permute.xlu1 %2723  ;;  %v12149_v25 = vpop.permute.xlu0 %2721 }
 0x22a   : > { %5532 = vrot.lane.b32.xlu1 %v5497_v45, %s10685_s14  ;;  %5530 = vrot.lane.b32.xlu0 %v5490_v44, %s10685_s14  ;;  %v12180_v45 = vld [vmem:[%s10752_s30 + $0x260] sm:$0x1f]   ;;  %v10309_v44 = vld [vmem:[%s10752_s30 + $0xb0] ss:$0 sps:$4 sm:$0xff]  }
 0x22c   : > { %v12155_v56 = vpop.permute.xlu1 %2727  ;;  %v12157_v51 = vpop.permute.xlu0 %2725 }
 0x22e   : > { %5568 = vrot.lane.b32.xlu1 %v10302_v60, %s10686_s15  ;;  %5566 = vrot.lane.b32.xlu0 %v10303_v23, %s10686_s15  ;;  %v10330_v60 = vld [vmem:[%s10752_s30 + $0x10] sm:$0x1f]   ;;  %v10331_v23 = vld [vmem:[%s10752_s30 + $0x8] sm:$0x1f]  }
 0x22f   : > { %v5672_v16 = vshll.u32 %v10330_v60, 16 }
 0x230   : > { %v12163_v6 = vpop.permute.xlu1 %2731  ;;  %v12165_v28 = vpop.permute.xlu0 %2729 }
 0x231   : > { %14872 = vst [vmem:[#allocation51_spill] sm:$0xff] %v12163_v6  ;;  %14873 = vst [vmem:[#allocation30_spill] sm:$0xff] %v12165_v28  ;;  %v5092_v28 = vshll.u32 %v10324_v43, 16  ;;  %v5085_v6 = vshll.u32 %v12180_v45, 16 }
 0x232   : > { %3759 = vrot.lane.b32.xlu1 %v10304_v30, %s10679_s8  ;;  %3757 = vrot.lane.b32.xlu0 %v10305_v1, %s10679_s8  ;;  %v8743_v30 = vld [vmem:[%s10752_s30 + $0xa0] sm:$0xf]  ;;  %v10310_v1 = vld [vmem:[%s10752_s30 + $0xa8] ss:$0 sps:$4 sm:$0xff]  }
 0x234   : > { %v12173_v32 = vpop.permute.xlu1 %2735  ;;  %v12176_v61 = vpop.permute.xlu0 %2733 }
 0x235   : > { %14874 = vst [vmem:[#allocation52_spill] sm:$0xff] %v12173_v32  ;;  %14875 = vst [vmem:[#allocation60_spill] sm:$0xff] %v12176_v61  ;;  %v3003_v61 = vsel %vm1169_vm0, %v8741_v3, %v11703_v63  ;;  %v5665_v63 = vshll.u32 %v10331_v23, 16 }
 0x236   : > { %5008 = vrot.lane.b32.xlu1 %v10306_v40, %s10679_s8  ;;  %5006 = vrot.lane.b32.xlu0 %v10307_v50, %s10679_s8  ;;  %v3012_v40 = vsel %vm1169_vm0, %v8744_v41, %v11709_v2  ;;  %v3009_v50 = vsel %vm1169_vm0, %v8743_v30, %v11712_v5  ;;  %v3026_v3 = vsel %vm1194_vm1, %v3003_v61, %v11737_v58  ;;  %v5094_v30 = vrot.slane %v5092_v28, 1 }
 0x237   : > { %v3032_v2 = vsel %vm1194_vm1, %v3012_v40, %v11745_v54  ;;  %v3030_v41 = vsel %vm1194_vm1, %v3009_v50, %v11747_v38  ;;  %v3044_v5 = vsel %vm1211_vm2, %v3028_v62, %v11771_v57  ;;  %v3042_v46 = vsel %vm1211_vm2, %v3026_v3, %v11773_v4  ;;  %v10315_v4 = vld [vmem:[%s10752_s30 + $0x2a0] ss:$0 sps:$4 sm:$0xff]  }
 0x238   : > { %v12191_v32 = vpop.permute.xlu1 %2763  ;;  %v12197_v55 = vpop.permute.xlu0 %2761  ;;  %v3046_v58 = vsel %vm1211_vm2, %v3030_v41, %v11781_v19  ;;  %v3060_v54 = vsel %vm1228_vm3, %v3044_v5, %v11801_v52  ;;  %v5090_v57 = vshrl.u32 %v10324_v43, 16  ;;  %v5087_v40 = vrot.slane %v5085_v6, 1  ;;  %v10316_v6 = vld [vmem:[%s10752_s30 + $0x298] ss:$0 sps:$4 sm:$0xff]   ;;  %v10319_v5 = vld [vmem:[%s10752_s30 + $0x2d0] ss:$0 sps:$4 sm:$0xff]  }
 0x239   : > { %v5674_v50 = vrot.slane %v5672_v16, 1  ;;  %v5663_v62 = vshrl.u32 %v10331_v23, 16  ;;  %v5667_v19 = vrot.slane %v5665_v63, 1  ;;  %v3058_v52 = vsel %vm1228_vm3, %v3042_v46, %v11803_v9 }
 0x23a   : > { %5572 = vrot.lane.b32.xlu1 %v10309_v44, %s10686_s15  ;;  %5570 = vrot.lane.b32.xlu0 %v10310_v1, %s10686_s15  ;;  %v3048_v44 = vsel %vm1211_vm2, %v3032_v2, %v11779_v29  ;;  %v5083_v1 = vshrl.u32 %v12180_v45, 16  ;;  %v5670_v29 = vshrl.u32 %v10330_v60, 16  ;;  %v3062_v43 = vsel %vm1228_vm3, %v3046_v58, %v11809_v20 }
 0x23b   : > { %v3064_v3 = vsel %vm1228_vm3, %v3048_v44, %v11807_v36  ;;  %v3076_v28 = vsel %vm1245_vm4, %v3060_v54, %v11832_v47  ;;  %v3074_v16 = vsel %vm1245_vm4, %v3058_v52, %v11834_v48  ;;  %v3078_v9 = vsel %vm1245_vm4, %v3062_v43, %v11845_v33  ;;  %v14878_v43 = vld [vmem:[#allocation35_spill] sm:$0xff] }
 0x23c   : > { %v12224_v61 = vpop.permute.xlu1 %2767  ;;  %v12226_v38 = vpop.permute.xlu0 %2765  ;;  %v3080_v45 = vsel %vm1245_vm4, %v3064_v3, %v11843_v53  ;;  %v3092_v36 = vsel %vm1262_vm5, %v3076_v28, %v11914_v18  ;;  %v3090_v47 = vsel %vm1262_vm5, %v3074_v16, %v11919_v7  ;;  %v3094_v48 = vsel %vm1262_vm5, %v3078_v9, %v11934_v0  ;;  %v12267_v18 = vld [vmem:[%s14671_s2] ss:$0 sm:$0xff]  ;;  %v10318_v7 = vld [vmem:[%s10752_s30 + $0x2d8] ss:$0 sps:$4 sm:$0xff]  }
 0x23d   : > { %v3096_v60 = vsel %vm1262_vm5, %v3080_v45, %v11928_v37  ;;  %v12259_v53 = vor.u32 %v5094_v30, %v5090_v57  ;;  %v3108_v33 = vsel %vm14694_vm6, %v3092_v36, %v11985_v24  ;;  %v12270_v37 = vor.u32 %v5087_v40, %v5083_v1  ;;  %v14876_v30 = vld [vmem:[#allocation41_spill] sm:$0xff]  ;;  %v14877_v40 = vld [vmem:[#allocation42_spill] sm:$0xff] }
 0x23e   : > { %5608 = vrot.lane.b32.xlu1 %v10312_v31, %s10687_s16  ;;  %5606 = vrot.lane.b32.xlu0 %v10313_v26, %s10687_s16  ;;  %v12272_v31 = vor.u32 %v5674_v50, %v5670_v29  ;;  %v12274_v0 = vor.u32 %v5667_v19, %v5663_v62  ;;  %v3106_v63 = vsel %vm14694_vm6, %v3090_v47, %v11987_v17 }
 0x23f   : > { %v3112_v24 = vsel %vm14694_vm6, %v3096_v60, %v11991_v39  ;;  %v3110_v2 = vsel %vm14694_vm6, %v3094_v48, %v11993_v34  ;;  %v3124_v41 = vsel %vm14693_vm7, %v3108_v33, %v12021_v22  ;;  %v3122_v26 = vsel %vm14693_vm7, %v3106_v63, %v12025_v21  ;;  %v14879_v60 = vld [vmem:[#allocation58_spill] sm:$0xff] }
 0x240   : > { %v12249_v20 = vpop.permute.xlu1 %2771  ;;  %v12257_v23 = vpop.permute.xlu0 %2769  ;;  %v3128_v46 = vsel %vm14693_vm7, %v3112_v24, %v12033_v8  ;;  %v3126_v17 = vsel %vm14693_vm7, %v3110_v2, %v12035_v49  ;;  %v3140_v39 = vsel %vm14684_vm8, %v3124_v41, %v12053_v27  ;;  %v3138_v22 = vsel %vm14684_vm8, %v3122_v26, %v12055_v12 }
 0x241   : > { %v3144_v58 = vsel %vm14684_vm8, %v3128_v46, %v12059_v11  ;;  %v3142_v21 = vsel %vm14684_vm8, %v3126_v17, %v12061_v42  ;;  %v3156_v27 = vsel %vm14683_vm9, %v3140_v39, %v12087_v13  ;;  %v3154_v57 = vsel %vm14683_vm9, %v3138_v22, %v12089_v35  ;;  %v10321_v42 = vld [vmem:[%s10752_s30 + $0x350] ss:$0 sps:$4 sm:$0xff]   ;;  %v10322_v35 = vld [vmem:[%s10752_s30 + $0x348] ss:$0 sps:$4 sm:$0xff]  }
 0x242   : > { %3763 = vrot.lane.b32.xlu1 %v10315_v4, %s10679_s8  ;;  %3761 = vrot.lane.b32.xlu0 %v10316_v6, %s10679_s8  ;;  %v3160_v12 = vsel %vm14683_vm9, %v3144_v58, %v14876_v30  ;;  %v3158_v4 = vsel %vm14683_vm9, %v3142_v21, %v14877_v40  ;;  %v3172_v62 = vsel %vm14686_vm10, %v3156_v27, %v12121_v14  ;;  %v10327_v21 = vld [vmem:[%s10752_s30 + $0xf8] ss:$0 sps:$4 sm:$0xff]  }
 0x243   : > { %v9881_v34 = vpop.f32.mrb[0].mxu0  ;;  %v3170_v28 = vsel %vm14686_vm10, %v3154_v57, %v14878_v43  ;;  %v3176_v14 = vsel %vm14686_vm10, %v3160_v12, %v12129_v59  ;;  %v3174_v48 = vsel %vm14686_vm10, %v3158_v4, %v14879_v60  ;;  %v3188_v63 = vsel %vm14685_vm11, %v3172_v62, %v12147_v15  ;;  %v10337_v62 = vld [vmem:[%s10752_s30 + $0x270] sm:$0x1f]  }
 0x244   : > { %v12294_v44 = vpop.permute.xlu1 %2775  ;;  %v1570_v8 = vadd.f32 %v9881_v34, %v12267_v18  ;;  %v12303_v49 = vpop.permute.xlu0 %2773  ;;  %v3186_v24 = vsel %vm14685_vm11, %v3170_v28, %v12149_v25  ;;  %v3192_v26 = vsel %vm14685_vm11, %v3176_v14, %v12155_v56  ;;  %v3190_v46 = vsel %vm14685_vm11, %v3174_v48, %v12157_v51  ;;  %v10338_v14 = vld [vmem:[%s10752_s30 + $0x2b0] sm:$0x1f]   ;;  %v10333_v48 = vld [vmem:[%s10752_s30 + $0x2e0] ss:$0 sps:$4 sm:$0xff]  }
 0x245   : > { %v1561_v54 = vpop.f32.mrb[1].mxu0  ;;  %vm14885_vm11 = vcmask 982016  }
 0x246   : > { %v1562_v11 = vadd.f32 %v12267_v18, %v1561_v54  ;;  %v9882_v1 = vpop.f32.mrb[2].mxu0  ;;  %3799 = vrot.lane.b32.xlu1 %v10318_v7, %s10680_s9  ;;  %vm1594_vm13 = vcmp.ge.f32.partialorder %v1570_v8, 0.0  ;;  %v1602_v29 = vmul.f32 0.2, %v1570_v8  ;;  %3797 = vrot.lane.b32.xlu0 %v10319_v5, %s10680_s9  ;;  %v10328_v54 = vld [vmem:[%s10752_s30 + $0xf0] ss:$0 sps:$4 sm:$0xff]  }
 0x247   : > { %v1573_v50 = vadd.f32 %v9882_v1, %v12267_v18  ;;  %v1564_v13 = vpop.f32.mrb[3].mxu0 }
 0x248   : > { %vm1592_vm14 = vcmp.ge.f32.partialorder %v1562_v11, 0.0  ;;  %v1600_v19 = vmul.f32 0.2, %v1562_v11  ;;  %v1565_v52 = vadd.f32 %v12267_v18, %v1564_v13  ;;  %v2876_v3 = vpop.permute.xlu1 %2875  ;;  %v1610_v6 = vsel %vm1594_vm13, %v1570_v8, %v1602_v29  ;;  %v2874_v45 = vpop.permute.xlu0 %2873  ;;  %v10336_v29 = vld [vmem:[%s10752_s30 + $0x278] sm:$0x1f]  }
 0x249   : > { %vm1595_vm9 = vcmp.ge.f32.partialorder %v1573_v50, 0.0  ;;  %v1603_v16 = vmul.f32 0.2, %v1573_v50  ;;  %v1618_v9 = vpack.c.bf16 %v1610_v6, %v1610_v6 }
 0x24a   : > { %v1608_v36 = vsel %vm1592_vm14, %v1562_v11, %v1600_v19  ;;  %vm1593_vm8 = vcmp.ge.f32.partialorder %v1565_v52, 0.0  ;;  %v1601_v47 = vmul.f32 0.2, %v1565_v52  ;;  %5012 = vrot.lane.b32.xlu1 %v10321_v42, %s10679_s8  ;;  %5010 = vrot.lane.b32.xlu0 %v10322_v35, %s10679_s8  ;;  %vm14883_vm14 = vcmask 916480  }
 0x24b   : > { %v1616_v33 = vpack.c.bf16 %v1608_v36, %v1608_v36  ;;  %v1611_v7 = vsel %vm1595_vm9, %v1573_v50, %v1603_v16  ;;  %1627 = vst.msk [vmem:[#allocation2 + $0xe8] sm:$0xf] %vm14689_vm15, %v1618_v9  ;;  %v9885_v5 = vpop.f32.mrb[4].mxu0  ;;  %vm14880_vm9 = vcmask 850944   ;;  %v10332_v36 = vld [vmem:[%s10752_s30 + $0x2e8] ss:$0 sps:$4 sm:$0xff]  }
 0x24c   : > { %v1619_v2 = vpack.c.bf16 %v1611_v7, %v1611_v7  ;;  %v1609_v41 = vsel %vm1593_vm8, %v1565_v52, %v1601_v47  ;;  %v2880_v59 = vpop.permute.xlu1 %2879  ;;  %v1586_v15 = vadd.f32 %v9885_v5, %v12267_v18  ;;  %v2878_v39 = vpop.permute.xlu0 %2877  ;;  %v3204_v34 = vsel %vm14880_vm9, %v3188_v63, %v12191_v32  ;;  %vm14881_vm8 = vmmov %vm14880_vm9  ;;  %v10339_v7 = vld [vmem:[%s10752_s30 + $0x2a8] sm:$0x1f]  }
 0x24d   : > { %1625 = vst.msk [vmem:[#allocation2 + $0xd8] sm:$0xf] %vm14689_vm15, %v1616_v33  ;;  %v1617_v17 = vpack.c.bf16 %v1609_v41, %v1609_v41  ;;  %v1577_v25 = vpop.f32.mrb[5].mxu0  ;;  %v3202_v22 = vsel %vm14881_vm8, %v3186_v24, %v12197_v55  ;;  %vm14882_vm13 = vmmov %vm14881_vm8  ;;  %v3220_v8 = vsel %vm14883_vm14, %v3204_v34, %v2876_v3  ;;  %v5106_v47 = vshll.u32 %v10336_v29, 16 }
 0x24e   : > { %v3208_v56 = vsel %vm14882_vm13, %v3192_v26, %v12224_v61  ;;  %1628 = vst.msk [vmem:[#allocation2 + $0xf0] sm:$0xf] %vm14689_vm15, %v1619_v2  ;;  %v1578_v51 = vadd.f32 %v12267_v18, %v1577_v25  ;;  %v9886_v58 = vpop.f32.mrb[6].mxu0  ;;  %5120 = vrot.lane.b32.xlu1 %v12259_v53, %s10680_s9  ;;  %vm1598_vm9 = vcmp.ge.f32.partialorder %v1586_v15, 0.0  ;;  %v1606_v32 = vmul.f32 0.2, %v1586_v15  ;;  %5118 = vrot.lane.b32.xlu0 %v12270_v37, %s10680_s9  ;;  %vm14884_vm8 = vmmov %vm14883_vm14 }
 0x24f   : > { %1626 = vst.msk [vmem:[#allocation2 + $0xe0] sm:$0xf] %vm14689_vm15, %v1617_v17  ;;  %v1589_v55 = vadd.f32 %v9886_v58, %v12267_v18  ;;  %v1580_v61 = vpop.f32.mrb[7].mxu0  ;;  %v3218_v27 = vsel %vm14884_vm8, %v3202_v22, %v2874_v45  ;;  %vm14886_vm8 = vcmask 850944   ;;  %v5099_v33 = vshll.u32 %v10337_v62, 16 }
 0x250   : > { %vm1596_vm13 = vcmp.ge.f32.partialorder %v1578_v51, 0.0  ;;  %v1604_v57 = vmul.f32 0.2, %v1578_v51  ;;  %v1581_v53 = vadd.f32 %v12267_v18, %v1580_v61  ;;  %v2988_v30 = vpop.permute.xlu1 %2987  ;;  %v1614_v12 = vsel %vm1598_vm9, %v1586_v15, %v1606_v32  ;;  %v2986_v1 = vpop.permute.xlu0 %2985  ;;  %vm14887_vm9 = vmmov %vm14885_vm11  ;;  %v10335_v2 = vld [vmem:[%s10752_s30 + $0x318] ss:$0 sps:$4 sm:$0xff]  }
 0x251   : > { %vm1599_vm14 = vcmp.ge.f32.partialorder %v1589_v55, 0.0  ;;  %v1607_v11 = vmul.f32 0.2, %v1589_v55  ;;  %v3236_v42 = vsel %vm14885_vm11, %v3220_v8, %v2988_v30  ;;  %v1622_v40 = vpack.c.bf16 %v1614_v12, %v1614_v12  ;;  %v10340_v26 = vld [vmem:[%s10752_s30 + $0x20] sm:$0x1f]  }
 0x252   : > { %v1612_v4 = vsel %vm1596_vm13, %v1578_v51, %v1604_v57  ;;  %vm1597_vm10 = vcmp.ge.f32.partialorder %v1581_v53, 0.0  ;;  %v1605_v37 = vmul.f32 0.2, %v1581_v53  ;;  %5612 = vrot.lane.b32.xlu1 %v10327_v21, %s10687_s16  ;;  %v3206_v50 = vsel %vm14886_vm8, %v3190_v46, %v12226_v38  ;;  %5610 = vrot.lane.b32.xlu0 %v10328_v54, %s10687_s16  ;;  %vm14891_vm8 = vmmov %vm14887_vm9  ;;  %v10341_v15 = vld [vmem:[%s10752_s30 + $0x18] sm:$0x1f]  }
 0x253   : > { %v1620_v13 = vpack.c.bf16 %v1612_v4, %v1612_v4  ;;  %v1615_v18 = vsel %vm1599_vm14, %v1589_v55, %v1607_v11  ;;  %v3234_v35 = vsel %vm14887_vm9, %v3218_v27, %v2986_v1  ;;  %1631 = vst.msk [vmem:[#allocation2 + $0x108] sm:$0xf] %vm14689_vm15, %v1622_v40  ;;  %vm14888_vm11 = vcmask 916480   ;;  %vm14890_vm14 = vmmov %vm14887_vm9  ;;  %v10342_v58 = vld [vmem:[%s10752_s30 + $0x58] sm:$0x1f]  }
 0x254   : > { %v3224_v19 = vsel %vm14888_vm11, %v3208_v56, %v2880_v59  ;;  %v1623_v52 = vpack.c.bf16 %v1615_v18, %v1615_v18  ;;  %v1613_v3 = vsel %vm1597_vm10, %v1581_v53, %v1605_v37  ;;  %v2992_v43 = vpop.permute.xlu1 %2991  ;;  %v9038_v28 = vcombine.low %v3234_v35, %v3236_v42  ;;  %vm14889_vm13 = vmmov %vm14888_vm11  ;;  %v2990_v45 = vpop.permute.xlu0 %2989  ;;  %v10343_v61 = vld [vmem:[%s10752_s30 + $0x50] sm:$0x1f]  }
 0x255   : > { %v3222_v38 = vsel %vm14889_vm13, %v3206_v50, %v2878_v39  ;;  %1629 = vst.msk [vmem:[#allocation2 + $0xf8] sm:$0xf] %vm14689_vm15, %v1620_v13  ;;  %v1621_v6 = vpack.c.bf16 %v1613_v3, %v1613_v3  ;;  %v3240_v16 = vsel %vm14890_vm14, %v3224_v19, %v2992_v43  ;;  %v5104_v41 = vshrl.u32 %v10336_v29, 16  ;;  %v10348_v43 = vld [vmem:[%s10752_s30 + $0x2c0] sm:$0x1f]  }
 0x256   : > { %1632 = vst.msk [vmem:[#allocation2 + $0x110] sm:$0xf] %vm14689_vm15, %v1623_v52  ;;  %9903 = vmatprep.mubr.bf16.mxu1 %v9038_v28  ;;  %v3238_v9 = vsel %vm14891_vm8, %v3222_v38, %v2990_v45  ;;  %5720 = vrot.lane.b32.xlu1 %v12272_v31, %s10688_s17  ;;  %v10334_v31 = vld [vmem:[%s10752_s30 + $0x320] ss:$0 sps:$4 sm:$0xff]   ;;  %v5108_v5 = vrot.slane %v5106_v47, 1  ;;  %v5204_v59 = vshll.u32 %v10338_v14, 16 }
 0x257   : > { %1630 = vst.msk [vmem:[#allocation2 + $0x100] sm:$0xf] %vm14689_vm15, %v1621_v6  ;;  %v9039_v60 = vcombine.low %v3238_v9, %v3240_v16  ;;  %5718 = vrot.lane.b32.xlu0 %v12274_v0, %s10688_s17  ;;  %v5097_v0 = vshrl.u32 %v10337_v62, 16  ;;  %v5101_v46 = vrot.slane %v5099_v33, 1  ;;  %v5197_v17 = vshll.u32 %v10339_v7, 16 }
 0x258   : > { %v12384_v63 = vpop.permute.xlu1 %2883  ;;  %v12386_v24 = vpop.permute.xlu0 %2881  ;;  %v5109_v34 = vor.u32 %v5108_v5, %v5104_v41  ;;  %v5202_v22 = vshrl.u32 %v10338_v14, 16  ;;  %v5206_v56 = vrot.slane %v5204_v59, 1  ;;  %v5686_v51 = vshll.u32 %v10340_v26, 16  ;;  %v10349_v38 = vld [vmem:[%s10752_s30 + $0x2b8] sm:$0x1f]  }
 0x259   : > { %9904 = vmatmul.mubr.bf16.vlgmr.msra.gmra.mrb[0].mxu1 %v9039_v60  ;;  %v5102_v21 = vor.u32 %v5101_v46, %v5097_v0  ;;  %v5195_v8 = vshrl.u32 %v10339_v7, 16  ;;  %v5199_v32 = vrot.slane %v5197_v17, 1  ;;  %v5679_v55 = vshll.u32 %v10341_v15, 16  ;;  %v10344_v45 = vld [vmem:[%s10752_s30 + $0x330] ss:$0 sps:$4 sm:$0xff]  }
 0x25a   : > { %3803 = vrot.lane.b32.xlu1 %v10332_v36, %s10680_s9  ;;  %v5207_v57 = vor.u32 %v5206_v56, %v5202_v22  ;;  %v5684_v53 = vshrl.u32 %v10340_v26, 16  ;;  %v5688_v30 = vrot.slane %v5686_v51, 1  ;;  %v5784_v12 = vshll.u32 %v10342_v58, 16  ;;  %v10345_v36 = vld [vmem:[%s10752_s30 + $0x328] ss:$0 sps:$4 sm:$0xff]  }
 0x25b   : > { %3801 = vrot.lane.b32.xlu0 %v10333_v48, %s10680_s9  ;;  %v5200_v11 = vor.u32 %v5199_v32, %v5195_v8  ;;  %v5677_v1 = vshrl.u32 %v10341_v15, 16  ;;  %v5681_v42 = vrot.slane %v5679_v55, 1  ;;  %v5777_v40 = vshll.u32 %v10343_v61, 16  ;;  %v10346_v48 = vld [vmem:[%s10752_s30 + $0x368] ss:$0 sps:$4 sm:$0xff]  }
 0x25c   : > { %v12394_v39 = vpop.permute.xlu1 %5000  ;;  %v12396_v25 = vpop.permute.xlu0 %4998  ;;  %v5689_v29 = vor.u32 %v5688_v30, %v5684_v53  ;;  %v5782_v50 = vshrl.u32 %v10342_v58, 16  ;;  %v5786_v13 = vrot.slane %v5784_v12, 1  ;;  %v5775_v35 = vshrl.u32 %v10343_v61, 16  ;;  %v10353_v59 = vld [vmem:[%s10752_s30 + $0x60] sm:$0x1f]  }
 0x25d   : > { %v5682_v18 = vor.u32 %v5681_v42, %v5677_v1  ;;  %v5779_v62 = vrot.slane %v5777_v40, 1  ;;  %v5218_v9 = vshll.u32 %v10348_v43, 16  ;;  %v5211_v47 = vshll.u32 %v10349_v38, 16  ;;  %v10350_v51 = vld [vmem:[%s10752_s30 + $0x418] ss:$0 sps:$4 sm:$0xff]   ;;  %v14893_v40 = vld [vmem:[#allocation5_spill] sm:$0xff] }
 0x25e   : > { %3839 = vrot.lane.b32.xlu1 %v10334_v31, %s10681_s10  ;;  %v5787_v3 = vor.u32 %v5786_v13, %v5782_v50  ;;  %v5216_v33 = vshrl.u32 %v10348_v43, 16  ;;  %v10352_v31 = vld [vmem:[%s10752_s30 + $0x68] sm:$0x1f]   ;;  %v5209_v41 = vshrl.u32 %v10349_v38, 16  ;;  %v10351_v8 = vld [vmem:[%s10752_s30 + $0x410] ss:$0 sps:$4 sm:$0xff]  }
 0x25f   : > { %3837 = vrot.lane.b32.xlu0 %v10335_v2, %s10681_s10  ;;  %v5780_v28 = vor.u32 %v5779_v62, %v5775_v35  ;;  %v5220_v7 = vrot.slane %v5218_v9, 1  ;;  %v10347_v2 = vld [vmem:[%s10752_s30 + $0x360] ss:$0 sps:$4 sm:$0xff]   ;;  %v5213_v5 = vrot.slane %v5211_v47, 1  ;;  %v5798_v17 = vshll.u32 %v10352_v31, 16  ;;  %v14894_v50 = vld [vmem:[#allocation8_spill] sm:$0xff] }
 0x260   : > { %v12402_v54 = vpop.permute.xlu1 %5004  ;;  %v12404_v27 = vpop.permute.xlu0 %5002  ;;  %v5796_v58 = vshrl.u32 %v10352_v31, 16  ;;  %v5789_v32 = vshrl.u32 %v10353_v59, 16  ;;  %v8746_v61 = vld [vmem:[%s10752_s30 + $0xb8] sm:$0xf]  ;;  %v8745_v53 = vld [vmem:[%s10752_s30 + $0xb0] sm:$0xf] }
 0x261   : > { %v5221_v46 = vor.u32 %v5220_v7, %v5216_v33  ;;  %v5214_v15 = vor.u32 %v5213_v5, %v5209_v41  ;;  %v14895_v35 = vld [vmem:[#allocation64_spill] sm:$0xff]  ;;  %v14897_v38 = vld [vmem:[#allocation11_spill] sm:$0xff]  ;;  %v14898_v9 = vld [vmem:[#allocation14_spill] sm:$0xff]  ;;  %vm14909_vm10 = vcmask 588800   ;;  %vm14913_vm11 = vcmask 654336  }
 0x262   : > { %5124 = vrot.lane.b32.xlu1 %v5109_v34, %s10680_s9  ;;  %v5791_v34 = vshll.u32 %v10353_v59, 16  ;;  %v10354_v47 = vld [vmem:[%s10752_s30 + $0x1c0] ss:$0 sps:$4 sm:$0xff]   ;;  %v14900_v7 = vld [vmem:[#allocation18_spill] sm:$0xff]  ;;  %v14902_v59 = vld [vmem:[#allocation24_spill] sm:$0xff]  ;;  %vm14916_vm14 = vcmask 719872  }
 0x263   : > { %5122 = vrot.lane.b32.xlu0 %v5102_v21, %s10680_s9  ;;  %v5800_v21 = vrot.slane %v5798_v17, 1  ;;  %v14901_v41 = vld [vmem:[#allocation19_spill] sm:$0xff]  ;;  %vm14911_vm9 = vmmov %vm14909_vm10 }
 0x264   : > { %v12408_v4 = vpop.permute.xlu1 %5112  ;;  %v12410_v37 = vpop.permute.xlu0 %5110  ;;  %v5793_v55 = vrot.slane %v5791_v34, 1  ;;  %vm14915_vm13 = vmmov %vm14913_vm11 }
 0x265   : > { %v5801_v12 = vor.u32 %v5800_v21, %v5796_v58  ;;  %vm14918_vm8 = vmmov %vm14916_vm14 }
 0x266   : > { %5232 = vrot.lane.b32.xlu1 %v5207_v57, %s10681_s10  ;;  %v5794_v42 = vor.u32 %v5793_v55, %v5789_v32  ;;  %v14906_v55 = vld [vmem:[#allocation26_spill] sm:$0xff] }
 0x267   : > { %5230 = vrot.lane.b32.xlu0 %v5200_v11, %s10681_s10  ;;  %v14892_v11 = vld [vmem:[#allocation4_spill] sm:$0xff] }
 0x268   : > { %v12414_v19 = vpop.permute.xlu1 %5116  ;;  %v12416_v52 = vpop.permute.xlu0 %5114  ;;  %v3018_v1 = vsel %vm1169_vm0, %v8746_v61, %v14892_v11 }
 0x269   : > { %v3036_v13 = vsel %vm1194_vm1, %v3018_v1, %v14894_v50  ;;  %v14908_v1 = vld [vmem:[#allocation28_spill] sm:$0xff]  ;;  %v14910_v50 = vld [vmem:[#allocation33_spill] sm:$0xff] }
 0x26a   : > { %5724 = vrot.lane.b32.xlu1 %v5689_v29, %s10688_s17  ;;  %v3015_v29 = vsel %vm1169_vm0, %v8745_v53, %v14893_v40  ;;  %v10356_v53 = vld [vmem:[%s10752_s30 + $0x378] ss:$0 sps:$4 sm:$0xff]   ;;  %v10357_v40 = vld [vmem:[%s10752_s30 + $0x370] ss:$0 sps:$4 sm:$0xff]  }
 0x26b   : > { %5722 = vrot.lane.b32.xlu0 %v5682_v18, %s10688_s17  ;;  %v3034_v62 = vsel %vm1194_vm1, %v3015_v29, %v14895_v35  ;;  %v8748_v29 = vld [vmem:[%s10752_s30 + $0xc8] sm:$0xf] }
 0x26c   : > { %v12422_v6 = vpop.permute.xlu1 %5224  ;;  %v12424_v16 = vpop.permute.xlu0 %5222  ;;  %v14912_v35 = vld [vmem:[#allocation49_spill] sm:$0xff] }
 0x26e   : > { %5832 = vrot.lane.b32.xlu1 %v5787_v3, %s10689_s18  ;;  %v14896_v3 = vld [vmem:[#allocation10_spill] sm:$0xff] }
 0x26f   : > { %5830 = vrot.lane.b32.xlu0 %v5780_v28, %s10689_s18  ;;  %v3052_v43 = vsel %vm1211_vm2, %v3036_v13, %v14896_v3 }
 0x270   : > { %v12430_v14 = vpop.permute.xlu1 %5228  ;;  %v12432_v60 = vpop.permute.xlu0 %5226 }
 0x272   : > { %3843 = vrot.lane.b32.xlu1 %v10344_v45, %s10681_s10  ;;  %v3050_v45 = vsel %vm1211_vm2, %v3034_v62, %v14897_v38  ;;  %v14914_v38 = vld [vmem:[#allocation29_spill] sm:$0xff] }
 0x273   : > { %3841 = vrot.lane.b32.xlu0 %v10345_v36, %s10681_s10  ;;  %v3068_v36 = vsel %vm1228_vm3, %v3052_v43, %v14898_v9  ;;  %v8747_v43 = vld [vmem:[%s10752_s30 + $0xc0] sm:$0xf] }
 0x274   : > { %v12440_v26 = vpop.permute.xlu1 %5264  ;;  %v12442_v0 = vpop.permute.xlu0 %5262  ;;  %v3084_v31 = vsel %vm1245_vm4, %v3068_v36, %v14900_v7 }
 0x276   : > { %3879 = vrot.lane.b32.xlu1 %v10346_v48, %s10682_s11  ;;  %v14899_v48 = vld [vmem:[#allocation15_spill] sm:$0xff] }
 0x277   : > { %3877 = vrot.lane.b32.xlu0 %v10347_v2, %s10682_s11  ;;  %v3066_v33 = vsel %vm1228_vm3, %v3050_v45, %v14899_v48  ;;  %v10355_v2 = vld [vmem:[%s10752_s30 + $0x1b8] ss:$0 sps:$4 sm:$0xff]  }
 0x278   : > { %v12446_v22 = vpop.permute.xlu1 %5268  ;;  %v12448_v56 = vpop.permute.xlu0 %5266  ;;  %v3082_v5 = vsel %vm1245_vm4, %v3066_v33, %v14901_v41  ;;  %v14919_v33 = vld [vmem:[#allocation51_spill] sm:$0xff] }
 0x27a   : > { %5236 = vrot.lane.b32.xlu1 %v5221_v46, %s10681_s10  ;;  %v3100_v46 = vsel %vm1262_vm5, %v3084_v31, %v14902_v59  ;;  %v10358_v31 = vld [vmem:[%s10752_s30 + $0x3b0] ss:$0 sps:$4 sm:$0xff]  }
 0x27b   : > { %5234 = vrot.lane.b32.xlu0 %v5214_v15, %s10681_s10  ;;  %v14903_v15 = vld [vmem:[#allocation21_spill] sm:$0xff] }
 0x27c   : > { %v12455_v57 = vpop.permute.xlu1 %5304  ;;  %v12458_v30 = vpop.permute.xlu0 %5302  ;;  %v3098_v34 = vsel %vm1262_vm5, %v3082_v5, %v14903_v15  ;;  %v14922_v5 = vld [vmem:[#allocation30_spill] sm:$0xff]  ;;  %v14925_v15 = vld [vmem:[#allocation7_spill] sm:$0xff] }
 0x27e   : > { %5272 = vrot.lane.b32.xlu1 %v10350_v51, %s10682_s11  ;;  %v14904_v51 = vld [vmem:[#allocation22_spill] sm:$0xff] }
 0x27f   : > { %5270 = vrot.lane.b32.xlu0 %v10351_v8, %s10682_s11  ;;  %v3116_v58 = vsel %vm14694_vm6, %v3100_v46, %v14904_v51  ;;  %v14905_v8 = vld [vmem:[#allocation25_spill] sm:$0xff]  ;;  %v10359_v46 = vld [vmem:[%s10752_s30 + $0x3a8] ss:$0 sps:$4 sm:$0xff]   ;;  %v14926_v51 = vld [vmem:[#allocation59_spill] sm:$0xff] }
 0x280   : > { %v12468_v18 = vpop.permute.xlu1 %5308  ;;  %v12474_v28 = vpop.permute.xlu0 %5306  ;;  %v3114_v32 = vsel %vm14694_vm6, %v3098_v34, %v14905_v8  ;;  %v3132_v61 = vsel %vm14693_vm7, %v3116_v58, %v14906_v55  ;;  %v3021_v34 = vsel %vm1169_vm0, %v8747_v43, %v14925_v15  ;;  %v14937_v43 = vld [vmem:[#allocation23_spill] sm:$0xff]  ;;  %v14943_v15 = vld [vmem:[#allocation48_spill] sm:$0xff] }
 0x282   : > { %5836 = vrot.lane.b32.xlu1 %v5801_v12, %s10689_s18  ;;  %v14907_v12 = vld [vmem:[#allocation27_spill] sm:$0xff] }
 0x283   : > { %5834 = vrot.lane.b32.xlu0 %v5794_v42, %s10689_s18  ;;  %v3130_v11 = vsel %vm14693_vm7, %v3114_v32, %v14907_v12  ;;  %v3148_v42 = vsel %vm14909_vm10, %v3132_v61, %v14908_v1  ;;  %vm14920_vm10 = vcmask 785408   ;;  %v14929_v61 = vld [vmem:[#allocation9_spill] sm:$0xff] }
 0x284   : > { %v12492_v17 = vpop.permute.xlu1 %5416  ;;  %v12498_v21 = vpop.permute.xlu0 %5414  ;;  %v3146_v13 = vsel %vm14911_vm9, %v3130_v11, %v14910_v50  ;;  %v3164_v62 = vsel %vm14913_vm11, %v3148_v42, %v14912_v35  ;;  %vm14923_vm9 = vmmov %vm14920_vm10  ;;  %vm14924_vm11 = vcmask 850944   ;;  %v14936_v35 = vld [vmem:[#allocation17_spill] sm:$0xff] }
 0x285   : > { %v3162_v45 = vsel %vm14915_vm13, %v3146_v13, %v14914_v38  ;;  %v3180_v9 = vsel %vm14916_vm14, %v3164_v62, %v12135_v10  ;;  %vm14927_vm13 = vmmov %vm14924_vm11  ;;  %vm14928_vm14 = vcmask 916480   ;;  %v10360_v13 = vld [vmem:[%s10752_s30 + $0x428] ss:$0 sps:$4 sm:$0xff]  }
 0x286   : > { %5872 = vrot.lane.b32.xlu1 %v10354_v47, %s10690_s19  ;;  %v14917_v47 = vld [vmem:[#allocation36_spill] sm:$0xff]  ;;  %v3196_v7 = vsel %vm14920_vm10, %v3180_v9, %v14919_v33  ;;  %vm14932_vm10 = vcmask 982016  }
 0x287   : > { %5870 = vrot.lane.b32.xlu0 %v10355_v2, %s10690_s19  ;;  %v3178_v48 = vsel %vm14918_vm8, %v3162_v45, %v14917_v47  ;;  %v14921_v2 = vld [vmem:[#allocation6_spill] sm:$0xff]  ;;  %v3212_v10 = vsel %vm14924_vm11, %v3196_v7, %v12249_v20  ;;  %v3038_v20 = vsel %vm1194_vm1, %v3021_v34, %v14929_v61  ;;  %vm14931_vm8 = vmmov %vm14928_vm14  ;;  %v10361_v45 = vld [vmem:[%s10752_s30 + $0x420] ss:$0 sps:$4 sm:$0xff]   ;;  %vm14946_vm11 = vcmask 588800  }
 0x288   : > { %v12517_v3 = vpop.permute.xlu1 %2887  ;;  %v12524_v36 = vpop.permute.xlu0 %2885  ;;  %v3024_v41 = vsel %vm1169_vm0, %v8748_v29, %v14921_v2  ;;  %v3194_v59 = vsel %vm14923_vm9, %v3178_v48, %v14922_v5  ;;  %v3228_v32 = vsel %vm14928_vm14, %v3212_v10, %v12384_v63  ;;  %v14934_v29 = vld [vmem:[#allocation16_spill] sm:$0xff]  ;;  %vm14935_vm9 = vmmov %vm14932_vm10  ;;  %v14942_v10 = vld [vmem:[#allocation47_spill] sm:$0xff]  ;;  %vm14950_vm14 = vcmask 654336  }
 0x289   : > { %v3040_v58 = vsel %vm1194_vm1, %v3024_v41, %v14926_v51  ;;  %v3210_v8 = vsel %vm14927_vm13, %v3194_v59, %v12257_v23  ;;  %v14938_v9 = vld [vmem:[#allocation20_spill] sm:$0xff]  ;;  %v10362_v51 = vld [vmem:[%s10752_s30 + $0x460] ss:$0 sps:$4 sm:$0xff]   ;;  %v10363_v61 = vld [vmem:[%s10752_s30 + $0x458] ss:$0 sps:$4 sm:$0xff]  }
 0x28a   : > { %3883 = vrot.lane.b32.xlu1 %v10356_v53, %s10682_s11  ;;  %v14930_v53 = vld [vmem:[#allocation12_spill] sm:$0xff]  ;;  %v3226_v11 = vsel %vm14931_vm8, %v3210_v8, %v12386_v24  ;;  %vm14948_vm13 = vmmov %vm14946_vm11 }
 0x28b   : > { %3881 = vrot.lane.b32.xlu0 %v10357_v40, %s10682_s11  ;;  %v3056_v12 = vsel %vm1211_vm2, %v3040_v58, %v14930_v53  ;;  %v14933_v40 = vld [vmem:[#allocation13_spill] sm:$0xff]  ;;  %v14939_v48 = vld [vmem:[#allocation32_spill] sm:$0xff]  ;;  %v14944_v58 = vld [vmem:[#allocation55_spill] sm:$0xff] }
 0x28c   : > { %v2996_v55 = vpop.permute.xlu1 %2995  ;;  %v2994_v42 = vpop.permute.xlu0 %2993  ;;  %v3054_v23 = vsel %vm1211_vm2, %v3038_v20, %v14933_v40  ;;  %v3072_v63 = vsel %vm1228_vm3, %v3056_v12, %v14934_v29  ;;  %v14941_v41 = vld [vmem:[#allocation40_spill] sm:$0xff]  ;;  %v14947_v20 = vld [vmem:[#allocation34_spill] sm:$0xff]  ;;  %vm14952_vm8 = vmmov %vm14950_vm14 }
 0x28d   : > { %v3244_v1 = vsel %vm14932_vm10, %v3228_v32, %v2996_v55  ;;  %v3242_v50 = vsel %vm14935_vm9, %v3226_v11, %v2994_v42  ;;  %v3070_v62 = vsel %vm1228_vm3, %v3054_v23, %v14936_v35  ;;  %v3088_v24 = vsel %vm1245_vm4, %v3072_v63, %v14937_v43  ;;  %v14945_v32 = vld [vmem:[#allocation56_spill] sm:$0xff]  ;;  %v14949_v12 = vld [vmem:[#allocation50_spill] sm:$0xff]  ;;  %v14951_v42 = vld [vmem:[#allocation57_spill] sm:$0xff] }
 0x28e   : > { %3919 = vrot.lane.b32.xlu1 %v10358_v31, %s10683_s12  ;;  %v9040_v38 = vcombine.low %v3242_v50, %v3244_v1  ;;  %v3086_v47 = vsel %vm1245_vm4, %v3070_v62, %v14938_v9  ;;  %v3104_v33 = vsel %vm1262_vm5, %v3088_v24, %v14939_v48  ;;  %v14940_v31 = vld [vmem:[#allocation39_spill] sm:$0xff]  ;;  %vm14954_vm10 = vcmask 719872   ;;  %v14955_v50 = vld [vmem:[#allocation44_spill] sm:$0xff]  ;;  %v10364_v43 = vld [vmem:[%s10752_s30 + $0x1d0] ss:$0 sps:$4 sm:$0xff]  }
 0x28f   : > { %3917 = vrot.lane.b32.xlu0 %v10359_v46, %s10683_s12  ;;  %v3102_v2 = vsel %vm1262_vm5, %v3086_v47, %v14940_v31  ;;  %v3120_v5 = vsel %vm14694_vm6, %v3104_v33, %v14941_v41  ;;  %v14953_v23 = vld [vmem:[#allocation43_spill] sm:$0xff]  ;;  %vm14956_vm9 = vmmov %vm14954_vm10  ;;  %v14957_v35 = vld [vmem:[#allocation52_spill] sm:$0xff] }
 0x290   : > { %v12572_v7 = vpop.permute.xlu1 %5420  ;;  %9907 = vmatprep.mubr.bf16.mxu1 %v9040_v38  ;;  %v12578_v59 = vpop.permute.xlu0 %5418  ;;  %v3118_v46 = vsel %vm14694_vm6, %v3102_v2, %v14942_v10  ;;  %v3136_v34 = vsel %vm14693_vm7, %v3120_v5, %v14943_v15  ;;  %v14959_v24 = vld [vmem:[#allocation60_spill] sm:$0xff] }
 0x291   : > { %v3134_v8 = vsel %vm14693_vm7, %v3118_v46, %v14944_v58  ;;  %v3152_v55 = vsel %vm14946_vm11, %v3136_v34, %v14945_v32  ;;  %vm14958_vm11 = vcmask 785408   ;;  %v10365_v9 = vld [vmem:[%s10752_s30 + $0x1c8] ss:$0 sps:$4 sm:$0xff]   ;;  %v10368_v46 = vld [vmem:[%s10752_s30 + $0x3c0] ss:$0 sps:$4 sm:$0xff]  }
 0x292   : > { %5276 = vrot.lane.b32.xlu1 %v10360_v13, %s10682_s11  ;;  %v3150_v53 = vsel %vm14948_vm13, %v3134_v8, %v14947_v20  ;;  %v3168_v11 = vsel %vm14950_vm14, %v3152_v55, %v14949_v12  ;;  %vm14960_vm13 = vmmov %vm14958_vm11  ;;  %vm14961_vm14 = vcmask 850944   ;;  %v10366_v5 = vld [vmem:[%s10752_s30 + $0x208] ss:$0 sps:$4 sm:$0xff]   ;;  %v10369_v34 = vld [vmem:[%s10752_s30 + $0x3b8] ss:$0 sps:$4 sm:$0xff]  }
 0x293   : > { %5274 = vrot.lane.b32.xlu0 %v10361_v45, %s10682_s11  ;;  %v3166_v40 = vsel %vm14952_vm8, %v3150_v53, %v14951_v42  ;;  %v3184_v29 = vsel %vm14954_vm10, %v3168_v11, %v14953_v23  ;;  %vm14962_vm8 = vmmov %vm14961_vm14  ;;  %vm14963_vm10 = vcmask 916480   ;;  %v10374_v15 = vld [vmem:[%s10752_s30 + $0x388] sm:$0x1f]   ;;  %v10370_v32 = vld [vmem:[%s10752_s30 + $0x3f8] ss:$0 sps:$4 sm:$0xff]  }
 0x294   : > { %v12596_v1 = vpop.permute.xlu1 %5528  ;;  %v12602_v63 = vpop.permute.xlu0 %5526  ;;  %v3182_v13 = vsel %vm14956_vm9, %v3166_v40, %v14955_v50  ;;  %v3200_v62 = vsel %vm14958_vm11, %v3184_v29, %v14957_v35  ;;  %vm14964_vm9 = vmmov %vm14963_vm10  ;;  %vm14965_vm11 = vcmask 982016   ;;  %v5396_v55 = vshll.u32 %v10374_v15, 16  ;;  %v10372_v11 = vld [vmem:[%s10752_s30 + $0x470] ss:$0 sps:$4 sm:$0xff]   ;;  %v10373_v29 = vld [vmem:[%s10752_s30 + $0x468] ss:$0 sps:$4 sm:$0xff]  }
 0x295   : > { %v3198_v38 = vsel %vm14960_vm13, %v3182_v13, %v14959_v24  ;;  %v3216_v45 = vsel %vm14961_vm14, %v3200_v62, %v12294_v44  ;;  %vm14966_vm13 = vmmov %vm14965_vm11  ;;  %v5394_v42 = vshrl.u32 %v10374_v15, 16  ;;  %v10378_v23 = vld [vmem:[%s10752_s30 + $0x130] sm:$0x1f]   ;;  %v10379_v35 = vld [vmem:[%s10752_s30 + $0x128] sm:$0x1f]  }
 0x296   : > { %5312 = vrot.lane.b32.xlu1 %v10362_v51, %s10683_s12  ;;  %v3214_v47 = vsel %vm14962_vm8, %v3198_v38, %v12303_v49  ;;  %v3232_v48 = vsel %vm14963_vm10, %v3216_v45, %v12517_v3  ;;  %v10367_v3 = vld [vmem:[%s10752_s30 + $0x200] ss:$0 sps:$4 sm:$0xff]   ;;  %v5398_v40 = vrot.slane %v5396_v55, 1  ;;  %v5976_v38 = vshll.u32 %v10378_v23, 16  ;;  %v355_v55 = vld [vmem:[#allocation2 + $0x94] sm:$0x1] }
 0x297   : > { %5310 = vrot.lane.b32.xlu0 %v10363_v61, %s10683_s12  ;;  %v3230_v31 = vsel %vm14964_vm9, %v3214_v47, %v12524_v36  ;;  %v10375_v51 = vld [vmem:[%s10752_s30 + $0x380] sm:$0x1f]   ;;  %v10371_v61 = vld [vmem:[%s10752_s30 + $0x3f0] ss:$0 sps:$4 sm:$0xff]  }
 0x298   : > { %v3000_v33 = vpop.permute.xlu1 %2999  ;;  %v2998_v44 = vpop.permute.xlu0 %2997  ;;  %v5389_v20 = vshll.u32 %v10375_v51, 16  ;;  %v5387_v50 = vshrl.u32 %v10375_v51, 16  ;;  %v5399_v24 = vor.u32 %v5398_v40, %v5394_v42  ;;  %v363_v47 = vld [vmem:[#allocation2 + $0xa4] sm:$0x1]  ;;  %v367_v42 = vld [vmem:[#allocation2 + $0xac] sm:$0x1] }
 0x299   : > { %v3248_v2 = vsel %vm14965_vm11, %v3232_v48, %v3000_v33  ;;  %v3246_v41 = vsel %vm14966_vm13, %v3230_v31, %v2998_v44  ;;  %v364_v31 = vsel %vm11953_vm12, 0, %v363_v47  ;;  %v10376_v44 = vld [vmem:[%s10752_s30 + $0x218] ss:$0 sps:$4 sm:$0xff]   ;;  %v10387_v47 = vld [vmem:[%s10752_s30 + $0x3c8] sm:$0x1f]   ;;  %vm15026_vm13 = vcmask 588800  }
 0x29a   : > { %5876 = vrot.lane.b32.xlu1 %v10364_v43, %s10690_s19  ;;  %v9041_v49 = vcombine.low %v3246_v41, %v3248_v2  ;;  %v5391_v13 = vrot.slane %v5389_v20, 1  ;;  %365 = vst [vmem:[#allocation2 + $0xa4] sm:$0x1] %v364_v31  ;;  %v5974_v41 = vshrl.u32 %v10378_v23, 16  ;;  %v10385_v20 = vld [vmem:[%s10752_s30 + $0x390] sm:$0x1f]  }
 0x29b   : > { %5874 = vrot.lane.b32.xlu0 %v10365_v9, %s10690_s19  ;;  %v5969_v9 = vshll.u32 %v10379_v35, 16  ;;  %v368_v23 = vsel %vm11953_vm12, 0, %v367_v42  ;;  %v5501_v42 = vshll.u32 %v10387_v47, 16  ;;  %vm3547_vm11 = vsmask.f32 7938 }
 0x29c   : > { %v12628_v10 = vpop.permute.xlu1 %5532  ;;  %9908 = vmatmul.mubr.bf16.gmra.mrb[4].mxu1 %v9041_v49  ;;  %v12630_v36 = vpop.permute.xlu0 %5530  ;;  %v5392_v45 = vor.u32 %v5391_v13, %v5387_v50  ;;  %v10377_v49 = vld [vmem:[%s10752_s30 + $0x210] ss:$0 sps:$4 sm:$0xff]   ;;  %369 = vst [vmem:[#allocation2 + $0xac] sm:$0x1] %v368_v23  ;;  %v10389_v23 = vld [vmem:[%s10752_s30 + $0x138] sm:$0x1f]  }
 0x29e   : > { %5912 = vrot.lane.b32.xlu1 %v10366_v5, %s10691_s24  ;;  %v5978_v5 = vrot.slane %v5976_v38, 1  ;;  %v10386_v38 = vld [vmem:[%s10752_s30 + $0x3d0] sm:$0x1f]  }
 0x29f   : > { %5910 = vrot.lane.b32.xlu0 %v10367_v3, %s10691_s24  ;;  %v5967_v3 = vshrl.u32 %v10379_v35, 16  ;;  %v10380_v35 = vld [vmem:[%s10752_s30 + $0x408] ss:$0 sps:$4 sm:$0xff]  }
 0x2a0   : > { %v12638_v58 = vpop.permute.xlu1 %5568  ;;  %v12640_v8 = vpop.permute.xlu0 %5566  ;;  %v5979_v51 = vor.u32 %v5978_v5, %v5974_v41  ;;  %v10382_v5 = vld [vmem:[%s10752_s30 + $0x440] ss:$0 sps:$4 sm:$0xff]  }
 0x2a2   : > { %3923 = vrot.lane.b32.xlu1 %v10368_v46, %s10683_s12  ;;  %v5971_v46 = vrot.slane %v5969_v9, 1  ;;  %v5403_v9 = vshll.u32 %v10385_v20, 16 }
 0x2a3   : > { %3921 = vrot.lane.b32.xlu0 %v10369_v34, %s10683_s12 }
 0x2a4   : > { %v12646_v53 = vpop.permute.xlu1 %3759  ;;  %v12648_v12 = vpop.permute.xlu0 %3757 }
 0x2a5   : > { %14967 = vst [vmem:[#allocation37_spill] sm:$0xff] %v12646_v53  ;;  %14968 = vst [vmem:[#allocation61_spill] sm:$0xff] %v12648_v12  ;;  %v10435_v53 = vld [vmem:[%s10752_s30 + $0x70] sm:$0x1f]  }
 0x2a6   : > { %3959 = vrot.lane.b32.xlu1 %v10370_v32, %s10684_s13  ;;  %v10384_v32 = vld [vmem:[%s10752_s30 + $0x398] sm:$0x1f]  }
 0x2a7   : > { %3957 = vrot.lane.b32.xlu0 %v10371_v61, %s10684_s13  ;;  %v5972_v61 = vor.u32 %v5971_v46, %v5967_v3  ;;  %v5408_v3 = vshrl.u32 %v10384_v32, 16 }
 0x2a8   : > { %v12656_v62 = vpop.permute.xlu1 %5008  ;;  %v12658_v43 = vpop.permute.xlu0 %5006 }
 0x2a9   : > { %14969 = vst [vmem:[#allocation38_spill] sm:$0xff] %v12656_v62  ;;  %14970 = vst [vmem:[#allocation45_spill] sm:$0xff] %v12658_v43  ;;  %v5983_v43 = vshll.u32 %v10389_v23, 16 }
 0x2aa   : > { %5316 = vrot.lane.b32.xlu1 %v10372_v11, %s10683_s12  ;;  %v356_v11 = vsel %vm11953_vm12, 0, %v355_v55  ;;  %v10388_v55 = vld [vmem:[%s10752_s30 + $0x140] sm:$0x1f]  }
 0x2ab   : > { %5314 = vrot.lane.b32.xlu0 %v10373_v29, %s10683_s12  ;;  %357 = vst [vmem:[#allocation2 + $0x94] sm:$0x1] %v356_v11  ;;  %v359_v29 = vld [vmem:[#allocation2 + $0x9c] sm:$0x1]  ;;  %v5405_v11 = vrot.slane %v5403_v9, 1 }
 0x2ac   : > { %v12662_v48 = vpop.permute.xlu1 %5572  ;;  %v12666_v2 = vpop.permute.xlu0 %5570  ;;  %v360_v13 = vsel %vm11953_vm12, 0, %v359_v29 }
 0x2ad   : > { %361 = vst [vmem:[#allocation2 + $0x9c] sm:$0x1] %v360_v13 }
 0x2ae   : > { %5424 = vrot.lane.b32.xlu1 %v5399_v24, %s10684_s13  ;;  %v5410_v24 = vshll.u32 %v10384_v32, 16  ;;  %v10447_v32 = vld [vmem:[%s14670_s1 + $0x8] sm:$0xff]  }
 0x2af   : > { %5422 = vrot.lane.b32.xlu0 %v5392_v45, %s10684_s13  ;;  %v10381_v45 = vld [vmem:[%s10752_s30 + $0x400] ss:$0 sps:$4 sm:$0xff]  }
 0x2b0   : > { %v12672_v15 = vpop.permute.xlu1 %5608  ;;  %v12674_v34 = vpop.permute.xlu0 %5606  ;;  %v5412_v46 = vrot.slane %v5410_v24, 1  ;;  %v5506_v24 = vshrl.u32 %v10386_v38, 16 }
 0x2b2   : > { %5916 = vrot.lane.b32.xlu1 %v10376_v44, %s10691_s24  ;;  %v10444_v44 = vld [vmem:[%s14670_s1] sm:$0xff]  }
 0x2b3   : > { %5914 = vrot.lane.b32.xlu0 %v10377_v49, %s10691_s24  ;;  %v10383_v49 = vld [vmem:[%s10752_s30 + $0x438] ss:$0 sps:$4 sm:$0xff]   ;;  %9935 = vmatprep.subr.bf16.mxu1 %v10444_v44 }
 0x2b4   : > { %v12682_v40 = vpop.permute.xlu1 %3763  ;;  %v12686_v50 = vpop.permute.xlu0 %3761  ;;  %9936 = vmatpush3.bf16.msra.mxu1 %v10444_v44  ;;  %v5503_v44 = vrot.slane %v5501_v42, 1 }
 0x2b5   : > { %14972 = vst [vmem:[#allocation46_spill] sm:$0xff] %v12682_v40  ;;  %14973 = vst [vmem:[#allocation53_spill] sm:$0xff] %v12686_v50  ;;  %v5499_v40 = vshrl.u32 %v10387_v47, 16  ;;  %9937 = vmatprep.subr.bf16.mxu1 %v10447_v32 }
 0x2b6   : > { %6024 = vrot.lane.b32.xlu1 %v5979_v51, %s10692_s25  ;;  %v5508_v51 = vshll.u32 %v10386_v38, 16  ;;  %v10450_v38 = vld [vmem:[%s14670_s1 + $0x10] sm:$0xff]  }
 0x2b7   : > { %6022 = vrot.lane.b32.xlu0 %v5972_v61, %s10692_s25  ;;  %v5401_v61 = vshrl.u32 %v10385_v20, 16  ;;  %v10390_v20 = vld [vmem:[%s10752_s30 + $0x178] sm:$0x1f]   ;;  %v5504_v47 = vor.u32 %v5503_v44, %v5499_v40  ;;  %v10456_v44 = vld [vmem:[%s14670_s1 + $0x20] sm:$0xff]  }
 0x2b8   : > { %v12696_v31 = vpop.permute.xlu1 %3799  ;;  %v12701_v41 = vpop.permute.xlu0 %3797  ;;  %v5510_v50 = vrot.slane %v5508_v51, 1  ;;  %9938 = vmatpush3.bf16.msra.mxu1 %v10447_v32  ;;  %v5981_v51 = vshrl.u32 %v10389_v23, 16 }
 0x2b9   : > { %14974 = vst [vmem:[#allocation54_spill] sm:$0xff] %v12696_v31  ;;  %14975 = vst [vmem:[#allocation62_spill] sm:$0xff] %v12701_v41  ;;  %v5406_v9 = vor.u32 %v5405_v11, %v5401_v61  ;;  %v5985_v61 = vrot.slane %v5983_v43, 1  ;;  %9939 = vmatprep.subr.bf16.mxu1 %v10450_v38 }
 0x2ba   : > { %3963 = vrot.lane.b32.xlu1 %v10380_v35, %s10684_s13  ;;  %v5413_v35 = vor.u32 %v5412_v46, %v5408_v3  ;;  %v5988_v3 = vshrl.u32 %v10388_v55, 16  ;;  %v6088_v46 = vshll.u32 %v10390_v20, 16 }
 0x2bb   : > { %3961 = vrot.lane.b32.xlu0 %v10381_v45, %s10684_s13  ;;  %v5990_v45 = vshll.u32 %v10388_v55, 16  ;;  %v6086_v55 = vshrl.u32 %v10390_v20, 16  ;;  %v5986_v43 = vor.u32 %v5985_v61, %v5981_v51  ;;  %v10393_v61 = vld [vmem:[%s10752_s30 + $0x448] ss:$0 sps:$4 sm:$0xff]  }
 0x2bc   : > { %v12709_v29 = vpop.permute.xlu1 %5012  ;;  %v12711_v13 = vpop.permute.xlu0 %5010  ;;  %9940 = vmatpush3.bf16.msra.mxu1 %v10450_v38  ;;  %v6090_v40 = vrot.slane %v6088_v46, 1  ;;  %v10396_v38 = vld [vmem:[%s10752_s30 + $0x3e0] sm:$0x1f]   ;;  %v10459_v46 = vld [vmem:[%s14670_s1 + $0x28] sm:$0xff]  }
 0x2bd   : > { %14976 = vst [vmem:[#allocation63_spill] sm:$0xff] %v12709_v29  ;;  %14977 = vst [vmem:[#allocation41_spill] sm:$0xff] %v12711_v13  ;;  %v10391_v29 = vld [vmem:[%s10752_s30 + $0x170] sm:$0x1f]   ;;  %v5522_v51 = vshll.u32 %v10396_v38, 16 }
 0x2be   : > { %3999 = vrot.lane.b32.xlu1 %v10382_v5, %s10685_s14  ;;  %v5511_v5 = vor.u32 %v5510_v50, %v5506_v24  ;;  %v6081_v11 = vshll.u32 %v10391_v29, 16  ;;  %v6079_v23 = vshrl.u32 %v10391_v29, 16  ;;  %v6091_v20 = vor.u32 %v6090_v40, %v6086_v55  ;;  %v10462_v55 = vld [vmem:[%s14670_s1 + $0x30] sm:$0xff]  }
 0x2bf   : > { %3997 = vrot.lane.b32.xlu0 %v10383_v49, %s10685_s14  ;;  %v5992_v49 = vrot.slane %v5990_v45, 1  ;;  %v10394_v40 = vld [vmem:[%s10752_s30 + $0x10] ss:$0 sps:$4 sm:$0xff]  }
 0x2c0   : > { %v12720_v13 = vpop.permute.xlu1 %5120  ;;  %v12722_v62 = vpop.permute.xlu0 %5118  ;;  %v6083_v24 = vrot.slane %v6081_v11, 1 }
 0x2c1   : > { %14978 = vst [vmem:[#allocation42_spill] sm:$0xff] %v12720_v13  ;;  %14979 = vst [vmem:[#allocation35_spill] sm:$0xff] %v12722_v62  ;;  %v5993_v50 = vor.u32 %v5992_v49, %v5988_v3  ;;  %v10415_v13 = vld [vmem:[%s10752_s30 + $0x2f0] ss:$0 sps:$4 sm:$0xff]  }
 0x2c2   : > { %5428 = vrot.lane.b32.xlu1 %v5413_v35, %s10684_s13  ;;  %v10453_v35 = vld [vmem:[%s14670_s1 + $0x18] sm:$0xff]   ;;  %v6084_v29 = vor.u32 %v6083_v24, %v6079_v23  ;;  %v5524_v23 = vrot.slane %v5522_v51, 1  ;;  %v10400_v24 = vld [vmem:[%s10752_s30 + $0x188] sm:$0x1f]  }
 0x2c3   : > { %5426 = vrot.lane.b32.xlu0 %v5406_v9, %s10684_s13  ;;  %9941 = vmatprep.subr.bf16.mxu1 %v10453_v35  ;;  %v6102_v51 = vshll.u32 %v10400_v24, 16 }
 0x2c4   : > { %v12729_v42 = vpop.permute.xlu1 %5612  ;;  %v12731_v32 = vpop.permute.xlu0 %5610  ;;  %9942 = vmatpush3.bf16.msra.mxu1 %v10453_v35 }
 0x2c5   : > { %14980 = vst [vmem:[#allocation58_spill] sm:$0xff] %v12731_v32  ;;  %9943 = vmatprep.subr.bf16.mxu1 %v10456_v44  ;;  %v6104_v62 = vrot.slane %v6102_v51, 1  ;;  %v10403_v51 = vld [vmem:[%s10752_s30 + $0x2a8] ss:$0 sps:$4 sm:$0xff]  }
 0x2c6   : > { %5536 = vrot.lane.b32.xlu1 %v5511_v5, %s10685_s14  ;;  %v10397_v5 = vld [vmem:[%s10752_s30 + $0x3d8] sm:$0x1f]  }
 0x2c7   : > { %5534 = vrot.lane.b32.xlu0 %v5504_v47, %s10685_s14  ;;  %v10392_v47 = vld [vmem:[%s10752_s30 + $0x450] ss:$0 sps:$4 sm:$0xff]   ;;  %v5515_v11 = vshll.u32 %v10397_v5, 16 }
 0x2c8   : > { %v12738_v45 = vpop.permute.xlu1 %5720  ;;  %9944 = vmatpush3.bf16.msra.mxu1 %v10456_v44  ;;  %v10395_v44 = vld [vmem:[%s10752_s30 + $0x8] ss:$0 sps:$4 sm:$0xff]  }
 0x2c9   : > { %v12740_v9 = vpop.permute.xlu0 %5718  ;;  %9945 = vmatprep.subr.bf16.mxu1 %v10459_v46 }
 0x2ca   : > { %6028 = vrot.lane.b32.xlu1 %v5993_v50, %s10692_s25 }
 0x2cb   : > { %6026 = vrot.lane.b32.xlu0 %v5986_v43, %s10692_s25  ;;  %v5520_v43 = vshrl.u32 %v10396_v38, 16 }
 0x2cc   : > { %v12749_v3 = vpop.permute.xlu1 %3803  ;;  %9946 = vmatpush3.bf16.msra.mxu1 %v10459_v46 }
 0x2cd   : > { %14981 = vst [vmem:[#allocation4_spill] sm:$0xff] %v12749_v3  ;;  %v12751_v49 = vpop.permute.xlu0 %3801  ;;  %9947 = vmatprep.subr.bf16.mxu1 %v10462_v55  ;;  %v5525_v38 = vor.u32 %v5524_v23, %v5520_v43 }
 0x2ce   : > { %14982 = vst [vmem:[#allocation5_spill] sm:$0xff] %v12751_v49  ;;  %6136 = vrot.lane.b32.xlu1 %v6091_v20, %s10693_s21  ;;  %v5513_v20 = vshrl.u32 %v10397_v5, 16  ;;  %v10401_v49 = vld [vmem:[%s10752_s30 + $0x180] sm:$0x1f]  }
 0x2cf   : > { %6134 = vrot.lane.b32.xlu0 %v6084_v29, %s10693_s21  ;;  %v5517_v29 = vrot.slane %v5515_v11, 1  ;;  %v6093_v43 = vshrl.u32 %v10401_v49, 16 }
 0x2d0   : > { %v12760_v35 = vpop.permute.xlu1 %3839  ;;  %9948 = vmatpush3.bf16.msra.mxu1 %v10462_v55 }
 0x2d1   : > { %14983 = vst [vmem:[#allocation8_spill] sm:$0xff] %v12760_v35  ;;  %v12762_v50 = vpop.permute.xlu0 %3837  ;;  %v5518_v5 = vor.u32 %v5517_v29, %v5513_v20 }
 0x2d2   : > { %14984 = vst [vmem:[#allocation64_spill] sm:$0xff] %v12762_v50  ;;  %4003 = vrot.lane.b32.xlu1 %v10392_v47, %s10685_s14  ;;  %v10465_v47 = vld [vmem:[%s14670_s1 + $0x38] sm:$0xff]  }
 0x2d3   : > { %4001 = vrot.lane.b32.xlu0 %v10393_v61, %s10685_s14  ;;  %v6095_v61 = vshll.u32 %v10401_v49, 16  ;;  %9949 = vmatprep.subr.bf16.mxu1 %v10465_v47  ;;  %v10402_v49 = vld [vmem:[%s10752_s30 + $0x2b0] ss:$0 sps:$4 sm:$0xff]  }
 0x2d4   : > { %v12773_v46 = vpop.permute.xlu1 %5124  ;;  %9950 = vmatpush3.bf16.msra.mxu1 %v10465_v47 }
 0x2d5   : > { %14985 = vst [vmem:[#allocation10_spill] sm:$0xff] %v12773_v46  ;;  %v12775_v3 = vpop.permute.xlu0 %5122  ;;  %v6100_v46 = vshrl.u32 %v10400_v24, 16  ;;  %v6097_v23 = vrot.slane %v6095_v61, 1 }
 0x2d6   : > { %14986 = vst [vmem:[#allocation11_spill] sm:$0xff] %v12775_v3  ;;  %4039 = vrot.lane.b32.xlu1 %v10394_v40, %s10686_s15  ;;  %v10398_v3 = vld [vmem:[%s10752_s30 + $0xc0] ss:$0 sps:$4 sm:$0xff]   ;;  %v10399_v40 = vld [vmem:[%s10752_s30 + $0xb8] ss:$0 sps:$4 sm:$0xff]  }
 0x2d7   : > { %4037 = vrot.lane.b32.xlu0 %v10395_v44, %s10686_s15  ;;  %v6105_v29 = vor.u32 %v6104_v62, %v6100_v46  ;;  %v6098_v47 = vor.u32 %v6097_v23, %v6093_v43  ;;  %v10404_v62 = vld [vmem:[%s10752_s30 + $0x20] ss:$0 sps:$4 sm:$0xff]   ;;  %v10405_v46 = vld [vmem:[%s10752_s30 + $0x18] ss:$0 sps:$4 sm:$0xff]   ;;  %v10407_v23 = vld [vmem:[%s10752_s30 + $0x50] ss:$0 sps:$4 sm:$0xff]  }
 0x2d8   : > { %v12782_v11 = vpop.permute.xlu1 %5232  ;;  %v10406_v43 = vld [vmem:[%s10752_s30 + $0x58] ss:$0 sps:$4 sm:$0xff]  }
 0x2d9   : > { %14987 = vst [vmem:[#allocation14_spill] sm:$0xff] %v12782_v11  ;;  %v12784_v55 = vpop.permute.xlu0 %5230  ;;  %v375_v11 = vld [vmem:[#allocation2 + $0xbc] sm:$0x1] }
 0x2da   : > { %14988 = vst [vmem:[#allocation15_spill] sm:$0xff] %v12784_v55  ;;  %5540 = vrot.lane.b32.xlu1 %v5525_v38, %s10685_s14 }
 0x2db   : > { %5538 = vrot.lane.b32.xlu0 %v5518_v5, %s10685_s14 }
 0x2dc   : > { %v12790_v44 = vpop.permute.xlu1 %5724 }
 0x2dd   : > { %14989 = vst [vmem:[#allocation18_spill] sm:$0xff] %v12790_v44  ;;  %v12792_v20 = vpop.permute.xlu0 %5722  ;;  %v5805_v44 = vshll.u32 %v10435_v53, 16 }
 0x2de   : > { %14990 = vst [vmem:[#allocation19_spill] sm:$0xff] %v12792_v20  ;;  %5576 = vrot.lane.b32.xlu1 %v10398_v3, %s10686_s15 }
 0x2df   : > { %5574 = vrot.lane.b32.xlu0 %v10399_v40, %s10686_s15 }
 0x2e0   : > { %v12796_v24 = vpop.permute.xlu1 %5832 }
 0x2e1   : > { %v12798_v38 = vpop.permute.xlu0 %5830 }
 0x2e2   : > { %6140 = vrot.lane.b32.xlu1 %v6105_v29, %s10693_s21 }
 0x2e3   : > { %6138 = vrot.lane.b32.xlu0 %v6098_v47, %s10693_s21 }
 0x2e4   : > { %v12804_v5 = vpop.permute.xlu1 %3843 }
 0x2e5   : > { %14991 = vst [vmem:[#allocation24_spill] sm:$0xff] %v12804_v5  ;;  %v12806_v3 = vpop.permute.xlu0 %3841 }
 0x2e6   : > { %14992 = vst [vmem:[#allocation21_spill] sm:$0xff] %v12806_v3  ;;  %3767 = vrot.lane.b32.xlu1 %v10402_v49, %s10679_s8  ;;  %v10408_v49 = vld [vmem:[%s10752_s30 + $0xd0] ss:$0 sps:$4 sm:$0xff]   ;;  %v379_v3 = vld [vmem:[#allocation2 + $0xc4] sm:$0x1] }
 0x2e7   : > { %3765 = vrot.lane.b32.xlu0 %v10403_v51, %s10679_s8  ;;  %v10409_v51 = vld [vmem:[%s10752_s30 + $0xc8] ss:$0 sps:$4 sm:$0xff]  }
 0x2e8   : > { %v12812_v61 = vpop.permute.xlu1 %3879 }
 0x2e9   : > { %14993 = vst [vmem:[#allocation22_spill] sm:$0xff] %v12812_v61  ;;  %v12814_v40 = vpop.permute.xlu0 %3877  ;;  %v10423_v61 = vld [vmem:[%s10752_s30 + $0x28] sm:$0x1f]  }
 0x2ea   : > { %14994 = vst [vmem:[#allocation25_spill] sm:$0xff] %v12814_v40  ;;  %4043 = vrot.lane.b32.xlu1 %v10404_v62, %s10686_s15 }
 0x2eb   : > { %4041 = vrot.lane.b32.xlu0 %v10405_v46, %s10686_s15  ;;  %v380_v46 = vsel %vm11953_vm12, 0, %v379_v3  ;;  %v10413_v3 = vld [vmem:[%s10752_s30 + $0x2b8] ss:$0 sps:$4 sm:$0xff]  }
 0x2ec   : > { %v12820_v29 = vpop.permute.xlu1 %5236  ;;  %381 = vst [vmem:[#allocation2 + $0xc4] sm:$0x1] %v380_v46 }
 0x2ed   : > { %14995 = vst [vmem:[#allocation26_spill] sm:$0xff] %v12820_v29  ;;  %v12822_v47 = vpop.permute.xlu0 %5234 }
 0x2ee   : > { %14996 = vst [vmem:[#allocation27_spill] sm:$0xff] %v12822_v47  ;;  %4079 = vrot.lane.b32.xlu1 %v10406_v43, %s10687_s16  ;;  %v10410_v47 = vld [vmem:[%s10752_s30 + $0x108] ss:$0 sps:$4 sm:$0xff]   ;;  %v10411_v43 = vld [vmem:[%s10752_s30 + $0x100] ss:$0 sps:$4 sm:$0xff]  }
 0x2ef   : > { %4077 = vrot.lane.b32.xlu0 %v10407_v23, %s10687_s16 }
 0x2f0   : > { %v12828_v62 = vpop.permute.xlu1 %5272 }
 0x2f1   : > { %14997 = vst [vmem:[#allocation28_spill] sm:$0xff] %v12828_v62  ;;  %v12832_v5 = vpop.permute.xlu0 %5270  ;;  %v10412_v62 = vld [vmem:[%s10752_s30 + $0x2c0] ss:$0 sps:$4 sm:$0xff]  }
 0x2f2   : > { %14998 = vst [vmem:[#allocation33_spill] sm:$0xff] %v12832_v5  ;;  %5580 = vrot.lane.b32.xlu1 %v10408_v49, %s10686_s15  ;;  %v371_v5 = vld [vmem:[#allocation2 + $0xb4] sm:$0x1] }
 0x2f3   : > { %5578 = vrot.lane.b32.xlu0 %v10409_v51, %s10686_s15  ;;  %v372_v49 = vsel %vm11953_vm12, 0, %v371_v5  ;;  %v383_v51 = vld [vmem:[#allocation2 + $0xcc] sm:$0x1]  ;;  %v376_v5 = vsel %vm11953_vm12, 0, %v375_v11 }
 0x2f4   : > { %v12838_v29 = vpop.permute.xlu1 %5836  ;;  %373 = vst [vmem:[#allocation2 + $0xb4] sm:$0x1] %v372_v49  ;;  %377 = vst [vmem:[#allocation2 + $0xbc] sm:$0x1] %v376_v5  ;;  %v10418_v5 = vld [vmem:[%s10752_s30 + $0xa0] ss:$0 sps:$4 sm:$0xff]  }
 0x2f5   : > { %14999 = vst [vmem:[#allocation49_spill] sm:$0xff] %v12838_v29  ;;  %v12840_v23 = vpop.permute.xlu0 %5834 }
 0x2f6   : > { %15000 = vst [vmem:[#allocation29_spill] sm:$0xff] %v12840_v23  ;;  %5616 = vrot.lane.b32.xlu1 %v10410_v47, %s10687_s16  ;;  %v384_v47 = vsel %vm11953_vm12, 0, %v383_v51  ;;  %v10416_v51 = vld [vmem:[%s10752_s30 + $0x68] ss:$0 sps:$4 sm:$0xff]  }
 0x2f7   : > { %5614 = vrot.lane.b32.xlu0 %v10411_v43, %s10687_s16  ;;  %v10414_v43 = vld [vmem:[%s10752_s30 + $0x2f8] ss:$0 sps:$4 sm:$0xff]   ;;  %385 = vst [vmem:[#allocation2 + $0xcc] sm:$0x1] %v384_v47  ;;  %v10417_v47 = vld [vmem:[%s10752_s30 + $0x60] ss:$0 sps:$4 sm:$0xff]  }
 0x2f8   : > { %v12846_v46 = vpop.permute.xlu1 %5872 }
 0x2f9   : > { %v12850_v55 = vpop.permute.xlu0 %5870 }
 0x2fa   : > { %3771 = vrot.lane.b32.xlu1 %v10412_v62, %s10679_s8  ;;  %v10422_v62 = vld [vmem:[%s10752_s30 + $0x30] sm:$0x1f]  }
 0x2fb   : > { %3769 = vrot.lane.b32.xlu0 %v10413_v3, %s10679_s8  ;;  %v5698_v41 = vshrl.u32 %v10422_v62, 16 }
 0x2fc   : > { %v12860_v49 = vpop.permute.xlu1 %3883 }
 0x2fd   : > { %15001 = vst [vmem:[#allocation36_spill] sm:$0xff] %v12860_v49  ;;  %v12862_v40 = vpop.permute.xlu0 %3881  ;;  %v5700_v49 = vshll.u32 %v10422_v62, 16 }
 0x2fe   : > { %15002 = vst [vmem:[#allocation51_spill] sm:$0xff] %v12862_v40  ;;  %3807 = vrot.lane.b32.xlu1 %v10414_v43, %s10680_s9  ;;  %v10419_v40 = vld [vmem:[%s10752_s30 + $0x98] ss:$0 sps:$4 sm:$0xff]   ;;  %v5693_v43 = vshll.u32 %v10423_v61, 16 }
 0x2ff   : > { %3805 = vrot.lane.b32.xlu0 %v10415_v13, %s10680_s9  ;;  %v10420_v13 = vld [vmem:[%s10752_s30 + $0x118] ss:$0 sps:$4 sm:$0xff]  }
 0x300   : > { %v12870_v11 = vpop.permute.xlu1 %3919  ;;  %v5695_v31 = vrot.slane %v5693_v43, 1  ;;  %v10425_v43 = vld [vmem:[%s10752_s30 + $0x300] ss:$0 sps:$4 sm:$0xff]  }
 0x301   : > { %15003 = vst [vmem:[#allocation6_spill] sm:$0xff] %v12870_v11  ;;  %v12872_v3 = vpop.permute.xlu0 %3917  ;;  %v5702_v11 = vrot.slane %v5700_v49, 1 }
 0x302   : > { %15004 = vst [vmem:[#allocation30_spill] sm:$0xff] %v12872_v3  ;;  %4083 = vrot.lane.b32.xlu1 %v10416_v51, %s10687_s16  ;;  %v10421_v51 = vld [vmem:[%s10752_s30 + $0x110] ss:$0 sps:$4 sm:$0xff]   ;;  %v5691_v3 = vshrl.u32 %v10423_v61, 16  ;;  %v10424_v61 = vld [vmem:[%s10752_s30 + $0x308] ss:$0 sps:$4 sm:$0xff]  }
 0x303   : > { %4081 = vrot.lane.b32.xlu0 %v10417_v47, %s10687_s16 }
 0x304   : > { %v12878_v50 = vpop.permute.xlu1 %5276  ;;  %v5696_v49 = vor.u32 %v5695_v31, %v5691_v3  ;;  %v10426_v31 = vld [vmem:[%s10752_s30 + $0x340] ss:$0 sps:$4 sm:$0xff]   ;;  %v10427_v3 = vld [vmem:[%s10752_s30 + $0x338] ss:$0 sps:$4 sm:$0xff]  }
 0x305   : > { %15005 = vst [vmem:[#allocation7_spill] sm:$0xff] %v12878_v50  ;;  %v12880_v35 = vpop.permute.xlu0 %5274 }
 0x306   : > { %15006 = vst [vmem:[#allocation59_spill] sm:$0xff] %v12880_v35  ;;  %4119 = vrot.lane.b32.xlu1 %v10418_v5, %s10688_s17  ;;  %v5703_v5 = vor.u32 %v5702_v11, %v5698_v41  ;;  %v10432_v11 = vld [vmem:[%s10752_s30 + $0x40] sm:$0x1f]  }
 0x307   : > { %4117 = vrot.lane.b32.xlu0 %v10419_v40, %s10688_s17  ;;  %v5714_v50 = vshll.u32 %v10432_v11, 16 }
 0x308   : > { %v12886_v47 = vpop.permute.xlu1 %5312 }
 0x309   : > { %15007 = vst [vmem:[#allocation9_spill] sm:$0xff] %v12886_v47  ;;  %v12888_v12 = vpop.permute.xlu0 %5310 }
 0x30a   : > { %15008 = vst [vmem:[#allocation12_spill] sm:$0xff] %v12888_v12  ;;  %5620 = vrot.lane.b32.xlu1 %v10420_v13, %s10687_s16  ;;  %v10434_v12 = vld [vmem:[%s10752_s30 + $0x78] sm:$0x1f]  }
 0x30b   : > { %5618 = vrot.lane.b32.xlu0 %v10421_v51, %s10687_s16  ;;  %v10433_v51 = vld [vmem:[%s10752_s30 + $0x38] sm:$0x1f]   ;;  %v5812_v23 = vshll.u32 %v10434_v12, 16 }
 0x30c   : > { %v12892_v62 = vpop.permute.xlu1 %5876  ;;  %v5707_v47 = vshll.u32 %v10433_v51, 16  ;;  %v5705_v29 = vshrl.u32 %v10433_v51, 16  ;;  %v5807_v51 = vrot.slane %v5805_v44, 1 }
 0x30d   : > { %15009 = vst [vmem:[#allocation13_spill] sm:$0xff] %v12892_v62  ;;  %v12894_v40 = vpop.permute.xlu0 %5874  ;;  %v5712_v62 = vshrl.u32 %v10432_v11, 16  ;;  %v5803_v11 = vshrl.u32 %v10435_v53, 16  ;;  %v10436_v53 = vld [vmem:[%s10752_s30 + $0x350] ss:$0 sps:$4 sm:$0xff]  }
 0x30e   : > { %15010 = vst [vmem:[#allocation16_spill] sm:$0xff] %v12894_v40  ;;  %5728 = vrot.lane.b32.xlu1 %v5703_v5, %s10688_s17  ;;  %v5709_v20 = vrot.slane %v5707_v47, 1 }
 0x30f   : > { %5726 = vrot.lane.b32.xlu0 %v5696_v49, %s10688_s17  ;;  %v10428_v49 = vld [vmem:[%s10752_s30 + $0xb0] ss:$0 sps:$4 sm:$0xff]  }
 0x310   : > { %v12900_v13 = vpop.permute.xlu1 %5912 }
 0x311   : > { %v12902_v41 = vpop.permute.xlu0 %5910 }
 0x312   : > { %3811 = vrot.lane.b32.xlu1 %v10424_v61, %s10680_s9  ;;  %v10429_v61 = vld [vmem:[%s10752_s30 + $0xa8] ss:$0 sps:$4 sm:$0xff]  }
 0x313   : > { %3809 = vrot.lane.b32.xlu0 %v10425_v43, %s10680_s9 }
 0x314   : > { %v12910_v5 = vpop.permute.xlu1 %3923 }
 0x315   : > { %15011 = vst [vmem:[#allocation17_spill] sm:$0xff] %v12910_v5  ;;  %v12912_v35 = vpop.permute.xlu0 %3921  ;;  %v10430_v5 = vld [vmem:[%s10752_s30 + $0xe8] ss:$0 sps:$4 sm:$0xff]  }
 0x316   : > { %15012 = vst [vmem:[#allocation23_spill] sm:$0xff] %v12912_v35  ;;  %3847 = vrot.lane.b32.xlu1 %v10426_v31, %s10681_s10  ;;  %v5716_v35 = vrot.slane %v5714_v50, 1  ;;  %v10431_v31 = vld [vmem:[%s10752_s30 + $0xe0] ss:$0 sps:$4 sm:$0xff]   ;;  %v5710_v50 = vor.u32 %v5709_v20, %v5705_v29  ;;  %v10437_v20 = vld [vmem:[%s10752_s30 + $0x348] ss:$0 sps:$4 sm:$0xff]  }
 0x317   : > { %3845 = vrot.lane.b32.xlu0 %v10427_v3, %s10681_s10 }
 0x318   : > { %v12920_v40 = vpop.permute.xlu1 %3959 }
 0x319   : > { %15013 = vst [vmem:[#allocation20_spill] sm:$0xff] %v12920_v40  ;;  %v12922_v43 = vpop.permute.xlu0 %3957  ;;  %v5814_v40 = vrot.slane %v5812_v23, 1  ;;  %v9319_v23 = vld [vmem:[%s10752_s30 + $0x2d0] sm:$0xf] }
 0x31a   : > { %15014 = vst [vmem:[#allocation32_spill] sm:$0xff] %v12922_v43  ;;  %4123 = vrot.lane.b32.xlu1 %v10428_v49, %s10688_s17  ;;  %v5717_v43 = vor.u32 %v5716_v35, %v5712_v62  ;;  %v5810_v49 = vshrl.u32 %v10434_v12, 16  ;;  %v9320_v12 = vld [vmem:[%s10752_s30 + $0x2d8] sm:$0xf]  ;;  %v6152_v29 = vsel %vm1169_vm0, %v9319_v23, %v12396_v25 }
 0x31b   : > { %4121 = vrot.lane.b32.xlu0 %v10429_v61, %s10688_s17  ;;  %v6155_v44 = vsel %vm1169_vm0, %v9320_v12, %v12394_v39 }
 0x31c   : > { %v12928_v3 = vpop.permute.xlu1 %5316 }
 0x31d   : > { %15015 = vst [vmem:[#allocation39_spill] sm:$0xff] %v12928_v3  ;;  %v12930_v32 = vpop.permute.xlu0 %5314 }
 0x31e   : > { %15016 = vst [vmem:[#allocation40_spill] sm:$0xff] %v12930_v32  ;;  %4159 = vrot.lane.b32.xlu1 %v10430_v5, %s10689_s18  ;;  %v5815_v32 = vor.u32 %v5814_v40, %v5810_v49  ;;  %v5808_v5 = vor.u32 %v5807_v51, %v5803_v11  ;;  %v6177_v40 = vsel %vm1194_vm1, %v6155_v44, %v12408_v4  ;;  %v12965_v49 = vld [vmem:[%s10752_s30 + $0x88] sm:$0x1f]   ;;  %v12975_v4 = vld [vmem:[%s14671_s2] ss:$0 sm:$0xff] }
 0x31f   : > { %4157 = vrot.lane.b32.xlu0 %v10431_v31, %s10689_s18  ;;  %v6193_v31 = vsel %vm1211_vm2, %v6177_v40, %v12422_v6  ;;  %15020 = vst [vmem:[#allocation56_spill] sm:$0xff] %v12975_v4  ;;  %v12985_v51 = vld [vmem:[%s10752_s30 + $0x80] sm:$0x1f]  }
 0x320   : > { %v12934_v47 = vpop.permute.xlu1 %5424  ;;  %v6209_v25 = vsel %vm1228_vm3, %v6193_v31, %v12440_v26 }
 0x321   : > { %15017 = vst [vmem:[#allocation47_spill] sm:$0xff] %v12934_v47  ;;  %v12936_v61 = vpop.permute.xlu0 %5422  ;;  %v6225_v11 = vsel %vm1245_vm4, %v6209_v25, %v12455_v57  ;;  %v3552_v47 = vld [vmem:[#allocation2 + $0x94] sm:$0x1] }
 0x322   : > { %15018 = vst [vmem:[#allocation48_spill] sm:$0xff] %v12936_v61  ;;  %5732 = vrot.lane.b32.xlu1 %v5717_v43, %s10688_s17 }
 0x323   : > { %5730 = vrot.lane.b32.xlu0 %v5710_v50, %s10688_s17 }
 0x324   : > { %v12941_v35 = vpop.permute.xlu1 %5916 }
 0x325   : > { %v12944_v62 = vpop.permute.xlu0 %5914 }
 0x326   : > { %15019 = vst [vmem:[#allocation55_spill] sm:$0xff] %v12944_v62  ;;  %5840 = vrot.lane.b32.xlu1 %v5815_v32, %s10689_s18  ;;  %v6175_v32 = vsel %vm1194_vm1, %v6152_v29, %v12410_v37  ;;  %v10438_v37 = vld [vmem:[%s10752_s30 + $0x388] ss:$0 sps:$4 sm:$0xff]   ;;  %v3555_v62 = vld [vmem:[#allocation2 + $0x98] sm:$0xf] }
 0x327   : > { %5838 = vrot.lane.b32.xlu0 %v5808_v5, %s10689_s18  ;;  %v6191_v50 = vsel %vm1211_vm2, %v6175_v32, %v12424_v16  ;;  %v10439_v16 = vld [vmem:[%s10752_s30 + $0x380] ss:$0 sps:$4 sm:$0xff]   ;;  %v6241_v5 = vsel %vm1262_vm5, %v6225_v11, %v12492_v17 }
 0x328   : > { %v12956_v43 = vpop.permute.xlu1 %6024  ;;  %v6207_v6 = vsel %vm1228_vm3, %v6191_v50, %v12442_v0  ;;  %v6257_v57 = vsel %vm14694_vm6, %v6241_v5, %v12596_v1  ;;  %v10441_v1 = vld [vmem:[%s10752_s30 + $0xf0] ss:$0 sps:$4 sm:$0xff]  }
 0x329   : > { %v12962_v39 = vpop.permute.xlu0 %6022  ;;  %v6223_v26 = vsel %vm1245_vm4, %v6207_v6, %v12458_v30  ;;  %v5826_v30 = vshll.u32 %v12965_v49, 16  ;;  %v6273_v17 = vsel %vm14693_vm7, %v6257_v57, %v12638_v58  ;;  %v5819_v6 = vshll.u32 %v12985_v51, 16 }
 0x32a   : > { %3851 = vrot.lane.b32.xlu1 %v10436_v53, %s10681_s10  ;;  %v6239_v0 = vsel %vm1262_vm5, %v6223_v26, %v12498_v21  ;;  %v10440_v21 = vld [vmem:[%s10752_s30 + $0xf8] ss:$0 sps:$4 sm:$0xff]  }
 0x32b   : > { %3849 = vrot.lane.b32.xlu0 %v10437_v20, %s10681_s10  ;;  %v6255_v29 = vsel %vm14694_vm6, %v6239_v0, %v12602_v63  ;;  %v5828_v0 = vrot.slane %v5826_v30, 1 }
 0x32c   : > { %v9905_v12 = vpop.f32.mrb[0].mxu1  ;;  %v12991_v23 = vpop.permute.xlu1 %3963 }
 0x32d   : > { %15021 = vst [vmem:[#allocation34_spill] sm:$0xff] %v12991_v23  ;;  %v3387_v53 = vadd.f32 %v9905_v12, %v12975_v4  ;;  %v3378_v44 = vpop.f32.mrb[1].mxu1  ;;  %v12998_v20 = vpop.permute.xlu0 %3961 }
 0x32e   : > { %15022 = vst [vmem:[#allocation50_spill] sm:$0xff] %v12998_v20  ;;  %v3379_v40 = vadd.f32 %v12975_v4, %v3378_v44  ;;  %v9906_v32 = vpop.f32.mrb[2].mxu1  ;;  %3887 = vrot.lane.b32.xlu1 %v10438_v37, %s10682_s11  ;;  %v5824_v37 = vshrl.u32 %v12965_v49, 16  ;;  %v10443_v20 = vld [vmem:[%s10752_s30 + $0x128] ss:$0 sps:$4 sm:$0xff]   ;;  %v5817_v49 = vshrl.u32 %v12985_v51, 16 }
 0x32f   : > { %vm3411_vm14 = vcmp.ge.f32.partialorder %v3387_v53, 0.0  ;;  %v3419_v31 = vmul.f32 0.2, %v3387_v53  ;;  %v3390_v50 = vadd.f32 %v9906_v32, %v12975_v4  ;;  %v3381_v25 = vpop.f32.mrb[3].mxu1  ;;  %3885 = vrot.lane.b32.xlu0 %v10439_v16, %s10682_s11  ;;  %v10442_v32 = vld [vmem:[%s10752_s30 + $0x130] ss:$0 sps:$4 sm:$0xff]  }
 0x330   : > { %vm3409_vm8 = vcmp.ge.f32.partialorder %v3379_v40, 0.0  ;;  %v3417_v63 = vmul.f32 0.2, %v3379_v40  ;;  %v3382_v58 = vadd.f32 %v12975_v4, %v3381_v25  ;;  %v13013_v11 = vpop.permute.xlu1 %3999 }
 0x331   : > { %15023 = vst [vmem:[#allocation57_spill] sm:$0xff] %v13013_v11  ;;  %v3427_v26 = vsel %vm3411_vm14, %v3387_v53, %v3419_v31  ;;  %vm3412_vm10 = vcmp.ge.f32.partialorder %v3390_v50, 0.0  ;;  %v3420_v5 = vmul.f32 0.2, %v3390_v50  ;;  %v13016_v12 = vpop.permute.xlu0 %3997  ;;  %v5821_v53 = vrot.slane %v5819_v6, 1  ;;  %vm13034_vm14 = vmand %vm14689_vm15, %vm3547_vm11 }
 0x332   : > { %15024 = vst [vmem:[#allocation43_spill] sm:$0xff] %v13016_v12  ;;  %v9789_v57 = vpack.c.bf16 %v3427_v26, %v3427_v26  ;;  %v3425_v16 = vsel %vm3409_vm8, %v3379_v40, %v3417_v63  ;;  %vm3410_vm9 = vcmp.ge.f32.partialorder %v3382_v58, 0.0  ;;  %v3418_v44 = vmul.f32 0.2, %v3382_v58  ;;  %4163 = vrot.lane.b32.xlu1 %v10440_v21, %s10689_s18  ;;  %v3561_v63 = vld [vmem:[#allocation2 + $0xa0] sm:$0xf]  ;;  %vm15031_vm8 = vmmov %vm15026_vm13 }
 0x333   : > { %v9787_v3 = vpack.c.bf16 %v3425_v16, %v3425_v16  ;;  %v3428_v25 = vsel %vm3412_vm10, %v3390_v50, %v3420_v5  ;;  %4161 = vrot.lane.b32.xlu0 %v10441_v1, %s10689_s18  ;;  %v6271_v40 = vsel %vm14693_vm7, %v6255_v29, %v12640_v8  ;;  %v6289_v21 = vsel %vm15026_vm13, %v6273_v17, %v12672_v15  ;;  %v3564_v50 = vld [vmem:[#allocation2 + $0xa4] sm:$0x1]  ;;  %v3549_v16 = vld [vmem:[#allocation2 + $0x90] sm:$0xf]  ;;  %v3567_v17 = vld [vmem:[#allocation2 + $0xa8] sm:$0xf] }
 0x334   : > { %v3482_v31 = vshrl.u32 %v9789_v57, 16  ;;  %v9790_v23 = vpack.c.bf16 %v3428_v25, %v3428_v25  ;;  %v3426_v61 = vsel %vm3410_vm9, %v3382_v58, %v3418_v44  ;;  %v13023_v30 = vpop.permute.xlu1 %5428  ;;  %v3485_v6 = vshll.u32 %v9789_v57, 16 }
 0x335   : > { %15025 = vst [vmem:[#allocation44_spill] sm:$0xff] %v13023_v30  ;;  %v3466_v26 = vshrl.u32 %v9787_v3, 16  ;;  %v9788_v1 = vpack.c.bf16 %v3426_v61, %v3426_v61  ;;  %v13029_v5 = vpop.permute.xlu0 %5426  ;;  %v5829_v58 = vor.u32 %v5828_v0, %v5824_v37  ;;  %v15028_v8 = vmov 0 }
 0x336   : > { %15027 = vst [vmem:[#allocation52_spill] sm:$0xff] %v13029_v5  ;;  %v3484_v51 = vrot.slane %v3482_v31, 7  ;;  %v3490_v25 = vshrl.u32 %v9790_v23, 16  ;;  %4199 = vrot.lane.b32.xlu1 %v10442_v32, %s10690_s19  ;;  %v15029_v8 = vsel %vm13034_vm14, 4294967295, %v15028_v8  ;;  %v3469_v29 = vshll.u32 %v9787_v3, 16 }
 0x337   : > { %15030 = vst [vmem:[#allocation60_spill] sm:$0xff] %v15029_v8  ;;  %v3468_v15 = vrot.slane %v3466_v26, 7  ;;  %v3474_v61 = vshrl.u32 %v9788_v1, 16  ;;  %4197 = vrot.lane.b32.xlu0 %v10443_v20, %s10690_s19  ;;  %v5822_v44 = vor.u32 %v5821_v53, %v5817_v49  ;;  %v3493_v30 = vshll.u32 %v9790_v23, 16  ;;  %v3570_v32 = vld [vmem:[#allocation2 + $0xac] sm:$0x1] }
 0x338   : > { %v3487_v57 = vor.u32 %v3485_v6, %v3484_v51  ;;  %v3488_v31 = vrot.slane %v3484_v51, 4  ;;  %v3492_v5 = vrot.slane %v3490_v25, 7  ;;  %v13039_v37 = vpop.permute.xlu1 %5536  ;;  %v3477_v4 = vshll.u32 %v9788_v1, 16  ;;  %v3558_v23 = vld [vmem:[#allocation2 + $0x9c] sm:$0x1] }
 0x339   : > { %v3471_v0 = vor.u32 %v3469_v29, %v3468_v15  ;;  %v3472_v12 = vrot.slane %v3468_v15, 4  ;;  %v3476_v11 = vrot.slane %v3474_v61, 7  ;;  %v13041_v3 = vpop.permute.xlu0 %5534  ;;  %v10448_v51 = vld [vmem:[%s10752_s30 + $0x1e0] ss:$0 sps:$4 sm:$0xff]   ;;  %vm15032_vm10 = vcmask 654336  }
 0x33a   : > { %v3562_v20 = vsel %vm13034_vm14, %v3487_v57, %v3561_v63  ;;  %v3565_v49 = vsel %vm11953_vm12, %v3488_v31, %v3564_v50  ;;  %v3495_v53 = vor.u32 %v3493_v30, %v3492_v5  ;;  %v3496_v26 = vrot.slane %v3492_v5, 4  ;;  %5844 = vrot.lane.b32.xlu1 %v5829_v58, %s10689_s18  ;;  %v10449_v63 = vld [vmem:[%s10752_s30 + $0x1d8] ss:$0 sps:$4 sm:$0xff]   ;;  %vm15033_vm9 = vmmov %vm15032_vm10  ;;  %v9322_v31 = vld [vmem:[%s10752_s30 + $0x2e8] sm:$0xf] }
 0x33b   : > { %3563 = vst [vmem:[#allocation2 + $0xa0] sm:$0xf] %v3562_v20  ;;  %3566 = vst [vmem:[#allocation2 + $0xa4] sm:$0x1] %v3565_v49  ;;  %v3550_v1 = vsel %vm13034_vm14, %v3471_v0, %v3549_v16  ;;  %v3553_v6 = vsel %vm11953_vm12, %v3472_v12, %v3552_v47  ;;  %v3479_v25 = vor.u32 %v3477_v4, %v3476_v11  ;;  %v3480_v15 = vrot.slane %v3476_v11, 4 }
 0x33c   : > { %5842 = vrot.lane.b32.xlu0 %v5822_v44, %s10689_s18  ;;  %v6287_v30 = vsel %vm15031_vm8, %v6271_v40, %v12674_v34  ;;  %v6305_v50 = vsel %vm15032_vm10, %v6289_v21, %v12738_v45  ;;  %3551 = vst [vmem:[#allocation2 + $0x90] sm:$0xf] %v3550_v1  ;;  %3554 = vst [vmem:[#allocation2 + $0x94] sm:$0x1] %v3553_v6  ;;  %v3568_v5 = vsel %vm13034_vm14, %v3495_v53, %v3567_v17  ;;  %v13063_v4 = vpop.permute.xlu1 %6028  ;;  %vm15034_vm11 = vcmask 719872  }
 0x33d   : > { %v3571_v47 = vsel %vm11953_vm12, %v3496_v26, %v3570_v32  ;;  %v6303_v11 = vsel %vm15033_vm9, %v6287_v30, %v12740_v9  ;;  %v6321_v34 = vsel %vm15034_vm11, %v6305_v50, %v12796_v24  ;;  %3569 = vst [vmem:[#allocation2 + $0xa8] sm:$0xf] %v3568_v5  ;;  %v3556_v45 = vsel %vm13034_vm14, %v3479_v25, %v3555_v62  ;;  %v13073_v40 = vpop.permute.xlu0 %6026  ;;  %vm15035_vm13 = vmmov %vm15034_vm11  ;;  %v10451_v24 = vld [vmem:[%s10752_s30 + $0x398] ss:$0 sps:$4 sm:$0xff]   ;;  %v10454_v44 = vld [vmem:[%s10752_s30 + $0x3d0] ss:$0 sps:$4 sm:$0xff]  }
 0x33e   : > { %3572 = vst [vmem:[#allocation2 + $0xac] sm:$0x1] %v3571_v47  ;;  %v3559_v12 = vsel %vm11953_vm12, %v3480_v15, %v3558_v23  ;;  %v6319_v21 = vsel %vm15035_vm13, %v6303_v11, %v12798_v38  ;;  %vm15036_vm8 = vcmask 785408   ;;  %3557 = vst [vmem:[#allocation2 + $0x98] sm:$0xf] %v3556_v45  ;;  %5880 = vrot.lane.b32.xlu1 %v10448_v51, %s10690_s19  ;;  %vm15038_vm9 = vcmask 850944  }
 0x33f   : > { %v6337_v9 = vsel %vm15036_vm8, %v6321_v34, %v12846_v46  ;;  %3560 = vst [vmem:[#allocation2 + $0x9c] sm:$0x1] %v3559_v12  ;;  %vm15037_vm10 = vmmov %vm15036_vm8  ;;  %v10452_v38 = vld [vmem:[%s10752_s30 + $0x390] ss:$0 sps:$4 sm:$0xff]   ;;  %vm15040_vm13 = vcmask 916480   ;;  %v6161_v20 = vsel %vm1169_vm0, %v9322_v31, %v12402_v54  ;;  %v15045_v5 = vld [vmem:[#allocation58_spill] sm:$0xff] }
 0x340   : > { %v6335_v62 = vsel %vm15037_vm10, %v6319_v21, %v12850_v55  ;;  %v6353_v16 = vsel %vm15038_vm9, %v6337_v9, %v12900_v13  ;;  %5878 = vrot.lane.b32.xlu0 %v10449_v63, %s10690_s19  ;;  %vm15039_vm11 = vmmov %vm15038_vm9  ;;  %v6137_v29 = vpop.permute.xlu1 %6136  ;;  %vm15042_vm10 = vcmask 982016   ;;  %v9321_v32 = vld [vmem:[%s10752_s30 + $0x2e0] sm:$0xf]  ;;  %v10458_v49 = vld [vmem:[%s10752_s30 + $0x138] ss:$0 sps:$4 sm:$0xff]   ;;  %v6181_v26 = vsel %vm1194_vm1, %v6161_v20, %v12414_v19 }
 0x341   : > { %v6351_v46 = vsel %vm15039_vm11, %v6335_v62, %v12902_v41  ;;  %v6369_v58 = vsel %vm15040_vm13, %v6353_v16, %v12956_v43  ;;  %vm15041_vm8 = vmmov %vm15040_vm13  ;;  %v6135_v61 = vpop.permute.xlu0 %6134  ;;  %v10455_v41 = vld [vmem:[%s10752_s30 + $0x3c8] ss:$0 sps:$4 sm:$0xff]   ;;  %v10457_v0 = vld [vmem:[%s10752_s30 + $0x140] ss:$0 sps:$4 sm:$0xff]   ;;  %v6158_v53 = vsel %vm1169_vm0, %v9321_v32, %v12404_v27  ;;  %v6197_v1 = vsel %vm1211_vm2, %v6181_v26, %v12430_v14 }
 0x342   : > { %v6367_v17 = vsel %vm15041_vm8, %v6351_v46, %v12962_v39  ;;  %v6385_v55 = vsel %vm15042_vm10, %v6369_v58, %v6137_v29  ;;  %vm15043_vm15 = vmmov %vm15042_vm10  ;;  %3891 = vrot.lane.b32.xlu1 %v10451_v24, %s10682_s11  ;;  %v6179_v51 = vsel %vm1194_vm1, %v6158_v53, %v12416_v52  ;;  %v6213_v25 = vsel %vm1228_vm3, %v6197_v1, %v12446_v22  ;;  %v10460_v27 = vld [vmem:[%s10752_s30 + $0x178] ss:$0 sps:$4 sm:$0xff]   ;;  %v10461_v14 = vld [vmem:[%s10752_s30 + $0x170] ss:$0 sps:$4 sm:$0xff]  }
 0x343   : > { %v6383_v13 = vsel %vm15043_vm15, %v6367_v17, %v6135_v61  ;;  %v6195_v54 = vsel %vm1211_vm2, %v6179_v51, %v12432_v60  ;;  %v6229_v52 = vsel %vm1245_vm4, %v6213_v25, %v12468_v18  ;;  %vm15044_vm15 = vcmask 588800   ;;  %v15047_v47 = vld [vmem:[#allocation18_spill] sm:$0xff]  ;;  %v15049_v34 = vld [vmem:[#allocation19_spill] sm:$0xff]  ;;  %v15051_v12 = vld [vmem:[#allocation49_spill] sm:$0xff] }
 0x344   : > { %v9632_v57 = vcombine.low %v6383_v13, %v6385_v55  ;;  %3889 = vrot.lane.b32.xlu0 %v10452_v38, %s10682_s11  ;;  %v13100_v43 = vpop.permute.xlu1 %4003  ;;  %v6211_v19 = vsel %vm1228_vm3, %v6195_v54, %v12448_v56  ;;  %v6245_v22 = vsel %vm1262_vm5, %v6229_v52, %v12572_v7  ;;  %vm15046_vm9 = vmmov %vm15044_vm15  ;;  %vm15048_vm11 = vcmask 654336   ;;  %v15055_v24 = vld [vmem:[#allocation13_spill] sm:$0xff]  ;;  %v10466_v16 = vld [vmem:[%s10752_s30 + $0x228] ss:$0 sps:$4 sm:$0xff]  }
 0x345   : > { %v13103_v39 = vpop.permute.xlu0 %4001  ;;  %v6227_v60 = vsel %vm1245_vm4, %v6211_v19, %v12474_v28  ;;  %v6261_v56 = vsel %vm14694_vm6, %v6245_v22, %v12628_v10  ;;  %v10463_v28 = vld [vmem:[%s10752_s30 + $0x1f0] ss:$0 sps:$4 sm:$0xff]   ;;  %v10464_v10 = vld [vmem:[%s10752_s30 + $0x1e8] ss:$0 sps:$4 sm:$0xff]   ;;  %vm15050_vm13 = vmmov %vm15048_vm11  ;;  %vm15052_vm8 = vcmask 719872  }
 0x346   : > { %9951 = vmatprep.mubr.bf16.mxu1 %v9632_v57  ;;  %3927 = vrot.lane.b32.xlu1 %v10454_v44, %s10683_s12  ;;  %v6243_v63 = vsel %vm1262_vm5, %v6227_v60, %v12578_v59  ;;  %v6277_v50 = vsel %vm14693_vm7, %v6261_v56, %v12662_v48  ;;  %vm15054_vm10 = vmmov %vm15052_vm8  ;;  %v15057_v38 = vld [vmem:[#allocation16_spill] sm:$0xff]  ;;  %v10467_v29 = vld [vmem:[%s10752_s30 + $0x220] ss:$0 sps:$4 sm:$0xff]  }
 0x347   : > { %v6259_v18 = vsel %vm14694_vm6, %v6243_v63, %v12630_v36  ;;  %v6293_v59 = vsel %vm15044_vm15, %v6277_v50, %v12729_v42  ;;  %v15053_v42 = vld [vmem:[#allocation29_spill] sm:$0xff]  ;;  %vm15056_vm15 = vcmask 785408   ;;  %v15060_v17 = vld [vmem:[#allocation55_spill] sm:$0xff]  ;;  %v10470_v20 = vld [vmem:[%s10752_s30 + $0x418] ss:$0 sps:$4 sm:$0xff]  }
 0x348   : > { %3925 = vrot.lane.b32.xlu0 %v10455_v41, %s10683_s12  ;;  %v13115_v23 = vpop.permute.xlu1 %4039  ;;  %v6275_v7 = vsel %vm14693_vm7, %v6259_v18, %v12666_v2  ;;  %v6309_v48 = vsel %vm15048_vm11, %v6293_v59, %v15047_v47  ;;  %vm15059_vm11 = vcmask 850944   ;;  %v10468_v31 = vld [vmem:[%s10752_s30 + $0x3e0] ss:$0 sps:$4 sm:$0xff]   ;;  %v10472_v51 = vld [vmem:[%s10752_s30 + $0x188] ss:$0 sps:$4 sm:$0xff]  }
 0x349   : > { %v13121_v6 = vpop.permute.xlu0 %4037  ;;  %v6291_v36 = vsel %vm15046_vm9, %v6275_v7, %v15045_v5  ;;  %v6325_v2 = vsel %vm15052_vm8, %v6309_v48, %v15051_v12  ;;  %vm15058_vm9 = vmmov %vm15056_vm15  ;;  %vm15062_vm8 = vcmask 916480   ;;  %v10478_v1 = vld [vmem:[%s10752_s30 + $0x150] sm:$0x1f]   ;;  %v10473_v54 = vld [vmem:[%s10752_s30 + $0x180] ss:$0 sps:$4 sm:$0xff]  }
 0x34a   : > { %4203 = vrot.lane.b32.xlu1 %v10457_v0, %s10690_s19  ;;  %v6307_v45 = vsel %vm15050_vm13, %v6291_v36, %v15049_v34  ;;  %v6341_v62 = vsel %vm15056_vm15, %v6325_v2, %v15055_v24  ;;  %vm15061_vm13 = vmmov %vm15059_vm11  ;;  %vm15064_vm15 = vcmask 982016   ;;  %v10479_v25 = vld [vmem:[%s10752_s30 + $0x148] sm:$0x1f]   ;;  %v10474_v52 = vld [vmem:[%s10752_s30 + $0x1c0] ss:$0 sps:$4 sm:$0xff]   ;;  %v6002_v50 = vshrl.u32 %v10478_v1, 16 }
 0x34b   : > { %v6323_v9 = vsel %vm15054_vm10, %v6307_v45, %v15053_v42  ;;  %v6357_v58 = vsel %vm15059_vm11, %v6341_v62, %v12941_v35  ;;  %vm15063_vm10 = vmmov %vm15062_vm8  ;;  %v10475_v60 = vld [vmem:[%s10752_s30 + $0x1b8] ss:$0 sps:$4 sm:$0xff]   ;;  %v5997_v22 = vshll.u32 %v10479_v25, 16  ;;  %v10530_v7 = vld [vmem:[%s14670_s1] sm:$0xff]  }
 0x34c   : > { %4201 = vrot.lane.b32.xlu0 %v10458_v49, %s10690_s19  ;;  %v13139_v15 = vpop.permute.xlu1 %5540  ;;  %v6339_v46 = vsel %vm15058_vm9, %v6323_v9, %v15057_v38  ;;  %v6373_v61 = vsel %vm15062_vm8, %v6357_v58, %v13063_v4  ;;  %vm15065_vm9 = vmmov %vm15064_vm15  ;;  %v10469_v4 = vld [vmem:[%s10752_s30 + $0x3d8] ss:$0 sps:$4 sm:$0xff]   ;;  %v10471_v49 = vld [vmem:[%s10752_s30 + $0x410] ss:$0 sps:$4 sm:$0xff]   ;;  %9911 = vmatprep.subr.bf16.mxu0 %v10530_v7 }
 0x34d   : > { %v13145_v30 = vpop.permute.xlu0 %5538  ;;  %v6355_v55 = vsel %vm15061_vm13, %v6339_v46, %v15060_v17  ;;  %v10476_v18 = vld [vmem:[%s10752_s30 + $0x238] ss:$0 sps:$4 sm:$0xff]   ;;  %v10477_v59 = vld [vmem:[%s10752_s30 + $0x230] ss:$0 sps:$4 sm:$0xff]   ;;  %v5999_v5 = vrot.slane %v5997_v22, 1  ;;  %9912 = vmatpush3.bf16.msra.mxu0 %v10530_v7  ;;  %v10531_v9 = vld [vmem:[%s14670_s1 + $0x8] sm:$0xff]  }
 0x34e   : > { %4239 = vrot.lane.b32.xlu1 %v10460_v27, %s10691_s24  ;;  %v6371_v44 = vsel %vm15063_vm10, %v6355_v55, %v13073_v40  ;;  %v10488_v34 = vld [vmem:[%s10752_s30 + $0x160] sm:$0x1f]   ;;  %v13242_v2 = vld [vmem:[%s10752_s30 + $0x158] sm:$0x1f]   ;;  %v10480_v24 = vld [vmem:[%s10752_s30 + $0x428] ss:$0 sps:$4 sm:$0xff]   ;;  %9913 = vmatprep.subr.bf16.mxu0 %v10531_v9 }
 0x34f   : > { %v6018_v62 = vshll.u32 %v10488_v34, 16  ;;  %v6011_v58 = vshll.u32 %v13242_v2, 16  ;;  %v10533_v7 = vld [vmem:[%s14670_s1 + $0x18] sm:$0xff]  }
 0x350   : > { %4237 = vrot.lane.b32.xlu0 %v10461_v14, %s10691_s24  ;;  %v13163_v11 = vpop.permute.xlu1 %5576  ;;  %v6004_v14 = vshll.u32 %v10478_v1, 16 }
 0x351   : > { %v13169_v21 = vpop.permute.xlu0 %5574  ;;  %9914 = vmatpush3.bf16.msra.mxu0 %v10531_v9 }
 0x352   : > { %5884 = vrot.lane.b32.xlu1 %v10463_v28, %s10690_s19  ;;  %v6006_v28 = vrot.slane %v6004_v14, 1 }
 0x354   : > { %5882 = vrot.lane.b32.xlu0 %v10464_v10, %s10690_s19  ;;  %v6141_v13 = vpop.permute.xlu1 %6140  ;;  %v5995_v10 = vshrl.u32 %v10479_v25, 16  ;;  %v6007_v48 = vor.u32 %v6006_v28, %v6002_v50 }
 0x355   : > { %v6389_v57 = vsel %vm15064_vm15, %v6373_v61, %v6141_v13  ;;  %v6139_v41 = vpop.permute.xlu0 %6138  ;;  %v10482_v13 = vld [vmem:[%s10752_s30 + $0x460] ss:$0 sps:$4 sm:$0xff]   ;;  %vm15118_vm15 = vcmask 588800  }
 0x356   : > { %v6387_v35 = vsel %vm15065_vm9, %v6371_v44, %v6139_v41  ;;  %5920 = vrot.lane.b32.xlu1 %v10466_v16, %s10691_s24  ;;  %v6000_v45 = vor.u32 %v5999_v5, %v5995_v10  ;;  %v10481_v16 = vld [vmem:[%s10752_s30 + $0x420] ss:$0 sps:$4 sm:$0xff]   ;;  %v13261_v44 = vld [vmem:[%s10752_s30 + $0x198] sm:$0x1f]   ;;  %vm15121_vm9 = vmmov %vm15118_vm15 }
 0x357   : > { %v9633_v32 = vcombine.low %v6387_v35, %v6389_v57  ;;  %v10532_v57 = vld [vmem:[%s14670_s1 + $0x10] sm:$0xff]   ;;  %v6116_v28 = vshll.u32 %v13261_v44, 16 }
 0x358   : > { %5918 = vrot.lane.b32.xlu0 %v10467_v29, %s10691_s24  ;;  %v13195_v0 = vpop.permute.xlu1 %3767  ;;  %v15071_v29 = vld [vmem:[#allocation56_spill] sm:$0xff]  ;;  %9915 = vmatprep.subr.bf16.mxu0 %v10532_v57 }
 0x359   : > { %15066 = vst [vmem:[#allocation58_spill] sm:$0xff] %v13195_v0  ;;  %9952 = vmatmul.mubr.bf16.vlgmr.msra.gmra.mrb[8].mxu1 %v9633_v32  ;;  %v13197_v40 = vpop.permute.xlu0 %3765  ;;  %v6016_v32 = vshrl.u32 %v10488_v34, 16  ;;  %9916 = vmatpush3.bf16.msra.mxu0 %v10532_v57 }
 0x35a   : > { %15067 = vst [vmem:[#allocation18_spill] sm:$0xff] %v13197_v40  ;;  %3931 = vrot.lane.b32.xlu1 %v10468_v31, %s10683_s12  ;;  %v10483_v31 = vld [vmem:[%s10752_s30 + $0x458] ss:$0 sps:$4 sm:$0xff]   ;;  %9917 = vmatprep.subr.bf16.mxu0 %v10533_v7  ;;  %v15102_v40 = vld [vmem:[#allocation61_spill] sm:$0xff] }
 0x35c   : > { %3929 = vrot.lane.b32.xlu0 %v10469_v4, %s10683_s12  ;;  %v13203_v53 = vpop.permute.xlu1 %4043  ;;  %v6020_v4 = vrot.slane %v6018_v62, 1 }
 0x35d   : > { %v13205_v26 = vpop.permute.xlu0 %4041  ;;  %9918 = vmatpush3.bf16.msra.mxu0 %v10533_v7 }
 0x35e   : > { %3967 = vrot.lane.b32.xlu1 %v10470_v20, %s10684_s13  ;;  %v6009_v20 = vshrl.u32 %v13242_v2, 16  ;;  %v10485_v2 = vld [vmem:[%s10752_s30 + $0x1c8] ss:$0 sps:$4 sm:$0xff]   ;;  %v13288_v9 = vor.u32 %v6020_v4, %v6016_v32  ;;  %v10534_v4 = vld [vmem:[%s14670_s1 + $0x20] sm:$0xff]  }
 0x35f   : > { %9919 = vmatprep.subr.bf16.mxu0 %v10534_v4 }
 0x360   : > { %3965 = vrot.lane.b32.xlu0 %v10471_v49, %s10684_s13  ;;  %v13213_v27 = vpop.permute.xlu1 %4079 }
 0x361   : > { %v13215_v19 = vpop.permute.xlu0 %4077  ;;  %9920 = vmatpush3.bf16.msra.mxu0 %v10534_v4  ;;  %v3579_v4 = vld [vmem:[#allocation2 + $0xb8] sm:$0xf] }
 0x362   : > { %4243 = vrot.lane.b32.xlu1 %v10472_v51, %s10691_s24 }
 0x364   : > { %4241 = vrot.lane.b32.xlu0 %v10473_v54, %s10691_s24  ;;  %v13221_v63 = vpop.permute.xlu1 %5580  ;;  %v13273_v54 = vld [vmem:[%s10752_s30 + $0x190] sm:$0x1f]  }
 0x365   : > { %v13223_v56 = vpop.permute.xlu0 %5578  ;;  %v6107_v32 = vshrl.u32 %v13273_v54, 16 }
 0x366   : > { %4279 = vrot.lane.b32.xlu1 %v10474_v52, %s10692_s25 }
 0x368   : > { %4277 = vrot.lane.b32.xlu0 %v10475_v60, %s10692_s25  ;;  %v13232_v36 = vpop.permute.xlu1 %5616  ;;  %v6013_v60 = vrot.slane %v6011_v58, 1 }
 0x369   : > { %v13234_v47 = vpop.permute.xlu0 %5614 }
 0x36a   : > { %5924 = vrot.lane.b32.xlu1 %v10476_v18, %s10691_s24 }
 0x36c   : > { %5922 = vrot.lane.b32.xlu0 %v10477_v59, %s10691_s24  ;;  %v13239_v12 = vpop.permute.xlu1 %3771 }
 0x36d   : > { %15068 = vst [vmem:[#allocation19_spill] sm:$0xff] %v13239_v12  ;;  %v13244_v42 = vpop.permute.xlu0 %3769 }
 0x36e   : > { %15069 = vst [vmem:[#allocation49_spill] sm:$0xff] %v13244_v42  ;;  %6032 = vrot.lane.b32.xlu1 %v6007_v48, %s10692_s25  ;;  %v10484_v48 = vld [vmem:[%s10752_s30 + $0x1d0] ss:$0 sps:$4 sm:$0xff]  }
 0x36f   : > { %v9909_v38 = vpop.f32.mrb[4].mxu1 }
 0x370   : > { %6030 = vrot.lane.b32.xlu0 %v6000_v45, %s10692_s25  ;;  %v13253_v46 = vpop.permute.xlu1 %3807  ;;  %v3403_v17 = vadd.f32 %v9909_v38, %v15071_v29  ;;  %v3394_v55 = vpop.f32.mrb[5].mxu1 }
 0x371   : > { %15070 = vst [vmem:[#allocation29_spill] sm:$0xff] %v13253_v46  ;;  %v13257_v61 = vpop.permute.xlu0 %3805  ;;  %v3395_v41 = vadd.f32 %v15071_v29, %v3394_v55  ;;  %v9910_v35 = vpop.f32.mrb[6].mxu1  ;;  %v3588_v55 = vld [vmem:[#allocation2 + $0xc4] sm:$0x1] }
 0x372   : > { %15072 = vst [vmem:[#allocation13_spill] sm:$0xff] %v13257_v61  ;;  %3971 = vrot.lane.b32.xlu1 %v10480_v24, %s10684_s13  ;;  %vm3415_vm11 = vcmp.ge.f32.partialorder %v3403_v17, 0.0  ;;  %v3423_v49 = vmul.f32 0.2, %v3403_v17  ;;  %v3406_v51 = vadd.f32 %v9910_v35, %v15071_v29  ;;  %v3397_v1 = vpop.f32.mrb[7].mxu1  ;;  %v6109_v24 = vshll.u32 %v13273_v54, 16 }
 0x373   : > { %vm3413_vm13 = vcmp.ge.f32.partialorder %v3395_v41, 0.0  ;;  %v3421_v25 = vmul.f32 0.2, %v3395_v41  ;;  %v3398_v52 = vadd.f32 %v15071_v29, %v3397_v1  ;;  %v10486_v35 = vld [vmem:[%s10752_s30 + $0x208] ss:$0 sps:$4 sm:$0xff]  }
 0x374   : > { %3969 = vrot.lane.b32.xlu0 %v10481_v16, %s10684_s13  ;;  %v13276_v14 = vpop.permute.xlu1 %4083  ;;  %v3431_v22 = vsel %vm3415_vm11, %v3403_v17, %v3423_v49  ;;  %vm3416_vm8 = vcmp.ge.f32.partialorder %v3406_v51, 0.0  ;;  %v3424_v18 = vmul.f32 0.2, %v3406_v51  ;;  %v3585_v17 = vld [vmem:[#allocation2 + $0xc0] sm:$0xf]  ;;  %vm15122_vm11 = vcmask 654336  }
 0x375   : > { %v13278_v50 = vpop.permute.xlu0 %4081  ;;  %v9793_v59 = vpack.c.bf16 %v3431_v22, %v3431_v22  ;;  %v3429_v10 = vsel %vm3413_vm13, %v3395_v41, %v3421_v25  ;;  %vm3414_vm10 = vcmp.ge.f32.partialorder %v3398_v52, 0.0  ;;  %v3422_v5 = vmul.f32 0.2, %v3398_v52  ;;  %v3573_v1 = vld [vmem:[#allocation2 + $0xb0] sm:$0xf]  ;;  %vm15125_vm13 = vmmov %vm15122_vm11 }
 0x376   : > { %4007 = vrot.lane.b32.xlu1 %v10482_v13, %s10685_s14  ;;  %v9791_v34 = vpack.c.bf16 %v3429_v10, %v3429_v10  ;;  %v3432_v45 = vsel %vm3416_vm8, %v3406_v51, %v3424_v18  ;;  %v3576_v25 = vld [vmem:[#allocation2 + $0xb4] sm:$0x1]  ;;  %v6118_v22 = vrot.slane %v6116_v28, 1  ;;  %vm15126_vm8 = vcmask 719872  }
 0x377   : > { %v3514_v62 = vshrl.u32 %v9793_v59, 16  ;;  %v9794_v16 = vpack.c.bf16 %v3432_v45, %v3432_v45  ;;  %v3430_v38 = vsel %vm3414_vm10, %v3398_v52, %v3422_v5  ;;  %v3517_v51 = vshll.u32 %v9793_v59, 16  ;;  %vm15129_vm10 = vmmov %vm15126_vm8 }
 0x378   : > { %4005 = vrot.lane.b32.xlu0 %v10483_v31, %s10685_s14  ;;  %v13291_v58 = vpop.permute.xlu1 %4119  ;;  %v3498_v13 = vshrl.u32 %v9791_v34, 16  ;;  %v9792_v57 = vpack.c.bf16 %v3430_v38, %v3430_v38  ;;  %v6014_v31 = vor.u32 %v6013_v60, %v6009_v20  ;;  %v3501_v7 = vshll.u32 %v9791_v34, 16  ;;  %v10487_v20 = vld [vmem:[%s10752_s30 + $0x200] ss:$0 sps:$4 sm:$0xff]  }
 0x379   : > { %v13294_v41 = vpop.permute.xlu0 %4117  ;;  %v3516_v49 = vrot.slane %v3514_v62, 7  ;;  %v3522_v52 = vshrl.u32 %v9794_v16, 16  ;;  %v6111_v60 = vrot.slane %v6109_v24, 1  ;;  %v3525_v38 = vshll.u32 %v9794_v16, 16  ;;  %v3591_v62 = vld [vmem:[#allocation2 + $0xc8] sm:$0xf] }
 0x37a   : > { %4283 = vrot.lane.b32.xlu1 %v10484_v48, %s10692_s25  ;;  %v3500_v18 = vrot.slane %v3498_v13, 7  ;;  %v3506_v10 = vshrl.u32 %v9792_v57, 16  ;;  %v3594_v48 = vld [vmem:[#allocation2 + $0xcc] sm:$0x1]  ;;  %v3509_v13 = vshll.u32 %v9792_v57, 16 }
 0x37b   : > { %v3519_v54 = vor.u32 %v3517_v51, %v3516_v49  ;;  %v3520_v5 = vrot.slane %v3516_v49, 4  ;;  %v3524_v45 = vrot.slane %v3522_v52, 7  ;;  %v3582_v52 = vld [vmem:[#allocation2 + $0xbc] sm:$0x1] }
 0x37c   : > { %4281 = vrot.lane.b32.xlu0 %v10485_v2, %s10692_s25  ;;  %v13304_v59 = vpop.permute.xlu1 %5620  ;;  %v3503_v29 = vor.u32 %v3501_v7, %v3500_v18  ;;  %v3504_v61 = vrot.slane %v3500_v18, 4  ;;  %v3508_v28 = vrot.slane %v3506_v10, 7  ;;  %v10535_v2 = vld [vmem:[%s14670_s1 + $0x28] sm:$0xff]  }
 0x37d   : > { %v13306_v34 = vpop.permute.xlu0 %5618  ;;  %v3586_v24 = vsel %vm13034_vm14, %v3519_v54, %v3585_v17  ;;  %v3589_v16 = vsel %vm11953_vm12, %v3520_v5, %v3588_v55  ;;  %v3527_v49 = vor.u32 %v3525_v38, %v3524_v45  ;;  %v3528_v51 = vrot.slane %v3524_v45, 4  ;;  %9921 = vmatprep.subr.bf16.mxu0 %v10535_v2 }
 0x37e   : > { %15073 = vst [vmem:[#allocation16_spill] sm:$0xff] %v13306_v34  ;;  %4319 = vrot.lane.b32.xlu1 %v10486_v35, %s10693_s21  ;;  %3587 = vst [vmem:[#allocation2 + $0xc0] sm:$0xf] %v3586_v24  ;;  %v3574_v57 = vsel %vm13034_vm14, %v3503_v29, %v3573_v1  ;;  %v3577_v18 = vsel %vm11953_vm12, %v3504_v61, %v3576_v25  ;;  %v3511_v7 = vor.u32 %v3509_v13, %v3508_v28  ;;  %v10536_v25 = vld [vmem:[%s14670_s1 + $0x30] sm:$0xff]   ;;  %v10495_v13 = vld [vmem:[%s10752_s30 + $0x28] ss:$0 sps:$4 sm:$0xff]  }
 0x37f   : > { %3590 = vst [vmem:[#allocation2 + $0xc4] sm:$0x1] %v3589_v16  ;;  %v3512_v10 = vrot.slane %v3508_v28, 4  ;;  %3575 = vst [vmem:[#allocation2 + $0xb0] sm:$0xf] %v3574_v57  ;;  %v3592_v17 = vsel %vm13034_vm14, %v3527_v49, %v3591_v62  ;;  %v3595_v55 = vsel %vm11953_vm12, %v3528_v51, %v3594_v48  ;;  %9922 = vmatpush3.bf16.msra.mxu0 %v10535_v2  ;;  %v10537_v62 = vld [vmem:[%s14670_s1 + $0x38] sm:$0xff]  }
 0x380   : > { %4317 = vrot.lane.b32.xlu0 %v10487_v20, %s10693_s21  ;;  %3578 = vst [vmem:[#allocation2 + $0xb4] sm:$0x1] %v3577_v18  ;;  %v13325_v35 = vpop.permute.xlu1 %5728  ;;  %3593 = vst [vmem:[#allocation2 + $0xc8] sm:$0xf] %v3592_v17  ;;  %v3580_v61 = vsel %vm13034_vm14, %v3511_v7, %v3579_v4  ;;  %v15074_v20 = vshrl.u32 %v13261_v44, 16  ;;  %v6112_v5 = vor.u32 %v6111_v60, %v6107_v32  ;;  %9923 = vmatprep.subr.bf16.mxu0 %v10536_v25 }
 0x381   : > { %3596 = vst [vmem:[#allocation2 + $0xcc] sm:$0x1] %v3595_v55  ;;  %v3583_v29 = vsel %vm11953_vm12, %v3512_v10, %v3582_v52  ;;  %v13331_v1 = vpop.permute.xlu0 %5726  ;;  %3581 = vst [vmem:[#allocation2 + $0xb8] sm:$0xf] %v3580_v61  ;;  %v10498_v44 = vld [vmem:[%s10752_s30 + $0x1a8] sm:$0x1f]  }
 0x382   : > { %3584 = vst [vmem:[#allocation2 + $0xbc] sm:$0x1] %v3583_v29  ;;  %6036 = vrot.lane.b32.xlu1 %v13288_v9, %s10692_s25  ;;  %v6119_v54 = vor.u32 %v6118_v22, %v15074_v20  ;;  %v10492_v9 = vld [vmem:[%s10752_s30 + $0x470] ss:$0 sps:$4 sm:$0xff]   ;;  %v10499_v32 = vld [vmem:[%s10752_s30 + $0x1a0] sm:$0x1f]  }
 0x383   : > { %9924 = vmatpush3.bf16.msra.mxu0 %v10536_v25  ;;  %v10494_v48 = vld [vmem:[%s10752_s30 + $0x30] ss:$0 sps:$4 sm:$0xff]   ;;  %v6130_v28 = vshll.u32 %v10498_v44, 16  ;;  %v6123_v2 = vshll.u32 %v10499_v32, 16  ;;  %v10496_v49 = vld [vmem:[%s10752_s30 + $0x218] ss:$0 sps:$4 sm:$0xff]  }
 0x384   : > { %6034 = vrot.lane.b32.xlu0 %v6014_v31, %s10692_s25  ;;  %v13341_v45 = vpop.permute.xlu1 %3811  ;;  %v10493_v31 = vld [vmem:[%s10752_s30 + $0x468] ss:$0 sps:$4 sm:$0xff]   ;;  %9925 = vmatprep.subr.bf16.mxu0 %v10537_v62  ;;  %v6128_v51 = vshrl.u32 %v10498_v44, 16  ;;  %v10497_v52 = vld [vmem:[%s10752_s30 + $0x210] ss:$0 sps:$4 sm:$0xff]   ;;  %v6121_v57 = vshrl.u32 %v10499_v32, 16 }
 0x385   : > { %15075 = vst [vmem:[#allocation55_spill] sm:$0xff] %v13341_v45  ;;  %v13343_v38 = vpop.permute.xlu0 %3809  ;;  %v6132_v4 = vrot.slane %v6130_v28, 1  ;;  %v6125_v18 = vrot.slane %v6123_v2, 1  ;;  %v10500_v25 = vld [vmem:[%s10752_s30 + $0x40] ss:$0 sps:$4 sm:$0xff]  }
 0x386   : > { %15076 = vst [vmem:[#allocation56_spill] sm:$0xff] %v13343_v38  ;;  %6144 = vrot.lane.b32.xlu1 %v6119_v54, %s10693_s21  ;;  %v10501_v20 = vld [vmem:[%s10752_s30 + $0x38] ss:$0 sps:$4 sm:$0xff]   ;;  %v10504_v32 = vld [vmem:[%s10752_s30 + $0x88] ss:$0 sps:$4 sm:$0xff]  }
 0x387   : > { %9926 = vmatpush3.bf16.msra.mxu0 %v10537_v62  ;;  %v6133_v17 = vor.u32 %v6132_v4, %v6128_v51  ;;  %v6126_v55 = vor.u32 %v6125_v18, %v6121_v57  ;;  %v10502_v62 = vld [vmem:[%s10752_s30 + $0x78] ss:$0 sps:$4 sm:$0xff]   ;;  %v10506_v2 = vld [vmem:[%s10752_s30 + $0xc0] ss:$0 sps:$4 sm:$0xff]   ;;  %v10509_v57 = vld [vmem:[%s10752_s30 + $0xc8] ss:$0 sps:$4 sm:$0xff]  }
 0x388   : > { %6142 = vrot.lane.b32.xlu0 %v6112_v5, %s10693_s21  ;;  %v13354_v22 = vpop.permute.xlu1 %3847 }
 0x389   : > { %15077 = vst [vmem:[#allocation65_spill] sm:$0xff] %v13354_v22  ;;  %v13356_v60 = vpop.permute.xlu0 %3845 }
 0x38a   : > { %15078 = vst [vmem:[#allocation66_spill] sm:$0xff] %v13356_v60  ;;  %4011 = vrot.lane.b32.xlu1 %v10492_v9, %s10685_s14  ;;  %v10503_v9 = vld [vmem:[%s10752_s30 + $0x70] ss:$0 sps:$4 sm:$0xff]  }
 0x38c   : > { %4009 = vrot.lane.b32.xlu0 %v10493_v31, %s10685_s14  ;;  %v13362_v24 = vpop.permute.xlu1 %4123 }
 0x38d   : > { %v13364_v16 = vpop.permute.xlu0 %4121 }
 0x38e   : > { %4047 = vrot.lane.b32.xlu1 %v10494_v48, %s10686_s15  ;;  %v10505_v48 = vld [vmem:[%s10752_s30 + $0x80] ss:$0 sps:$4 sm:$0xff]  }
 0x390   : > { %4045 = vrot.lane.b32.xlu0 %v10495_v13, %s10686_s15  ;;  %v13370_v7 = vpop.permute.xlu1 %4159 }
 0x391   : > { %v13372_v10 = vpop.permute.xlu0 %4157 }
 0x392   : > { %4323 = vrot.lane.b32.xlu1 %v10496_v49, %s10693_s21  ;;  %v10507_v49 = vld [vmem:[%s10752_s30 + $0xb8] ss:$0 sps:$4 sm:$0xff]  }
 0x394   : > { %4321 = vrot.lane.b32.xlu0 %v10497_v52, %s10693_s21  ;;  %v13376_v61 = vpop.permute.xlu1 %5732  ;;  %v10508_v52 = vld [vmem:[%s10752_s30 + $0xd0] ss:$0 sps:$4 sm:$0xff]  }
 0x395   : > { %15079 = vst [vmem:[#allocation67_spill] sm:$0xff] %v13376_v61  ;;  %v13378_v29 = vpop.permute.xlu0 %5730  ;;  %v15108_v61 = vld [vmem:[#allocation64_spill] sm:$0xff] }
 0x396   : > { %15080 = vst [vmem:[#allocation68_spill] sm:$0xff] %v13378_v29  ;;  %6148 = vrot.lane.b32.xlu1 %v6133_v17, %s10693_s21 }
 0x398   : > { %6146 = vrot.lane.b32.xlu0 %v6126_v55, %s10693_s21  ;;  %v13384_v54 = vpop.permute.xlu1 %5840  ;;  %v10510_v55 = vld [vmem:[%s10752_s30 + $0x108] ss:$0 sps:$4 sm:$0xff]  }
 0x399   : > { %v13386_v5 = vpop.permute.xlu0 %5838 }
 0x39a   : > { %4051 = vrot.lane.b32.xlu1 %v10500_v25, %s10686_s15  ;;  %v295_v25 = vld [vmem:[#allocation2 + $0x1c] sm:$0x1] }
 0x39c   : > { %4049 = vrot.lane.b32.xlu0 %v10501_v20, %s10686_s15  ;;  %v13392_v44 = vpop.permute.xlu1 %3851  ;;  %v10511_v20 = vld [vmem:[%s10752_s30 + $0x100] ss:$0 sps:$4 sm:$0xff]  }
 0x39d   : > { %15081 = vst [vmem:[#allocation69_spill] sm:$0xff] %v13392_v44  ;;  %v13394_v31 = vpop.permute.xlu0 %3849 }
 0x39e   : > { %15082 = vst [vmem:[#allocation70_spill] sm:$0xff] %v13394_v31  ;;  %4087 = vrot.lane.b32.xlu1 %v10502_v62, %s10687_s16  ;;  %v296_v62 = vsel %vm11953_vm12, 0, %v295_v25  ;;  %v10515_v25 = vld [vmem:[%s10752_s30 + $0x148] ss:$0 sps:$4 sm:$0xff]  }
 0x39f   : > { %297 = vst [vmem:[#allocation2 + $0x1c] sm:$0x1] %v296_v62  ;;  %v287_v62 = vld [vmem:[#allocation2 + $0xc] sm:$0x1]  ;;  %v10525_v31 = vld [vmem:[%s10752_s30 + $0x1e8] ss:$0 sps:$4 sm:$0xff]  }
 0x3a0   : > { %4085 = vrot.lane.b32.xlu0 %v10503_v9, %s10687_s16  ;;  %v13400_v28 = vpop.permute.xlu1 %3887 }
 0x3a1   : > { %15083 = vst [vmem:[#allocation71_spill] sm:$0xff] %v13400_v28  ;;  %v13402_v13 = vpop.permute.xlu0 %3885  ;;  %v291_v28 = vld [vmem:[#allocation2 + $0x14] sm:$0x1] }
 0x3a2   : > { %15084 = vst [vmem:[#allocation72_spill] sm:$0xff] %v13402_v13  ;;  %4091 = vrot.lane.b32.xlu1 %v10504_v32, %s10687_s16 }
 0x3a4   : > { %4089 = vrot.lane.b32.xlu0 %v10505_v48, %s10687_s16  ;;  %v13408_v51 = vpop.permute.xlu1 %4163  ;;  %v10512_v48 = vld [vmem:[%s10752_s30 + $0x118] ss:$0 sps:$4 sm:$0xff]  }
 0x3a5   : > { %v13410_v4 = vpop.permute.xlu0 %4161 }
 0x3a6   : > { %4127 = vrot.lane.b32.xlu1 %v10506_v2, %s10688_s17  ;;  %v10513_v2 = vld [vmem:[%s10752_s30 + $0x110] ss:$0 sps:$4 sm:$0xff]  }
 0x3a8   : > { %4125 = vrot.lane.b32.xlu0 %v10507_v49, %s10688_s17  ;;  %v13416_v18 = vpop.permute.xlu1 %4199 }
 0x3a9   : > { %v13418_v17 = vpop.permute.xlu0 %4197 }
 0x3aa   : > { %4131 = vrot.lane.b32.xlu1 %v10508_v52, %s10688_s17 }
 0x3ac   : > { %4129 = vrot.lane.b32.xlu0 %v10509_v57, %s10688_s17  ;;  %v13426_v9 = vpop.permute.xlu1 %5844  ;;  %v10514_v57 = vld [vmem:[%s10752_s30 + $0x150] ss:$0 sps:$4 sm:$0xff]  }
 0x3ad   : > { %15085 = vst [vmem:[#allocation73_spill] sm:$0xff] %v13426_v9  ;;  %v15106_v9 = vld [vmem:[#allocation8_spill] sm:$0xff] }
 0x3ae   : > { %v13428_v32 = vpop.permute.xlu0 %5842  ;;  %4167 = vrot.lane.b32.xlu1 %v10510_v55, %s10689_s18  ;;  %v288_v55 = vsel %vm11953_vm12, 0, %v287_v62  ;;  %v10517_v62 = vld [vmem:[%s10752_s30 + $0x158] ss:$0 sps:$4 sm:$0xff]  }
 0x3af   : > { %15086 = vst [vmem:[#allocation74_spill] sm:$0xff] %v13428_v32  ;;  %289 = vst [vmem:[#allocation2 + $0xc] sm:$0x1] %v288_v55 }
 0x3b0   : > { %4165 = vrot.lane.b32.xlu0 %v10511_v20, %s10689_s18  ;;  %v13434_v49 = vpop.permute.xlu1 %5880  ;;  %v299_v20 = vld [vmem:[#allocation2 + $0x24] sm:$0x1] }
 0x3b2   : > { %v13436_v52 = vpop.permute.xlu0 %5878  ;;  %4171 = vrot.lane.b32.xlu1 %v10512_v48, %s10689_s18  ;;  %v300_v48 = vsel %vm11953_vm12, 0, %v299_v20  ;;  %v10519_v20 = vld [vmem:[%s10752_s30 + $0x190] ss:$0 sps:$4 sm:$0xff]  }
 0x3b3   : > { %301 = vst [vmem:[#allocation2 + $0x24] sm:$0x1] %v300_v48 }
 0x3b4   : > { %4169 = vrot.lane.b32.xlu0 %v10513_v2, %s10689_s18  ;;  %v13442_v8 = vpop.permute.xlu1 %3891  ;;  %v10516_v2 = vld [vmem:[%s10752_s30 + $0x160] ss:$0 sps:$4 sm:$0xff]  }
 0x3b5   : > { %15087 = vst [vmem:[#allocation75_spill] sm:$0xff] %v13442_v8  ;;  %v292_v8 = vsel %vm11953_vm12, 0, %v291_v28 }
 0x3b6   : > { %v13446_v13 = vpop.permute.xlu0 %3889  ;;  %4207 = vrot.lane.b32.xlu1 %v10514_v57, %s10690_s19  ;;  %293 = vst [vmem:[#allocation2 + $0x14] sm:$0x1] %v292_v8  ;;  %v10518_v57 = vld [vmem:[%s10752_s30 + $0x198] ss:$0 sps:$4 sm:$0xff]   ;;  %v10520_v8 = vld [vmem:[%s10752_s30 + $0x1a8] ss:$0 sps:$4 sm:$0xff]  }
 0x3b7   : > { %15088 = vst [vmem:[#allocation76_spill] sm:$0xff] %v13446_v13 }
 0x3b8   : > { %4205 = vrot.lane.b32.xlu0 %v10515_v25, %s10690_s19  ;;  %v13456_v13 = vpop.permute.xlu1 %3927  ;;  %v10521_v25 = vld [vmem:[%s10752_s30 + $0x1a0] ss:$0 sps:$4 sm:$0xff]  }
 0x3b9   : > { %15089 = vst [vmem:[#allocation77_spill] sm:$0xff] %v13456_v13 }
 0x3ba   : > { %v13458_v55 = vpop.permute.xlu0 %3925  ;;  %4211 = vrot.lane.b32.xlu1 %v10516_v2, %s10690_s19 }
 0x3bb   : > { %15090 = vst [vmem:[#allocation78_spill] sm:$0xff] %v13458_v55  ;;  %v10523_v55 = vld [vmem:[%s10752_s30 + $0x1d8] ss:$0 sps:$4 sm:$0xff]  }
 0x3bc   : > { %4209 = vrot.lane.b32.xlu0 %v10517_v62, %s10690_s19  ;;  %v13464_v48 = vpop.permute.xlu1 %4203  ;;  %v10522_v62 = vld [vmem:[%s10752_s30 + $0x1e0] ss:$0 sps:$4 sm:$0xff]  }
 0x3be   : > { %v13466_v28 = vpop.permute.xlu0 %4201  ;;  %4247 = vrot.lane.b32.xlu1 %v10518_v57, %s10691_s24 }
 0x3c0   : > { %4245 = vrot.lane.b32.xlu0 %v10519_v20, %s10691_s24  ;;  %v13472_v33 = vpop.permute.xlu1 %4239  ;;  %v10524_v20 = vld [vmem:[%s10752_s30 + $0x1f0] ss:$0 sps:$4 sm:$0xff]  }
 0x3c2   : > { %v13474_v2 = vpop.permute.xlu0 %4237  ;;  %4251 = vrot.lane.b32.xlu1 %v10520_v8, %s10691_s24  ;;  %v10526_v8 = vld [vmem:[%s10752_s30 + $0x228] ss:$0 sps:$4 sm:$0xff]  }
 0x3c4   : > { %4249 = vrot.lane.b32.xlu0 %v10521_v25, %s10691_s24  ;;  %v13480_v13 = vpop.permute.xlu1 %5884  ;;  %v10527_v25 = vld [vmem:[%s10752_s30 + $0x220] ss:$0 sps:$4 sm:$0xff]  }
 0x3c5   : > { %15091 = vst [vmem:[#allocation79_spill] sm:$0xff] %v13480_v13 }
 0x3c6   : > { %v13482_v57 = vpop.permute.xlu0 %5882  ;;  %4287 = vrot.lane.b32.xlu1 %v10522_v62, %s10692_s25  ;;  %v10529_v62 = vld [vmem:[%s10752_s30 + $0x230] ss:$0 sps:$4 sm:$0xff]  }
 0x3c7   : > { %15092 = vst [vmem:[#allocation80_spill] sm:$0xff] %v13482_v57  ;;  %v15103_v57 = vld [vmem:[#allocation54_spill] sm:$0xff] }
 0x3c8   : > { %4285 = vrot.lane.b32.xlu0 %v10523_v55, %s10692_s25  ;;  %v13488_v44 = vpop.permute.xlu1 %5920  ;;  %v10528_v55 = vld [vmem:[%s10752_s30 + $0x238] ss:$0 sps:$4 sm:$0xff]  }
 0x3ca   : > { %v13490_v60 = vpop.permute.xlu0 %5918  ;;  %4291 = vrot.lane.b32.xlu1 %v10524_v20, %s10692_s25 }
 0x3cc   : > { %4289 = vrot.lane.b32.xlu0 %v10525_v31, %s10692_s25  ;;  %v13496_v22 = vpop.permute.xlu1 %3931 }
 0x3cd   : > { %15093 = vst [vmem:[#allocation81_spill] sm:$0xff] %v13496_v22 }
 0x3ce   : > { %v13498_v38 = vpop.permute.xlu0 %3929  ;;  %4327 = vrot.lane.b32.xlu1 %v10526_v8, %s10693_s21 }
 0x3cf   : > { %15094 = vst [vmem:[#allocation82_spill] sm:$0xff] %v13498_v38 }
 0x3d0   : > { %4325 = vrot.lane.b32.xlu0 %v10527_v25, %s10693_s21  ;;  %v13504_v45 = vpop.permute.xlu1 %3967  ;;  %v9059_v25 = vld [vmem:[%s10752_s30 + $0x248] sm:$0xf] }
 0x3d1   : > { %15095 = vst [vmem:[#allocation83_spill] sm:$0xff] %v13504_v45  ;;  %v9058_v45 = vld [vmem:[%s10752_s30 + $0x240] sm:$0xf] }
 0x3d2   : > { %v13506_v46 = vpop.permute.xlu0 %3965  ;;  %4331 = vrot.lane.b32.xlu1 %v10528_v55, %s10693_s21  ;;  %v15101_v55 = vld [vmem:[#allocation37_spill] sm:$0xff]  ;;  %v4335_v0 = vsel %vm1169_vm0, %v9058_v45, %v15102_v40 }
 0x3d3   : > { %15096 = vst [vmem:[#allocation84_spill] sm:$0xff] %v13506_v46  ;;  %v15110_v40 = vld [vmem:[#allocation25_spill] sm:$0xff] }
 0x3d4   : > { %4329 = vrot.lane.b32.xlu0 %v10529_v62, %s10693_s21  ;;  %v13510_v31 = vpop.permute.xlu1 %4243  ;;  %v4338_v62 = vsel %vm1169_vm0, %v9059_v25, %v15101_v55  ;;  %v15109_v25 = vld [vmem:[#allocation22_spill] sm:$0xff] }
 0x3d5   : > { %15097 = vst [vmem:[#allocation85_spill] sm:$0xff] %v13510_v31  ;;  %v4360_v13 = vsel %vm1194_vm1, %v4338_v62, %v15103_v57  ;;  %v15111_v57 = vld [vmem:[#allocation6_spill] sm:$0xff] }
 0x3d6   : > { %v13512_v20 = vpop.permute.xlu0 %4241  ;;  %v4376_v29 = vsel %vm1211_vm2, %v4360_v13, %v15106_v9  ;;  %v15112_v31 = vld [vmem:[#allocation30_spill] sm:$0xff] }
 0x3d7   : > { %15098 = vst [vmem:[#allocation86_spill] sm:$0xff] %v13512_v20  ;;  %v4392_v55 = vsel %vm1228_vm3, %v4376_v29, %v15109_v25  ;;  %v15115_v29 = vld [vmem:[#allocation57_spill] sm:$0xff] }
 0x3d8   : > { %v4280_v38 = vpop.permute.xlu1 %4279  ;;  %v4408_v62 = vsel %vm1245_vm4, %v4392_v55, %v15111_v57 }
 0x3da   : > { %v4278_v22 = vpop.permute.xlu0 %4277 }
 0x3dc   : > { %v13514_v8 = vpop.permute.xlu1 %5924 }
 0x3dd   : > { %15099 = vst [vmem:[#allocation87_spill] sm:$0xff] %v13514_v8 }
 0x3de   : > { %v13516_v42 = vpop.permute.xlu0 %5922 }
 0x3df   : > { %15100 = vst [vmem:[#allocation88_spill] sm:$0xff] %v13516_v42  ;;  %v15105_v42 = vld [vmem:[#allocation62_spill] sm:$0xff] }
 0x3e0   : > { %v13519_v12 = vpop.permute.xlu1 %6032  ;;  %v4358_v32 = vsel %vm1194_vm1, %v4335_v0, %v15105_v42  ;;  %v15113_v42 = vld [vmem:[#allocation20_spill] sm:$0xff] }
 0x3e1   : > { %v4374_v34 = vsel %vm1211_vm2, %v4358_v32, %v15108_v61  ;;  %v4424_v13 = vsel %vm1262_vm5, %v4408_v62, %v15113_v42  ;;  %v15114_v61 = vld [vmem:[#allocation32_spill] sm:$0xff]  ;;  %v15119_v42 = vld [vmem:[#allocation45_spill] sm:$0xff] }
 0x3e2   : > { %v13522_v46 = vpop.permute.xlu0 %6030  ;;  %v4390_v45 = vsel %vm1228_vm3, %v4374_v34, %v15110_v40  ;;  %v4440_v25 = vsel %vm14694_vm6, %v4424_v13, %v15115_v29  ;;  %v15116_v40 = vld [vmem:[#allocation43_spill] sm:$0xff] }
 0x3e3   : > { %v4406_v0 = vsel %vm1245_vm4, %v4390_v45, %v15112_v31  ;;  %v4456_v31 = vsel %vm14693_vm7, %v4440_v25, %v13115_v23  ;;  %v15117_v45 = vld [vmem:[#allocation38_spill] sm:$0xff] }
 0x3e4   : > { %v13530_v8 = vpop.permute.xlu1 %3971  ;;  %v4422_v32 = vsel %vm1262_vm5, %v4406_v0, %v15114_v61  ;;  %v4472_v0 = vsel %vm15118_vm15, %v4456_v31, %v13213_v27  ;;  %v15120_v61 = vld [vmem:[#allocation42_spill] sm:$0xff]  ;;  %vm15130_vm15 = vcmask 785408  }
 0x3e5   : > { %15104 = vst [vmem:[#allocation37_spill] sm:$0xff] %v13530_v8  ;;  %v9324_v8 = vld [vmem:[%s10752_s30 + $0x2f8] sm:$0xf]  ;;  %v4438_v55 = vsel %vm14694_vm6, %v4422_v32, %v15116_v40  ;;  %v4488_v23 = vsel %vm15122_vm11, %v4472_v0, %v13291_v58  ;;  %v15128_v58 = vld [vmem:[#allocation28_spill] sm:$0xff]  ;;  %vm15134_vm11 = vcmask 850944  }
 0x3e6   : > { %v13536_v20 = vpop.permute.xlu0 %3969  ;;  %v6167_v57 = vsel %vm1169_vm0, %v9324_v8, %v15117_v45  ;;  %v4454_v62 = vsel %vm14693_vm7, %v4438_v55, %v13121_v6  ;;  %v15123_v8 = vld [vmem:[#allocation35_spill] sm:$0xff]  ;;  %v15124_v40 = vld [vmem:[#allocation14_spill] sm:$0xff]  ;;  %v4504_v55 = vsel %vm15126_vm8, %v4488_v23, %v13370_v7  ;;  %vm15138_vm8 = vcmask 916480  }
 0x3e7   : > { %15107 = vst [vmem:[#allocation61_spill] sm:$0xff] %v13536_v20  ;;  %v9323_v20 = vld [vmem:[%s10752_s30 + $0x2f0] sm:$0xf]  ;;  %v6185_v29 = vsel %vm1194_vm1, %v6167_v57, %v15120_v61  ;;  %v4470_v32 = vsel %vm15121_vm9, %v4454_v62, %v13215_v19  ;;  %v15127_v19 = vld [vmem:[#allocation15_spill] sm:$0xff]  ;;  %v4520_v0 = vsel %vm15130_vm15, %v4504_v55, %v13416_v18  ;;  %vm15133_vm9 = vmmov %vm15130_vm15  ;;  %vm15141_vm15 = vcmask 982016  }
 0x3e8   : > { %v13551_v9 = vpop.permute.xlu1 %4007  ;;  %v6164_v13 = vsel %vm1169_vm0, %v9323_v20, %v15119_v42  ;;  %v6201_v27 = vsel %vm1211_vm2, %v6185_v29, %v15124_v40  ;;  %v4486_v20 = vsel %vm15125_vm13, %v4470_v32, %v13294_v41  ;;  %v15131_v42 = vld [vmem:[#allocation33_spill] sm:$0xff]  ;;  %v4536_v29 = vsel %vm15134_vm11, %v4520_v0, %v13472_v33  ;;  %v15135_v32 = vld [vmem:[#allocation12_spill] sm:$0xff]  ;;  %vm15137_vm13 = vmmov %vm15134_vm11 }
 0x3e9   : > { %v6183_v6 = vsel %vm1194_vm1, %v6164_v13, %v15123_v8  ;;  %v6217_v57 = vsel %vm1228_vm3, %v6201_v27, %v15128_v58  ;;  %v4502_v62 = vsel %vm15129_vm10, %v4486_v20, %v13372_v10  ;;  %v15132_v13 = vld [vmem:[#allocation9_spill] sm:$0xff]  ;;  %v15136_v8 = vld [vmem:[#allocation47_spill] sm:$0xff]  ;;  %v15139_v27 = vld [vmem:[#allocation48_spill] sm:$0xff]  ;;  %vm15143_vm11 = vcmask 588800  }
 0x3ea   : > { %v13558_v34 = vpop.permute.xlu0 %4005  ;;  %v6199_v45 = vsel %vm1211_vm2, %v6183_v6, %v15127_v19  ;;  %v6233_v7 = vsel %vm1245_vm4, %v6217_v57, %v15132_v13  ;;  %v4518_v61 = vsel %vm15133_vm9, %v4502_v62, %v13418_v17  ;;  %v4552_v6 = vsel %vm15138_vm8, %v4536_v29, %v4280_v38  ;;  %vm15140_vm10 = vmmov %vm15138_vm8  ;;  %v9326_v29 = vld [vmem:[%s10752_s30 + $0x308] sm:$0xf] }
 0x3eb   : > { %v6215_v41 = vsel %vm1228_vm3, %v6199_v45, %v15131_v42  ;;  %v6249_v10 = vsel %vm1262_vm5, %v6233_v7, %v15136_v8  ;;  %v4534_v18 = vsel %vm15137_vm13, %v4518_v61, %v13474_v2  ;;  %vm15142_vm9 = vmmov %vm15141_vm15  ;;  %vm15145_vm8 = vcmask 654336   ;;  %v15153_v61 = vld [vmem:[#allocation53_spill] sm:$0xff] }
 0x3ec   : > { %v13578_v25 = vpop.permute.xlu1 %4283  ;;  %v6231_v23 = vsel %vm1245_vm4, %v6215_v41, %v15135_v32  ;;  %v6265_v33 = vsel %vm14694_vm6, %v6249_v10, %v13039_v37  ;;  %v4550_v20 = vsel %vm15140_vm10, %v4534_v18, %v4278_v22  ;;  %v9061_v22 = vld [vmem:[%s10752_s30 + $0x258] sm:$0xf]  ;;  %vm15144_vm13 = vmmov %vm15143_vm11  ;;  %v15154_v32 = vld [vmem:[#allocation4_spill] sm:$0xff] }
 0x3ed   : > { %v6247_v17 = vsel %vm1262_vm5, %v6231_v23, %v15139_v27  ;;  %v6281_v2 = vsel %vm14693_vm7, %v6265_v33, %v13163_v11  ;;  %v9060_v11 = vld [vmem:[%s10752_s30 + $0x250] sm:$0xf]  ;;  %vm15146_vm10 = vmmov %vm15145_vm8  ;;  %v9325_v10 = vld [vmem:[%s10752_s30 + $0x300] sm:$0xf] }
 0x3ee   : > { %v13588_v31 = vpop.permute.xlu0 %4281  ;;  %v6263_v45 = vsel %vm14694_vm6, %v6247_v17, %v13041_v3  ;;  %v6297_v57 = vsel %vm15143_vm11, %v6281_v2, %v13232_v36  ;;  %vm15149_vm11 = vcmask 785408   ;;  %v15157_v18 = vld [vmem:[#allocation5_spill] sm:$0xff]  ;;  %v15165_v2 = vld [vmem:[#allocation51_spill] sm:$0xff] }
 0x3ef   : > { %v6279_v58 = vsel %vm14693_vm7, %v6263_v45, %v13169_v21  ;;  %v6313_v3 = vsel %vm15145_vm8, %v6297_v57, %v13325_v35  ;;  %v15150_v35 = vld [vmem:[#allocation46_spill] sm:$0xff]  ;;  %vm15152_vm8 = vcmask 850944   ;;  %v15161_v33 = vld [vmem:[#allocation21_spill] sm:$0xff] }
 0x3f0   : > { %v4320_v40 = vpop.permute.xlu1 %4319  ;;  %v6295_v62 = vsel %vm15144_vm13, %v6279_v58, %v13234_v47  ;;  %v4344_v13 = vsel %vm1169_vm0, %v9061_v22, %v15150_v35  ;;  %vm15151_vm13 = vmmov %vm15149_vm11  ;;  %v15166_v58 = vld [vmem:[#allocation17_spill] sm:$0xff]  ;;  %v15171_v35 = vld [vmem:[#allocation11_spill] sm:$0xff] }
 0x3f1   : > { %v4568_v55 = vsel %vm15141_vm15, %v4552_v6, %v4320_v40  ;;  %v6311_v42 = vsel %vm15146_vm10, %v6295_v62, %v13331_v1  ;;  %vm15147_vm15 = vcmask 719872   ;;  %v4364_v23 = vsel %vm1194_vm1, %v4344_v13, %v15154_v32  ;;  %vm15155_vm10 = vmmov %vm15152_vm8  ;;  %v15158_v6 = vld [vmem:[#allocation24_spill] sm:$0xff]  ;;  %v15168_v62 = vld [vmem:[#allocation10_spill] sm:$0xff] }
 0x3f2   : > { %v4318_v19 = vpop.permute.xlu0 %4317  ;;  %v6329_v21 = vsel %vm15147_vm15, %v6313_v3, %v13384_v54  ;;  %v4341_v54 = vsel %vm1169_vm0, %v9060_v11, %v15153_v61  ;;  %v15169_v11 = vld [vmem:[#allocation23_spill] sm:$0xff]  ;;  %v15173_v61 = vld [vmem:[#allocation50_spill] sm:$0xff] }
 0x3f3   : > { %v4566_v38 = vsel %vm15142_vm9, %v4550_v20, %v4318_v19  ;;  %vm15148_vm9 = vmmov %vm15147_vm15  ;;  %v6345_v47 = vsel %vm15149_vm11, %v6329_v21, %v13434_v49  ;;  %vm15156_vm15 = vcmask 916480   ;;  %vm15160_vm11 = vcmask 982016   ;;  %v15162_v20 = vld [vmem:[#allocation36_spill] sm:$0xff]  ;;  %v15164_v19 = vld [vmem:[#allocation63_spill] sm:$0xff] }
 0x3f4   : > { %v9307_v37 = vcombine.low %v4566_v38, %v4568_v55  ;;  %v13633_v0 = vpop.permute.xlu1 %6036  ;;  %v6327_v41 = vsel %vm15148_vm9, %v6311_v42, %v13386_v5  ;;  %v6361_v1 = vsel %vm15152_vm8, %v6345_v47, %v13488_v44  ;;  %v4380_v44 = vsel %vm1211_vm2, %v4364_v23, %v15158_v6  ;;  %vm15159_vm9 = vmmov %vm15156_vm15  ;;  %v15170_v21 = vld [vmem:[#allocation34_spill] sm:$0xff]  ;;  %v15174_v23 = vld [vmem:[#allocation27_spill] sm:$0xff] }
 0x3f5   : > { %v6343_v7 = vsel %vm15151_vm13, %v6327_v41, %v13436_v52  ;;  %v6377_v49 = vsel %vm15156_vm15, %v6361_v1, %v13519_v12  ;;  %v4362_v52 = vsel %vm1194_vm1, %v4341_v54, %v15157_v18  ;;  %v4396_v12 = vsel %vm1228_vm3, %v4380_v44, %v15162_v20  ;;  %vm15163_vm13 = vmmov %vm15160_vm11  ;;  %v15177_v44 = vld [vmem:[#allocation39_spill] sm:$0xff] }
 0x3f6   : > { %v13640_v36 = vpop.permute.xlu0 %6034  ;;  %9927 = vmatprep.mubr.bf16.mxu0 %v9307_v37  ;;  %v6359_v5 = vsel %vm15155_vm10, %v6343_v7, %v13490_v60  ;;  %v4378_v60 = vsel %vm1211_vm2, %v4362_v52, %v15161_v33  ;;  %v6173_v45 = vsel %vm1169_vm0, %v9326_v29, %v15164_v19  ;;  %v15167_v37 = vld [vmem:[#allocation41_spill] sm:$0xff]  ;;  %v15172_v7 = vld [vmem:[#allocation26_spill] sm:$0xff]  ;;  %v15176_v52 = vld [vmem:[#allocation59_spill] sm:$0xff]  ;;  %vm15178_vm8 = vcmask 588800  }
 0x3f7   : > { %v6375_v40 = vsel %vm15159_vm9, %v6359_v5, %v13522_v46  ;;  %v4394_v38 = vsel %vm1228_vm3, %v4378_v60, %v15165_v2  ;;  %v4412_v46 = vsel %vm1245_vm4, %v4396_v12, %v15166_v58  ;;  %v6170_v22 = vsel %vm1169_vm0, %v9325_v10, %v15167_v37  ;;  %v15180_v60 = vld [vmem:[#allocation44_spill] sm:$0xff]  ;;  %vm15181_vm10 = vmmov %vm15178_vm8  ;;  %v15193_v37 = vld [vmem:[#allocation67_spill] sm:$0xff] }
 0x3f8   : > { %v6145_v8 = vpop.permute.xlu1 %6144  ;;  %v6189_v3 = vsel %vm1194_vm1, %v6173_v45, %v15168_v62  ;;  %v4410_v42 = vsel %vm1245_vm4, %v4394_v38, %v15169_v11  ;;  %v4428_v41 = vsel %vm1262_vm5, %v4412_v46, %v15170_v21  ;;  %v6187_v13 = vsel %vm1194_vm1, %v6170_v22, %v15171_v35  ;;  %v15189_v46 = vld [vmem:[#allocation85_spill] sm:$0xff]  ;;  %v15195_v22 = vld [vmem:[#allocation86_spill] sm:$0xff] }
 0x3f9   : > { %v6393_v27 = vsel %vm15160_vm11, %v6377_v49, %v6145_v8  ;;  %v6205_v1 = vsel %vm1211_vm2, %v6189_v3, %v15172_v7  ;;  %v4426_v54 = vsel %vm1262_vm5, %v4410_v42, %v15173_v61  ;;  %v4444_v29 = vsel %vm14694_vm6, %v4428_v41, %v13100_v43  ;;  %v15175_v49 = vld [vmem:[#allocation7_spill] sm:$0xff]  ;;  %v15204_v35 = vld [vmem:[#allocation74_spill] sm:$0xff]  ;;  %v15209_v61 = vld [vmem:[#allocation80_spill] sm:$0xff] }
 0x3fa   : > { %v6143_v17 = vpop.permute.xlu0 %6142  ;;  %v6203_v5 = vsel %vm1211_vm2, %v6187_v13, %v15174_v23  ;;  %v6221_v8 = vsel %vm1228_vm3, %v6205_v1, %v15175_v49  ;;  %v4442_v10 = vsel %vm14694_vm6, %v4426_v54, %v13103_v39  ;;  %v4460_v18 = vsel %vm14693_vm7, %v4444_v29, %v13203_v53  ;;  %v15206_v7 = vld [vmem:[#allocation79_spill] sm:$0xff]  ;;  %v15213_v49 = vld [vmem:[#allocation88_spill] sm:$0xff] }
 0x3fb   : > { %v6391_v55 = vsel %vm15163_vm13, %v6375_v40, %v6143_v17  ;;  %v6219_v6 = vsel %vm1228_vm3, %v6203_v5, %v15176_v52  ;;  %v6237_v43 = vsel %vm1245_vm4, %v6221_v8, %v15177_v44  ;;  %v4458_v40 = vsel %vm14693_vm7, %v4442_v10, %v13205_v26  ;;  %v15179_v17 = vld [vmem:[#allocation40_spill] sm:$0xff]  ;;  %v15211_v29 = vld [vmem:[#allocation87_spill] sm:$0xff] }
 0x3fc   : > { %v9634_v57 = vcombine.low %v6391_v55, %v6393_v27  ;;  %v13688_v47 = vpop.permute.xlu1 %4011  ;;  %v4476_v27 = vsel %vm15178_vm8, %v4460_v18, %v13276_v14  ;;  %v6235_v33 = vsel %vm1245_vm4, %v6219_v6, %v15179_v17  ;;  %v6253_v39 = vsel %vm1262_vm5, %v6237_v43, %v15180_v60  ;;  %v15183_v55 = vld [vmem:[#allocation52_spill] sm:$0xff] }
 0x3fd   : > { %v4474_v53 = vsel %vm15181_vm10, %v4458_v40, %v13278_v50  ;;  %vm15182_vm15 = vcmask 654336   ;;  %v6251_v26 = vsel %vm1262_vm5, %v6235_v33, %v15183_v55  ;;  %v6269_v14 = vsel %vm14694_vm6, %v6253_v39, %v13139_v15 }
 0x3fe   : > { %9955 = vmatprep.mubr.bf16.mxu1 %v9634_v57  ;;  %v13698_v32 = vpop.permute.xlu0 %4009  ;;  %v4492_v20 = vsel %vm15182_vm15, %v4476_v27, %v13362_v24  ;;  %vm15184_vm9 = vmmov %vm15182_vm15  ;;  %vm15185_vm11 = vcmask 719872   ;;  %v6267_v50 = vsel %vm14694_vm6, %v6251_v26, %v13145_v30  ;;  %v6285_v24 = vsel %vm14693_vm7, %v6269_v14, %v13221_v63  ;;  %v15191_v57 = vld [vmem:[#allocation16_spill] sm:$0xff] }
 0x3ff   : > { %v4490_v19 = vsel %vm15184_vm9, %v4474_v53, %v13364_v16  ;;  %v4508_v45 = vsel %vm15185_vm11, %v4492_v20, %v13408_v51  ;;  %vm15186_vm13 = vmmov %vm15185_vm11  ;;  %vm15187_vm8 = vcmask 785408   ;;  %v6283_v16 = vsel %vm14693_vm7, %v6267_v50, %v13223_v56  ;;  %v9062_v50 = vld [vmem:[%s10752_s30 + $0x260] sm:$0xf] }
 0x400   : > { %v13724_v12 = vpop.permute.xlu1 %4047  ;;  %v4506_v38 = vsel %vm15186_vm13, %v4490_v19, %v13410_v4  ;;  %v4524_v15 = vsel %vm15187_vm8, %v4508_v45, %v13464_v48  ;;  %v6301_v51 = vsel %vm15181_vm10, %v6285_v24, %v13304_v59  ;;  %vm15188_vm15 = vmmov %vm15187_vm8  ;;  %vm15190_vm9 = vcmask 850944   ;;  %v15198_v59 = vld [vmem:[#allocation68_spill] sm:$0xff]  ;;  %v9065_v24 = vld [vmem:[%s10752_s30 + $0x278] sm:$0xf] }
 0x401   : > { %v4522_v58 = vsel %vm15188_vm15, %v4506_v38, %v13466_v28  ;;  %v4540_v30 = vsel %vm15190_vm9, %v4524_v15, %v15189_v46  ;;  %vm15192_vm11 = vmmov %vm15181_vm10  ;;  %vm15194_vm13 = vcmask 654336   ;;  %vm15197_vm7 = vcmask 916480   ;;  %v15200_v28 = vld [vmem:[#allocation73_spill] sm:$0xff] }
 0x402   : > { %v13734_v2 = vpop.permute.xlu0 %4045  ;;  %v6299_v63 = vsel %vm15192_vm11, %v6283_v16, %v15191_v57  ;;  %v6317_v4 = vsel %vm15194_vm13, %v6301_v51, %v15193_v37  ;;  %vm15196_vm8 = vmmov %vm15190_vm9  ;;  %v4556_v56 = vsel %vm15197_vm7, %v4540_v30, %v13578_v25  ;;  %vm15201_vm15 = vcmask 719872   ;;  %v9063_v45 = vld [vmem:[%s10752_s30 + $0x268] sm:$0xf]  ;;  %v9064_v38 = vld [vmem:[%s10752_s30 + $0x270] sm:$0xf] }
 0x403   : > { %v4538_v48 = vsel %vm15196_vm8, %v4522_v58, %v15195_v22  ;;  %vm15199_vm10 = vmmov %vm15194_vm13  ;;  %v6333_v11 = vsel %vm15201_vm15, %v6317_v4, %v15200_v28  ;;  %vm15203_vm11 = vcmask 982016   ;;  %vm15207_vm8 = vcmask 785408   ;;  %v15218_v16 = vld [vmem:[#allocation58_spill] sm:$0xff]  ;;  %v15220_v57 = vld [vmem:[#allocation19_spill] sm:$0xff] }
 0x404   : > { %v4324_v62 = vpop.permute.xlu1 %4323  ;;  %v6315_v3 = vsel %vm15199_vm10, %v6299_v63, %v15198_v59  ;;  %vm15202_vm9 = vmmov %vm15197_vm7  ;;  %v6349_v1 = vsel %vm15207_vm8, %v6333_v11, %v15206_v7  ;;  %vm15212_vm10 = vcmask 850944   ;;  %v4350_v51 = vsel %vm1169_vm0, %v9063_v45, %v15218_v16  ;;  %v15219_v58 = vld [vmem:[#allocation18_spill] sm:$0xff]  ;;  %v15221_v37 = vld [vmem:[#allocation49_spill] sm:$0xff] }
 0x405   : > { %v4554_v42 = vsel %vm15202_vm9, %v4538_v48, %v13588_v31  ;;  %v4572_v21 = vsel %vm15203_vm11, %v4556_v56, %v4324_v62  ;;  %vm15205_vm13 = vmmov %vm15201_vm15  ;;  %v6365_v23 = vsel %vm15212_vm10, %v6349_v1, %v15211_v29  ;;  %v4347_v46 = vsel %vm1169_vm0, %v9062_v50, %v15219_v58  ;;  %v15222_v22 = vld [vmem:[#allocation29_spill] sm:$0xff]  ;;  %v13835_v59 = vld [vmem:[%s14671_s2] ss:$0 sm:$0xff] }
 0x406   : > { %v4322_v41 = vpop.permute.xlu0 %4321  ;;  %v6331_v13 = vsel %vm15205_vm13, %v6315_v3, %v15204_v35  ;;  %vm15208_vm7 = vmmov %vm15203_vm11  ;;  %v6381_v8 = vsel %vm15202_vm9, %v6365_v23, %v13633_v0  ;;  %v4356_v63 = vsel %vm1169_vm0, %v9065_v24, %v15220_v57  ;;  %v4353_v4 = vsel %vm1169_vm0, %v9064_v38, %v15221_v37  ;;  %v15223_v56 = vld [vmem:[#allocation13_spill] sm:$0xff]  ;;  %v15224_v3 = vld [vmem:[#allocation55_spill] sm:$0xff] }
 0x407   : > { %v4570_v25 = vsel %vm15208_vm7, %v4554_v42, %v4322_v41  ;;  %vm15210_vm6 = vmmov %vm15207_vm8  ;;  %v4368_v48 = vsel %vm1194_vm1, %v4350_v51, %v15222_v22  ;;  %v4366_v62 = vsel %vm1194_vm1, %v4347_v46, %v15223_v56  ;;  %v4372_v28 = vsel %vm1194_vm1, %v4356_v63, %v15224_v3  ;;  %v15225_v11 = vld [vmem:[#allocation56_spill] sm:$0xff]  ;;  %v15227_v35 = vld [vmem:[#allocation66_spill] sm:$0xff] }
 0x408   : > { %v6347_v54 = vsel %vm15210_vm6, %v6331_v13, %v15209_v61  ;;  %v9308_v5 = vcombine.low %v4570_v25, %v4572_v21  ;;  %vm15214_vm15 = vmmov %vm15212_vm10  ;;  %v6149_v10 = vpop.permute.xlu1 %6148  ;;  %v4370_v42 = vsel %vm1194_vm1, %v4353_v4, %v15225_v11  ;;  %v15226_v21 = vld [vmem:[#allocation65_spill] sm:$0xff]  ;;  %v4382_v13 = vsel %vm1211_vm2, %v4366_v62, %v15227_v35  ;;  %v15229_v25 = vld [vmem:[#allocation70_spill] sm:$0xff] }
 0x409   : > { %v6363_v31 = vsel %vm15214_vm15, %v6347_v54, %v15213_v49  ;;  %vm15215_vm11 = vmmov %vm15202_vm9  ;;  %v4384_v41 = vsel %vm1211_vm2, %v4368_v48, %v15226_v21  ;;  %v15228_v7 = vld [vmem:[#allocation69_spill] sm:$0xff]  ;;  %v4386_v61 = vsel %vm1211_vm2, %v4370_v42, %v15229_v25  ;;  %v15230_v54 = vld [vmem:[#allocation71_spill] sm:$0xff]  ;;  %vm15242_vm9 = vcmask 457728  }
 0x40a   : > { %v6379_v18 = vsel %vm15215_vm11, %v6363_v31, %v13640_v36  ;;  %vm15216_vm13 = vmmov %vm15208_vm7  ;;  %v6147_v6 = vpop.permute.xlu0 %6146  ;;  %9928 = vmatmul.mubr.bf16.vlgmr.msra.gmra.mrb[8].mxu0 %v9308_v5  ;;  %v4388_v1 = vsel %vm1211_vm2, %v4372_v28, %v15228_v7  ;;  %v4400_v29 = vsel %vm1228_vm3, %v4384_v41, %v15230_v54  ;;  %v15231_v23 = vld [vmem:[#allocation72_spill] sm:$0xff]  ;;  %v15235_v24 = vld [vmem:[#allocation78_spill] sm:$0xff] }
 0x40b   : > { %v6397_v52 = vsel %vm15216_vm13, %v6381_v8, %v6149_v10  ;;  %vm15217_vm8 = vmmov %vm15208_vm7  ;;  %v4398_v5 = vsel %vm1228_vm3, %v4382_v13, %v15231_v23  ;;  %v15232_v8 = vld [vmem:[#allocation75_spill] sm:$0xff]  ;;  %v15236_v16 = vld [vmem:[#allocation81_spill] sm:$0xff] }
 0x40c   : > { %v6395_v44 = vsel %vm15217_vm8, %v6379_v18, %v6147_v6  ;;  %v13784_v40 = vpop.permute.xlu1 %4051  ;;  %v4404_v10 = vsel %vm1228_vm3, %v4388_v1, %v15232_v8  ;;  %v15233_v18 = vld [vmem:[#allocation76_spill] sm:$0xff]  ;;  %v15234_v6 = vld [vmem:[#allocation77_spill] sm:$0xff]  ;;  %v4414_v38 = vsel %vm1245_vm4, %v4398_v5, %v15235_v24  ;;  %v15237_v58 = vld [vmem:[#allocation82_spill] sm:$0xff]  ;;  %vm15245_vm8 = vcmask 523264  }
 0x40d   : > { %v9635_v43 = vcombine.low %v6395_v44, %v6397_v52  ;;  %v4402_v52 = vsel %vm1228_vm3, %v4386_v61, %v15233_v18  ;;  %v4416_v44 = vsel %vm1245_vm4, %v4400_v29, %v15234_v6  ;;  %v4420_v51 = vsel %vm1245_vm4, %v4404_v10, %v15236_v16  ;;  %v15238_v37 = vld [vmem:[#allocation83_spill] sm:$0xff]  ;;  %v15239_v62 = vld [vmem:[#allocation84_spill] sm:$0xff]  ;;  %v15240_v21 = vld [vmem:[#allocation37_spill] sm:$0xff] }
 0x40e   : > { %v13786_v27 = vpop.permute.xlu0 %4049  ;;  %v4418_v46 = vsel %vm1245_vm4, %v4402_v52, %v15237_v58  ;;  %v4432_v4 = vsel %vm1262_vm5, %v4416_v44, %v15238_v37  ;;  %v4430_v3 = vsel %vm1262_vm5, %v4414_v38, %v15239_v62  ;;  %v4436_v41 = vsel %vm1262_vm5, %v4420_v51, %v15240_v21  ;;  %v15241_v54 = vld [vmem:[#allocation61_spill] sm:$0xff]  ;;  %vm15243_vm11 = vmmov %vm15242_vm9  ;;  %v6710_v24 = vld [vmem:[#allocation2 + $0x1c] sm:$0x1] }
 0x40f   : > { %9956 = vmatmul.mubr.bf16.gmra.mrb[12].mxu1 %v9635_v43  ;;  %v13885_v29 = vsel %vm1262_vm5, %v4418_v46, %v15241_v54  ;;  %v4448_v23 = vsel %vm15242_vm9, %v4432_v4, %v13551_v9  ;;  %v4446_v8 = vsel %vm15243_vm11, %v4430_v3, %v13558_v34  ;;  %vm15244_vm13 = vmmov %vm15242_vm9  ;;  %v6695_v46 = vld [vmem:[#allocation2 + $0x8] sm:$0xf]  ;;  %v6698_v4 = vld [vmem:[#allocation2 + $0xc] sm:$0x1]  ;;  %vm15253_vm11 = vcmask 719872  }
 0x410   : > { %v13788_v0 = vpop.permute.xlu1 %4087  ;;  %v4452_v44 = vsel %vm15244_vm13, %v4436_v41, %v13688_v47  ;;  %v6713_v3 = vld [vmem:[#allocation2 + $0x20] sm:$0xf] }
 0x412   : > { %v13790_v17 = vpop.permute.xlu0 %4085 }
 0x414   : > { %v13792_v36 = vpop.permute.xlu1 %4091 }
 0x416   : > { %v13794_v33 = vpop.permute.xlu0 %4089 }
 0x418   : > { %v13796_v60 = vpop.permute.xlu1 %4127 }
 0x41a   : > { %v13798_v39 = vpop.permute.xlu0 %4125 }
 0x41c   : > { %v13800_v53 = vpop.permute.xlu1 %4131 }
 0x41e   : > { %v13802_v20 = vpop.permute.xlu0 %4129 }
 0x420   : > { %v13804_v55 = vpop.permute.xlu1 %4167 }
 0x422   : > { %v13806_v26 = vpop.permute.xlu0 %4165 }
 0x424   : > { %v13808_v14 = vpop.permute.xlu1 %4171 }
 0x426   : > { %v13810_v19 = vpop.permute.xlu0 %4169 }
 0x428   : > { %v13816_v15 = vpop.permute.xlu1 %4207 }
 0x42a   : > { %v13822_v30 = vpop.permute.xlu0 %4205 }
 0x42c   : > { %v9953_v49 = vpop.f32.mrb[8].mxu1  ;;  %v13853_v31 = vpop.permute.xlu1 %4211 }
 0x42d   : > { %v6536_v43 = vadd.f32 %v9953_v49, %v13835_v59  ;;  %v6527_v45 = vpop.f32.mrb[9].mxu1 }
 0x42e   : > { %v13862_v50 = vpop.permute.xlu0 %4209  ;;  %v6528_v57 = vadd.f32 %v13835_v59, %v6527_v45  ;;  %v9954_v63 = vpop.f32.mrb[10].mxu1  ;;  %v6707_v45 = vld [vmem:[#allocation2 + $0x18] sm:$0xf] }
 0x42f   : > { %vm6560_vm6 = vcmp.ge.f32.partialorder %v6536_v43, 0.0  ;;  %v6568_v22 = vmul.f32 0.2, %v6536_v43  ;;  %v6539_v48 = vadd.f32 %v9954_v63, %v13835_v59  ;;  %v6530_v56 = vpop.f32.mrb[11].mxu1 }
 0x430   : > { %vm6558_vm7 = vcmp.ge.f32.partialorder %v6528_v57, 0.0  ;;  %v6566_v28 = vmul.f32 0.2, %v6528_v57  ;;  %v6531_v11 = vadd.f32 %v13835_v59, %v6530_v56  ;;  %v13877_v42 = vpop.permute.xlu1 %4247 }
 0x431   : > { %v6576_v35 = vsel %vm6560_vm6, %v6536_v43, %v6568_v22  ;;  %vm6561_vm10 = vcmp.ge.f32.partialorder %v6539_v48, 0.0  ;;  %v6569_v13 = vmul.f32 0.2, %v6539_v48  ;;  %v4464_v43 = vsel %vm15245_vm8, %v4448_v23, %v13724_v12  ;;  %vm15246_vm6 = vmmov %vm15245_vm8 }
 0x432   : > { %v13881_v7 = vpop.permute.xlu0 %4245  ;;  %v9797_v1 = vpack.c.bf16 %v6576_v35, %v6576_v35  ;;  %v6574_v25 = vsel %vm6558_vm7, %v6528_v57, %v6566_v28  ;;  %vm6559_vm15 = vcmp.ge.f32.partialorder %v6531_v11, 0.0  ;;  %v6567_v61 = vmul.f32 0.2, %v6531_v11  ;;  %vm15254_vm8 = vmmov %vm15246_vm6 }
 0x433   : > { %v9795_v5 = vpack.c.bf16 %v6574_v25, %v6574_v25  ;;  %v6577_v49 = vsel %vm6561_vm10, %v6539_v48, %v6569_v13  ;;  %v4462_v34 = vsel %vm15246_vm6, %v4446_v8, %v13734_v2  ;;  %vm15247_vm7 = vcmask 588800   ;;  %v6716_v2 = vld [vmem:[#allocation2 + $0x24] sm:$0x1]  ;;  %vm15255_vm6 = vmmov %vm15253_vm11 }
 0x434   : > { %v6631_v10 = vshrl.u32 %v9797_v1, 16  ;;  %v9798_v18 = vpack.c.bf16 %v6577_v49, %v6577_v49  ;;  %v6575_v52 = vsel %vm6559_vm15, %v6531_v11, %v6567_v61  ;;  %v13891_v6 = vpop.permute.xlu1 %4251  ;;  %v6634_v58 = vshll.u32 %v9797_v1, 16  ;;  %v6704_v49 = vld [vmem:[#allocation2 + $0x14] sm:$0x1]  ;;  %vm15250_vm10 = vmmov %vm15247_vm7 }
 0x435   : > { %v6615_v38 = vshrl.u32 %v9795_v5, 16  ;;  %v9796_v9 = vpack.c.bf16 %v6575_v52, %v6575_v52  ;;  %v4480_v63 = vsel %vm15247_vm7, %v4464_v43, %v13788_v0  ;;  %v6618_v37 = vshll.u32 %v9795_v5, 16  ;;  %v6701_v5 = vld [vmem:[#allocation2 + $0x10] sm:$0xf] }
 0x436   : > { %v13897_v16 = vpop.permute.xlu0 %4249  ;;  %v6633_v51 = vrot.slane %v6631_v10, 7  ;;  %v6639_v57 = vshrl.u32 %v9798_v18, 16  ;;  %v6642_v62 = vshll.u32 %v9798_v18, 16  ;;  %v4478_v43 = vsel %vm15250_vm10, %v4462_v34, %v13790_v17  ;;  %vm15257_vm10 = vmmov %vm15254_vm8 }
 0x437   : > { %v6617_v47 = vrot.slane %v6615_v38, 7  ;;  %v6623_v12 = vshrl.u32 %v9796_v9, 16  ;;  %v6626_v35 = vshll.u32 %v9796_v9, 16  ;;  %vm15251_vm15 = vcmask 654336  }
 0x438   : > { %v6636_v22 = vor.u32 %v6634_v58, %v6633_v51  ;;  %v6637_v48 = vrot.slane %v6633_v51, 4  ;;  %v6641_v56 = vrot.slane %v6639_v57, 7  ;;  %v4288_v28 = vpop.permute.xlu1 %4287  ;;  %vm15252_vm9 = vmmov %vm15251_vm15  ;;  %v4468_v57 = vsel %vm15254_vm8, %v4452_v44, %v13784_v40 }
 0x439   : > { %v6620_v11 = vor.u32 %v6618_v37, %v6617_v47  ;;  %v6621_v21 = vrot.slane %v6617_v47, 4  ;;  %v6625_v41 = vrot.slane %v6623_v12, 7  ;;  %v4494_v51 = vsel %vm15252_vm9, %v4478_v43, %v13798_v39  ;;  %v335_v43 = vld [vmem:[#allocation2 + $0x6c] sm:$0x1] }
 0x43a   : > { %v4286_v13 = vpop.permute.xlu0 %4285  ;;  %v6708_v25 = vsel %vm13034_vm14, %v6636_v22, %v6707_v45  ;;  %v6711_v61 = vsel %vm11953_vm12, %v6637_v48, %v6710_v24  ;;  %v6644_v54 = vor.u32 %v6642_v62, %v6641_v56  ;;  %v6645_v23 = vrot.slane %v6641_v56, 4 }
 0x43b   : > { %6709 = vst [vmem:[#allocation2 + $0x18] sm:$0xf] %v6708_v25  ;;  %6712 = vst [vmem:[#allocation2 + $0x1c] sm:$0x1] %v6711_v61  ;;  %v6696_v8 = vsel %vm13034_vm14, %v6620_v11, %v6695_v46  ;;  %v6699_v10 = vsel %vm11953_vm12, %v6621_v21, %v6698_v4  ;;  %v6628_v18 = vor.u32 %v6626_v35, %v6625_v41  ;;  %v6629_v52 = vrot.slane %v6625_v41, 4 }
 0x43c   : > { %v4496_v45 = vsel %vm15251_vm15, %v4480_v63, %v13796_v60  ;;  %6697 = vst [vmem:[#allocation2 + $0x8] sm:$0xf] %v6696_v8  ;;  %6700 = vst [vmem:[#allocation2 + $0xc] sm:$0x1] %v6699_v10  ;;  %v6714_v24 = vsel %vm13034_vm14, %v6644_v54, %v6713_v3  ;;  %v6717_v38 = vsel %vm11953_vm12, %v6645_v23, %v6716_v2  ;;  %v4292_v9 = vpop.permute.xlu1 %4291  ;;  %vm15256_vm7 = vcmask 785408  }
 0x43d   : > { %v4512_v58 = vsel %vm15253_vm11, %v4496_v45, %v13804_v55  ;;  %6715 = vst [vmem:[#allocation2 + $0x20] sm:$0xf] %v6714_v24  ;;  %6718 = vst [vmem:[#allocation2 + $0x24] sm:$0x1] %v6717_v38  ;;  %v6702_v17 = vsel %vm13034_vm14, %v6628_v18, %v6701_v5  ;;  %v6705_v60 = vsel %vm11953_vm12, %v6629_v52, %v6704_v49  ;;  %vm15258_vm15 = vcmask 588800  }
 0x43e   : > { %v4290_v34 = vpop.permute.xlu0 %4289  ;;  %v4450_v46 = vsel %vm15244_vm13, %v13885_v29, %v13698_v32  ;;  %v4510_v39 = vsel %vm15255_vm6, %v4494_v51, %v13806_v26  ;;  %v4528_v55 = vsel %vm15256_vm7, %v4512_v58, %v13816_v15  ;;  %6703 = vst [vmem:[#allocation2 + $0x10] sm:$0xf] %v6702_v17  ;;  %6706 = vst [vmem:[#allocation2 + $0x14] sm:$0x1] %v6705_v60  ;;  %vm15260_vm11 = vcmask 850944  }
 0x43f   : > { %v4466_v63 = vsel %vm15257_vm10, %v4450_v46, %v13786_v27  ;;  %v4484_v47 = vsel %vm15258_vm15, %v4468_v57, %v13792_v36  ;;  %vm15259_vm9 = vmmov %vm15256_vm7  ;;  %v4544_v40 = vsel %vm15260_vm11, %v4528_v55, %v13877_v42  ;;  %vm15262_vm8 = vcmask 654336   ;;  %v323_v11 = vld [vmem:[#allocation2 + $0x54] sm:$0x1]  ;;  %v311_v21 = vld [vmem:[#allocation2 + $0x3c] sm:$0x1] }
 0x440   : > { %v4526_v32 = vsel %vm15259_vm9, %v4510_v39, %v13822_v30  ;;  %vm15261_vm13 = vmmov %vm15258_vm15  ;;  %v4500_v15 = vsel %vm15262_vm8, %v4484_v47, %v13800_v53  ;;  %vm15264_vm7 = vcmask 916480   ;;  %v4328_v44 = vpop.permute.xlu1 %4327  ;;  %vm15266_vm15 = vcmask 719872   ;;  %v303_v41 = vld [vmem:[#allocation2 + $0x2c] sm:$0x1]  ;;  %v327_v35 = vld [vmem:[#allocation2 + $0x5c] sm:$0x1] }
 0x441   : > { %v4482_v26 = vsel %vm15261_vm13, %v4466_v63, %v13794_v33  ;;  %vm15263_vm6 = vmmov %vm15260_vm11  ;;  %v4560_v27 = vsel %vm15264_vm7, %v4544_v40, %v4288_v28  ;;  %v4516_v30 = vsel %vm15266_vm15, %v4500_v15, %v13808_v14  ;;  %vm15268_vm11 = vcmask 982016   ;;  %v315_v25 = vld [vmem:[#allocation2 + $0x44] sm:$0x1]  ;;  %v307_v23 = vld [vmem:[#allocation2 + $0x34] sm:$0x1] }
 0x442   : > { %v4542_v29 = vsel %vm15263_vm6, %v4526_v32, %v13881_v7  ;;  %vm15265_vm10 = vmmov %vm15262_vm8  ;;  %v4576_v37 = vsel %vm15268_vm11, %v4560_v27, %v4328_v44  ;;  %v4326_v33 = vpop.permute.xlu0 %4325  ;;  %vm15270_vm8 = vcmask 785408   ;;  %v312_v2 = vsel %vm11953_vm12, 0, %v311_v21  ;;  %v283_v5 = vld [vmem:[#allocation2 + $0x4] sm:$0x1]  ;;  %v13988_v10 = vld [vmem:[#allocation2 + $0x48] sm:$0xf] }
 0x443   : > { %v4498_v36 = vsel %vm15265_vm10, %v4482_v26, %v13802_v20  ;;  %vm15267_vm9 = vmmov %vm15264_vm7  ;;  %v4532_v7 = vsel %vm15270_vm8, %v4516_v30, %v13853_v31  ;;  %vm15273_vm10 = vcmask 850944   ;;  %313 = vst [vmem:[#allocation2 + $0x3c] sm:$0x1] %v312_v2  ;;  %v328_v61 = vsel %vm11953_vm12, 0, %v327_v35  ;;  %v319_v18 = vld [vmem:[#allocation2 + $0x4c] sm:$0x1] }
 0x444   : > { %v4558_v42 = vsel %vm15267_vm9, %v4542_v29, %v4286_v13  ;;  %vm15269_vm13 = vmmov %vm15266_vm15  ;;  %v4548_v20 = vsel %vm15273_vm10, %v4532_v7, %v13891_v6  ;;  %v4332_v56 = vpop.permute.xlu1 %4331  ;;  %v304_v13 = vsel %vm11953_vm12, 0, %v303_v41  ;;  %v316_v54 = vsel %vm11953_vm12, 0, %v315_v25  ;;  %329 = vst [vmem:[#allocation2 + $0x5c] sm:$0x1] %v328_v61  ;;  %v347_v38 = vld [vmem:[#allocation2 + $0x84] sm:$0x1] }
 0x445   : > { %v4514_v53 = vsel %vm15269_vm13, %v4498_v36, %v13810_v19  ;;  %vm15271_vm6 = vmmov %vm15268_vm11  ;;  %v4564_v48 = vsel %vm15267_vm9, %v4548_v20, %v4292_v9  ;;  %305 = vst [vmem:[#allocation2 + $0x2c] sm:$0x1] %v304_v13  ;;  %v308_v49 = vsel %vm11953_vm12, 0, %v307_v23  ;;  %v284_v8 = vsel %vm11953_vm12, 0, %v283_v5  ;;  %v339_v9 = vld [vmem:[#allocation2 + $0x74] sm:$0x1] }
 0x446   : > { %v4574_v4 = vsel %vm15271_vm6, %v4558_v42, %v4326_v33  ;;  %vm15272_vm7 = vmmov %vm15270_vm8  ;;  %v4330_v31 = vpop.permute.xlu0 %4329  ;;  %317 = vst [vmem:[#allocation2 + $0x44] sm:$0x1] %v316_v54  ;;  %v9652_v52 = vcombine.low %v13988_v10, %v13988_v10  ;;  %v320_v45 = vsel %vm11953_vm12, 0, %v319_v18  ;;  %v336_v24 = vsel %vm11953_vm12, 0, %v335_v43  ;;  %v343_v17 = vld [vmem:[#allocation2 + $0x7c] sm:$0x1] }
 0x447   : > { %v4530_v12 = vsel %vm15272_vm7, %v4514_v53, %v13862_v50  ;;  %v9309_v14 = vcombine.low %v4574_v4, %v4576_v37  ;;  %vm15274_vm15 = vmmov %vm15273_vm10  ;;  %v331_v50 = vld [vmem:[#allocation2 + $0x64] sm:$0x1]  ;;  %309 = vst [vmem:[#allocation2 + $0x34] sm:$0x1] %v308_v49  ;;  %v348_v51 = vsel %vm11953_vm12, 0, %v347_v38  ;;  %v340_v58 = vsel %vm11953_vm12, 0, %v339_v9 }
 0x448   : > { %v4546_v22 = vsel %vm15274_vm15, %v4530_v12, %v13897_v16  ;;  %vm15275_vm11 = vmmov %vm15267_vm9  ;;  %v332_v6 = vsel %vm11953_vm12, 0, %v331_v50  ;;  %v324_v16 = vsel %vm11953_vm12, 0, %v323_v11  ;;  %285 = vst [vmem:[#allocation2 + $0x4] sm:$0x1] %v284_v8  ;;  %6898 = vrot.lane.b32.xlu0 %v9652_v52, %s10679_s8  ;;  %v344_v60 = vsel %vm11953_vm12, 0, %v343_v17 }
 0x449   : > { %v4562_v19 = vsel %vm15275_vm11, %v4546_v22, %v4290_v34  ;;  %vm15276_vm13 = vmmov %vm15271_vm6  ;;  %9931 = vmatprep.mubr.bf16.mxu0 %v9309_v14  ;;  %333 = vst [vmem:[#allocation2 + $0x64] sm:$0x1] %v332_v6  ;;  %v351_v34 = vld [vmem:[#allocation2 + $0x8c] sm:$0x1]  ;;  %v6744_v57 = vld [vmem:[#allocation2 + $0x8] sm:$0xf] }
 0x44a   : > { %v4580_v62 = vsel %vm15276_vm13, %v4564_v48, %v4332_v56  ;;  %vm15277_vm8 = vmmov %vm15271_vm6  ;;  %325 = vst [vmem:[#allocation2 + $0x54] sm:$0x1] %v324_v16  ;;  %v352_v46 = vsel %vm11953_vm12, 0, %v351_v34  ;;  %v6761_v39 = vld [vmem:[#allocation2 + $0xc] sm:$0x1]  ;;  %vm15278_vm11 = vcmask 60416  }
 0x44b   : > { %v4578_v3 = vsel %vm15277_vm8, %v4562_v19, %v4330_v31  ;;  %321 = vst [vmem:[#allocation2 + $0x4c] sm:$0x1] %v320_v45  ;;  %337 = vst [vmem:[#allocation2 + $0x6c] sm:$0x1] %v336_v24  ;;  %v6743_v55 = vld [vmem:[#allocation2] sm:$0xf]  ;;  %v14005_v47 = vcombine.low %v6744_v57, %v6761_v39 }
 0x44c   : > { %v9310_v28 = vcombine.low %v4578_v3, %v4580_v62  ;;  %349 = vst [vmem:[#allocation2 + $0x84] sm:$0x1] %v348_v51  ;;  %341 = vst [vmem:[#allocation2 + $0x74] sm:$0x1] %v340_v58  ;;  %v6746_v32 = vld [vmem:[#allocation2 + $0x18] sm:$0xf] }
 0x44d   : > { %345 = vst [vmem:[#allocation2 + $0x7c] sm:$0x1] %v344_v60  ;;  %353 = vst [vmem:[#allocation2 + $0x8c] sm:$0x1] %v352_v46  ;;  %v6745_v40 = vld [vmem:[#allocation2 + $0x10] sm:$0xf] }
 0x44e   : > { %9932 = vmatmul.mubr.bf16.gmra.mrb[12].mxu0 %v9310_v28  ;;  %v6762_v26 = vld [vmem:[#allocation2 + $0x14] sm:$0x1]  ;;  %v6763_v15 = vld [vmem:[#allocation2 + $0x1c] sm:$0x1]  ;;  %v6964_v37 = vshll.u32 %v14005_v47, 16  ;;  %vm15279_vm13 = vmmov %vm15278_vm11 }
 0x44f   : > { %v6760_v63 = vld [vmem:[#allocation2 + $0x4] sm:$0x1]  ;;  %v14012_v33 = vcombine.low %v6745_v40, %v6762_v26  ;;  %v14014_v53 = vcombine.low %v6746_v32, %v6763_v15  ;;  %vm15280_vm8 = vmmov %vm15278_vm11  ;;  %v6731_v39 = vld [vmem:[#allocation2 + $0x38] sm:$0xf] }
 0x450   : > { %v14007_v27 = vcombine.low %v6743_v55, %v6760_v63  ;;  %v14031_v51 = vrot.slane %v6964_v37, 1  ;;  %v6734_v32 = vld [vmem:[#allocation2 + $0x3c] sm:$0x1] }
 0x451   : > { %v6978_v58 = vshll.u32 %v14014_v53, 16  ;;  %v6971_v34 = vshll.u32 %v14012_v33, 16  ;;  %v6769_v26 = vld [vmem:[#allocation2 + $0x54] sm:$0x1] }
 0x452   : > { %v6955_v20 = vshrl.u32 %v14007_v27, 16  ;;  %v6957_v56 = vshll.u32 %v14007_v27, 16  ;;  %v6768_v21 = vld [vmem:[#allocation2 + $0x4c] sm:$0x1] }
 0x453   : > { %v14027_v8 = vcombine.low %v13988_v10, %v6768_v21 }
 0x454   : > { %v6959_v24 = vrot.slane %v6957_v56, 1 }
 0x455   : > { %v7051_v1 = vshrl.u32 %v14027_v8, 16 }
 0x456   : > { %v6960_v15 = vor.u32 %v6959_v24, %v6955_v20 }
 0x4dd   : > { %v9929_v29 = vpop.f32.mrb[8].mxu0 }
 0x4de   : > { %v4719_v44 = vadd.f32 %v9929_v29, %v13835_v59  ;;  %v4710_v36 = vpop.f32.mrb[9].mxu0  ;;  %v7053_v29 = vshll.u32 %v14027_v8, 16 }
 0x4df   : > { %v4711_v30 = vadd.f32 %v13835_v59, %v4710_v36  ;;  %v9930_v42 = vpop.f32.mrb[10].mxu0 }
 0x4e0   : > { %vm4743_vm6 = vcmp.ge.f32.partialorder %v4719_v44, 0.0  ;;  %v4751_v7 = vmul.f32 0.2, %v4719_v44  ;;  %v4722_v4 = vadd.f32 %v9930_v42, %v13835_v59  ;;  %v4713_v12 = vpop.f32.mrb[11].mxu0  ;;  %v6722_v42 = vld [vmem:[#allocation2 + $0x2c] sm:$0x1] }
 0x4e1   : > { %vm4741_vm7 = vcmp.ge.f32.partialorder %v4711_v30, 0.0  ;;  %v4749_v14 = vmul.f32 0.2, %v4711_v30  ;;  %v4714_v22 = vadd.f32 %v13835_v59, %v4713_v12 }
 0x4e2   : > { %v9957_v48 = vpop.f32.mrb[12].mxu1  ;;  %v4759_v19 = vsel %vm4743_vm6, %v4719_v44, %v4751_v7  ;;  %vm4744_vm10 = vcmp.ge.f32.partialorder %v4722_v4, 0.0  ;;  %v4752_v62 = vmul.f32 0.2, %v4722_v4 }
 0x4e3   : > { %v6552_v31 = vadd.f32 %v9957_v48, %v13835_v59  ;;  %v6543_v3 = vpop.f32.mrb[13].mxu1  ;;  %v4767_v28 = vpack.c.bf16 %v4759_v19, %v4759_v19  ;;  %v4757_v50 = vsel %vm4741_vm7, %v4711_v30, %v4749_v14  ;;  %vm4742_vm15 = vcmp.ge.f32.partialorder %v4714_v22, 0.0  ;;  %v6719_v30 = vld [vmem:[#allocation2 + $0x28] sm:$0xf] }
 0x4e4   : > { %v4750_v11 = vmul.f32 0.2, %v4714_v22  ;;  %v9958_v6 = vpop.f32.mrb[14].mxu1  ;;  %v4765_v16 = vpack.c.bf16 %v4757_v50, %v4757_v50  ;;  %v4760_v2 = vsel %vm4744_vm10, %v4722_v4, %v4752_v62  ;;  %v6544_v61 = vadd.f32 %v13835_v59, %v6543_v3  ;;  %vm15281_vm10 = vmmov %vm15280_vm8  ;;  %v6770_v3 = vld [vmem:[#allocation2 + $0x5c] sm:$0x1] }
 0x4e5   : > { %vm6564_vm9 = vcmp.ge.f32.partialorder %v6552_v31, 0.0  ;;  %v6572_v41 = vmul.f32 0.2, %v6552_v31  ;;  %v6546_v35 = vpop.f32.mrb[15].mxu1  ;;  %4776 = vst.msk [vmem:[#allocation2 + $0x60] sm:$0xf] %vm15278_vm11, %v4767_v28  ;;  %v4768_v13 = vpack.c.bf16 %v4760_v2, %v4760_v2  ;;  %v6555_v54 = vadd.f32 %v9958_v6, %v13835_v59 }
 0x4e6   : > { %v4758_v25 = vsel %vm4742_vm15, %v4714_v22, %v4750_v11  ;;  %4774 = vst.msk [vmem:[#allocation2 + $0x50] sm:$0xf] %vm15279_vm13, %v4765_v16  ;;  %v6547_v49 = vadd.f32 %v13835_v59, %v6546_v35  ;;  %vm6562_vm6 = vcmp.ge.f32.partialorder %v6544_v61, 0.0  ;;  %v6570_v52 = vmul.f32 0.2, %v6544_v61 }
 0x4e7   : > { %v4766_v23 = vpack.c.bf16 %v4758_v25, %v4758_v25  ;;  %v6580_v5 = vsel %vm6564_vm9, %v6552_v31, %v6572_v41  ;;  %4777 = vst.msk [vmem:[#allocation2 + $0x68] sm:$0xf] %vm15280_vm8, %v4768_v13  ;;  %vm6565_vm7 = vcmp.ge.f32.partialorder %v6555_v54, 0.0  ;;  %v6573_v43 = vmul.f32 0.2, %v6555_v54 }
 0x4e8   : > { %v9801_v18 = vpack.c.bf16 %v6580_v5, %v6580_v5  ;;  %vm6563_vm15 = vcmp.ge.f32.partialorder %v6547_v49, 0.0  ;;  %v6571_v45 = vmul.f32 0.2, %v6547_v49  ;;  %v6578_v9 = vsel %vm6562_vm6, %v6544_v61, %v6570_v52  ;;  %v6737_v11 = vld [vmem:[#allocation2 + $0x40] sm:$0xf]  ;;  %vm15282_vm6 = vmmov %vm15280_vm8 }
 0x4e9   : > { %4775 = vst.msk [vmem:[#allocation2 + $0x58] sm:$0xf] %vm15281_vm10, %v4766_v23  ;;  %v9799_v10 = vpack.c.bf16 %v6578_v9, %v6578_v9  ;;  %v6581_v17 = vsel %vm6565_vm7, %v6555_v54, %v6573_v43  ;;  %v6740_v6 = vld [vmem:[#allocation2 + $0x44] sm:$0x1]  ;;  %v6725_v35 = vld [vmem:[#allocation2 + $0x30] sm:$0xf]  ;;  %vm15283_vm7 = vmmov %vm15282_vm6 }
 0x4ea   : > { %v6663_v38 = vshrl.u32 %v9801_v18, 16  ;;  %v6579_v60 = vsel %vm6563_vm15, %v6547_v49, %v6571_v45  ;;  %v6666_v57 = vshll.u32 %v9801_v18, 16  ;;  %v9802_v55 = vpack.c.bf16 %v6581_v17, %v6581_v17  ;;  %v6728_v13 = vld [vmem:[#allocation2 + $0x34] sm:$0x1]  ;;  %v6771_v43 = vld [vmem:[#allocation2 + $0x64] sm:$0x1]  ;;  %vm15284_vm10 = vmmov %vm15282_vm6 }
 0x4eb   : > { %v9800_v63 = vpack.c.bf16 %v6579_v60, %v6579_v60  ;;  %v6647_v40 = vshrl.u32 %v9799_v10, 16  ;;  %v6650_v36 = vshll.u32 %v9799_v10, 16  ;;  %v6962_v45 = vshrl.u32 %v14005_v47, 16 }
 0x4ec   : > { %v6665_v46 = vrot.slane %v6663_v38, 7  ;;  %v6671_v37 = vshrl.u32 %v9802_v55, 16  ;;  %v6674_v12 = vshll.u32 %v9802_v55, 16  ;;  %v6755_v48 = vld [vmem:[#allocation2 + $0x60] sm:$0xf]  ;;  %v6973_v10 = vrot.slane %v6971_v34, 1 }
 0x4ed   : > { %v6753_v7 = vld [vmem:[#allocation2 + $0x50] sm:$0xf]  ;;  %v6649_v4 = vrot.slane %v6647_v40, 7  ;;  %v6655_v14 = vshrl.u32 %v9800_v63, 16  ;;  %v6658_v62 = vshll.u32 %v9800_v63, 16  ;;  %v9655_v61 = vcombine.low %v6755_v48, %v6755_v48 }
 0x4ee   : > { %v6668_v27 = vor.u32 %v6666_v57, %v6665_v46  ;;  %v6669_v44 = vrot.slane %v6665_v46, 4  ;;  %v9653_v22 = vcombine.low %v6753_v7, %v6753_v7  ;;  %v6673_v19 = vrot.slane %v6671_v37, 7  ;;  %v6792_v37 = vld [vmem:[#allocation2 + $0x94] sm:$0x1] }
 0x4ef   : > { %v6652_v28 = vor.u32 %v6650_v36, %v6649_v4  ;;  %v6653_v50 = vrot.slane %v6649_v4, 4  ;;  %v6657_v21 = vrot.slane %v6655_v14, 7  ;;  %v9669_v25 = vcombine.low %v6753_v7, %v6769_v26  ;;  %v6778_v7 = vld [vmem:[#allocation2 + $0xa0] sm:$0xf]  ;;  %v6779_v14 = vld [vmem:[#allocation2 + $0xa8] sm:$0xf] }
 0x4f0   : > { %v6732_v56 = vsel %vm13034_vm14, %v6668_v27, %v6731_v39  ;;  %v6735_v20 = vsel %vm11953_vm12, %v6669_v44, %v6734_v32  ;;  %v6754_v31 = vld [vmem:[#allocation2 + $0x58] sm:$0xf]  ;;  %6900 = vrot.lane.b32.xlu1 %v9653_v22, %s10679_s8  ;;  %v6676_v2 = vor.u32 %v6674_v12, %v6673_v19  ;;  %v6677_v41 = vrot.slane %v6673_v19, 4  ;;  %v6776_v44 = vld [vmem:[#allocation2 + $0x90] sm:$0xf] }
 0x4f1   : > { %6733 = vst [vmem:[#allocation2 + $0x38] sm:$0xf] %v6732_v56  ;;  %6736 = vst [vmem:[#allocation2 + $0x3c] sm:$0x1] %v6735_v20  ;;  %v9654_v16 = vcombine.low %v6754_v31, %v6754_v31  ;;  %v6720_v54 = vsel %vm13034_vm14, %v6652_v28, %v6719_v30  ;;  %v6723_v23 = vsel %vm11953_vm12, %v6653_v50, %v6722_v42  ;;  %v6661_v49 = vrot.slane %v6657_v21, 4 }
 0x4f2   : > { %v6660_v5 = vor.u32 %v6658_v62, %v6657_v21  ;;  %6721 = vst [vmem:[#allocation2 + $0x28] sm:$0xf] %v6720_v54  ;;  %6724 = vst [vmem:[#allocation2 + $0x2c] sm:$0x1] %v6723_v23  ;;  %v6738_v18 = vsel %vm13034_vm14, %v6676_v2, %v6737_v11  ;;  %v6741_v52 = vsel %vm11953_vm12, %v6677_v41, %v6740_v6  ;;  %v6969_v60 = vshrl.u32 %v14012_v33, 16 }
 0x4f3   : > { %6902 = vrot.lane.b32.xlu0 %v9654_v16, %s10679_s8  ;;  %6739 = vst [vmem:[#allocation2 + $0x40] sm:$0xf] %v6738_v18  ;;  %6742 = vst [vmem:[#allocation2 + $0x44] sm:$0x1] %v6741_v52  ;;  %v6729_v38 = vsel %vm11953_vm12, %v6661_v49, %v6728_v13  ;;  %v9670_v9 = vcombine.low %v6754_v31, %v6770_v3  ;;  %v6967_v17 = vor.u32 %v14031_v51, %v6962_v45  ;;  %v6777_v30 = vld [vmem:[#allocation2 + $0x98] sm:$0xf] }
 0x4f4   : > { %v6726_v24 = vsel %vm13034_vm14, %v6660_v5, %v6725_v35  ;;  %6904 = vrot.lane.b32.xlu1 %v9655_v61, %s10679_s8  ;;  %6730 = vst [vmem:[#allocation2 + $0x34] sm:$0x1] %v6729_v38  ;;  %v6980_v47 = vrot.slane %v6978_v58, 1  ;;  %v9671_v46 = vcombine.low %v6755_v48, %v6771_v43  ;;  %v7055_v57 = vrot.slane %v7053_v29, 1  ;;  %v6793_v12 = vld [vmem:[#allocation2 + $0x9c] sm:$0x1] }
 0x4f5   : > { %6727 = vst [vmem:[#allocation2 + $0x30] sm:$0xf] %v6726_v24  ;;  %v7060_v39 = vshll.u32 %v9669_v25, 16  ;;  %v6974_v55 = vor.u32 %v6973_v10, %v6969_v60  ;;  %v6976_v34 = vshrl.u32 %v14014_v53, 16  ;;  %v7067_v63 = vshll.u32 %v9670_v9, 16 }
 0x4f6   : > { %v7056_v33 = vor.u32 %v7055_v57, %v7051_v1  ;;  %v7074_v40 = vshll.u32 %v9671_v46, 16  ;;  %v7058_v58 = vshrl.u32 %v9669_v25, 16  ;;  %v7072_v53 = vshrl.u32 %v9671_v46, 16  ;;  %v6794_v56 = vld [vmem:[#allocation2 + $0xa4] sm:$0x1] }
 0x4f7   : > { %7010 = vrot.lane.b32.xlu0 %v6960_v15, %s10680_s9  ;;  %v6981_v51 = vor.u32 %v6980_v47, %v6976_v34  ;;  %v7062_v32 = vrot.slane %v7060_v39, 1  ;;  %v7069_v26 = vrot.slane %v7067_v63, 1  ;;  %v7065_v15 = vshrl.u32 %v9670_v9, 16  ;;  %v6784_v20 = vld [vmem:[#allocation2 + $0xd8] sm:$0xf] }
 0x4f8   : > { %7012 = vrot.lane.b32.xlu1 %v6967_v17, %s10680_s9  ;;  %v7076_v29 = vrot.slane %v7074_v40, 1  ;;  %v9676_v42 = vcombine.low %v6776_v44, %v6776_v44  ;;  %v9677_v4 = vcombine.low %v6777_v30, %v6777_v30  ;;  %v9692_v22 = vcombine.low %v6776_v44, %v6792_v37  ;;  %v6795_v31 = vld [vmem:[#allocation2 + $0xac] sm:$0x1]  ;;  %v6785_v3 = vld [vmem:[#allocation2 + $0xe0] sm:$0xf] }
 0x4f9   : > { %v7063_v8 = vor.u32 %v7062_v32, %v7058_v58  ;;  %v7070_v27 = vor.u32 %v7069_v26, %v7065_v15  ;;  %v9678_v48 = vcombine.low %v6778_v7, %v6778_v7  ;;  %v9693_v19 = vcombine.low %v6777_v30, %v6793_v12  ;;  %v6800_v6 = vld [vmem:[#allocation2 + $0xdc] sm:$0x1]  ;;  %v6786_v21 = vld [vmem:[#allocation2 + $0xe8] sm:$0xf]  ;;  %v6801_v2 = vld [vmem:[#allocation2 + $0xe4] sm:$0x1] }
 0x4fa   : > { %v7077_v36 = vor.u32 %v7076_v29, %v7072_v53  ;;  %v9679_v62 = vcombine.low %v6779_v14, %v6779_v14  ;;  %v9694_v28 = vcombine.low %v6778_v7, %v6794_v56  ;;  %v9684_v50 = vcombine.low %v6784_v20, %v6784_v20  ;;  %v6787_v13 = vld [vmem:[#allocation2 + $0xf0] sm:$0xf]  ;;  %v6802_v61 = vld [vmem:[#allocation2 + $0xec] sm:$0x1]  ;;  %v6803_v18 = vld [vmem:[#allocation2 + $0xf4] sm:$0x1] }
 0x4fb   : > { %7014 = vrot.lane.b32.xlu0 %v6974_v55, %s10680_s9  ;;  %v7229_v11 = vshll.u32 %v9692_v22, 16  ;;  %v9695_v16 = vcombine.low %v6779_v14, %v6795_v31  ;;  %v9685_v41 = vcombine.low %v6785_v3, %v6785_v3  ;;  %v7236_v35 = vshll.u32 %v9693_v19, 16 }
 0x4fc   : > { %7016 = vrot.lane.b32.xlu1 %v6981_v51, %s10680_s9  ;;  %v9700_v25 = vcombine.low %v6784_v20, %v6800_v6  ;;  %v9686_v54 = vcombine.low %v6786_v21, %v6786_v21  ;;  %v7243_v5 = vshll.u32 %v9694_v28, 16  ;;  %v9701_v49 = vcombine.low %v6785_v3, %v6801_v2  ;;  %v6808_v20 = vld [vmem:[#allocation2 + $0x8] sm:$0xf] }
 0x4fd   : > { %v7231_v23 = vrot.slane %v7229_v11, 1  ;;  %v9687_v52 = vcombine.low %v6787_v13, %v6787_v13  ;;  %v7227_v43 = vshrl.u32 %v9692_v22, 16  ;;  %v7238_v45 = vrot.slane %v7236_v35, 1  ;;  %v6809_v11 = vld [vmem:[#allocation2 + $0x10] sm:$0xf] }
 0x4fe   : > { %v7250_v24 = vshll.u32 %v9695_v16, 16  ;;  %v9702_v38 = vcombine.low %v6786_v21, %v6802_v61  ;;  %v7234_v10 = vshrl.u32 %v9693_v19, 16  ;;  %v7245_v17 = vrot.slane %v7243_v5, 1  ;;  %v6810_v61 = vld [vmem:[#allocation2 + $0x18] sm:$0xf] }
 0x4ff   : > { %7106 = vrot.lane.b32.xlu0 %v7056_v33, %s10681_s10  ;;  %v7232_v9 = vor.u32 %v7231_v23, %v7227_v43  ;;  %v7325_v60 = vshll.u32 %v9700_v25, 16  ;;  %v9703_v47 = vcombine.low %v6787_v13, %v6803_v18  ;;  %v7241_v1 = vshrl.u32 %v9694_v28, 16  ;;  %v6764_v23 = vld [vmem:[#allocation2 + $0x24] sm:$0x1] }
 0x500   : > { %7108 = vrot.lane.b32.xlu1 %v7063_v8, %s10681_s10  ;;  %v7239_v46 = vor.u32 %v7238_v45, %v7234_v10  ;;  %v7252_v57 = vrot.slane %v7250_v24, 1  ;;  %v7332_v39 = vshll.u32 %v9701_v49, 16  ;;  %v7248_v34 = vshrl.u32 %v9695_v16, 16  ;;  %v14100_v45 = vld [vmem:[#allocation2 + $0x20] sm:$0xf] }
 0x501   : > { %v7246_v55 = vor.u32 %v7245_v17, %v7241_v1  ;;  %v7327_v63 = vrot.slane %v7325_v60, 1  ;;  %v7339_v51 = vshll.u32 %v9702_v38, 16  ;;  %v7323_v32 = vshrl.u32 %v9700_v25, 16  ;;  %v14102_v24 = vld [vmem:[#allocation2 + $0x28] sm:$0xf] }
 0x502   : > { %v7253_v33 = vor.u32 %v7252_v57, %v7248_v34  ;;  %v7334_v40 = vrot.slane %v7332_v39, 1  ;;  %v7346_v58 = vshll.u32 %v9703_v47, 16  ;;  %v7330_v8 = vshrl.u32 %v9701_v49, 16  ;;  %v14113_v57 = vld [vmem:[#allocation2 + $0x58] sm:$0xf] }
 0x503   : > { %7110 = vrot.lane.b32.xlu0 %v7070_v27, %s10681_s10  ;;  %v7328_v26 = vor.u32 %v7327_v63, %v7323_v32  ;;  %v7341_v15 = vrot.slane %v7339_v51, 1  ;;  %v7344_v7 = vshrl.u32 %v9703_v47, 16  ;;  %v9708_v16 = vcombine.low %v6808_v20, %v6808_v20  ;;  %v14118_v34 = vld [vmem:[#allocation2 + $0x30] sm:$0xf]  ;;  %v6766_v63 = vld [vmem:[#allocation2 + $0x34] sm:$0x1] }
 0x504   : > { %7112 = vrot.lane.b32.xlu1 %v7077_v36, %s10681_s10  ;;  %v7335_v44 = vor.u32 %v7334_v40, %v7330_v8  ;;  %v7337_v36 = vshrl.u32 %v9702_v38, 16  ;;  %v7348_v30 = vrot.slane %v7346_v58, 1  ;;  %v9709_v13 = vcombine.low %v6809_v11, %v6809_v11  ;;  %v6765_v38 = vld [vmem:[#allocation2 + $0x2c] sm:$0x1]  ;;  %v6825_v51 = vld [vmem:[#allocation2 + $0x14] sm:$0x1] }
 0x505   : > { %v9710_v5 = vcombine.low %v6810_v61, %v6810_v61  ;;  %v9711_v47 = vcombine.low %v14100_v45, %v14100_v45  ;;  %vm15287_vm15 = vcmask 523264  }
 0x506   : > { %v7342_v22 = vor.u32 %v7341_v15, %v7337_v36  ;;  %v7349_v31 = vor.u32 %v7348_v30, %v7344_v7  ;;  %v9666_v15 = vcombine.low %v14118_v34, %v6766_v63 }
 0x507   : > { %7146 = vrot.lane.b32.xlu0 %v9676_v42, %s10682_s11 }
 0x508   : > { %7148 = vrot.lane.b32.xlu1 %v9677_v4, %s10682_s11 }
 0x50b   : > { %7150 = vrot.lane.b32.xlu0 %v9678_v48, %s10682_s11 }
 0x50c   : > { %7152 = vrot.lane.b32.xlu1 %v9679_v62, %s10682_s11 }
 0x50f   : > { %7186 = vrot.lane.b32.xlu0 %v9684_v50, %s10683_s12 }
 0x510   : > { %7188 = vrot.lane.b32.xlu1 %v9685_v41, %s10683_s12  ;;  %v6756_v41 = vld [vmem:[#allocation2 + $0x68] sm:$0xf] }
 0x511   : > { %v9656_v25 = vcombine.low %v6756_v41, %v6756_v41 }
 0x513   : > { %7190 = vrot.lane.b32.xlu0 %v9686_v54, %s10683_s12  ;;  %v6747_v54 = vld [vmem:[#allocation2 + $0x20] sm:$0xf] }
 0x514   : > { %7192 = vrot.lane.b32.xlu1 %v9687_v52, %s10683_s12  ;;  %v9664_v49 = vcombine.low %v6747_v54, %v6764_v23  ;;  %v14097_v52 = vld [vmem:[#allocation2 + $0x50] sm:$0xf] }
 0x515   : > { %v9716_v10 = vcombine.low %v14097_v52, %v14097_v52 }
 0x516   : > { %v6985_v17 = vshll.u32 %v9664_v49, 16  ;;  %v6983_v32 = vshrl.u32 %v9664_v49, 16  ;;  %v6774_v49 = vld [vmem:[#allocation2 + $0x7c] sm:$0x1] }
 0x517   : > { %7282 = vrot.lane.b32.xlu0 %v7232_v9, %s10684_s13  ;;  %v6824_v9 = vld [vmem:[#allocation2 + $0xc] sm:$0x1] }
 0x518   : > { %7284 = vrot.lane.b32.xlu1 %v7239_v46, %s10684_s13  ;;  %v9665_v46 = vcombine.low %v14102_v24, %v6765_v38  ;;  %v9724_v1 = vcombine.low %v6808_v20, %v6824_v9 }
 0x51a   : > { %v6992_v40 = vshll.u32 %v9665_v46, 16  ;;  %v7499_v20 = vshrl.u32 %v9724_v1, 16 }
 0x51b   : > { %7286 = vrot.lane.b32.xlu0 %v7246_v55, %s10684_s13  ;;  %v6987_v55 = vrot.slane %v6985_v17, 1 }
 0x51c   : > { %7288 = vrot.lane.b32.xlu1 %v7253_v33, %s10684_s13  ;;  %v9717_v33 = vcombine.low %v14113_v57, %v14113_v57  ;;  %v6994_v36 = vrot.slane %v6992_v40, 1  ;;  %v6775_v40 = vld [vmem:[#allocation2 + $0x84] sm:$0x1] }
 0x51d   : > { %v6988_v8 = vor.u32 %v6987_v55, %v6983_v32 }
 0x51f   : > { %7378 = vrot.lane.b32.xlu0 %v7328_v26, %s10685_s14  ;;  %v7501_v26 = vshll.u32 %v9724_v1, 16 }
 0x520   : > { %7380 = vrot.lane.b32.xlu1 %v7335_v44, %s10685_s14 }
 0x521   : > { %v9933_v29 = vpop.f32.mrb[12].mxu0  ;;  %v7503_v30 = vrot.slane %v7501_v26, 1 }
 0x522   : > { %v4735_v27 = vadd.f32 %v9933_v29, %v13835_v59  ;;  %v4726_v53 = vpop.f32.mrb[13].mxu0  ;;  %v9725_v29 = vcombine.low %v6809_v11, %v6825_v51 }
 0x523   : > { %v4727_v42 = vadd.f32 %v13835_v59, %v4726_v53  ;;  %v9934_v37 = vpop.f32.mrb[14].mxu0  ;;  %7382 = vrot.lane.b32.xlu0 %v7342_v22, %s10685_s14  ;;  %v14127_v53 = vld [vmem:[#allocation2 + $0x60] sm:$0xf]  ;;  %v6999_v22 = vshll.u32 %v9666_v15, 16 }
 0x524   : > { %vm4747_vm14 = vcmp.ge.f32.partialorder %v4735_v27, 0.0  ;;  %v4755_v4 = vmul.f32 0.2, %v4735_v27  ;;  %v4738_v12 = vadd.f32 %v9934_v37, %v13835_v59  ;;  %v4729_v14 = vpop.f32.mrb[15].mxu0  ;;  %7384 = vrot.lane.b32.xlu1 %v7349_v31, %s10685_s14  ;;  %v6767_v37 = vld [vmem:[#allocation2 + $0x3c] sm:$0x1] }
 0x525   : > { %vm4745_vm9 = vcmp.ge.f32.partialorder %v4727_v42, 0.0  ;;  %v4753_v48 = vmul.f32 0.2, %v4727_v42  ;;  %v4730_v56 = vadd.f32 %v13835_v59, %v4729_v14  ;;  %v6990_v14 = vshrl.u32 %v9665_v46, 16  ;;  %v6773_v31 = vld [vmem:[#allocation2 + $0x74] sm:$0x1] }
 0x526   : > { %v4763_v19 = vsel %vm4747_vm14, %v4735_v27, %v4755_v4  ;;  %vm4748_vm11 = vcmp.ge.f32.partialorder %v4738_v12, 0.0  ;;  %v4756_v62 = vmul.f32 0.2, %v4738_v12  ;;  %v6772_v27 = vld [vmem:[#allocation2 + $0x6c] sm:$0x1]  ;;  %v7001_v11 = vrot.slane %v6999_v22, 1 }
 0x527   : > { %v4771_v3 = vpack.c.bf16 %v4763_v19, %v4763_v19  ;;  %v4761_v28 = vsel %vm4745_vm9, %v4727_v42, %v4753_v48  ;;  %vm4746_vm13 = vcmp.ge.f32.partialorder %v4730_v56, 0.0  ;;  %v4754_v50 = vmul.f32 0.2, %v4730_v56  ;;  %7418 = vrot.lane.b32.xlu0 %v9708_v16, %s10686_s15  ;;  %v14132_v42 = vld [vmem:[#allocation2 + $0x38] sm:$0xf] }
 0x528   : > { %v4769_v6 = vpack.c.bf16 %v4761_v28, %v4761_v28  ;;  %v4764_v21 = vsel %vm4748_vm11, %v4738_v12, %v4756_v62  ;;  %7420 = vrot.lane.b32.xlu1 %v9709_v13, %s10686_s15  ;;  %15285 = vst [vmem:[#allocation54_spill] sm:$0xff] %v14132_v42  ;;  %v9672_v7 = vcombine.low %v6756_v41, %v6772_v27  ;;  %v6826_v4 = vld [vmem:[#allocation2 + $0x1c] sm:$0x1]  ;;  %v7508_v48 = vshll.u32 %v9725_v29, 16  ;;  %v6832_v28 = vld [vmem:[#allocation2 + $0x54] sm:$0x1]  ;;  %vm15290_vm11 = vmmov %vm15287_vm15 }
 0x529   : > { %4780 = vst.msk [vmem:[#allocation2 + $0x80] sm:$0xf] %vm15280_vm8, %v4771_v3  ;;  %v4772_v59 = vpack.c.bf16 %v4764_v21, %v4764_v21  ;;  %v4762_v2 = vsel %vm4746_vm13, %v4730_v56, %v4754_v50  ;;  %v9718_v12 = vcombine.low %v14127_v53, %v14127_v53  ;;  %v6995_v56 = vor.u32 %v6994_v36, %v6990_v14  ;;  %v14139_v3 = vld [vmem:[#allocation2 + $0x68] sm:$0xf]  ;;  %v387_v46 = vld [vmem:[#allocation2 + $0xd4] sm:$0x1] }
 0x52a   : > { %4778 = vst.msk [vmem:[#allocation2 + $0x70] sm:$0xf] %vm15282_vm6, %v4769_v6  ;;  %v4770_v35 = vpack.c.bf16 %v4762_v2, %v4762_v2  ;;  %v9667_v19 = vcombine.low %v14132_v42, %v6767_v37  ;;  %v9726_v62 = vcombine.low %v6810_v61, %v6826_v4  ;;  %v7504_v50 = vor.u32 %v7503_v30, %v7499_v20 }
 0x52b   : > { %4781 = vst.msk [vmem:[#allocation2 + $0x88] sm:$0xf] %vm15283_vm7, %v4772_v59  ;;  %6906 = vrot.lane.b32.xlu0 %v9656_v25, %s10679_s8  ;;  %v7081_v6 = vshll.u32 %v9672_v7, 16  ;;  %v7510_v21 = vrot.slane %v7508_v48, 1  ;;  %v6827_v59 = vld [vmem:[#allocation2 + $0x24] sm:$0x1]  ;;  %v9719_v2 = vcombine.low %v14139_v3, %v14139_v3  ;;  %v9732_v13 = vcombine.low %v14097_v52, %v6832_v28  ;;  %vm15294_vm7 = vmmov %vm15290_vm11 }
 0x52c   : > { %4779 = vst.msk [vmem:[#allocation2 + $0x78] sm:$0xf] %vm15284_vm10, %v4770_v35  ;;  %v6997_v41 = vshrl.u32 %v9666_v15, 16  ;;  %v7006_v35 = vshll.u32 %v9667_v19, 16  ;;  %v7515_v25 = vshll.u32 %v9726_v62, 16  ;;  %v7506_v54 = vshrl.u32 %v9725_v29, 16 }
 0x52d   : > { %v7083_v23 = vrot.slane %v7081_v6, 1  ;;  %v6834_v29 = vld [vmem:[#allocation2 + $0x64] sm:$0x1]  ;;  %v6780_v28 = vld [vmem:[#allocation2 + $0xb0] sm:$0xf]  ;;  %vm15288_vm14 = vcmask 588800  }
 0x52e   : > { %v7002_v61 = vor.u32 %v7001_v11, %v6997_v41  ;;  %v7008_v38 = vrot.slane %v7006_v35, 1  ;;  %v7517_v17 = vrot.slane %v7515_v25, 1  ;;  %v9734_v4 = vcombine.low %v14127_v53, %v6834_v29  ;;  %v6781_v35 = vld [vmem:[#allocation2 + $0xb8] sm:$0xf]  ;;  %v6797_v29 = vld [vmem:[#allocation2 + $0xbc] sm:$0x1]  ;;  %vm15291_vm13 = vmmov %vm15288_vm14 }
 0x52f   : > { %7422 = vrot.lane.b32.xlu0 %v9710_v5, %s10686_s15  ;;  %v9727_v5 = vcombine.low %v14100_v45, %v6827_v59  ;;  %v388_v45 = vsel %vm11953_vm12, 0, %v387_v46  ;;  %v9680_v6 = vcombine.low %v6780_v28, %v6780_v28  ;;  %v6841_v25 = vld [vmem:[#allocation2 + $0x98] sm:$0xf]  ;;  %vm15293_vm6 = vcmask 654336   ;;  %vm15295_vm10 = vmmov %vm15291_vm13 }
 0x530   : > { %v14123_v58 = vld [vmem:[#allocation2 + $0x80] sm:$0xf]  ;;  %389 = vst [vmem:[#allocation2 + $0xd4] sm:$0x1] %v388_v45  ;;  %v7611_v53 = vshll.u32 %v9734_v4, 16 }
 0x531   : > { %v6757_v18 = vld [vmem:[#allocation2 + $0x70] sm:$0xf]  ;;  %v9659_v44 = vcombine.low %v14123_v58, %v14123_v58  ;;  %v7522_v55 = vshll.u32 %v9727_v5, 16  ;;  %v7520_v37 = vshrl.u32 %v9727_v5, 16  ;;  %v6796_v45 = vld [vmem:[#allocation2 + $0xb4] sm:$0x1] }
 0x532   : > { %v9657_v43 = vcombine.low %v6757_v18, %v6757_v18  ;;  %v9673_v16 = vcombine.low %v6757_v18, %v6773_v31  ;;  %v7511_v18 = vor.u32 %v7510_v21, %v7506_v54 }
 0x533   : > { %v14107_v60 = vld [vmem:[#allocation2 + $0x78] sm:$0xf]  ;;  %7458 = vrot.lane.b32.xlu0 %v9716_v10, %s10687_s16  ;;  %v6833_v10 = vld [vmem:[#allocation2 + $0x5c] sm:$0x1]  ;;  %v7524_v27 = vrot.slane %v7522_v55, 1 }
 0x534   : > { %6908 = vrot.lane.b32.xlu1 %v9657_v43, %s10679_s8  ;;  %v9658_v39 = vcombine.low %v14107_v60, %v14107_v60  ;;  %v7079_v43 = vshrl.u32 %v9672_v7, 16  ;;  %v7088_v9 = vshll.u32 %v9673_v16, 16  ;;  %v9674_v52 = vcombine.low %v14107_v60, %v6774_v49  ;;  %v423_v7 = vld [vmem:[#allocation2 + $0x11c] sm:$0x1]  ;;  %v6782_v49 = vld [vmem:[#allocation2 + $0xc0] sm:$0xf] }
 0x535   : > { %v9733_v63 = vcombine.low %v14113_v57, %v6833_v10  ;;  %v7086_v26 = vshrl.u32 %v9673_v16, 16  ;;  %v7595_v57 = vshrl.u32 %v9732_v13, 16  ;;  %v424_v22 = vsel %vm11953_vm12, 0, %v423_v7  ;;  %v14187_v55 = vld [vmem:[#allocation2 + $0xa8] sm:$0xf] }
 0x536   : > { %v7084_v1 = vor.u32 %v7083_v23, %v7079_v43  ;;  %v7090_v32 = vrot.slane %v7088_v9, 1  ;;  %v7095_v15 = vshll.u32 %v9674_v52, 16  ;;  %425 = vst [vmem:[#allocation2 + $0x11c] sm:$0x1] %v424_v22  ;;  %v7093_v48 = vshrl.u32 %v9674_v52, 16 }
 0x537   : > { %6910 = vrot.lane.b32.xlu0 %v9658_v39, %s10679_s8  ;;  %v7004_v39 = vshrl.u32 %v9667_v19, 16  ;;  %v7604_v30 = vshll.u32 %v9733_v63, 16  ;;  %v6835_v19 = vld [vmem:[#allocation2 + $0x6c] sm:$0x1]  ;;  %v7602_v31 = vshrl.u32 %v9733_v63, 16  ;;  %v7613_v16 = vrot.slane %v7611_v53, 1 }
 0x538   : > { %7424 = vrot.lane.b32.xlu1 %v9711_v47, %s10686_s15  ;;  %v7597_v47 = vshll.u32 %v9732_v13, 16  ;;  %v7091_v36 = vor.u32 %v7090_v32, %v7086_v26  ;;  %v7097_v14 = vrot.slane %v7095_v15, 1  ;;  %v9740_v23 = vcombine.low %v6841_v25, %v6841_v25  ;;  %v14182_v52 = vld [vmem:[#allocation2 + $0xc8] sm:$0xf]  ;;  %v14201_v26 = vld [vmem:[#allocation2 + $0xe0] sm:$0xf] }
 0x539   : > { %v7009_v51 = vor.u32 %v7008_v38, %v7004_v39  ;;  %v6842_v38 = vld [vmem:[#allocation2 + $0xa0] sm:$0xf]  ;;  %v9682_v10 = vcombine.low %v6782_v49, %v6782_v49  ;;  %v9696_v32 = vcombine.low %v6780_v28, %v6796_v45  ;;  %v9697_v7 = vcombine.low %v6781_v35, %v6797_v29  ;;  %v6859_v28 = vld [vmem:[#allocation2 + $0xa4] sm:$0x1] }
 0x53a   : > { %v9741_v46 = vcombine.low %v6842_v38, %v6842_v38  ;;  %vm15286_vm12 = vcmask 457728  }
 0x53b   : > { %7018 = vrot.lane.b32.xlu0 %v6988_v8, %s10680_s9  ;;  %v7599_v8 = vrot.slane %v7597_v47, 1  ;;  %v7264_v53 = vshll.u32 %v9697_v7, 16  ;;  %vm15289_vm9 = vmmov %vm15286_vm12 }
 0x53c   : > { %7460 = vrot.lane.b32.xlu1 %v9717_v33, %s10687_s16  ;;  %v7513_v33 = vshrl.u32 %v9726_v62, 16  ;;  %v7098_v62 = vor.u32 %v7097_v14, %v7093_v48  ;;  %v14222_v14 = vld [vmem:[#allocation2 + $0xe8] sm:$0xf]  ;;  %vm15292_vm8 = vmmov %vm15289_vm9 }
 0x53e   : > { %v7518_v60 = vor.u32 %v7517_v17, %v7513_v33  ;;  %v6788_v17 = vld [vmem:[#allocation2 + $0xf8] sm:$0xf]  ;;  %v14194_v33 = vld [vmem:[#allocation2 + $0x100] sm:$0xf] }
 0x53f   : > { %7462 = vrot.lane.b32.xlu0 %v9718_v12, %s10687_s16  ;;  %v7600_v12 = vor.u32 %v7599_v8, %v7595_v57  ;;  %v9688_v39 = vcombine.low %v6788_v17, %v6788_v17  ;;  %v9689_v15 = vcombine.low %v14194_v33, %v14194_v33  ;;  %v7257_v57 = vshll.u32 %v9696_v32, 16 }
 0x540   : > { %6912 = vrot.lane.b32.xlu1 %v9659_v44, %s10679_s8  ;;  %v9675_v44 = vcombine.low %v14123_v58, %v6775_v40  ;;  %v7525_v58 = vor.u32 %v7524_v27, %v7520_v37  ;;  %v14208_v27 = vld [vmem:[#allocation2 + $0xb0] sm:$0xf]  ;;  %v14215_v37 = vld [vmem:[#allocation2 + $0x108] sm:$0xf] }
 0x541   : > { %v9690_v48 = vcombine.low %v14215_v37, %v14215_v37 }
 0x542   : > { %v7102_v20 = vshll.u32 %v9675_v44, 16  ;;  %v7100_v21 = vshrl.u32 %v9675_v44, 16 }
 0x543   : > { %7554 = vrot.lane.b32.xlu0 %v7504_v50, %s10688_s17  ;;  %v9735_v50 = vcombine.low %v14139_v3, %v6835_v19  ;;  %v14170_v3 = vpop.permute.xlu0 %6898 }
 0x544   : > { %7020 = vrot.lane.b32.xlu1 %v6995_v56, %s10680_s9  ;;  %v7606_v56 = vrot.slane %v7604_v30, 1  ;;  %v7104_v11 = vrot.slane %v7102_v20, 1  ;;  %v6858_v30 = vld [vmem:[#allocation2 + $0x9c] sm:$0x1]  ;;  %v6798_v20 = vld [vmem:[#allocation2 + $0xc4] sm:$0x1] }
 0x545   : > { %v7618_v41 = vshll.u32 %v9735_v50, 16  ;;  %v7616_v5 = vshrl.u32 %v9735_v50, 16  ;;  %v9756_v22 = vcombine.low %v6841_v25, %v6858_v30  ;;  %v14234_v50 = vld [vmem:[#allocation2 + $0x110] sm:$0xf]  ;;  %v7266_v25 = vrot.slane %v7264_v53, 1 }
 0x546   : > { %v7607_v0 = vor.u32 %v7606_v56, %v7602_v31  ;;  %v7105_v59 = vor.u32 %v7104_v11, %v7100_v21  ;;  %v7259_v56 = vrot.slane %v7257_v57, 1  ;;  %v7255_v31 = vshrl.u32 %v9696_v32, 16  ;;  %v6804_v11 = vld [vmem:[#allocation2 + $0xfc] sm:$0x1]  ;;  %v6806_v53 = vld [vmem:[#allocation2 + $0x10c] sm:$0x1] }
 0x547   : > { %7022 = vrot.lane.b32.xlu0 %v7002_v61, %s10680_s9  ;;  %v9681_v61 = vcombine.low %v6781_v35, %v6781_v35  ;;  %v7620_v54 = vrot.slane %v7618_v41, 1  ;;  %v14244_v41 = vcombine.low %v6842_v38, %v6859_v28  ;;  %v7771_v32 = vshrl.u32 %v9756_v22, 16 }
 0x548   : > { %7464 = vrot.lane.b32.xlu1 %v9719_v2, %s10687_s16  ;;  %v7609_v2 = vshrl.u32 %v9734_v4, 16  ;;  %v7260_v21 = vor.u32 %v7259_v56, %v7255_v31 }
 0x549   : > { %v7621_v43 = vor.u32 %v7620_v54, %v7616_v5  ;;  %v6799_v54 = vld [vmem:[#allocation2 + $0xcc] sm:$0x1] }
 0x54a   : > { %v7614_v13 = vor.u32 %v7613_v16, %v7609_v2  ;;  %v7773_v16 = vshll.u32 %v9756_v22, 16  ;;  %v10658_v2 = vld [vmem:[%s14672_s3] sm:$0xff]   ;;  %v10660_v22 = vld [vmem:[%s14672_s3 + $0x10] sm:$0xff]  }
 0x54b   : > { %7114 = vrot.lane.b32.xlu0 %v7084_v1, %s10681_s10  ;;  %9959 = vmatprep.subr.bf16.mxu0 %v10658_v2 }
 0x54c   : > { %7556 = vrot.lane.b32.xlu1 %v7511_v18, %s10688_s17  ;;  %9983 = vmatprep.subr.bf16.mxu1 %v10658_v2 }
 0x54d   : > { %9960 = vmatpush3.bf16.msra.mxu0 %v10658_v2  ;;  %9991 = vmatpush3.bf16.msra.mxu1 %v10658_v2 }
 0x54f   : > { %7558 = vrot.lane.b32.xlu0 %v7518_v60, %s10688_s17  ;;  %v9742_v60 = vcombine.low %v14187_v55, %v14187_v55 }
 0x550   : > { %7024 = vrot.lane.b32.xlu1 %v7009_v51, %s10680_s9  ;;  %v9683_v51 = vcombine.low %v14182_v52, %v14182_v52  ;;  %s276_s9 = scalar_lea.vmem %s14676_s7, %s15360_s27 }
 0x553   : > { %7650 = vrot.lane.b32.xlu0 %v7600_v12, %s10689_s18  ;;  %v9743_v12 = vcombine.low %v14208_v27, %v14208_v27 }
 0x554   : > { %7116 = vrot.lane.b32.xlu1 %v7091_v36, %s10681_s10  ;;  %v9748_v36 = vcombine.low %v14201_v26, %v14201_v26 }
 0x557   : > { %7118 = vrot.lane.b32.xlu0 %v7098_v62, %s10681_s10  ;;  %v9749_v62 = vcombine.low %v14222_v14, %v14222_v14 }
 0x558   : > { %7560 = vrot.lane.b32.xlu1 %v7525_v58, %s10688_s17 }
 0x55b   : > { %7154 = vrot.lane.b32.xlu0 %v9680_v6, %s10682_s11 }
 0x55c   : > { %7652 = vrot.lane.b32.xlu1 %v7607_v0, %s10689_s18  ;;  %v9698_v0 = vcombine.low %v6782_v49, %v6798_v20  ;;  %v7262_v49 = vshrl.u32 %v9697_v7, 16 }
 0x55e   : > { %v7271_v38 = vshll.u32 %v9698_v0, 16  ;;  %v7269_v56 = vshrl.u32 %v9698_v0, 16 }
 0x55f   : > { %7654 = vrot.lane.b32.xlu0 %v7614_v13, %s10689_s18  ;;  %v9691_v13 = vcombine.low %v14234_v50, %v14234_v50 }
 0x560   : > { %7120 = vrot.lane.b32.xlu1 %v7105_v59, %s10681_s10  ;;  %v14239_v59 = vld [vmem:[#allocation2 + $0xf0] sm:$0xf]  ;;  %v7273_v30 = vrot.slane %v7271_v38, 1 }
 0x561   : > { %v9750_v5 = vcombine.low %v14239_v59, %v14239_v59 }
 0x562   : > { %v14173_v18 = vpop.permute.xlu1 %6900 }
 0x563   : > { %7690 = vrot.lane.b32.xlu0 %v9740_v23, %s10690_s19 }
 0x564   : > { %7156 = vrot.lane.b32.xlu1 %v9681_v61, %s10682_s11  ;;  %v14251_v61 = vcombine.low %v6788_v17, %v6804_v11  ;;  %v10659_v17 = vld [vmem:[%s14672_s3 + $0x8] sm:$0xff]   ;;  %v7274_v11 = vor.u32 %v7273_v30, %v7269_v56 }
 0x565   : > { %v14176_v9 = vpop.permute.xlu0 %6902  ;;  %9961 = vmatprep.subr.bf16.mxu0 %v10659_v17  ;;  %9984 = vmatprep.subr.bf16.mxu1 %v10659_v17 }
 0x566   : > { %v14179_v47 = vpop.permute.xlu1 %6904  ;;  %v7353_v7 = vshll.u32 %v14251_v61, 16  ;;  %9962 = vmatpush3.bf16.msra.mxu0 %v10659_v17  ;;  %9992 = vmatpush3.bf16.msra.mxu1 %v10659_v17  ;;  %v7351_v2 = vshrl.u32 %v14251_v61, 16 }
 0x567   : > { %7158 = vrot.lane.b32.xlu0 %v9682_v10, %s10682_s11  ;;  %v6860_v10 = vld [vmem:[#allocation2 + $0xac] sm:$0x1]  ;;  %9963 = vmatprep.subr.bf16.mxu0 %v10660_v22 }
 0x568   : > { %7656 = vrot.lane.b32.xlu1 %v7621_v43, %s10689_s18  ;;  %v7775_v43 = vrot.slane %v7773_v16, 1  ;;  %v14271_v29 = vcombine.low %v14187_v55, %v6860_v10  ;;  %9985 = vmatprep.subr.bf16.mxu1 %v10660_v22  ;;  %v7355_v16 = vrot.slane %v7353_v7, 1 }
 0x569   : > { %v14184_v1 = vpop.permute.xlu0 %7010 }
 0x56a   : > { %v14189_v63 = vpop.permute.xlu1 %7012  ;;  %v7776_v57 = vor.u32 %v7775_v43, %v7771_v32  ;;  %v7787_v0 = vshll.u32 %v14271_v29, 16  ;;  %9964 = vmatpush3.bf16.msra.mxu0 %v10660_v22  ;;  %9993 = vmatpush3.bf16.msra.mxu1 %v10660_v22  ;;  %v9706_v43 = vcombine.low %v14215_v37, %v6806_v53  ;;  %v7356_v38 = vor.u32 %v7355_v16, %v7351_v2  ;;  %v6807_v37 = vld [vmem:[#allocation2 + $0x114] sm:$0x1] }
 0x56b   : > { %7194 = vrot.lane.b32.xlu0 %v9688_v39, %s10683_s12  ;;  %v6805_v39 = vld [vmem:[#allocation2 + $0x104] sm:$0x1]  ;;  %v9707_v56 = vcombine.low %v14234_v50, %v6807_v37 }
 0x56c   : > { %7692 = vrot.lane.b32.xlu1 %v9741_v46, %s10690_s19  ;;  %v14262_v46 = vcombine.low %v14182_v52, %v6799_v54  ;;  %v7789_v10 = vrot.slane %v7787_v0, 1 }
 0x56d   : > { %v14196_v40 = vpop.permute.xlu0 %7014 }
 0x56e   : > { %v14203_v8 = vpop.permute.xlu1 %7016 }
 0x56f   : > { %7694 = vrot.lane.b32.xlu0 %v9742_v60, %s10690_s19  ;;  %v7780_v60 = vshll.u32 %v14244_v41, 16 }
 0x570   : > { %7160 = vrot.lane.b32.xlu1 %v9683_v51, %s10682_s11  ;;  %v7267_v51 = vor.u32 %v7266_v25, %v7262_v49  ;;  %v6867_v25 = vld [vmem:[#allocation2 + $0xec] sm:$0x1] }
 0x571   : > { %v14210_v44 = vpop.permute.xlu0 %7106  ;;  %v7782_v20 = vrot.slane %v7780_v60, 1 }
 0x572   : > { %v14217_v4 = vpop.permute.xlu1 %7108 }
 0x573   : > { %7730 = vrot.lane.b32.xlu0 %v9748_v36, %s10691_s24  ;;  %v6866_v36 = vld [vmem:[#allocation2 + $0xe4] sm:$0x1] }
 0x574   : > { %7196 = vrot.lane.b32.xlu1 %v9689_v15, %s10683_s12  ;;  %v14268_v15 = vld [vmem:[#allocation2 + $0xf8] sm:$0xf]  ;;  %v14290_v31 = vcombine.low %v14201_v26, %v6866_v36  ;;  %v7785_v36 = vshrl.u32 %v14271_v29, 16  ;;  %v10663_v29 = vld [vmem:[%s14672_s3 + $0x28] sm:$0xff]  }
 0x575   : > { %v14224_v58 = vpop.permute.xlu0 %7110  ;;  %v10661_v26 = vld [vmem:[%s14672_s3 + $0x18] sm:$0xff]  }
 0x576   : > { %v14229_v19 = vpop.permute.xlu1 %7112  ;;  %9965 = vmatprep.subr.bf16.mxu0 %v10661_v26  ;;  %9986 = vmatprep.subr.bf16.mxu1 %v10661_v26  ;;  %v7869_v17 = vshll.u32 %v14290_v31, 16  ;;  %v7790_v30 = vor.u32 %v7789_v10, %v7785_v36  ;;  %v7867_v53 = vshrl.u32 %v14290_v31, 16 }
 0x577   : > { %7198 = vrot.lane.b32.xlu0 %v9690_v48, %s10683_s12  ;;  %v9751_v48 = vcombine.low %v14268_v15, %v14268_v15  ;;  %9966 = vmatpush3.bf16.msra.mxu0 %v10661_v26 }
 0x578   : > { %7696 = vrot.lane.b32.xlu1 %v9743_v12, %s10690_s19  ;;  %v14278_v12 = vcombine.low %v14194_v33, %v6805_v39  ;;  %v6861_v33 = vld [vmem:[#allocation2 + $0xb4] sm:$0x1]  ;;  %v9765_v39 = vcombine.low %v14222_v14, %v6867_v25  ;;  %9994 = vmatpush3.bf16.msra.mxu1 %v10661_v26  ;;  %v7871_v22 = vrot.slane %v7869_v17, 1  ;;  %v6812_v17 = vld [vmem:[#allocation2 + $0x28] sm:$0xf] }
 0x579   : > { %v14236_v6 = vpop.permute.xlu0 %7146  ;;  %v10664_v26 = vld [vmem:[%s14672_s3 + $0x30] sm:$0xff]  }
 0x57a   : > { %v14246_v35 = vpop.permute.xlu1 %7148  ;;  %v7360_v49 = vshll.u32 %v14278_v12, 16  ;;  %v7358_v7 = vshrl.u32 %v14278_v12, 16  ;;  %v7876_v12 = vshll.u32 %v9765_v39, 16  ;;  %v7872_v16 = vor.u32 %v7871_v22, %v7867_v53  ;;  %v6814_v53 = vld [vmem:[#allocation2 + $0x38] sm:$0xf] }
 0x57b   : > { %7290 = vrot.lane.b32.xlu0 %v7260_v21, %s10684_s13  ;;  %v7778_v21 = vshrl.u32 %v14244_v41, 16 }
 0x57c   : > { %7732 = vrot.lane.b32.xlu1 %v9749_v62, %s10691_s24  ;;  %v7278_v62 = vshll.u32 %v14262_v46, 16 }
 0x57d   : > { %v14253_v23 = vpop.permute.xlu0 %7150 }
 0x57e   : > { %v14264_v45 = vpop.permute.xlu1 %7152  ;;  %v7280_v41 = vrot.slane %v7278_v62, 1 }
 0x57f   : > { %7734 = vrot.lane.b32.xlu0 %v9750_v5, %s10691_s24  ;;  %v7783_v5 = vor.u32 %v7782_v20, %v7778_v21  ;;  %v6868_v20 = vld [vmem:[#allocation2 + $0xf4] sm:$0x1] }
 0x580   : > { %7200 = vrot.lane.b32.xlu1 %v9691_v13, %s10683_s12  ;;  %v9759_v13 = vcombine.low %v14208_v27, %v6861_v33  ;;  %v7276_v27 = vshrl.u32 %v14262_v46, 16  ;;  %v7362_v46 = vrot.slane %v7360_v49, 1  ;;  %v9766_v21 = vcombine.low %v14239_v59, %v6868_v20  ;;  %v6869_v49 = vld [vmem:[#allocation2 + $0xfc] sm:$0x1]  ;;  %v6828_v20 = vld [vmem:[#allocation2 + $0x2c] sm:$0x1] }
 0x581   : > { %v14274_v52 = vpop.permute.xlu0 %7186  ;;  %v7878_v59 = vrot.slane %v7876_v12, 1  ;;  %v6829_v12 = vld [vmem:[#allocation2 + $0x34] sm:$0x1] }
 0x582   : > { %v14283_v55 = vpop.permute.xlu1 %7188  ;;  %v7281_v60 = vor.u32 %v7280_v41, %v7276_v27  ;;  %v7363_v33 = vor.u32 %v7362_v46, %v7358_v7  ;;  %v7792_v0 = vshrl.u32 %v9759_v13, 16  ;;  %v7374_v41 = vshll.u32 %v9707_v56, 16 }
 0x583   : > { %7826 = vrot.lane.b32.xlu0 %v7776_v57, %s10692_s25  ;;  %v7794_v57 = vshll.u32 %v9759_v13, 16  ;;  %v7874_v27 = vshrl.u32 %v9765_v39, 16  ;;  %v7883_v10 = vshll.u32 %v9766_v21, 16  ;;  %v9712_v46 = vcombine.low %v6812_v17, %v6812_v17 }
 0x584   : > { %7292 = vrot.lane.b32.xlu1 %v7267_v51, %s10684_s13  ;;  %v10662_v51 = vld [vmem:[%s14672_s3 + $0x20] sm:$0xff]   ;;  %v7881_v7 = vshrl.u32 %v9766_v21, 16  ;;  %v9728_v21 = vcombine.low %v6812_v17, %v6828_v20 }
 0x585   : > { %v14293_v28 = vpop.permute.xlu0 %7190  ;;  %9967 = vmatprep.subr.bf16.mxu0 %v10662_v51  ;;  %9987 = vmatprep.subr.bf16.mxu1 %v10662_v51  ;;  %v7879_v37 = vor.u32 %v7878_v59, %v7874_v27  ;;  %v6820_v27 = vld [vmem:[#allocation2 + $0x70] sm:$0xf] }
 0x586   : > { %v14302_v54 = vpop.permute.xlu1 %7192  ;;  %9968 = vmatpush3.bf16.msra.mxu0 %v10662_v51  ;;  %9995 = vmatpush3.bf16.msra.mxu1 %v10662_v51  ;;  %v10665_v51 = vld [vmem:[%s14672_s3 + $0x38] sm:$0xff]  }
 0x587   : > { %7294 = vrot.lane.b32.xlu0 %v7274_v11, %s10684_s13  ;;  %v7796_v11 = vrot.slane %v7794_v57, 1  ;;  %9969 = vmatprep.subr.bf16.mxu0 %v10663_v29  ;;  %v7372_v57 = vshrl.u32 %v9707_v56, 16  ;;  %v6831_v56 = vld [vmem:[#allocation2 + $0x44] sm:$0x1] }
 0x588   : > { %7736 = vrot.lane.b32.xlu1 %v9751_v48, %s10691_s24  ;;  %v7367_v48 = vshll.u32 %v9706_v43, 16  ;;  %9988 = vmatprep.subr.bf16.mxu1 %v10663_v29 }
 0x589   : > { %v14308_v61 = vpop.permute.xlu0 %7282  ;;  %v7797_v25 = vor.u32 %v7796_v11, %v7792_v0  ;;  %v6830_v11 = vld [vmem:[#allocation2 + $0x3c] sm:$0x1] }
 0x58a   : > { %v14316_v32 = vpop.permute.xlu1 %7284  ;;  %v7369_v2 = vrot.slane %v7367_v48, 1  ;;  %9970 = vmatpush3.bf16.msra.mxu0 %v10663_v29  ;;  %9996 = vmatpush3.bf16.msra.mxu1 %v10663_v29  ;;  %v6813_v48 = vld [vmem:[#allocation2 + $0x30] sm:$0xf] }
 0x58b   : > { %7386 = vrot.lane.b32.xlu0 %v7356_v38, %s10685_s14  ;;  %9971 = vmatprep.subr.bf16.mxu0 %v10664_v26 }
 0x58c   : > { %7828 = vrot.lane.b32.xlu1 %v7783_v5, %s10692_s25  ;;  %v7365_v5 = vshrl.u32 %v9706_v43, 16  ;;  %9989 = vmatprep.subr.bf16.mxu1 %v10664_v26  ;;  %v9767_v43 = vcombine.low %v14268_v15, %v6869_v49 }
 0x58d   : > { %v14321_v14 = vpop.permute.xlu0 %7286 }
 0x58e   : > { %v14328_v62 = vpop.permute.xlu1 %7288  ;;  %v7370_v38 = vor.u32 %v7369_v2, %v7365_v5  ;;  %9972 = vmatpush3.bf16.msra.mxu0 %v10664_v26  ;;  %9997 = vmatpush3.bf16.msra.mxu1 %v10664_v26  ;;  %v7890_v22 = vshll.u32 %v9767_v43, 16  ;;  %v9713_v2 = vcombine.low %v6813_v48, %v6813_v48  ;;  %v9729_v5 = vcombine.low %v6813_v48, %v6829_v12  ;;  %v6838_v48 = vld [vmem:[#allocation2 + $0x84] sm:$0x1]  ;;  %v10666_v12 = vld [vmem:[#allocation2] sm:$0xf] }
 0x58f   : > { %7830 = vrot.lane.b32.xlu0 %v7790_v30, %s10692_s25  ;;  %9973 = vmatprep.subr.bf16.mxu0 %v10665_v51  ;;  %v7885_v30 = vrot.slane %v7883_v10, 1  ;;  %v7888_v49 = vshrl.u32 %v9767_v43, 16 }
 0x590   : > { %7296 = vrot.lane.b32.xlu1 %v7281_v60, %s10684_s13  ;;  %v7376_v60 = vrot.slane %v7374_v41, 1  ;;  %9990 = vmatprep.subr.bf16.mxu1 %v10665_v51  ;;  %v7892_v26 = vrot.slane %v7890_v22, 1  ;;  %v9714_v41 = vcombine.low %v6814_v53, %v6814_v53 }
 0x591   : > { %v14334_v50 = vpop.permute.xlu0 %7378 }
 0x592   : > { %v14339_v31 = vpop.permute.xlu1 %7380  ;;  %9974 = vmatpush3.bf16.msra.mxu0 %v10665_v51  ;;  %9998 = vmatpush3.bf16.msra.mxu1 %v10665_v51  ;;  %v7377_v15 = vor.u32 %v7376_v60, %v7372_v57  ;;  %v7893_v51 = vor.u32 %v7892_v26, %v7888_v49  ;;  %v9720_v57 = vcombine.low %v6820_v27, %v6820_v27 }
 0x593   : > { %7922 = vrot.lane.b32.xlu0 %v7872_v16, %s10693_s21  ;;  %v6815_v16 = vld [vmem:[#allocation2 + $0x40] sm:$0xf] }
 0x594   : > { %7388 = vrot.lane.b32.xlu1 %v7363_v33, %s10685_s14  ;;  %v7886_v33 = vor.u32 %v7885_v30, %v7881_v7  ;;  %v7536_v30 = vshll.u32 %v9729_v5, 16  ;;  %v6822_v7 = vld [vmem:[#allocation2 + $0x80] sm:$0xf]  ;;  %v9715_v43 = vcombine.low %v6815_v16, %v6815_v16 }
 0x595   : > { %v14343_v13 = vpop.permute.xlu0 %7382  ;;  %v9722_v26 = vcombine.low %v6822_v7, %v6822_v7 }
 0x596   : > { %v14350_v36 = vpop.permute.xlu1 %7384 }
 0x597   : > { %7390 = vrot.lane.b32.xlu0 %v7370_v38, %s10685_s14  ;;  %v9731_v38 = vcombine.low %v6815_v16, %v6831_v56  ;;  %v7940_v56 = vsel %vm1169_vm0, %v10666_v12, %v14170_v3  ;;  %v6823_v12 = vld [vmem:[#allocation2 + $0x88] sm:$0xf] }
 0x598   : > { %7832 = vrot.lane.b32.xlu1 %v7797_v25, %s10692_s25  ;;  %v9730_v25 = vcombine.low %v6814_v53, %v6830_v11 }
 0x599   : > { %v14353_v39 = vpop.permute.xlu0 %7418 }
 0x59a   : > { %v14359_v0 = vpop.permute.xlu1 %7420  ;;  %v7543_v60 = vshll.u32 %v9730_v25, 16 }
 0x59b   : > { %7426 = vrot.lane.b32.xlu0 %v9712_v46, %s10686_s15  ;;  %v6836_v46 = vld [vmem:[#allocation2 + $0x74] sm:$0x1] }
 0x59c   : > { %7924 = vrot.lane.b32.xlu1 %v7879_v37, %s10693_s21  ;;  %v7529_v37 = vshll.u32 %v9728_v21, 16  ;;  %v14374_v20 = vcombine.low %v6820_v27, %v6836_v46  ;;  %v7545_v11 = vrot.slane %v7543_v60, 1  ;;  %v14383_v27 = vcombine.low %v6822_v7, %v6838_v48  ;;  %v6837_v46 = vld [vmem:[#allocation2 + $0x7c] sm:$0x1]  ;;  %v6839_v7 = vld [vmem:[#allocation2 + $0x8c] sm:$0x1] }
 0x59d   : > { %v14357_v29 = vpop.permute.xlu0 %6906  ;;  %v7541_v60 = vshrl.u32 %v9730_v25, 16 }
 0x59e   : > { %v7531_v53 = vrot.slane %v7529_v37, 1  ;;  %v7527_v37 = vshrl.u32 %v9728_v21, 16  ;;  %v7625_v21 = vshll.u32 %v14374_v20, 16 }
 0x59f   : > { %7926 = vrot.lane.b32.xlu0 %v7886_v33, %s10693_s21  ;;  %v6821_v33 = vld [vmem:[#allocation2 + $0x78] sm:$0xf]  ;;  %v7546_v48 = vor.u32 %v7545_v11, %v7541_v60  ;;  %v7639_v11 = vshll.u32 %v14383_v27, 16 }
 0x5a0   : > { %7392 = vrot.lane.b32.xlu1 %v7377_v15, %s10685_s14  ;;  %v7550_v15 = vshll.u32 %v9731_v38, 16 }
 0x5a1   : > { %v14363_v59 = vpop.permute.xlu0 %7422 }
 0x5a2   : > { %v7552_v49 = vrot.slane %v7550_v15, 1  ;;  %v7548_v15 = vshrl.u32 %v9731_v38, 16  ;;  %v7963_v38 = vsel %vm1194_vm1, %v7940_v56, %v14184_v1  ;;  %v7623_v1 = vshrl.u32 %v14374_v20, 16  ;;  %v10668_v56 = vld [vmem:[#allocation2 + $0x18] sm:$0xf] }
 0x5a3   : > { %7430 = vrot.lane.b32.xlu0 %v9714_v41, %s10686_s15  ;;  %v7538_v41 = vrot.slane %v7536_v30, 1  ;;  %v7534_v30 = vshrl.u32 %v9729_v5, 16 }
 0x5a4   : > { %7428 = vrot.lane.b32.xlu1 %v9713_v2, %s10686_s15  ;;  %v7553_v5 = vor.u32 %v7552_v49, %v7548_v15 }
 0x5a5   : > { %v14369_v17 = vpop.permute.xlu0 %7458 }
 0x5a6   : > { %v14365_v10 = vpop.permute.xlu1 %6908 }
 0x5a7   : > { %7466 = vrot.lane.b32.xlu0 %v9720_v57, %s10687_s16 }
 0x5a8   : > { %7928 = vrot.lane.b32.xlu1 %v7893_v51, %s10693_s21  ;;  %v10667_v51 = vld [vmem:[#allocation2 + $0x10] sm:$0xf] }
 0x5a9   : > { %v14379_v2 = vpop.permute.xlu0 %6910  ;;  %v7946_v16 = vsel %vm1169_vm0, %v10667_v51, %v14176_v9  ;;  %v7532_v9 = vor.u32 %v7531_v53, %v7527_v37  ;;  %v7539_v51 = vor.u32 %v7538_v41, %v7534_v30  ;;  %v9723_v53 = vcombine.low %v6823_v12, %v6823_v12 }
 0x5aa   : > { %v14371_v22 = vpop.permute.xlu1 %7424  ;;  %v7967_v57 = vsel %vm1194_vm1, %v7946_v16, %v14196_v40  ;;  %v14395_v40 = vcombine.low %v6821_v33, %v6837_v46  ;;  %v14412_v41 = vcombine.low %v6823_v12, %v6839_v7  ;;  %v7627_v16 = vrot.slane %v7625_v21, 1 }
 0x5ab   : > { %7470 = vrot.lane.b32.xlu0 %v9722_v26, %s10687_s16  ;;  %v7983_v42 = vsel %vm1211_vm2, %v7967_v57, %v14224_v58  ;;  %v10669_v57 = vld [vmem:[#allocation2 + $0x8] sm:$0xf] }
 0x5ac   : > { %7432 = vrot.lane.b32.xlu1 %v9715_v43, %s10686_s15  ;;  %v9721_v43 = vcombine.low %v6821_v33, %v6821_v33  ;;  %v7999_v25 = vsel %vm1228_vm3, %v7983_v42, %v14253_v23  ;;  %v7979_v42 = vsel %vm1211_vm2, %v7963_v38, %v14210_v44  ;;  %v7628_v15 = vor.u32 %v7627_v16, %v7623_v1 }
 0x5ad   : > { %v14398_v26 = vpop.permute.xlu0 %7018  ;;  %v8015_v58 = vsel %vm1245_vm4, %v7999_v25, %v14293_v28  ;;  %v7949_v28 = vsel %vm1169_vm0, %v10668_v56, %v14179_v47  ;;  %v7995_v49 = vsel %vm1228_vm3, %v7979_v42, %v14236_v6  ;;  %v7632_v47 = vshll.u32 %v14395_v40, 16  ;;  %v6862_v56 = vld [vmem:[#allocation2 + $0xbc] sm:$0x1] }
 0x5ae   : > { %v14387_v3 = vpop.permute.xlu1 %7460  ;;  %v8031_v23 = vsel %vm1262_vm5, %v8015_v58, %v14321_v14  ;;  %v7969_v14 = vsel %vm1194_vm1, %v7949_v28, %v14203_v8  ;;  %v8011_v46 = vsel %vm1245_vm4, %v7995_v49, %v14274_v52  ;;  %v7641_v8 = vrot.slane %v7639_v11, 1  ;;  %v6845_v58 = vld [vmem:[#allocation2 + $0xb8] sm:$0xf]  ;;  %v6847_v28 = vld [vmem:[#allocation2 + $0xc8] sm:$0xf] }
 0x5af   : > { %7562 = vrot.lane.b32.xlu0 %v7532_v9, %s10688_s17  ;;  %v8047_v44 = vsel %vm15286_vm12, %v8031_v23, %v14343_v13  ;;  %v7985_v6 = vsel %vm1211_vm2, %v7969_v14, %v14229_v19  ;;  %v8027_v13 = vsel %vm1262_vm5, %v8011_v46, %v14308_v61  ;;  %v7943_v52 = vsel %vm1169_vm0, %v10669_v57, %v14173_v18  ;;  %vm15296_vm12 = vmmov %vm15292_vm8  ;;  %v15300_v49 = vld [vmem:[#allocation54_spill] sm:$0xff]  ;;  %v6846_v14 = vld [vmem:[#allocation2 + $0xc0] sm:$0xf] }
 0x5b0   : > { %7468 = vrot.lane.b32.xlu1 %v9721_v43, %s10687_s16  ;;  %v8063_v20 = vsel %vm15287_vm15, %v8047_v44, %v14363_v59  ;;  %v8001_v59 = vsel %vm1228_vm3, %v7985_v6, %v14264_v45  ;;  %v8043_v43 = vsel %vm15289_vm9, %v8027_v13, %v14334_v50  ;;  %v7955_v19 = vsel %vm1169_vm0, %v14102_v24, %v14365_v10  ;;  %vm15297_vm15 = vmmov %vm15294_vm7  ;;  %v6854_v6 = vld [vmem:[#allocation2 + $0x100] sm:$0xf]  ;;  %v6848_v13 = vld [vmem:[#allocation2 + $0xd0] sm:$0xf] }
 0x5b1   : > { %v7463_v37 = vpop.permute.xlu0 %7462  ;;  %v7965_v61 = vsel %vm1194_vm1, %v7943_v52, %v14189_v63  ;;  %v8017_v30 = vsel %vm1245_vm4, %v8001_v59, %v14302_v54  ;;  %v8059_v18 = vsel %vm15290_vm11, %v8043_v43, %v14353_v39  ;;  %vm15299_vm9 = vmmov %vm15293_vm6  ;;  %v9744_v23 = vcombine.low %v6845_v58, %v6845_v58  ;;  %v6863_v52 = vld [vmem:[#allocation2 + $0xc4] sm:$0x1] }
 0x5b2   : > { %v14409_v33 = vpop.permute.xlu1 %6912  ;;  %v14434_v60 = vsel %vm15288_vm14, %v8063_v20, %v7463_v37  ;;  %v7981_v50 = vsel %vm1211_vm2, %v7965_v61, %v14217_v4  ;;  %v8033_v24 = vsel %vm1262_vm5, %v8017_v30, %v14328_v62  ;;  %v8075_v10 = vsel %vm15291_vm13, %v8059_v18, %v14369_v17  ;;  %vm15298_vm14 = vmmov %vm15295_vm10  ;;  %v6865_v30 = vld [vmem:[#allocation2 + $0xd4] sm:$0x1]  ;;  %v6856_v18 = vld [vmem:[#allocation2 + $0x110] sm:$0xf] }
 0x5b3   : > { %7566 = vrot.lane.b32.xlu0 %v7546_v48, %s10688_s17  ;;  %v7997_v54 = vsel %vm1228_vm3, %v7981_v50, %v14246_v35  ;;  %v8049_v39 = vsel %vm15292_vm8, %v8033_v24, %v14350_v36  ;;  %v7637_v4 = vshrl.u32 %v14383_v27, 16  ;;  %v7634_v48 = vrot.slane %v7632_v47, 1  ;;  %vm15301_vm11 = vmmov %vm15293_vm6  ;;  %v6864_v47 = vld [vmem:[#allocation2 + $0xcc] sm:$0x1] }
 0x5b4   : > { %7472 = vrot.lane.b32.xlu1 %v9723_v53, %s10687_s16  ;;  %v8013_v62 = vsel %vm1245_vm4, %v7997_v54, %v14283_v55  ;;  %v8065_v17 = vsel %vm15294_vm7, %v8049_v39, %v14371_v22  ;;  %v7646_v35 = vshll.u32 %v14412_v41, 16  ;;  %v7958_v55 = vsel %vm1169_vm0, %v14118_v34, %v14379_v2  ;;  %v10670_v2 = vld [vmem:[#allocation2 + $0x20] sm:$0xf]  ;;  %v6872_v39 = vld [vmem:[#allocation2 + $0x114] sm:$0x1] }
 0x5b5   : > { %v7555_v63 = vpop.permute.xlu0 %7554  ;;  %v8029_v36 = vsel %vm1262_vm5, %v8013_v62, %v14316_v32  ;;  %v7642_v25 = vor.u32 %v7641_v8, %v7637_v4  ;;  %v9760_v46 = vcombine.low %v6845_v58, %v6862_v56  ;;  %v9745_v8 = vcombine.low %v6846_v14, %v6846_v14 }
 0x5b6   : > { %v7021_v12 = vpop.permute.xlu1 %7020  ;;  %v14465_v9 = vsel %vm15293_vm6, %v8075_v10, %v7555_v63  ;;  %v8045_v27 = vsel %vm15296_vm12, %v8029_v36, %v14339_v31  ;;  %v7648_v34 = vrot.slane %v7646_v35, 1  ;;  %v9762_v59 = vcombine.low %v6847_v28, %v6864_v47  ;;  %v6855_v63 = vld [vmem:[#allocation2 + $0x108] sm:$0xf] }
 0x5b7   : > { %v7973_v45 = vsel %vm1194_vm1, %v7955_v19, %v7021_v12  ;;  %7658 = vrot.lane.b32.xlu0 %v7628_v15, %s10689_s18  ;;  %v8061_v38 = vsel %vm15297_vm15, %v8045_v27, %v14359_v0  ;;  %v6870_v19 = vld [vmem:[#allocation2 + $0x104] sm:$0x1]  ;;  %v9752_v12 = vcombine.low %v6854_v6, %v6854_v6  ;;  %v7801_v61 = vshll.u32 %v9760_v46, 16 }
 0x5b8   : > { %7564 = vrot.lane.b32.xlu1 %v7539_v51, %s10688_s17  ;;  %v7630_v51 = vshrl.u32 %v14395_v40, 16  ;;  %v8077_v53 = vsel %vm15298_vm14, %v8061_v38, %v14387_v3  ;;  %v7644_v3 = vshrl.u32 %v14412_v41, 16  ;;  %v9746_v41 = vcombine.low %v6847_v28, %v6847_v28 }
 0x5b9   : > { %v7023_v22 = vpop.permute.xlu0 %7022  ;;  %v9761_v50 = vcombine.low %v6846_v14, %v6863_v52  ;;  %v9763_v15 = vcombine.low %v6848_v13, %v6865_v30  ;;  %v9754_v4 = vcombine.low %v6856_v18, %v6856_v18  ;;  %v7803_v62 = vrot.slane %v7801_v61, 1 }
 0x5ba   : > { %v7465_v7 = vpop.permute.xlu1 %7464  ;;  %v7975_v32 = vsel %vm1194_vm1, %v7958_v55, %v7023_v22  ;;  %v7635_v11 = vor.u32 %v7634_v48, %v7630_v51  ;;  %v7649_v16 = vor.u32 %v7648_v34, %v7644_v3  ;;  %v6857_v48 = vld [vmem:[#allocation2 + $0x118] sm:$0xf]  ;;  %v9753_v36 = vcombine.low %v6855_v63, %v6855_v63  ;;  %v6871_v22 = vld [vmem:[#allocation2 + $0x10c] sm:$0x1] }
 0x5bb   : > { %v8081_v21 = vsel %vm15295_vm10, %v8065_v17, %v7465_v7  ;;  %7662 = vrot.lane.b32.xlu0 %v7642_v25, %s10689_s18  ;;  %v7815_v17 = vshll.u32 %v9762_v59, 16  ;;  %v7808_v27 = vshll.u32 %v9761_v50, 16  ;;  %v9770_v55 = vcombine.low %v6856_v18, %v6872_v39 }
 0x5bc   : > { %7568 = vrot.lane.b32.xlu1 %v7553_v5, %s10688_s17  ;;  %v7952_v5 = vsel %vm1169_vm0, %v10670_v2, %v14357_v29  ;;  %v7961_v29 = vsel %vm1169_vm0, %v15300_v49, %v14409_v33  ;;  %vm15302_vm0 = vmmov %vm15293_vm6  ;;  %v9755_v58 = vcombine.low %v6857_v48, %v6857_v48  ;;  %v9769_v34 = vcombine.low %v6855_v63, %v6871_v22 }
 0x5bd   : > { %v7971_v0 = vsel %vm1194_vm1, %v7952_v5, %v14398_v26  ;;  %v7115_v42 = vpop.permute.xlu0 %7114  ;;  %v7813_v5 = vshrl.u32 %v9762_v59, 16  ;;  %v7911_v56 = vshll.u32 %v9770_v55, 16  ;;  %v7909_v52 = vshrl.u32 %v9770_v55, 16 }
 0x5be   : > { %v7557_v31 = vpop.permute.xlu1 %7556  ;;  %v7987_v1 = vsel %vm1211_vm2, %v7971_v0, %v7115_v42  ;;  %v7810_v0 = vrot.slane %v7808_v27, 1  ;;  %vm15311_vm10 = vcmask 916480   ;;  %vm15313_vm15 = vcmask 982016  }
 0x5bf   : > { %v14493_v40 = vsel %vm15299_vm9, %v8077_v53, %v7557_v31  ;;  %7698 = vrot.lane.b32.xlu0 %v9744_v23, %s10690_s19  ;;  %v7817_v53 = vrot.slane %v7815_v17, 1  ;;  %v7822_v31 = vshll.u32 %v9763_v15, 16  ;;  %v7806_v23 = vshrl.u32 %v9761_v50, 16  ;;  %vm15312_vm12 = vmmov %vm15311_vm10 }
 0x5c0   : > { %7660 = vrot.lane.b32.xlu1 %v7635_v11, %s10689_s18  ;;  %v6873_v11 = vld [vmem:[#allocation2 + $0x11c] sm:$0x1]  ;;  %vm15314_vm14 = vmmov %vm15313_vm15 }
 0x5c1   : > { %v7559_v20 = vpop.permute.xlu0 %7558  ;;  %v9771_v28 = vcombine.low %v6857_v48, %v6873_v11  ;;  %v7811_v14 = vor.u32 %v7810_v0, %v7806_v23 }
 0x5c2   : > { %v7025_v44 = vpop.permute.xlu1 %7024  ;;  %v14508_v37 = vsel %vm15301_vm11, %v14434_v60, %v7559_v20  ;;  %v9747_v60 = vcombine.low %v6848_v13, %v6848_v13  ;;  %v7904_v20 = vshll.u32 %v9769_v34, 16  ;;  %v7913_v13 = vrot.slane %v7911_v56, 1 }
 0x5c3   : > { %v7977_v26 = vsel %vm1194_vm1, %v7961_v29, %v7025_v44  ;;  %7702 = vrot.lane.b32.xlu0 %v9746_v41, %s10690_s19  ;;  %v7818_v29 = vor.u32 %v7817_v53, %v7813_v5  ;;  %v7820_v44 = vshrl.u32 %v9763_v15, 16  ;;  %v7916_v61 = vshrl.u32 %v9771_v28, 16 }
 0x5c4   : > { %7664 = vrot.lane.b32.xlu1 %v7649_v16, %s10689_s18  ;;  %v7906_v59 = vrot.slane %v7904_v20, 1 }
 0x5c5   : > { %v14515_v43 = vpop.permute.xlu0 %7650 }
 0x5c6   : > { %v7117_v33 = vpop.permute.xlu1 %7116 }
 0x5c7   : > { %v14512_v57 = vsel %vm1211_vm2, %v7973_v45, %v7117_v33  ;;  %7738 = vrot.lane.b32.xlu0 %v9752_v12, %s10691_s24  ;;  %v9768_v45 = vcombine.low %v6854_v6, %v6870_v19  ;;  %v7918_v33 = vshll.u32 %v9771_v28, 16  ;;  %v7914_v12 = vor.u32 %v7913_v13, %v7909_v52 }
 0x5c8   : > { %7700 = vrot.lane.b32.xlu1 %v9745_v8, %s10690_s19 }
 0x5c9   : > { %v7119_v54 = vpop.permute.xlu0 %7118  ;;  %v7897_v25 = vshll.u32 %v9768_v45, 16 }
 0x5ca   : > { %v7561_v24 = vpop.permute.xlu1 %7560  ;;  %v7991_v7 = vsel %vm1211_vm2, %v7975_v32, %v7119_v54 }
 0x5cb   : > { %v14519_v10 = vsel %vm15302_vm0, %v8081_v21, %v7561_v24  ;;  %7742 = vrot.lane.b32.xlu0 %v9754_v4, %s10691_s24  ;;  %v7799_v21 = vshrl.u32 %v9760_v46, 16  ;;  %v7899_v3 = vrot.slane %v7897_v25, 1  ;;  %v7895_v46 = vshrl.u32 %v9768_v45, 16 }
 0x5cc   : > { %7704 = vrot.lane.b32.xlu1 %v9747_v60, %s10690_s19  ;;  %v7902_v60 = vshrl.u32 %v9769_v34, 16 }
 0x5cd   : > { %v7155_v51 = vpop.permute.xlu0 %7154  ;;  %v7804_v38 = vor.u32 %v7803_v62, %v7799_v21  ;;  %v7900_v47 = vor.u32 %v7899_v3, %v7895_v46 }
 0x5ce   : > { %v14523_v35 = vpop.permute.xlu1 %7652  ;;  %v8003_v32 = vsel %vm1228_vm3, %v7987_v1, %v7155_v51  ;;  %v7824_v1 = vrot.slane %v7822_v31, 1  ;;  %v7907_v50 = vor.u32 %v7906_v59, %v7902_v60 }
 0x5cf   : > { %7834 = vrot.lane.b32.xlu0 %v7804_v38, %s10692_s25 }
 0x5d0   : > { %7740 = vrot.lane.b32.xlu1 %v9753_v36, %s10691_s24  ;;  %v7825_v6 = vor.u32 %v7824_v1, %v7820_v44 }
 0x5d1   : > { %v14531_v49 = vpop.permute.xlu0 %7654 }
 0x5d2   : > { %v7121_v2 = vpop.permute.xlu1 %7120 }
 0x5d3   : > { %v7993_v42 = vsel %vm1211_vm2, %v7977_v26, %v7121_v2  ;;  %7838 = vrot.lane.b32.xlu0 %v7818_v29, %s10692_s25  ;;  %vm15303_vm2 = vmmov %vm15292_vm8  ;;  %vm15307_vm8 = vcmask 785408  }
 0x5d4   : > { %7744 = vrot.lane.b32.xlu1 %v9755_v58, %s10691_s24  ;;  %vm15308_vm6 = vmmov %vm15307_vm8 }
 0x5d5   : > { %v7691_v41 = vpop.permute.xlu0 %7690  ;;  %vm15317_vm0 = vmmov %vm15308_vm6 }
 0x5d6   : > { %v7157_v16 = vpop.permute.xlu1 %7156 }
 0x5d7   : > { %v8005_v26 = vsel %vm1228_vm3, %v14512_v57, %v7157_v16  ;;  %7930 = vrot.lane.b32.xlu0 %v7900_v47, %s10693_s21  ;;  %v7920_v57 = vrot.slane %v7918_v33, 1 }
 0x5d8   : > { %7836 = vrot.lane.b32.xlu1 %v7811_v14, %s10692_s25 }
 0x5d9   : > { %v7159_v19 = vpop.permute.xlu0 %7158  ;;  %v7921_v45 = vor.u32 %v7920_v57, %v7916_v61 }
 0x5da   : > { %v14537_v8 = vpop.permute.xlu1 %7656  ;;  %v8007_v30 = vsel %vm1228_vm3, %v7991_v7, %v7159_v19 }
 0x5db   : > { %7934 = vrot.lane.b32.xlu0 %v7914_v12, %s10693_s21 }
 0x5dc   : > { %7840 = vrot.lane.b32.xlu1 %v7825_v6, %s10692_s25 }
 0x5dd   : > { %v7195_v24 = vpop.permute.xlu0 %7194 }
 0x5de   : > { %v7693_v18 = vpop.permute.xlu1 %7692  ;;  %v8019_v63 = vsel %vm1245_vm4, %v8003_v32, %v7195_v24 }
 0x5e0   : > { %7932 = vrot.lane.b32.xlu1 %v7907_v50, %s10693_s21 }
 0x5e1   : > { %v7695_v39 = vpop.permute.xlu0 %7694 }
 0x5e2   : > { %v7161_v15 = vpop.permute.xlu1 %7160 }
 0x5e3   : > { %v8009_v54 = vsel %vm1228_vm3, %v7993_v42, %v7161_v15  ;;  %vm15304_vm3 = vmmov %vm15303_vm2 }
 0x5e4   : > { %7936 = vrot.lane.b32.xlu1 %v7921_v45, %s10693_s21 }
 0x5e5   : > { %v7731_v17 = vpop.permute.xlu0 %7730 }
 0x5e6   : > { %v7197_v4 = vpop.permute.xlu1 %7196 }
 0x5e7   : > { %v8021_v62 = vsel %vm1245_vm4, %v8005_v26, %v7197_v4 }
 0x5e9   : > { %v7199_v48 = vpop.permute.xlu0 %7198 }
 0x5ea   : > { %v7697_v7 = vpop.permute.xlu1 %7696  ;;  %v8023_v36 = vsel %vm1245_vm4, %v8007_v30, %v7199_v48 }
 0x5ed   : > { %v7291_v27 = vpop.permute.xlu0 %7290 }
 0x5ee   : > { %v7733_v21 = vpop.permute.xlu1 %7732  ;;  %v8035_v55 = vsel %vm1262_vm5, %v8019_v63, %v7291_v27 }
 0x5f1   : > { %v7735_v51 = vpop.permute.xlu0 %7734 }
 0x5f2   : > { %v7201_v22 = vpop.permute.xlu1 %7200 }
 0x5f3   : > { %v8025_v25 = vsel %vm1245_vm4, %v8009_v54, %v7201_v22  ;;  %vm15305_vm4 = vcmask 719872  }
 0x5f4   : > { %v8107_v44 = vsel %vm15305_vm4, %v14465_v9, %v14515_v43  ;;  %vm15306_vm13 = vmmov %vm15305_vm4 }
 0x5f5   : > { %v7827_v53 = vpop.permute.xlu0 %7826  ;;  %v8109_v1 = vsel %vm15306_vm13, %v14493_v40, %v14523_v35  ;;  %v8123_v16 = vsel %vm15307_vm8, %v8107_v44, %v7691_v41  ;;  %vm15315_vm9 = vmmov %vm15305_vm4 }
 0x5f6   : > { %v7293_v38 = vpop.permute.xlu1 %7292  ;;  %v8125_v14 = vsel %vm15308_vm6, %v8109_v1, %v7693_v18  ;;  %v8111_v59 = vsel %vm15315_vm9, %v14508_v37, %v14531_v49  ;;  %vm15316_vm11 = vmmov %vm15305_vm4 }
 0x5f7   : > { %v8037_v58 = vsel %vm1262_vm5, %v8021_v62, %v7293_v38  ;;  %v8113_v19 = vsel %vm15316_vm11, %v14519_v10, %v14537_v8  ;;  %v8127_v12 = vsel %vm15317_vm0, %v8111_v59, %v7695_v39  ;;  %vm15321_vm13 = vmmov %vm15311_vm10  ;;  %vm15331_vm11 = vcmask 457728  }
 0x5f8   : > { %vm15322_vm8 = vmmov %vm15311_vm10 }
 0x5f9   : > { %v7295_v32 = vpop.permute.xlu0 %7294  ;;  %vm15323_vm6 = vmmov %vm15314_vm14 }
 0x5fa   : > { %v7737_v31 = vpop.permute.xlu1 %7736  ;;  %v14553_v11 = vsel %vm1262_vm5, %v8023_v36, %v7295_v32 }
 0x5fd   : > { %v7387_v2 = vpop.permute.xlu0 %7386 }
 0x5fe   : > { %v7829_v34 = vpop.permute.xlu1 %7828  ;;  %v14556_v5 = vsel %vm15303_vm2, %v8035_v55, %v7387_v2  ;;  %vm15318_vm2 = vmmov %vm15317_vm0 }
 0x5ff   : > { %v8129_v60 = vsel %vm15318_vm2, %v8113_v19, %v7697_v7  ;;  %vm15332_vm0 = vmmov %vm15331_vm11  ;;  %vm15333_vm2 = vcmask 719872  }
 0x601   : > { %v7831_v23 = vpop.permute.xlu0 %7830 }
 0x602   : > { %v7297_v0 = vpop.permute.xlu1 %7296 }
 0x603   : > { %v14559_v42 = vsel %vm1262_vm5, %v8025_v25, %v7297_v0  ;;  %vm15309_vm5 = vcmask 850944  }
 0x604   : > { %v8139_v20 = vsel %vm15309_vm5, %v8123_v16, %v7731_v17  ;;  %vm15310_vm7 = vmmov %vm15309_vm5 }
 0x605   : > { %v7923_v28 = vpop.permute.xlu0 %7922  ;;  %v8141_v26 = vsel %vm15310_vm7, %v8125_v14, %v7733_v21  ;;  %v8155_v47 = vsel %vm15311_vm10, %v8139_v20, %v7827_v53  ;;  %vm15325_vm7 = vcmask 523264  }
 0x606   : > { %v7389_v3 = vpop.permute.xlu1 %7388  ;;  %v8157_v6 = vsel %vm15312_vm12, %v8141_v26, %v7829_v34  ;;  %v8171_v9 = vsel %vm15313_vm15, %v8155_v47, %v7923_v28  ;;  %vm15326_vm10 = vmmov %vm15325_vm7  ;;  %vm15327_vm12 = vcmask 588800  }
 0x607   : > { %v8053_v56 = vsel %vm15304_vm3, %v8037_v58, %v7389_v3  ;;  %vm15319_vm3 = vmmov %vm15309_vm5 }
 0x608   : > { %v8143_v57 = vsel %vm15319_vm3, %v8127_v12, %v7735_v51  ;;  %vm15320_vm4 = vmmov %vm15319_vm3 }
 0x609   : > { %v7391_v46 = vpop.permute.xlu0 %7390  ;;  %v8145_v30 = vsel %vm15320_vm4, %v8129_v60, %v7737_v31  ;;  %v8159_v18 = vsel %vm15321_vm13, %v8143_v57, %v7831_v23  ;;  %vm15324_vm5 = vmmov %vm15323_vm6 }
 0x60a   : > { %v7833_v29 = vpop.permute.xlu1 %7832  ;;  %vm15328_vm15 = vmmov %vm15327_vm12  ;;  %v8055_v16 = vsel %vm15331_vm11, %v14553_v11, %v7391_v46 }
 0x60b   : > { %v8161_v50 = vsel %vm15322_vm8, %v8145_v30, %v7833_v29  ;;  %vm15334_vm3 = vmmov %vm15333_vm2  ;;  %vm15337_vm8 = vcmask 785408  }
 0x60c   : > { %vm15335_vm4 = vmmov %vm15325_vm7 }
 0x60d   : > { %v7427_v40 = vpop.permute.xlu0 %7426  ;;  %vm15336_vm13 = vmmov %vm15335_vm4 }
 0x60e   : > { %v7925_v13 = vpop.permute.xlu1 %7924  ;;  %v8067_v2 = vsel %vm15325_vm7, %v14556_v5, %v7427_v40 }
 0x60f   : > { %v8173_v43 = vsel %vm15314_vm14, %v8157_v6, %v7925_v13  ;;  %vm15329_vm14 = vcmask 654336  }
 0x610   : > { %v9773_v33 = vcombine.low %v8171_v9, %v8173_v43  ;;  %vm15330_vm9 = vmmov %vm15329_vm14 }
 0x611   : > { %v7927_v41 = vpop.permute.xlu0 %7926 }
 0x612   : > { %v7393_v35 = vpop.permute.xlu1 %7392  ;;  %9975 = vmatprep.mubr.bf16.mxu0 %v9773_v33  ;;  %v8175_v37 = vsel %vm15323_vm6, %v8159_v18, %v7927_v41  ;;  %vm15338_vm6 = vmmov %vm15337_vm8 }
 0x613   : > { %v8057_v14 = vsel %vm15332_vm0, %v14559_v42, %v7393_v35  ;;  %vm15347_vm0 = vmmov %vm15333_vm2 }
 0x615   : > { %v7431_v61 = vpop.permute.xlu0 %7430 }
 0x616   : > { %v7429_v52 = vpop.permute.xlu1 %7428  ;;  %v8071_v20 = vsel %vm15335_vm4, %v8055_v16, %v7431_v61 }
 0x617   : > { %v8069_v0 = vsel %vm15326_vm10, %v8053_v56, %v7429_v52  ;;  %vm15341_vm10 = vcmask 850944  }
 0x619   : > { %v7467_v10 = vpop.permute.xlu0 %7466 }
 0x61a   : > { %v7929_v24 = vpop.permute.xlu1 %7928  ;;  %v8083_v23 = vsel %vm15327_vm12, %v8067_v2, %v7467_v10 }
 0x61b   : > { %v8177_v49 = vsel %vm15324_vm5, %v8161_v50, %v7929_v24  ;;  %vm15339_vm5 = vmmov %vm15327_vm12 }
 0x61c   : > { %v9774_v45 = vcombine.low %v8175_v37, %v8177_v49  ;;  %vm15340_vm7 = vmmov %vm15339_vm5 }
 0x61d   : > { %v7471_v63 = vpop.permute.xlu0 %7470  ;;  %vm15342_vm12 = vmmov %vm15341_vm10 }
 0x61e   : > { %v7433_v8 = vpop.permute.xlu1 %7432  ;;  %9976 = vmatmul.mubr.bf16.vlgmr.msra.gmra.mrb[16].mxu0 %v9774_v45  ;;  %v8087_v13 = vsel %vm15339_vm5, %v8071_v20, %v7471_v63 }
 0x61f   : > { %v8073_v26 = vsel %vm15336_vm13, %v8057_v14, %v7433_v8  ;;  %vm15351_vm13 = vmmov %vm15338_vm6  ;;  %v9772_v8 = vld [vmem:[%s14673_s4] ss:$0 sm:$0xff] }
 0x621   : > { %v7563_v54 = vpop.permute.xlu0 %7562 }
 0x622   : > { %v7469_v15 = vpop.permute.xlu1 %7468  ;;  %v8099_v28 = vsel %vm15329_vm14, %v8083_v23, %v7563_v54  ;;  %vm15344_vm14 = vmmov %vm15330_vm9 }
 0x623   : > { %v8085_v3 = vsel %vm15328_vm15, %v8069_v0, %v7469_v15  ;;  %vm15343_vm15 = vmmov %vm15330_vm9  ;;  %v8373_v0 = vld [vmem:[%s14674_s5 + $0x18] sm:$0xff] }
 0x625   : > { %v7567_v4 = vpop.permute.xlu0 %7566 }
 0x626   : > { %v7473_v39 = vpop.permute.xlu1 %7472  ;;  %v8103_v46 = vsel %vm15343_vm15, %v8087_v13, %v7567_v4  ;;  %v8374_v13 = vld [vmem:[%s14674_s5 + $0x20] sm:$0xff] }
 0x627   : > { %v8089_v9 = vsel %vm15340_vm7, %v8073_v26, %v7473_v39 }
 0x629   : > { %v7659_v17 = vpop.permute.xlu0 %7658 }
 0x62a   : > { %v7565_v62 = vpop.permute.xlu1 %7564  ;;  %v8115_v5 = vsel %vm15333_vm2, %v8099_v28, %v7659_v17  ;;  %vm15348_vm2 = vmmov %vm15347_vm0 }
 0x62b   : > { %v8101_v29 = vsel %vm15330_vm9, %v8085_v3, %v7565_v62  ;;  %vm15345_vm9 = vcmask 916480  }
 0x62c   : > { %vm15346_vm11 = vmmov %vm15345_vm9 }
 0x62d   : > { %v7663_v48 = vpop.permute.xlu0 %7662  ;;  %vm15355_vm7 = vmmov %vm15345_vm9 }
 0x62e   : > { %v7569_v7 = vpop.permute.xlu1 %7568  ;;  %v8119_v41 = vsel %vm15347_vm0, %v8103_v46, %v7663_v48  ;;  %v8375_v46 = vld [vmem:[%s14674_s5 + $0x28] sm:$0xff] }
 0x62f   : > { %v8105_v43 = vsel %vm15344_vm14, %v8089_v9, %v7569_v7 }
 0x631   : > { %v7699_v21 = vpop.permute.xlu0 %7698 }
 0x632   : > { %v7661_v36 = vpop.permute.xlu1 %7660  ;;  %v8131_v47 = vsel %vm15337_vm8, %v8115_v5, %v7699_v21  ;;  %vm15352_vm8 = vmmov %vm15338_vm6  ;;  %v8370_v21 = vld [vmem:[%s14674_s5] sm:$0xff] }
 0x633   : > { %v8117_v56 = vsel %vm15334_vm3, %v8101_v29, %v7661_v36  ;;  %vm15349_vm3 = vcmask 982016  }
 0x634   : > { %vm15350_vm4 = vmmov %vm15349_vm3 }
 0x635   : > { %v7703_v55 = vpop.permute.xlu0 %7702  ;;  %vm15358_vm15 = vmmov %vm15349_vm3 }
 0x636   : > { %v7665_v27 = vpop.permute.xlu1 %7664  ;;  %v8135_v12 = vsel %vm15351_vm13, %v8119_v41, %v7703_v55 }
 0x637   : > { %v8121_v52 = vsel %vm15348_vm2, %v8105_v43, %v7665_v27 }
 0x639   : > { %v7739_v25 = vpop.permute.xlu0 %7738 }
 0x63a   : > { %v7701_v22 = vpop.permute.xlu1 %7700  ;;  %v8147_v11 = vsel %vm15341_vm10, %v8131_v47, %v7739_v25  ;;  %v8371_v25 = vld [vmem:[%s14674_s5 + $0x8] sm:$0xff] }
 0x63b   : > { %v8133_v6 = vsel %vm15338_vm6, %v8117_v56, %v7701_v22  ;;  %vm15353_vm6 = vmmov %vm15341_vm10 }
 0x63c   : > { %vm15354_vm5 = vmmov %vm15353_vm6 }
 0x63d   : > { %v7743_v38 = vpop.permute.xlu0 %7742  ;;  %vm15356_vm10 = vmmov %vm15355_vm7 }
 0x63e   : > { %v7705_v51 = vpop.permute.xlu1 %7704  ;;  %v8151_v30 = vsel %vm15353_vm6, %v8135_v12, %v7743_v38  ;;  %v8372_v38 = vld [vmem:[%s14674_s5 + $0x10] sm:$0xff] }
 0x63f   : > { %v8137_v60 = vsel %vm15352_vm8, %v8121_v52, %v7705_v51  ;;  %v8377_v52 = vld [vmem:[%s14674_s5 + $0x38] sm:$0xff] }
 0x641   : > { %v7835_v53 = vpop.permute.xlu0 %7834 }
 0x642   : > { %v7741_v58 = vpop.permute.xlu1 %7740  ;;  %v8163_v33 = vsel %vm15345_vm9, %v8147_v11, %v7835_v53 }
 0x643   : > { %v8149_v42 = vsel %vm15342_vm12, %v8133_v6, %v7741_v58  ;;  %vm15357_vm12 = vmmov %vm15349_vm3 }
 0x645   : > { %v7839_v32 = vpop.permute.xlu0 %7838 }
 0x646   : > { %v7745_v31 = vpop.permute.xlu1 %7744  ;;  %v8167_v50 = vsel %vm15355_vm7, %v8151_v30, %v7839_v32 }
 0x647   : > { %v8153_v18 = vsel %vm15354_vm5, %v8137_v60, %v7745_v31 }
 0x649   : > { %v7931_v44 = vpop.permute.xlu0 %7930 }
 0x64a   : > { %v7837_v34 = vpop.permute.xlu1 %7836  ;;  %v8179_v59 = vsel %vm15349_vm3, %v8163_v33, %v7931_v44  ;;  %v8376_v33 = vld [vmem:[%s14674_s5 + $0x30] sm:$0xff] }
 0x64b   : > { %v8165_v40 = vsel %vm15346_vm11, %v8149_v42, %v7837_v34 }
 0x64d   : > { %v7935_v61 = vpop.permute.xlu0 %7934 }
 0x64e   : > { %v7841_v1 = vpop.permute.xlu1 %7840  ;;  %v8183_v49 = vsel %vm15357_vm12, %v8167_v50, %v7935_v61 }
 0x64f   : > { %v8169_v24 = vsel %vm15356_vm10, %v8153_v18, %v7841_v1 }
 0x652   : > { %v7933_v35 = vpop.permute.xlu1 %7932 }
 0x653   : > { %v8181_v19 = vsel %vm15350_vm4, %v8165_v40, %v7933_v35 }
 0x654   : > { %v9775_v57 = vcombine.low %v8179_v59, %v8181_v19 }
 0x656   : > { %v7937_v37 = vpop.permute.xlu1 %7936  ;;  %9979 = vmatprep.mubr.bf16.mxu1 %v9775_v57 }
 0x657   : > { %v8185_v45 = vsel %vm15358_vm15, %v8169_v24, %v7937_v37 }
 0x658   : > { %v9776_v10 = vcombine.low %v8183_v49, %v8185_v45 }
 0x65a   : > { %9980 = vmatmul.mubr.bf16.vlgmr.msra.gmra.mrb[16].mxu1 %v9776_v10 }
 0x6f1   : > { %v9977_v63 = vpop.f32.mrb[16].mxu0 }
 0x6f2   : > { %v8324_v15 = vadd.f32 %v9977_v63, %v9772_v8  ;;  %v8315_v54 = vpop.f32.mrb[17].mxu0 }
 0x6f3   : > { %v8316_v39 = vadd.f32 %v9772_v8, %v8315_v54  ;;  %v9978_v4 = vpop.f32.mrb[18].mxu0 }
 0x6f4   : > { %vm8348_vm14 = vcmp.ge.f32.partialorder %v8324_v15, 0.0  ;;  %v8356_v62 = vmul.f32 0.2, %v8324_v15  ;;  %v8327_v17 = vadd.f32 %v9978_v4, %v9772_v8  ;;  %v8318_v7 = vpop.f32.mrb[19].mxu0 }
 0x6f5   : > { %vm8346_vm9 = vcmp.ge.f32.partialorder %v8316_v39, 0.0  ;;  %v8354_v48 = vmul.f32 0.2, %v8316_v39  ;;  %v8319_v36 = vadd.f32 %v9772_v8, %v8318_v7 }
 0x6f6   : > { %v8357_v27 = vmul.f32 0.2, %v8327_v17  ;;  %v8364_v51 = vsel %vm8348_vm14, %v8324_v15, %v8356_v62  ;;  %vm8349_vm0 = vcmp.ge.f32.partialorder %v8327_v17, 0.0 }
 0x6f7   : > { %vm8347_vm11 = vcmp.ge.f32.partialorder %v8319_v36, 0.0  ;;  %v8355_v55 = vmul.f32 0.2, %v8319_v36  ;;  %v8362_v22 = vsel %vm8346_vm9, %v8316_v39, %v8354_v48  ;;  %v8380_v34 = vmul.f32 %v8372_v38, %v8364_v51 }
 0x6f8   : > { %v8378_v58 = vmul.f32 %v8370_v21, %v8362_v22  ;;  %v8365_v2 = vsel %vm8349_vm0, %v8327_v17, %v8357_v27  ;;  %v8430_v51 = vlaneseq }
 0x6f9   : > { %v8363_v53 = vsel %vm8347_vm11, %v8319_v36, %v8355_v55  ;;  %v8392_v3 = vsel %vm1194_vm1, %v8380_v34, 0.0  ;;  %v8381_v28 = vmul.f32 %v8373_v0, %v8365_v2  ;;  %v8423_v55 = vld [vmem:[#allocation3] sm:$0x1] }
 0x6fa   : > { %v8386_v31 = vsel %vm1194_vm1, %v8378_v58, 0.0  ;;  %v8379_v32 = vmul.f32 %v8371_v25, %v8363_v53  ;;  %v8431_v38 = vshrl.u32 %v8430_v51, 7 }
 0x6fb   : > { %8387 = vadd.xlane.f32.xlu0 %v8386_v31  ;;  %v8395_v29 = vsel %vm1194_vm1, %v8381_v28, 0.0 }
 0x6fc   : > { %v8389_v23 = vsel %vm1194_vm1, %v8379_v32, 0.0  ;;  %v8432_v58 = vsub.s32 0, %v8431_v38 }
 0x6fd   : > { %8390 = vadd.xlane.f32.xlu1 %v8389_v23 }
 0x6ff   : > { %8393 = vadd.xlane.f32.xlu0 %v8392_v3 }
 0x703   : > { %8396 = vadd.xlane.f32.xlu0 %v8395_v29 }
 0x72d   : > { %v9981_v44 = vpop.f32.mrb[16].mxu1 }
 0x72e   : > { %v8340_v1 = vadd.f32 %v9981_v44, %v9772_v8  ;;  %v8331_v16 = vpop.f32.mrb[17].mxu1 }
 0x72f   : > { %v8332_v14 = vadd.f32 %v9772_v8, %v8331_v16  ;;  %v9982_v5 = vpop.f32.mrb[18].mxu1 }
 0x730   : > { %vm8352_vm2 = vcmp.ge.f32.partialorder %v8340_v1, 0.0  ;;  %v8360_v56 = vmul.f32 0.2, %v8340_v1  ;;  %v8343_v20 = vadd.f32 %v9982_v5, %v9772_v8  ;;  %v8334_v26 = vpop.f32.mrb[19].mxu1 }
 0x731   : > { %vm8350_vm3 = vcmp.ge.f32.partialorder %v8332_v14, 0.0  ;;  %v8358_v47 = vmul.f32 0.2, %v8332_v14  ;;  %v8335_v6 = vadd.f32 %v9772_v8, %v8334_v26 }
 0x732   : > { %vm8353_vm4 = vcmp.ge.f32.partialorder %v8343_v20, 0.0  ;;  %v8361_v9 = vmul.f32 0.2, %v8343_v20  ;;  %v8368_v43 = vsel %vm8352_vm2, %v8340_v1, %v8360_v56 }
 0x733   : > { %vm8351_vm13 = vcmp.ge.f32.partialorder %v8335_v6, 0.0  ;;  %v8359_v11 = vmul.f32 0.2, %v8335_v6  ;;  %v8366_v42 = vsel %vm8350_vm3, %v8332_v14, %v8358_v47  ;;  %v8384_v12 = vmul.f32 %v8376_v33, %v8368_v43 }
 0x734   : > { %v8382_v40 = vmul.f32 %v8374_v13, %v8366_v42  ;;  %v8369_v41 = vsel %vm8353_vm4, %v8343_v20, %v8361_v9 }
 0x735   : > { %v8367_v35 = vsel %vm8351_vm13, %v8335_v6, %v8359_v11  ;;  %v8385_v61 = vmul.f32 %v8377_v52, %v8369_v41  ;;  %v8404_v57 = vsel %vm1194_vm1, %v8384_v12, 0.0 }
 0x736   : > { %v8398_v59 = vsel %vm1194_vm1, %v8382_v40, 0.0  ;;  %v8383_v19 = vmul.f32 %v8375_v46, %v8367_v35 }
 0x737   : > { %8399 = vadd.xlane.f32.xlu1 %v8398_v59  ;;  %v8407_v30 = vsel %vm1194_vm1, %v8385_v61, 0.0 }
 0x738   : > { %v8401_v60 = vsel %vm1194_vm1, %v8383_v19, 0.0 }
 0x739   : > { %8402 = vadd.xlane.f32.xlu0 %v8401_v60 }
 0x73b   : > { %8405 = vadd.xlane.f32.xlu1 %v8404_v57 }
 0x73d   : > { %8408 = vadd.xlane.f32.xlu0 %v8407_v30 }
 0x788   : > { %v8388_v18 = vpop.xlane.xlu0 %8387 }
 0x78a   : > { %v8391_v50 = vpop.xlane.xlu1 %8390 }
 0x78b   : > { %v8410_v37 = vadd.f32 %v8391_v50, %v8388_v18 }
 0x78c   : > { %v8394_v24 = vpop.xlane.xlu0 %8393 }
 0x78d   : > { %v8411_v45 = vadd.f32 %v8410_v37, %v8394_v24 }
 0x790   : > { %v8397_v49 = vpop.xlane.xlu0 %8396 }
 0x791   : > { %v8412_v10 = vadd.f32 %v8411_v45, %v8397_v49 }
 0x7c4   : > { %v8400_v8 = vpop.xlane.xlu1 %8399 }
 0x7c5   : > { %v8413_v63 = vadd.f32 %v8412_v10, %v8400_v8 }
 0x7c6   : > { %v8403_v15 = vpop.xlane.xlu0 %8402 }
 0x7c7   : > { %v8414_v54 = vadd.f32 %v8413_v63, %v8403_v15 }
 0x7c8   : > { %v8406_v39 = vpop.xlane.xlu1 %8405 }
 0x7c9   : > { %v8415_v4 = vadd.f32 %v8414_v54, %v8406_v39 }
 0x7ca   : > { %v8409_v62 = vpop.xlane.xlu0 %8408 }
 0x7cb   : > { %v8416_v17 = vadd.f32 %v8415_v4, %v8409_v62 }
 0x7cd   : > { %v8417_v7 = vrot.slane %v8416_v17, 4 }
 0x7cf   : > { %v8418_v48 = vadd.f32 %v8417_v7, %v8416_v17 }
 0x7d1   : > { %v8419_v36 = vrot.slane %v8418_v48, 2 }
 0x7d3   : > { %v8420_v21 = vadd.f32 %v8419_v36, %v8418_v48 }
 0x7d5   : > { %v8421_v27 = vrot.slane %v8420_v21, 1 }
 0x7d7   : > { %v8422_v22 = vadd.f32 %v8421_v27, %v8420_v21 }
 0x7d9   : > { %v8424_v25 = vadd.f32 %v8423_v55, %v8422_v22 }
 0x7db   : > { %8427 = vperm.xlu1 %10024, %v8424_v25  }
 0x85a   : > { %v8428_v53 = vpop.permute.xlu1 %8427 }
 0x85b   : > { %v8433_v31 = vrot.slane %v8428_v53, %v8432_v58 }
 0x85d   : > { %8434 = vst [vmem:[%s276_s9] sm:$0x1] %v8433_v31 }
 0x85e PF: > { %s19_s26 = sadd.s32 1, %s10677_s26  }
 0x85f   : > { %p16_p4 = scmp.ge.s32.totalorder %s19_s26, 4  }
 0x861   :  { %18 = sbr.rel (!%p16_p4) target bundleno = 3 (0x3), region = 108 }

</bundles_post_ra>
